<compile_context>
chip_gen: v6e
topology: v6e:2x2x1
jax: 0.10.0
libtpu: 0.0.40
codegen_flags: <defaults>
</compile_context>

<pallas_src>
import functools
import math

import jax
import jax.numpy as jnp
from jax.experimental import pallas as pl
from jax.experimental.pallas import tpu as pltpu

LN_EPS = 1e-12  # RemBertConfig.layer_norm_eps default


# ------------------------- hardware-aware knobs -------------------------

def _default_vmem_limit():
    """~48 MiB on v7x (64 MiB VMEM/TC), ~96 MiB on v5e/v6e (128 MiB), 48 MiB fallback."""
    try:
        info = pltpu.get_tpu_info()
        cap = getattr(info, "vmem_capacity_bytes", None)
        if cap:
            return int(min(cap * 3 // 4, 100 * 1024 * 1024))
    except Exception:
        pass
    return 48 * 1024 * 1024


_VMEM_LIMIT = _default_vmem_limit()


def _pick_tile(dim, target, aligns=(256, 128)):
    """Largest tile <= target that divides `dim`, preferring coarser alignment.

    A full-dim block is always layout-legal; otherwise lane tiles prefer multiples of
    256 (full MXU column groups on v6e/v7x, also fine on v5e) then 128, and sublane
    tiles use multiples of 8, so the (8,128) constraint always holds.
    """
    if dim <= target:
        return dim
    for align in aligns:
        t = (target // align) * align
        while t >= align:
            if dim % t == 0:
                return t
            t -= align
    return dim


# ------------------------- linear (matmul + bias + act [+ residual + LayerNorm]) -----

def _linear_kernel(*refs, activation, fused_ln, eps):
    if fused_ln:
        x_ref, w_ref, b_ref, r_ref, g_ref, bt_ref, o_ref, acc_ref = refs
    else:
        x_ref, w_ref, b_ref, o_ref, acc_ref = refs

    @pl.when(pl.program_id(2) == 0)
    def _():
        acc_ref[...] = jnp.zeros_like(acc_ref)

    acc_ref[...] += jnp.dot(x_ref[...], w_ref[...],
                            preferred_element_type=jnp.float32)

    @pl.when(pl.program_id(2) == pl.num_programs(2) - 1)
    def _():
        y = acc_ref[...] + b_ref[...].astype(jnp.float32)
        if activation == "gelu":   # exact (erf-based) GELU == HF "gelu"
            y = 0.5 * y * (1.0 + jax.lax.erf(y * (1.0 / math.sqrt(2.0))))
        elif activation == "tanh":
            y = jnp.tanh(y)
        if fused_ln:
            # residual add + LayerNorm fused into the epilogue (tn == N required).
            y = y + r_ref[...].astype(jnp.float32)
            mean = jnp.mean(y, axis=-1, keepdims=True)
            yc = y - mean
            var = jnp.mean(yc * yc, axis=-1, keepdims=True)
            y = yc * jax.lax.rsqrt(var + eps)
            y = y * g_ref[...] + bt_ref[...]
        o_ref[...] = y.astype(o_ref.dtype)


def pallas_linear(x, w, b, activation=None, out_dtype=jnp.bfloat16,
                  residual=None, ln_gamma=None, ln_beta=None, ln_eps=LN_EPS):
    M, K = x.shape
    K2, N = w.shape
    assert K == K2
    fused_ln = ln_gamma is not None

    tm = _pick_tile(M, 512, (8,))
    tk = _pick_tile(K, 1536, (256, 128))        # K=1152 -> single acc pass
    tn = N if fused_ln else _pick_tile(N, 1152, (256, 128))
    grid = (M // tm, N // tn, K // tk)

    in_specs = [
        pl.BlockSpec((tm, tk), lambda i, j, k: (i, k)),
        pl.BlockSpec((tk, tn), lambda i, j, k: (k, j)),
        pl.BlockSpec((1, tn), lambda i, j, k: (0, j)),
    ]
    args = [x.astype(jnp.bfloat16), w.astype(jnp.bfloat16),
            b.reshape(1, N).astype(jnp.float32)]
    if fused_ln:
        assert residual is not None and tn == N
        in_specs += [
            pl.BlockSpec((tm, N), lambda i, j, k: (i, 0)),
            pl.BlockSpec((1, N), lambda i, j, k: (0, 0)),
            pl.BlockSpec((1, N), lambda i, j, k: (0, 0)),
        ]
        args += [residual.astype(jnp.bfloat16),
                 ln_gamma.reshape(1, N).astype(jnp.float32),
                 ln_beta.reshape(1, N).astype(jnp.float32)]

    return pl.pallas_call(
        functools.partial(_linear_kernel, activation=activation,
                          fused_ln=fused_ln, eps=ln_eps),
        out_shape=jax.ShapeDtypeStruct((M, N), out_dtype),
        grid=grid,
        in_specs=in_specs,
        out_specs=pl.BlockSpec((tm, tn), lambda i, j, k: (i, j)),
        scratch_shapes=[pltpu.VMEM((tm, tn), jnp.float32)],
        compiler_params=pltpu.CompilerParams(
            dimension_semantics=("parallel", "parallel", "arbitrary"),
            vmem_limit_bytes=_VMEM_LIMIT),
    )(*args)


# ------------------------- standalone LayerNorm (embeddings only) -------------------

def _layernorm_kernel(x_ref, g_ref, b_ref, o_ref, *, eps):
    x = x_ref[...].astype(jnp.float32)
    mean = jnp.mean(x, axis=-1, keepdims=True)
    xc = x - mean
    var = jnp.mean(xc * xc, axis=-1, keepdims=True)
    y = xc * jax.lax.rsqrt(var + eps)
    o_ref[...] = (y * g_ref[...] + b_ref[...]).astype(o_ref.dtype)


def pallas_layernorm(x, gamma, beta, eps=LN_EPS, out_dtype=jnp.bfloat16):
    M, D = x.shape
    tm = _pick_tile(M, 1024, (8,))               # memory-bound: big row tile
    row_spec = pl.BlockSpec((tm, D), lambda i: (i, 0))
    vec_spec = pl.BlockSpec((1, D), lambda i: (0, 0))
    return pl.pallas_call(
        functools.partial(_layernorm_kernel, eps=eps),
        out_shape=jax.ShapeDtypeStruct((M, D), out_dtype),
        grid=(M // tm,),
        in_specs=[row_spec, vec_spec, vec_spec],
        out_specs=row_spec,
        compiler_params=pltpu.CompilerParams(
            dimension_semantics=("parallel",),
            vmem_limit_bytes=_VMEM_LIMIT),
    )(x, gamma.reshape(1, D).astype(jnp.float32),
      beta.reshape(1, D).astype(jnp.float32))


# ------------------------- attention (flash-style, per batch x head-group) ----------

def _attention_kernel(q_ref, k_ref, v_ref, bias_ref, o_ref,
                      m_sc, l_sc, acc_sc, *, dh, hp):
    kv = pl.program_id(3)

    @pl.when(kv == 0)
    def _():
        m_sc[...] = jnp.full_like(m_sc, -1e30)
        l_sc[...] = jnp.zeros_like(l_sc)
        acc_sc[...] = jnp.zeros_like(acc_sc)

    bias = bias_ref[...]                         # (1, tkv) fp32 additive key mask
    for i in range(hp):                          # hp heads per block, statically unrolled
        lo = i * dh
        q = q_ref[:, lo:lo + dh]                 # (tq, dh) bf16; 1/sqrt(dh) pre-folded
        k = k_ref[:, lo:lo + dh]                 # (tkv, dh)
        v = v_ref[:, lo:lo + dh]
        s = jax.lax.dot_general(q, k, (((1,), (1,)), ((), ())),
                                preferred_element_type=jnp.float32) + bias
        m_prev = m_sc[i]                         # (tq, 1)
        m_new = jnp.maximum(m_prev, jnp.max(s, axis=-1, keepdims=True))
        alpha = jnp.exp(m_prev - m_new)
        p = jnp.exp(s - m_new)
        l_sc[i] = alpha * l_sc[i] + jnp.sum(p, axis=-1, keepdims=True)
        acc_sc[i] = alpha * acc_sc[i] + jnp.dot(p.astype(v.dtype), v,
                                                preferred_element_type=jnp.float32)
        m_sc[i] = m_new

    @pl.when(kv == pl.num_programs(3) - 1)
    def _():
        # Normalize every head and write once: a single full-width lane-dense store.
        parts = [acc_sc[i] * pl.reciprocal(l_sc[i], approx=True) for i in range(hp)]
        o_ref[...] = jnp.concatenate(parts, axis=-1).astype(o_ref.dtype)


def _pick_head_group(H, dh, cb_cap=512):
    """Largest head group whose column block is 128-lane aligned and <= cb_cap lanes."""
    hp = 0
    for cand in range(1, H + 1):
        if H % cand == 0 and (cand * dh) % 128 == 0 and cand * dh <= cb_cap:
            hp = cand
    return hp


def pallas_attention(qkv, mask_bias, *, B, S, D, H):
    """qkv: (B*S, 3D) bf16 fused projection (q already scaled).  Returns (B, S, D) bf16."""
    dh = D // H
    hp = _pick_head_group(H, dh)
    tq = _pick_tile(S, 256, (8,))
    tkv = _pick_tile(S, 256, (8,))
    nq, nkv = S // tq, S // tkv

    if hp:
        # Zero-copy: slice q / k / v head-group column blocks straight out of the fused
        # (B, S, 3D) tensor via BlockSpec index maps (no transposes, no split).
        cb = hp * dh
        G = H // hp
        qkv3 = qkv.reshape(B, S, 3 * D)
        in_specs = [
            pl.BlockSpec((None, tq, cb), lambda b, g, qi, kv: (b, qi, g)),
            pl.BlockSpec((None, tkv, cb), lambda b, g, qi, kv: (b, kv, G + g)),
            pl.BlockSpec((None, tkv, cb), lambda b, g, qi, kv: (b, kv, 2 * G + g)),
            pl.BlockSpec((None, 1, tkv), lambda b, g, qi, kv: (b, 0, kv)),
        ]
        args = (qkv3, qkv3, qkv3, mask_bias)
    else:
        # Small / toy dims: no 128-lane-aligned head group exists, so split q/k/v in
        # JAX and use full-width (= D) blocks, which are always layout-legal.
        hp, cb, G = H, D, 1
        q, k, v = jnp.split(qkv, 3, axis=-1)
        in_specs = [
            pl.BlockSpec((None, tq, cb), lambda b, g, qi, kv: (b, qi, 0)),
            pl.BlockSpec((None, tkv, cb), lambda b, g, qi, kv: (b, kv, 0)),
            pl.BlockSpec((None, tkv, cb), lambda b, g, qi, kv: (b, kv, 0)),
            pl.BlockSpec((None, 1, tkv), lambda b, g, qi, kv: (b, 0, kv)),
        ]
        args = (q.reshape(B, S, D), k.reshape(B, S, D), v.reshape(B, S, D), mask_bias)

    kernel = functools.partial(_attention_kernel, dh=dh, hp=hp)
    return pl.pallas_call(
        kernel,
        out_shape=jax.ShapeDtypeStruct((B, S, D), jnp.bfloat16),
        grid=(B, G, nq, nkv),
        in_specs=in_specs,
        out_specs=pl.BlockSpec((None, tq, cb), lambda b, g, qi, kv: (b, qi, g)),
        scratch_shapes=[
            pltpu.VMEM((hp, tq, 1), jnp.float32),    # running max m
            pltpu.VMEM((hp, tq, 1), jnp.float32),    # running denom l
            pltpu.VMEM((hp, tq, dh), jnp.float32),   # running context acc
        ],
        compiler_params=pltpu.CompilerParams(
            dimension_semantics=("parallel", "parallel", "parallel", "arbitrary"),
            vmem_limit_bytes=_VMEM_LIMIT),
    )(*args)


# ------------------------- pooler + regression head (single tiny kernel) ------------

def _pooler_head_kernel(cls_ref, pw_ref, pb_ref, dw_ref, db_ref, o_ref):
    pooled = jnp.tanh(
        jnp.dot(cls_ref[...], pw_ref[...], preferred_element_type=jnp.float32)
        + pb_ref[...].astype(jnp.float32))
    out = (jnp.dot(pooled.astype(dw_ref.dtype), dw_ref[...],
                   preferred_element_type=jnp.float32)
           + db_ref[...].astype(jnp.float32))
    o_ref[...] = out.astype(o_ref.dtype)


def pallas_pooler_head(cls, pool_w, pool_b, dense_w, dense_b):
    Bq, D = cls.shape
    return pl.pallas_call(
        _pooler_head_kernel,
        out_shape=jax.ShapeDtypeStruct((Bq, 1), jnp.float32),
        grid=(1,),
        in_specs=[
            pl.BlockSpec((Bq, D), lambda i: (0, 0)),
            pl.BlockSpec((D, D), lambda i: (0, 0)),
            pl.BlockSpec((1, D), lambda i: (0, 0)),
            pl.BlockSpec((D, 1), lambda i: (0, 0)),
            pl.BlockSpec((1, 1), lambda i: (0, 0)),
        ],
        out_specs=pl.BlockSpec((Bq, 1), lambda i: (0, 0)),
        compiler_params=pltpu.CompilerParams(
            dimension_semantics=("arbitrary",),
            vmem_limit_bytes=_VMEM_LIMIT),
    )(cls.astype(jnp.bfloat16), pool_w.astype(jnp.bfloat16),
      pool_b.reshape(1, D).astype(jnp.float32),
      dense_w.astype(jnp.bfloat16), dense_b.reshape(1, 1).astype(jnp.float32))


# ------------------------- parameters -------------------------

def init_params(key, cfg):
    E = cfg["input_embedding_size"]
    D = cfg["hidden_size"]
    I = cfg["intermediate_size"]
    keys = iter(jax.random.split(key, 8 + cfg["num_hidden_layers"] * 16))

    def w(shape):
        return (0.02 * jax.random.normal(next(keys), shape)).astype(jnp.float32)

    def zeros(shape):
        return jnp.zeros(shape, jnp.float32)

    def ones(shape):
        return jnp.ones(shape, jnp.float32)

    params = {
        "word_emb": w((cfg["vocab_size"], E)),
        "pos_emb": w((cfg["max_position_embeddings"], E)),
        "type_emb": w((cfg["type_vocab_size"], E)),
        "emb_ln_g": ones((E,)), "emb_ln_b": zeros((E,)),
        "map_w": w((E, D)), "map_b": zeros((D,)),      # embedding_hidden_mapping_in
        "pool_w": w((D, D)), "pool_b": zeros((D,)),    # RemBertPooler
        "dense_w": w((D, 1)), "dense_b": zeros((1,)),  # BleurtModel.dense
        "layers": [],
    }
    for _ in range(cfg["num_hidden_layers"]):
        params["layers"].append({
            "q_w": w((D, D)), "q_b": zeros((D,)),
            "k_w": w((D, D)), "k_b": zeros((D,)),
            "v_w": w((D, D)), "v_b": zeros((D,)),
            "ao_w": w((D, D)), "ao_b": zeros((D,)),
            "ln1_g": ones((D,)), "ln1_b": zeros((D,)),
            "i_w": w((D, I)), "i_b": zeros((I,)),
            "o_w": w((I, D)), "o_b": zeros((D,)),
            "ln2_g": ones((D,)), "ln2_b": zeros((D,)),
        })
    return params


def prepare_params(raw, cfg):
    """Fuse q/k/v weights, fold 1/sqrt(dh) into q, cast matmul weights to bf16."""
    D = cfg["hidden_size"]
    H = cfg["num_attention_heads"]
    scale = 1.0 / math.sqrt(D // H)

    def bf(t):
        return t.astype(jnp.bfloat16)

    out = {
        "word_emb": raw["word_emb"],
        "pos_emb": raw["pos_emb"],
        "type_emb": raw["type_emb"],
        "emb_ln_g": raw["emb_ln_g"], "emb_ln_b": raw["emb_ln_b"],
        "map_w": bf(raw["map_w"]), "map_b": raw["map_b"],
        "pool_w": bf(raw["pool_w"]), "pool_b": raw["pool_b"],
        "dense_w": bf(raw["dense_w"]), "dense_b": raw["dense_b"],
        "layers": [],
    }
    for lp in raw["layers"]:
        qkv_w = jnp.concatenate([lp["q_w"] * scale, lp["k_w"], lp["v_w"]], axis=1)
        qkv_b = jnp.concatenate([lp["q_b"] * scale, lp["k_b"], lp["v_b"]], axis=0)
        out["layers"].append({
            "qkv_w": bf(qkv_w), "qkv_b": qkv_b,
            "ao_w": bf(lp["ao_w"]), "ao_b": lp["ao_b"],
            "ln1_g": lp["ln1_g"], "ln1_b": lp["ln1_b"],
            "i_w": bf(lp["i_w"]), "i_b": lp["i_b"],
            "o_w": bf(lp["o_w"]), "o_b": lp["o_b"],
            "ln2_g": lp["ln2_g"], "ln2_b": lp["ln2_b"],
        })
    return out


# ------------------------- model forward -------------------------

def bleurt_forward(params, input_ids, input_mask, segment_ids, cfg):
    B, S = input_ids.shape
    D = cfg["hidden_size"]
    H = cfg["num_attention_heads"]

    # RemBertEmbeddings: word + position + token-type, then LayerNorm.
    # TODO(synk): embedding-table gathers stay in JAX (no clean Pallas gather here).
    emb = (jnp.take(params["word_emb"], input_ids, axis=0)
           + params["pos_emb"][None, :S, :]
           + jnp.take(params["type_emb"], segment_ids, axis=0))
    E = emb.shape[-1]
    x = pallas_layernorm(emb.reshape(B * S, E),
                         params["emb_ln_g"], params["emb_ln_b"])

    # RemBertEncoder.embedding_hidden_mapping_in
    h = pallas_linear(x, params["map_w"], params["map_b"])        # (B*S, D) bf16

    # extended attention mask, additive over keys.  -1e9 (finite) instead of
    # finfo(float32).min: same softmax result, no inf-inf NaN risk.
    mask_bias = ((1.0 - input_mask.astype(jnp.float32)) * -1e9).reshape(B, 1, S)

    for lp in params["layers"]:
        qkv = pallas_linear(h, lp["qkv_w"], lp["qkv_b"])          # fused Q|K|V (B*S, 3D)
        ctx = pallas_attention(qkv, mask_bias, B=B, S=S, D=D, H=H)  # (B, S, D)
        # attention output projection with fused residual + LayerNorm epilogue
        h = pallas_linear(ctx.reshape(B * S, D), lp["ao_w"], lp["ao_b"],
                          residual=h, ln_gamma=lp["ln1_g"], ln_beta=lp["ln1_b"])
        inter = pallas_linear(h, lp["i_w"], lp["i_b"], activation="gelu")
        # FFN down projection with fused residual + LayerNorm epilogue
        h = pallas_linear(inter, lp["o_w"], lp["o_b"],
                          residual=h, ln_gamma=lp["ln2_g"], ln_beta=lp["ln2_b"])

    # RemBertPooler (first token -> Linear -> tanh) + BleurtModel.dense, fused.
    cls = h.reshape(B, S, D)[:, 0, :]                             # (B, D) bf16
    return pallas_pooler_head(cls, params["pool_w"], params["pool_b"],
                              params["dense_w"], params["dense_b"])


# ------------------------- self-tests (pure-JAX references) -------------------------

def _attention_selftest():
    """Exercises kv-chunked online softmax, q tiling and the column-group path."""
    B, S, D, H = 2, 512, 128, 2
    dh = D // H
    kq, km = jax.random.split(jax.random.PRNGKey(1))
    qkv = (0.5 * jax.random.normal(kq, (B * S, 3 * D))).astype(jnp.bfloat16)
    mask = (jax.random.uniform(km, (B, S)) > 0.2).astype(jnp.float32)
    bias = ((1.0 - mask) * -1e9).reshape(B, 1, S)
    out = pallas_attention(qkv, bias, B=B, S=S, D=D, H=H)

    q, k, v = jnp.split(qkv.astype(jnp.float32), 3, axis=-1)

    def split_heads(t):
        return t.reshape(B, S, H, dh).transpose(0, 2, 1, 3)

    qh, kh, vh = split_heads(q), split_heads(k), split_heads(v)
    s = jnp.einsum("bhqd,bhkd->bhqk", qh, kh) + bias[:, :, None, :]
    p = jax.nn.softmax(s, axis=-1)
    ref = jnp.einsum("bhqk,bhkd->bhqd", p, vh).transpose(0, 2, 1, 3).reshape(B, S, D)
    err = float(jnp.max(jnp.abs(out.astype(jnp.float32) - ref)))
    assert err < 5e-2, f"attention selftest err={err}"


def _linear_ln_selftest():
    """Exercises multi-step K accumulation and the fused residual+LayerNorm epilogue."""
    kx, kw, kb, kr, kg = jax.random.split(jax.random.PRNGKey(2), 5)
    M, K, N = 256, 3072, 512
    x = (0.05 * jax.random.normal(kx, (M, K))).astype(jnp.bfloat16)
    w = (0.02 * jax.random.normal(kw, (K, N))).astype(jnp.bfloat16)
    b = 0.01 * jax.random.normal(kb, (N,))
    res = (0.1 * jax.random.normal(kr, (M, N))).astype(jnp.bfloat16)
    gamma = 1.0 + 0.02 * jax.random.normal(kg, (N,))
    beta = jnp.zeros((N,), jnp.float32)
    out = pallas_linear(x, w, b, residual=res, ln_gamma=gamma, ln_beta=beta)

    y = jnp.dot(x, w, preferred_element_type=jnp.float32) + b + res.astype(jnp.float32)
    mean = jnp.mean(y, axis=-1, keepdims=True)
    var = jnp.mean((y - mean) ** 2, axis=-1, keepdims=True)
    ref = (y - mean) * jax.lax.rsqrt(var + LN_EPS) * gamma + beta
    err = float(jnp.max(jnp.abs(out.astype(jnp.float32) - ref)))
    assert err < 5e-2, f"fused linear+LN selftest err={err}"


# ------------------------- main -------------------------

if __name__ == "__main__":
    # Validate the two riskiest kernels against pure-JAX references first.
    _attention_selftest()
    _linear_ln_selftest()

    cfg = dict(
        vocab_size=100,
        input_embedding_size=16,
        hidden_size=32,
        num_attention_heads=4,
        num_hidden_layers=2,
        intermediate_size=64,
        max_position_embeddings=64,
        type_vocab_size=2,
    )
    B, S = 2, 16

    key = jax.random.PRNGKey(0)
    pkey, ikey = jax.random.split(key)
    params = prepare_params(init_params(pkey, cfg), cfg)

    input_ids = jax.random.randint(ikey, (B, S), 0, cfg["vocab_size"],
                                   dtype=jnp.int32)
    input_mask = jnp.array([[1] * S,
                            [1] * (S - 3) + [0, 0, 0]], dtype=jnp.int32)
    segment_ids = jnp.array([[0] * (S // 2) + [1] * (S // 2)] * B,
                            dtype=jnp.int32)

    forward = jax.jit(lambda p, a, m, s: bleurt_forward(p, a, m, s, cfg))
    out = forward(params, input_ids, input_mask, segment_ids)
    out = jax.block_until_ready(out)

    assert out.shape == (B, 1), out.shape
    assert bool(jnp.all(jnp.isfinite(out)))
    print("KERNEL_OK")
</pallas_src>

<mosaic_0001>
module attributes {stable_mosaic.version = 11 : i64} {
  func.func @_attention_kernel(%arg0: i32, %arg1: i32, %arg2: i32, %arg3: i32, %arg4: memref<1x256x128xbf16, #tpu.memory_space<vmem>>, %arg5: memref<1x256x128xbf16, #tpu.memory_space<vmem>>, %arg6: memref<1x256x128xbf16, #tpu.memory_space<vmem>>, %arg7: memref<1x1x256xf32, #tpu.memory_space<vmem>>, %arg8: memref<1x256x128xbf16, #tpu.memory_space<vmem>>, %arg9: memref<2x256x1xf32, #tpu.memory_space<vmem>>, %arg10: memref<2x256x1xf32, #tpu.memory_space<vmem>>, %arg11: memref<2x256x64xf32, #tpu.memory_space<vmem>>) attributes {dimension_semantics = [#tpu.dimension_semantics<parallel>, #tpu.dimension_semantics<parallel>, #tpu.dimension_semantics<parallel>, #tpu.dimension_semantics<arbitrary>], iteration_bounds = array<i64: 2, 1, 2, 2>, scalar_prefetch = 0 : i64, scratch_operands = 3 : i64, tpu.core_type = #tpu.core_type<tc>, window_params = [{transform_indices = @transform_0, window_bounds = array<i64: 1, 256, 128>}, {transform_indices = @transform_1, window_bounds = array<i64: 1, 256, 128>}, {transform_indices = @transform_2, window_bounds = array<i64: 1, 256, 128>}, {transform_indices = @transform_3, window_bounds = array<i64: 1, 1, 256>}, {transform_indices = @transform_4, window_bounds = array<i64: 1, 256, 128>}]} {
    %c0_i32 = arith.constant 0 : i32
    %0 = arith.cmpi eq, %arg3, %c0_i32 : i32
    %1 = arith.extui %0 : i1 to i32
    %c0_i32_0 = arith.constant 0 : i32
    %2 = arith.cmpi ne, %1, %c0_i32_0 : i32
    scf.if %2 {
      %cst_63 = arith.constant -1.000000e+30 : f32
      %90 = vector.broadcast %cst_63 : f32 to vector<2x256x1xf32>
      %c0_64 = arith.constant 0 : index
      %c0_65 = arith.constant 0 : index
      %c0_66 = arith.constant 0 : index
      %91 = vector.load %arg9[%c0_64, %c0_65, %c0_66] : memref<2x256x1xf32, #tpu.memory_space<vmem>>, vector<2x256x1xf32>
      tpu.vector_store %arg9[%c0_64, %c0_65, %c0_66], %90 {strides = array<i32>} : memref<2x256x1xf32, #tpu.memory_space<vmem>>, vector<2x256x1xf32>,
      %cst_67 = arith.constant 0.000000e+00 : f32
      %92 = vector.broadcast %cst_67 : f32 to vector<2x256x1xf32>
      %c0_68 = arith.constant 0 : index
      %c0_69 = arith.constant 0 : index
      %c0_70 = arith.constant 0 : index
      %93 = vector.load %arg10[%c0_68, %c0_69, %c0_70] : memref<2x256x1xf32, #tpu.memory_space<vmem>>, vector<2x256x1xf32>
      tpu.vector_store %arg10[%c0_68, %c0_69, %c0_70], %92 {strides = array<i32>} : memref<2x256x1xf32, #tpu.memory_space<vmem>>, vector<2x256x1xf32>,
      %cst_71 = arith.constant 0.000000e+00 : f32
      %94 = vector.broadcast %cst_71 : f32 to vector<2x256x64xf32>
      %c0_72 = arith.constant 0 : index
      %c0_73 = arith.constant 0 : index
      %c0_74 = arith.constant 0 : index
      %95 = vector.load %arg11[%c0_72, %c0_73, %c0_74] : memref<2x256x64xf32, #tpu.memory_space<vmem>>, vector<2x256x64xf32>
      tpu.vector_store %arg11[%c0_72, %c0_73, %c0_74], %94 {strides = array<i32>} : memref<2x256x64xf32, #tpu.memory_space<vmem>>, vector<2x256x64xf32>,
    } else {
    }
    %c0 = arith.constant 0 : index
    %c0_1 = arith.constant 0 : index
    %c0_2 = arith.constant 0 : index
    %3 = vector.load %arg7[%c0, %c0_1, %c0_2] : memref<1x1x256xf32, #tpu.memory_space<vmem>>, vector<1x1x256xf32>
    %4 = vector.shape_cast %3 : vector<1x1x256xf32> to vector<1x256xf32>
    %c0_3 = arith.constant 0 : index
    %c0_4 = arith.constant 0 : index
    %c0_5 = arith.constant 0 : index
    %5 = vector.load %arg4[%c0_3, %c0_4, %c0_5] : memref<1x256x128xbf16, #tpu.memory_space<vmem>>, vector<1x256x64xbf16>
    %6 = vector.shape_cast %5 : vector<1x256x64xbf16> to vector<256x64xbf16>
    %c0_6 = arith.constant 0 : index
    %c0_7 = arith.constant 0 : index
    %c0_8 = arith.constant 0 : index
    %7 = vector.load %arg5[%c0_6, %c0_7, %c0_8] : memref<1x256x128xbf16, #tpu.memory_space<vmem>>, vector<1x256x64xbf16>
    %8 = vector.shape_cast %7 : vector<1x256x64xbf16> to vector<256x64xbf16>
    %c0_9 = arith.constant 0 : index
    %c0_10 = arith.constant 0 : index
    %c0_11 = arith.constant 0 : index
    %9 = vector.load %arg6[%c0_9, %c0_10, %c0_11] : memref<1x256x128xbf16, #tpu.memory_space<vmem>>, vector<1x256x64xbf16>
    %10 = vector.shape_cast %9 : vector<1x256x64xbf16> to vector<256x64xbf16>
    %cst = arith.constant dense<0.000000e+00> : vector<256x256xf32>
    %11 = tpu.matmul %6, %8, %cst {dimension_numbers = #tpu.dot_dimension_numbers<[1], [1], [0], [0], [0, 0, 1, 0], [], []>} : vector<256x64xbf16>, vector<256x64xbf16>, vector<256x256xf32> -> vector<256x256xf32>
    %12 = vector.broadcast %4 : vector<1x256xf32> to vector<256x256xf32>
    %13 = arith.addf %11, %12 : vector<256x256xf32>
    %c0_12 = arith.constant 0 : index
    %c0_13 = arith.constant 0 : index
    %c0_14 = arith.constant 0 : index
    %14 = vector.load %arg9[%c0_12, %c0_13, %c0_14] : memref<2x256x1xf32, #tpu.memory_space<vmem>>, vector<1x256x1xf32>
    %15 = vector.shape_cast %14 : vector<1x256x1xf32> to vector<256x1xf32>
    %cst_15 = arith.constant dense<0xFF800000> : vector<256xf32>
    %16 = vector.multi_reduction <maximumf>, %13, %cst_15 [1] : vector<256x256xf32> to vector<256xf32>
    %17 = vector.shape_cast %16 : vector<256xf32> to vector<256x1xf32>
    %18 = arith.maximumf %15, %17 : vector<256x1xf32>
    %19 = arith.subf %15, %18 : vector<256x1xf32>
    %20 = math.exp %19 : vector<256x1xf32>
    %21 = vector.broadcast %18 : vector<256x1xf32> to vector<256x256xf32>
    %22 = arith.subf %13, %21 : vector<256x256xf32>
    %23 = math.exp %22 : vector<256x256xf32>
    %c0_16 = arith.constant 0 : index
    %c0_17 = arith.constant 0 : index
    %c0_18 = arith.constant 0 : index
    %24 = vector.load %arg10[%c0_16, %c0_17, %c0_18] : memref<2x256x1xf32, #tpu.memory_space<vmem>>, vector<1x256x1xf32>
    %25 = vector.shape_cast %24 : vector<1x256x1xf32> to vector<256x1xf32>
    %26 = arith.mulf %20, %25 : vector<256x1xf32>
    %cst_19 = arith.constant dense<0.000000e+00> : vector<256xf32>
    %27 = vector.multi_reduction <add>, %23, %cst_19 [1] : vector<256x256xf32> to vector<256xf32>
    %28 = vector.shape_cast %27 : vector<256xf32> to vector<256x1xf32>
    %29 = arith.addf %26, %28 : vector<256x1xf32>
    %c0_20 = arith.constant 0 : index
    %c0_21 = arith.constant 0 : index
    %c0_22 = arith.constant 0 : index
    %30 = vector.load %arg10[%c0_20, %c0_21, %c0_22] : memref<2x256x1xf32, #tpu.memory_space<vmem>>, vector<1x256x1xf32>
    %31 = vector.shape_cast %30 : vector<1x256x1xf32> to vector<256x1xf32>
    %32 = vector.shape_cast %29 : vector<256x1xf32> to vector<1x256x1xf32>
    tpu.vector_store %arg10[%c0_20, %c0_21, %c0_22], %32 {strides = array<i32>} : memref<2x256x1xf32, #tpu.memory_space<vmem>>, vector<1x256x1xf32>,
    %c0_23 = arith.constant 0 : index
    %c0_24 = arith.constant 0 : index
    %c0_25 = arith.constant 0 : index
    %33 = vector.load %arg11[%c0_23, %c0_24, %c0_25] : memref<2x256x64xf32, #tpu.memory_space<vmem>>, vector<1x256x64xf32>
    %34 = vector.shape_cast %33 : vector<1x256x64xf32> to vector<256x64xf32>
    %35 = vector.broadcast %20 : vector<256x1xf32> to vector<256x64xf32>
    %36 = arith.mulf %35, %34 : vector<256x64xf32>
    %37 = arith.truncf %23 : vector<256x256xf32> to vector<256x256xbf16>
    %cst_26 = arith.constant dense<0.000000e+00> : vector<256x64xf32>
    %38 = tpu.matmul %37, %10, %cst_26 {dimension_numbers = #tpu.dot_dimension_numbers<[1], [0], [0], [1], [0, 0, 1, 1], [], []>} : vector<256x256xbf16>, vector<256x64xbf16>, vector<256x64xf32> -> vector<256x64xf32>
    %39 = arith.addf %36, %38 : vector<256x64xf32>
    %c0_27 = arith.constant 0 : index
    %c0_28 = arith.constant 0 : index
    %c0_29 = arith.constant 0 : index
    %40 = vector.load %arg11[%c0_27, %c0_28, %c0_29] : memref<2x256x64xf32, #tpu.memory_space<vmem>>, vector<1x256x64xf32>
    %41 = vector.shape_cast %40 : vector<1x256x64xf32> to vector<256x64xf32>
    %42 = vector.shape_cast %39 : vector<256x64xf32> to vector<1x256x64xf32>
    tpu.vector_store %arg11[%c0_27, %c0_28, %c0_29], %42 {strides = array<i32>} : memref<2x256x64xf32, #tpu.memory_space<vmem>>, vector<1x256x64xf32>,
    %c0_30 = arith.constant 0 : index
    %c0_31 = arith.constant 0 : index
    %c0_32 = arith.constant 0 : index
    %43 = vector.load %arg9[%c0_30, %c0_31, %c0_32] : memref<2x256x1xf32, #tpu.memory_space<vmem>>, vector<1x256x1xf32>
    %44 = vector.shape_cast %43 : vector<1x256x1xf32> to vector<256x1xf32>
    %45 = vector.shape_cast %18 : vector<256x1xf32> to vector<1x256x1xf32>
    tpu.vector_store %arg9[%c0_30, %c0_31, %c0_32], %45 {strides = array<i32>} : memref<2x256x1xf32, #tpu.memory_space<vmem>>, vector<1x256x1xf32>,
    %c0_33 = arith.constant 0 : index
    %c0_34 = arith.constant 0 : index
    %c64 = arith.constant 64 : index
    %46 = vector.load %arg4[%c0_33, %c0_34, %c64] : memref<1x256x128xbf16, #tpu.memory_space<vmem>>, vector<1x256x64xbf16>
    %47 = vector.shape_cast %46 : vector<1x256x64xbf16> to vector<256x64xbf16>
    %c0_35 = arith.constant 0 : index
    %c0_36 = arith.constant 0 : index
    %c64_37 = arith.constant 64 : index
    %48 = vector.load %arg5[%c0_35, %c0_36, %c64_37] : memref<1x256x128xbf16, #tpu.memory_space<vmem>>, vector<1x256x64xbf16>
    %49 = vector.shape_cast %48 : vector<1x256x64xbf16> to vector<256x64xbf16>
    %c0_38 = arith.constant 0 : index
    %c0_39 = arith.constant 0 : index
    %c64_40 = arith.constant 64 : index
    %50 = vector.load %arg6[%c0_38, %c0_39, %c64_40] : memref<1x256x128xbf16, #tpu.memory_space<vmem>>, vector<1x256x64xbf16>
    %51 = vector.shape_cast %50 : vector<1x256x64xbf16> to vector<256x64xbf16>
    %cst_41 = arith.constant dense<0.000000e+00> : vector<256x256xf32>
    %52 = tpu.matmul %47, %49, %cst_41 {dimension_numbers = #tpu.dot_dimension_numbers<[1], [1], [0], [0], [0, 0, 1, 0], [], []>} : vector<256x64xbf16>, vector<256x64xbf16>, vector<256x256xf32> -> vector<256x256xf32>
    %53 = vector.broadcast %4 : vector<1x256xf32> to vector<256x256xf32>
    %54 = arith.addf %52, %53 : vector<256x256xf32>
    %c1 = arith.constant 1 : index
    %c0_42 = arith.constant 0 : index
    %c0_43 = arith.constant 0 : index
    %55 = vector.load %arg9[%c1, %c0_42, %c0_43] : memref<2x256x1xf32, #tpu.memory_space<vmem>>, vector<1x256x1xf32>
    %56 = vector.shape_cast %55 : vector<1x256x1xf32> to vector<256x1xf32>
    %cst_44 = arith.constant dense<0xFF800000> : vector<256xf32>
    %57 = vector.multi_reduction <maximumf>, %54, %cst_44 [1] : vector<256x256xf32> to vector<256xf32>
    %58 = vector.shape_cast %57 : vector<256xf32> to vector<256x1xf32>
    %59 = arith.maximumf %56, %58 : vector<256x1xf32>
    %60 = arith.subf %56, %59 : vector<256x1xf32>
    %61 = math.exp %60 : vector<256x1xf32>
    %62 = vector.broadcast %59 : vector<256x1xf32> to vector<256x256xf32>
    %63 = arith.subf %54, %62 : vector<256x256xf32>
    %64 = math.exp %63 : vector<256x256xf32>
    %c1_45 = arith.constant 1 : index
    %c0_46 = arith.constant 0 : index
    %c0_47 = arith.constant 0 : index
    %65 = vector.load %arg10[%c1_45, %c0_46, %c0_47] : memref<2x256x1xf32, #tpu.memory_space<vmem>>, vector<1x256x1xf32>
    %66 = vector.shape_cast %65 : vector<1x256x1xf32> to vector<256x1xf32>
    %67 = arith.mulf %61, %66 : vector<256x1xf32>
    %cst_48 = arith.constant dense<0.000000e+00> : vector<256xf32>
    %68 = vector.multi_reduction <add>, %64, %cst_48 [1] : vector<256x256xf32> to vector<256xf32>
    %69 = vector.shape_cast %68 : vector<256xf32> to vector<256x1xf32>
    %70 = arith.addf %67, %69 : vector<256x1xf32>
    %c1_49 = arith.constant 1 : index
    %c0_50 = arith.constant 0 : index
    %c0_51 = arith.constant 0 : index
    %71 = vector.load %arg10[%c1_49, %c0_50, %c0_51] : memref<2x256x1xf32, #tpu.memory_space<vmem>>, vector<1x256x1xf32>
    %72 = vector.shape_cast %71 : vector<1x256x1xf32> to vector<256x1xf32>
    %73 = vector.shape_cast %70 : vector<256x1xf32> to vector<1x256x1xf32>
    tpu.vector_store %arg10[%c1_49, %c0_50, %c0_51], %73 {strides = array<i32>} : memref<2x256x1xf32, #tpu.memory_space<vmem>>, vector<1x256x1xf32>,
    %c1_52 = arith.constant 1 : index
    %c0_53 = arith.constant 0 : index
    %c0_54 = arith.constant 0 : index
    %74 = vector.load %arg11[%c1_52, %c0_53, %c0_54] : memref<2x256x64xf32, #tpu.memory_space<vmem>>, vector<1x256x64xf32>
    %75 = vector.shape_cast %74 : vector<1x256x64xf32> to vector<256x64xf32>
    %76 = vector.broadcast %61 : vector<256x1xf32> to vector<256x64xf32>
    %77 = arith.mulf %76, %75 : vector<256x64xf32>
    %78 = arith.truncf %64 : vector<256x256xf32> to vector<256x256xbf16>
    %cst_55 = arith.constant dense<0.000000e+00> : vector<256x64xf32>
    %79 = tpu.matmul %78, %51, %cst_55 {dimension_numbers = #tpu.dot_dimension_numbers<[1], [0], [0], [1], [0, 0, 1, 1], [], []>} : vector<256x256xbf16>, vector<256x64xbf16>, vector<256x64xf32> -> vector<256x64xf32>
    %80 = arith.addf %77, %79 : vector<256x64xf32>
    %c1_56 = arith.constant 1 : index
    %c0_57 = arith.constant 0 : index
    %c0_58 = arith.constant 0 : index
    %81 = vector.load %arg11[%c1_56, %c0_57, %c0_58] : memref<2x256x64xf32, #tpu.memory_space<vmem>>, vector<1x256x64xf32>
    %82 = vector.shape_cast %81 : vector<1x256x64xf32> to vector<256x64xf32>
    %83 = vector.shape_cast %80 : vector<256x64xf32> to vector<1x256x64xf32>
    tpu.vector_store %arg11[%c1_56, %c0_57, %c0_58], %83 {strides = array<i32>} : memref<2x256x64xf32, #tpu.memory_space<vmem>>, vector<1x256x64xf32>,
    %c1_59 = arith.constant 1 : index
    %c0_60 = arith.constant 0 : index
    %c0_61 = arith.constant 0 : index
    %84 = vector.load %arg9[%c1_59, %c0_60, %c0_61] : memref<2x256x1xf32, #tpu.memory_space<vmem>>, vector<1x256x1xf32>
    %85 = vector.shape_cast %84 : vector<1x256x1xf32> to vector<256x1xf32>
    %86 = vector.shape_cast %59 : vector<256x1xf32> to vector<1x256x1xf32>
    tpu.vector_store %arg9[%c1_59, %c0_60, %c0_61], %86 {strides = array<i32>} : memref<2x256x1xf32, #tpu.memory_space<vmem>>, vector<1x256x1xf32>,
    %c1_i32 = arith.constant 1 : i32
    %87 = arith.cmpi eq, %arg3, %c1_i32 : i32
    %88 = arith.extui %87 : i1 to i32
    %c0_i32_62 = arith.constant 0 : i32
    %89 = arith.cmpi ne, %88, %c0_i32_62 : i32
    scf.if %89 {
      %c0_63 = arith.constant 0 : index
      %c0_64 = arith.constant 0 : index
      %c0_65 = arith.constant 0 : index
      %90 = vector.load %arg11[%c0_63, %c0_64, %c0_65] : memref<2x256x64xf32, #tpu.memory_space<vmem>>, vector<1x256x64xf32>
      %91 = vector.shape_cast %90 : vector<1x256x64xf32> to vector<256x64xf32>
      %c0_66 = arith.constant 0 : index
      %c0_67 = arith.constant 0 : index
      %c0_68 = arith.constant 0 : index
      %92 = vector.load %arg10[%c0_66, %c0_67, %c0_68] : memref<2x256x1xf32, #tpu.memory_space<vmem>>, vector<1x256x1xf32>
      %93 = vector.shape_cast %92 : vector<1x256x1xf32> to vector<256x1xf32>
      %94 = tpu.reciprocal %93 {approx = true} : vector<256x1xf32> -> vector<256x1xf32>
      %95 = vector.broadcast %94 : vector<256x1xf32> to vector<256x64xf32>
      %96 = arith.mulf %91, %95 : vector<256x64xf32>
      %c1_69 = arith.constant 1 : index
      %c0_70 = arith.constant 0 : index
      %c0_71 = arith.constant 0 : index
      %97 = vector.load %arg11[%c1_69, %c0_70, %c0_71] : memref<2x256x64xf32, #tpu.memory_space<vmem>>, vector<1x256x64xf32>
      %98 = vector.shape_cast %97 : vector<1x256x64xf32> to vector<256x64xf32>
      %c1_72 = arith.constant 1 : index
      %c0_73 = arith.constant 0 : index
      %c0_74 = arith.constant 0 : index
      %99 = vector.load %arg10[%c1_72, %c0_73, %c0_74] : memref<2x256x1xf32, #tpu.memory_space<vmem>>, vector<1x256x1xf32>
      %100 = vector.shape_cast %99 : vector<1x256x1xf32> to vector<256x1xf32>
      %101 = tpu.reciprocal %100 {approx = true} : vector<256x1xf32> -> vector<256x1xf32>
      %102 = vector.broadcast %101 : vector<256x1xf32> to vector<256x64xf32>
      %103 = arith.mulf %98, %102 : vector<256x64xf32>
      %104 = tpu.concatenate %96, %103 in 1 : vector<256x64xf32>, vector<256x64xf32> -> vector<256x128xf32>
      %105 = arith.truncf %104 : vector<256x128xf32> to vector<256x128xbf16>
      %c0_75 = arith.constant 0 : index
      %c0_76 = arith.constant 0 : index
      %c0_77 = arith.constant 0 : index
      %106 = vector.load %arg8[%c0_75, %c0_76, %c0_77] : memref<1x256x128xbf16, #tpu.memory_space<vmem>>, vector<1x256x128xbf16>
      %107 = vector.shape_cast %106 : vector<1x256x128xbf16> to vector<256x128xbf16>
      %108 = vector.shape_cast %105 : vector<256x128xbf16> to vector<1x256x128xbf16>
      tpu.vector_store %arg8[%c0_75, %c0_76, %c0_77], %108 {strides = array<i32>} : memref<1x256x128xbf16, #tpu.memory_space<vmem>>, vector<1x256x128xbf16>,
    } else {
    }
    return
  }
  func.func @transform_0(%arg0: i32, %arg1: i32, %arg2: i32, %arg3: i32) -> (i32, i32, i32) {
    %c0_i32 = arith.constant 0 : i32
    return %arg0, %arg2, %arg1 : i32, i32, i32
  }
  func.func @transform_1(%arg0: i32, %arg1: i32, %arg2: i32, %arg3: i32) -> (i32, i32, i32) {
    %c1_i32 = arith.constant 1 : i32
    %0 = arith.addi %c1_i32, %arg1 : i32
    %c0_i32 = arith.constant 0 : i32
    return %arg0, %arg3, %0 : i32, i32, i32
  }
  func.func @transform_2(%arg0: i32, %arg1: i32, %arg2: i32, %arg3: i32) -> (i32, i32, i32) {
    %c2_i32 = arith.constant 2 : i32
    %0 = arith.addi %c2_i32, %arg1 : i32
    %c0_i32 = arith.constant 0 : i32
    return %arg0, %arg3, %0 : i32, i32, i32
  }
  func.func @transform_3(%arg0: i32, %arg1: i32, %arg2: i32, %arg3: i32) -> (i32, i32, i32) {
    %c0_i32 = arith.constant 0 : i32
    %c0_i32_0 = arith.constant 0 : i32
    return %arg0, %c0_i32, %arg3 : i32, i32, i32
  }
  func.func @transform_4(%arg0: i32, %arg1: i32, %arg2: i32, %arg3: i32) -> (i32, i32, i32) {
    %c0_i32 = arith.constant 0 : i32
    return %arg0, %arg2, %arg1 : i32, i32, i32
  }
}

</mosaic_0001>

<bundles_post_ra>
// kernel: tpu_custom_call.1
= control target key start
LH: loop header
LB: loop body
LE: loop exit
PB: predicated region body
PF: predicated region fallthrough
CT: control target
= control target key end

     0   :  { %s11116_s0 = inlined_call_operand.hbm [shape: bf16[2,512,384], index: 0, kind: input, shape index: {}]   ;;  %s11117_s1 = inlined_call_operand.hbm [shape: bf16[2,512,384], index: 1, kind: input, shape index: {}]   ;;  %s11118_s2 = inlined_call_operand.hbm [shape: bf16[2,512,384], index: 2, kind: input, shape index: {}]   ;;  %s11119_s3 = inlined_call_operand.hbm [shape: f32[2,1,512], index: 3, kind: input, shape index: {}]   ;;  %s11120_s4 = inlined_call_operand.hbm [shape: bf16[2,512,128], index: 4, kind: output, shape index: {}]  }
   0x1   :  { %11335 = sst [smem:[#allocation142_spill]] %s11116_s0 }
   0x2   :  { %11336 = sst [smem:[#allocation143_spill]] %s11117_s1 }
   0x3   :  { %11337 = sst [smem:[#allocation144_spill]] %s11118_s2 }
   0x4   :  { %11338 = sst [smem:[#allocation145_spill]] %s11119_s3 }
   0x5   :  { %11339 = sst [smem:[#allocation146_spill]] %s11120_s4 }
   0x6   :  { %9 = vsyncpa [#allocation6], 0 }
   0x7   :  { %11 = vsyncpa [#allocation6 + $0x1], 0 }
   0x8   :  { %12 = vsyncpa [#allocation9], 0 }
   0x9   :  { %14 = vsyncpa [#allocation9 + $0x1], 0 }
   0xa   :  { %15 = vsyncpa [#allocation12], 0 }
   0xb   :  { %17 = vsyncpa [#allocation12 + $0x1], 0 }
   0xc   :  { %18 = vsyncpa [#allocation7], 0 }
   0xd   :  { %20 = vsyncpa [#allocation7 + $0x1], 0  ;;  %s7589_s15 = smov 0   ;;  %s7591_s16 = smov 0  }
   0xe   :  { %s7593_s17 = smov 0   ;;  %s7595_s18 = smov 0  }
   0xf   :  { %s7597_s19 = smov 0   ;;  %s7599_s20 = smov 0  }
  0x10   :  { %s7601_s21 = smov 0   ;;  %s7603_s22 = smov 0  }
  0x11   :  { %s7605_s23 = smov 0   ;;  %s7607_s24 = smov 0  }
  0x12   :  { %s7609_s25 = smov 0   ;;  %s7611_s26 = smov 0  }
  0x13   :  { %s7613_s27 = smov 0  }
  0x14 LB: > { %11340 = sst [smem:[#allocation18_spill]] %s7503_s16  ;;  %s41_s28 = sadd.s32 1, %s7535_s24  ;;  %s7547_s27 = sphi %s7613_s27, %s26_s27   ;;  %s7543_s26 = sphi %s7611_s26, %s11881_s26   ;;  %s7539_s25 = sphi %s7609_s25, %s11880_s25   ;;  %s7535_s24 = sphi %s7607_s24, %s11879_s24   ;;  %s7531_s23 = sphi %s7605_s23, %s11878_s23   ;;  %s7527_s22 = sphi %s7603_s22, %s11877_s22   ;;  %s7523_s21 = sphi %s7601_s21, %s11876_s21   ;;  %s7519_s20 = sphi %s7599_s20, %s11875_s20   ;;  %s7515_s19 = sphi %s7597_s19, %s11874_s19   ;;  %s7511_s18 = sphi %s7595_s18, %s11873_s18   ;;  %s7507_s17 = sphi %s7593_s17, %s11872_s17   ;;  %s7503_s16 = sphi %s7591_s16, %s11871_s16   ;;  %s7499_s15 = sphi %s7589_s15, %s11867_s15  }
  0x15   : > { %11341 = sst [smem:[#allocation19_spill]] %s7511_s18  ;;  %p7656_p0 = scmp.ge.s32.totalorder %s41_s28, 2 }
  0x16   : > { %11342 = sst [smem:[#allocation20_spill]] %s7523_s21  ;;  %p71_p1 = scmp.eq.s32.totalorder %s7547_s27, 0 }
  0x17   : > { %11343 = sst [smem:[#allocation21_spill]] %s7527_s22  ;;  %p102_p2 = scmp.ne.s32.totalorder %s7507_s17, %s7503_s16 }
  0x18   : > { %11344 = sst [smem:[#allocation22_spill]] %s7531_s23  ;;  %s11883_s28 = smov (%p7656_p0, %s41_s28), 0 }
  0x19   : > { %p104_p3 = por %p102_p2, %p71_p1  ;;  %p108_p4 = scmp.ne.s32.totalorder %s7503_s16, %s7499_s15 }
  0x1a   : > { %p11128_p5 = scmp.lt.s32.totalorder %s7547_s27, 8  ;;  %s11122_s7 = smul.u32 192, %s7543_s26 }
  0x1b   : > { %s247_s8 = sand.u32 1, %s7547_s27   ;;  %s7678_s9 = sand.u32 1, %s7507_s17  }
  0x1c   : > { %s5791_s10 = sshll.u32 %s7678_s9, 7  ;;  %s5648_s11 = smul.u32 96, %s7535_s24 }
  0x1d   : > { %p7684_p6 = pnand %p11128_p5, %p104_p3  ;;  %s251_s14 = scalar_lea.vmem [#allocation8], %s5791_s10 }
  0x1e   : > { %s7690_s13 = sadd.s32 %s11122_s7, %s5648_s11  ;;  %s263_s5 = sshll.u32 %s251_s14, 4  ;;  %s264_s5 = int_to_ptr.vmem [resolvable:$true] %s263_s5 }
  0x1f   : > { %s5792_s6 = sshll.u32 %s7690_s13, 6  ;;  %s11347_s1 = sld [smem:[#allocation143_spill]] }
  0x20   : > { %s7698_s21 = scalar_lea.sflag [#allocation9], %s247_s8  ;;  %p11125_p7 = pneg %p7684_p6 }
  0x21   : > { %s7302_s3 = scalar_lea.vmem %s264_s5, 2048  ;;  %s7549_s11 = smov [#allocation8]  }
  0x22   : > { %p7303_p8 = scmp.ne.s32.totalorder %s264_s5, %s7302_s3  ;;  %s7307_s7 = sshll.u32 %s7549_s11, 4  ;;  %s7308_s7 = int_to_ptr.vmem [resolvable:$false] %s7307_s7 }
  0x23   : > { %s7309_s13 = scalar_lea.vmem %s7308_s7, 4096  ;;  %p7310_p11 = scmp.lt.s32.totalorder %s264_s5, %s7308_s7 }
  0x24   : > { %p7305_p9 = pnand %p7303_p8, %p11125_p7  ;;  %p7311_p12 = scmp.lt.s32.totalorder %s7309_s13, %s7302_s3 }
  0x25   : > { %s5653_s23 = scalar_lea.hbm %s11347_s1, %s5792_s6 }
  0x26   : > { %s5654_s22 = scalar_lea.hbm %s5653_s23, 64  ;;  %p7306_p10 = pneg %p7305_p9 }
  0x27   : > { %p7312_p13 = por %p7311_p12, %p7310_p11 }
  0x29   : > { %p7313_p2 = pnand %p7312_p13, %p7306_p10 }
  0x2b   : > { %7316 = shalt.err (!%p7313_p2)
}
  0x2c   : > { %s11123_s4 = smov 192   ;;  %s11126_s23 = smov 64  }
  0x2d   : > { %s11129_s29 = smov 4   ;;  %s11348_s2 = sld [smem:[#allocation144_spill]] }
  0x2e   : > { %6470 = dma.hbm_to_vmem [thread:$0]  (!%p7684_p6), %s5654_s22, 2048, %s264_s5, %s7698_s21, %s11123_s4, %s11126_s23, %s11129_s29  }
  0x2f   : > { %s277_s14 = scalar_lea.vmem [#allocation10], %s5791_s10  ;;  %p5799_p3 = scmp.ge.s32.totalorder %s7547_s27, 1 }
  0x30   : > { %s289_s11 = sshll.u32 %s277_s14, 4  ;;  %p318_p8 = scmp.lt.s32.totalorder %s7547_s27, 9  ;;  %s7719_s11 = int_to_ptr.vmem [resolvable:$true] %s289_s11 }
  0x31   : > { %s7728_s5 = sadd.s32 4294967295, %s7547_s27   ;;  %s44_s10 = sadd.s32 1, %s7539_s25 }
  0x32   : > { %p7723_p9 = pnand %p5799_p3, %p318_p8  ;;  %11351 = sst [smem:[#allocation24_spill]] %s7728_s5 }
  0x33   : > { %s7714_s8 = scalar_lea.hbm %s11348_s2, %s5792_s6  ;;  %s5784_s6 = sadd.s32 4294967294, %s7547_s27  }
  0x34   : > { %s11349_s22 = scalar_select %p7723_p9, 1, 0 }
  0x35   : > { %s11885_s10 = smov (!%p7656_p0, %s44_s10), %s7539_s25  ;;  %s63_s3 = sadd.s32 1, %s7519_s20 }
  0x36   : > { %11350 = sst [smem:[#allocation23_spill]] %s11349_s22  ;;  %p70_p10 = scmp.ne.s32.totalorder %s7519_s20, %s7515_s19 }
  0x37   : > { %p46_p11 = scmp.ge.s32.totalorder %s11885_s10, 2  ;;  %p76_p12 = scmp.ne.s32.totalorder %s7515_s19, %s7511_s18 }
  0x38   : > { %p7745_p13 = por %p71_p1, %p70_p10  ;;  %p77_p2 = scmp.eq.s32.totalorder %s7728_s5, 0 }
  0x39   : > { %s11887_s10 = smov (%p46_p11, %s11885_s10), 0  ;;  %s11354_s30 = sadd.s32 1, %s7543_s26 }
  0x3a   : > { %11353 = sst [smem:[#allocation25_spill]] %s11887_s10  ;;  %s11889_s30 = smov (!%p46_p11, %s11354_s30), %s7543_s26 }
  0x3b   : > { %s57_s14 = ssub.s32 %s7539_s25, %s11887_s10  ;;  %p7760_p0 = por %p77_p2, %p76_p12 }
  0x3c   : > { %p54_p1 = scmp.ge.s32.totalorder %s11889_s30, 2  ;;  %p7767_p3 = por %p108_p4, %p77_p2 }
  0x3d   : > { %s11355_s13 = scalar_select %p7760_p0, 1, 0 }
  0x3e   : > { %s11357_s4 = scalar_select %p7767_p3, 1, 0 }
  0x3f   : > { %11356 = sst [smem:[#allocation26_spill]] %s11355_s13  ;;  %p196_p8 = scmp.eq.s32.totalorder %s7728_s5, 7 }
  0x40   : > { %11358 = sst [smem:[#allocation27_spill]] %s11357_s4  ;;  %p202_p7 = scmp.eq.s32.totalorder %s5784_s6, 7 }
  0x41   : > { %s11891_s30 = smov (%p54_p1, %s11889_s30), 0  ;;  %p7777_p11 = por %p196_p8, %p70_p10 }
  0x42   : > { %11359 = sst [smem:[#allocation28_spill]] %s11891_s30  ;;  %p7784_p5 = por %p202_p7, %p76_p12 }
  0x43   : > { %s11360_s23 = scalar_select %p7777_p11, 1, 0 }
  0x44   : > { %s11362_s15 = scalar_select %p7784_p5, 1, 0 }
  0x45   : > { %11361 = sst [smem:[#allocation29_spill]] %s11360_s23  ;;  %s56_s29 = ssub.s32 %s7543_s26, %s11891_s30 }
  0x46   : > { %11363 = sst [smem:[#allocation30_spill]] %s11362_s15  ;;  %s222_s1 = sand.u32 1, %s7519_s20  }
  0x47   : > { %s58_s2 = sor.u32 %s57_s14, %s56_s29  ;;  %s11364_s6 = ssub.s32 %s7535_s24, %s11883_s28 }
  0x48   : > { %s90_s10 = sor.u32 %s11364_s6, %s56_s29  ;;  %p61_p4 = scmp.eq.s32.totalorder %s58_s2, 0 }
  0x49   : > { %p93_p2 = scmp.eq.s32.totalorder %s90_s10, 0  ;;  %s5787_s4 = sshll.u32 %s222_s1, 7 }
  0x4a   : > { %s7795_s16 = scalar_select %p61_p4, %s7519_s20, %s63_s3  }
  0x4b   : > { %s11365_s5 = sadd.s32 1, %s7507_s17  ;;  %s6452_s22 = smul.u32 96, %s7539_s25 }
  0x4c   : > { %s7800_s13 = scalar_select %p93_p2, %s7507_s17, %s11365_s5  }
  0x4d   : > { %s226_s23 = scalar_lea.vmem [#allocation5], %s5787_s4  ;;  %p11366_p7 = scmp.lt.s32.totalorder %s7547_s27, 8 }
  0x4e   : > { %s237_s18 = sshll.u32 %s226_s23, 4  ;;  %s11368_s14 = smul.u32 192, %s7543_s26  ;;  %s238_s18 = int_to_ptr.vmem [resolvable:$true] %s237_s18 }
  0x4f   : > { %p7807_p10 = pnand %p11366_p7, %p7745_p13  ;;  %s11369_s0 = sld [smem:[#allocation142_spill]] }
  0x50   : > { %s234_s29 = sadd.s32 %s11368_s14, %s6452_s22  ;;  %s223_s5 = scalar_lea.sflag [#allocation6], %s222_s1 }
  0x51   : > { %s5790_s2 = sshll.u32 %s234_s29, 6  ;;  %p7320_p12 = pneg %p7807_p10 }
  0x52   : > { %s7331_s4 = scalar_lea.vmem %s238_s18, 2048  ;;  %s7553_s23 = smov [#allocation5]  }
  0x53   : > { %p7332_p1 = scmp.ne.s32.totalorder %s238_s18, %s7331_s4  ;;  %s7336_s7 = sshll.u32 %s7553_s23, 4  ;;  %s7337_s7 = int_to_ptr.vmem [resolvable:$false] %s7336_s7 }
  0x54   : > { %s7338_s30 = scalar_lea.vmem %s7337_s7, 4096  ;;  %p7339_p13 = scmp.lt.s32.totalorder %s238_s18, %s7337_s7 }
  0x55   : > { %s236_s6 = scalar_lea.hbm %s11369_s0, %s5790_s2  ;;  %p7334_p8 = pnand %p7332_p1, %p7320_p12 }
  0x56   : > { %p7340_p2 = scmp.lt.s32.totalorder %s7338_s30, %s7331_s4 }
  0x57   : > { %p7335_p4 = pneg %p7334_p8 }
  0x58   : > { %p7341_p7 = por %p7340_p2, %p7339_p13 }
  0x5a   : > { %p7342_p5 = pnand %p7341_p7, %p7335_p4 }
  0x5c   : > { %7345 = shalt.err (!%p7342_p5)
}
  0x5d   : > { %s11370_s22 = smov 4   ;;  %s11371_s14 = smov 64  }
  0x5e   : > { %s11372_s1 = smov 192   ;;  %s7359_s29 = scalar_lea.vmem %s7719_s11, 2048 }
  0x5f   : > { %6467 = dma.hbm_to_vmem [thread:$0]  (!%p7807_p10), %s236_s6, 2048, %s238_s18, %s223_s5, %s11372_s1, %s11371_s14, %s11370_s22  }
  0x60   : > { %p7360_p12 = scmp.ne.s32.totalorder %s7719_s11, %s7359_s29  ;;  %p11373_p1 = pneg %p7684_p6 }
  0x61   : > { %s7554_s30 = smov [#allocation10]  }
  0x62   : > { %p7362_p8 = pnand %p7360_p12, %p11373_p1  ;;  %s7364_s2 = sshll.u32 %s7554_s30, 4  ;;  %s7365_s2 = int_to_ptr.vmem [resolvable:$false] %s7364_s2 }
  0x63   : > { %s7366_s10 = scalar_lea.vmem %s7365_s2, 4096  ;;  %p7367_p5 = scmp.lt.s32.totalorder %s7719_s11, %s7365_s2 }
  0x64   : > { %p7363_p11 = pneg %p7362_p8  ;;  %p7368_p4 = scmp.lt.s32.totalorder %s7366_s10, %s7359_s29 }
  0x66   : > { %p7369_p13 = por %p7368_p4, %p7367_p5 }
  0x68   : > { %p7370_p2 = pnand %p7369_p13, %p7363_p11 }
  0x6a   : > { %7373 = shalt.err (!%p7370_p2)
}
  0x6b   : > { %s11374_s18 = scalar_lea.hbm %s7714_s8, 128  ;;  %s5795_s15 = sshll.u32 %s7678_s9, 1 }
  0x6c   : > { %6473 = dma.hbm_to_vmem [thread:$0]  (!%p7684_p6), %s11374_s18, 2048, %s7719_s11, %s7698_s21, %s11372_s1, %s11371_s14, %s11370_s22  }
  0x6d   : > { %s5796_s3 = sshll.u32 %s7535_s24, 1  ;;  %s5797_s6 = sshll.u32 %s7543_s26, 2 }
  0x6e   : > { %s309_s5 = sadd.s32 %s5797_s6, %s5796_s3  ;;  %s303_s4 = scalar_lea.vmem [#allocation11], %s5795_s15 }
  0x6f   : > { %s313_s23 = sshll.u32 %s303_s4, 4  ;;  %s5798_s7 = sshll.u32 %s309_s5, 4  ;;  %s314_s23 = int_to_ptr.vmem [resolvable:$true] %s313_s23 }
  0x70   : > { %s11375_s2 = sld [smem:[#allocation145_spill]]  ;;  %s300_s0 = scalar_lea.sflag [#allocation12], %s7678_s9 }
  0x71   : > { %s7388_s8 = scalar_lea.vmem %s314_s23, 32  ;;  %p11376_p10 = pmov %p11373_p1 }
  0x72   : > { %p7389_p11 = scmp.ne.s32.totalorder %s314_s23, %s7388_s8  ;;  %s7555_s21 = smov [#allocation11]  }
  0x73   : > { %s7393_s11 = sshll.u32 %s7555_s21, 4  ;;  %s7394_s11 = int_to_ptr.vmem [resolvable:$false] %s7393_s11 }
  0x74   : > { %p7391_p7 = pnand %p7389_p11, %p11376_p10  ;;  %s7395_s22 = scalar_lea.vmem %s7394_s11, 64 }
  0x75   : > { %p7396_p1 = scmp.lt.s32.totalorder %s314_s23, %s7394_s11  ;;  %p7397_p8 = scmp.lt.s32.totalorder %s7395_s22, %s7388_s8 }
  0x76   : > { %s311_s10 = scalar_lea.hbm %s11375_s2, %s5798_s7  ;;  %p7392_p12 = pneg %p7391_p7 }
  0x77   : > { %p7398_p5 = por %p7397_p8, %p7396_p1 }
  0x79   : > { %p7399_p4 = pnand %p7398_p5, %p7392_p12 }
  0x7b   : > { %7402 = shalt.err (!%p7399_p4)
}
  0x7c   : > { %6476 = dma.hbm_to_vmem [thread:$0]  (!%p7684_p6), %s311_s10, 32, %s314_s23, %s300_s0  }
  0x7d   : > { %322 = sbr.rel (%p7723_p9) target bundleno = 2258 (0x8d2), region = 36 }
  0x82   : > { %s7853_s1 = sand.u32 1, %s7515_s19  }
  0x83   : > { %s5800_s18 = sshll.u32 %s7853_s1, 7  ;;  %s325_s15 = scalar_lea.sflag [#allocation6], %s7853_s1 }
  0x84   : > { %s7857_s3 = scalar_lea.vmem [#allocation5], %s5800_s18 }
  0x85   : > { %7482 = dma.done.wait (%p7760_p0), %s325_s15, 2048  }
  0x86   : > { %7484 = vsyncadd (%p7760_p0), %s325_s15, 4294965248  ;;  %s11379_s12 = sld [smem:[#allocation24_spill]] }
  0x87   : > { %s11380_s0 = sld [smem:[#allocation18_spill]] }
  0x8c   : > { %s333_s5 = sand.u32 1, %s11379_s12  }
  0x8d   : > { %s335_s4 = sand.u32 1, %s11380_s0   ;;  %s334_s7 = scalar_lea.sflag [#allocation9], %s333_s5 }
  0x8e   : > { %s5801_s23 = sshll.u32 %s335_s4, 7 }
  0x8f   : > { %s7865_s29 = scalar_lea.vmem [#allocation8], %s5801_s23 }
  0x90   : > { %7486 = dma.done.wait (%p7767_p3), %s334_s7, 4096  }
  0x91   : > { %7488 = vsyncadd (%p7767_p3), %s334_s7, 4294963200  ;;  %s5803_s30 = sshll.u32 %s335_s4, 1  ;;  %s7871_s2 = scalar_lea.vmem [#allocation10], %s5801_s23 }
  0x92   : > { %s352_s10 = scalar_lea.sflag [#allocation12], %s335_s4  ;;  %s7873_s8 = scalar_lea.vmem [#allocation11], %s5803_s30 }
  0x93   : > { %7490 = dma.done.wait (%p7767_p3), %s352_s10, 32  }
  0x94   : > { %7492 = vsyncadd (%p7767_p3), %s352_s10, 4294967264  ;;  %s7879_s21 = scalar_lea.vmem [#allocation13], %s5800_s18  ;;  %s11382_s11 = sld [smem:[#allocation20_spill]] }
  0x9a   : > { %p5805_p6 = scmp.ne.s32.totalorder %s11382_s11, 0 }
  0x9c   : > { %406 = sbr.rel (%p5805_p6) target bundleno = 258 (0x102), region = 56 }
  0xa1   : > { %vm407_vm0 = vcmask 7168   ;;  %vm536_vm1 = vcmask 523264   ;;  %v7556_v0 = vmov -1e+30   ;;  %v7557_v1 = vmov 0.0  }
  0xa2   : > { %408 = vst.msk [vmem:[#allocation2] sm:$0xff] %vm407_vm0, %v7556_v0  ;;  %409 = vst.msk [vmem:[#allocation2 + $0x8] sm:$0xff] %vm407_vm0, %v7556_v0 }
  0xa3   : > { %410 = vst.msk [vmem:[#allocation2 + $0x10] sm:$0xff] %vm407_vm0, %v7556_v0  ;;  %411 = vst.msk [vmem:[#allocation2 + $0x18] sm:$0xff] %vm407_vm0, %v7556_v0 }
  0xa4   : > { %412 = vst.msk [vmem:[#allocation2 + $0x20] sm:$0xff] %vm407_vm0, %v7556_v0  ;;  %413 = vst.msk [vmem:[#allocation2 + $0x28] sm:$0xff] %vm407_vm0, %v7556_v0 }
  0xa5   : > { %414 = vst.msk [vmem:[#allocation2 + $0x30] sm:$0xff] %vm407_vm0, %v7556_v0  ;;  %415 = vst.msk [vmem:[#allocation2 + $0x38] sm:$0xff] %vm407_vm0, %v7556_v0 }
  0xa6   : > { %416 = vst.msk [vmem:[#allocation2 + $0x40] sm:$0xff] %vm407_vm0, %v7556_v0  ;;  %417 = vst.msk [vmem:[#allocation2 + $0x48] sm:$0xff] %vm407_vm0, %v7556_v0 }
  0xa7   : > { %418 = vst.msk [vmem:[#allocation2 + $0x50] sm:$0xff] %vm407_vm0, %v7556_v0  ;;  %419 = vst.msk [vmem:[#allocation2 + $0x58] sm:$0xff] %vm407_vm0, %v7556_v0 }
  0xa8   : > { %420 = vst.msk [vmem:[#allocation2 + $0x60] sm:$0xff] %vm407_vm0, %v7556_v0  ;;  %421 = vst.msk [vmem:[#allocation2 + $0x68] sm:$0xff] %vm407_vm0, %v7556_v0 }
  0xa9   : > { %422 = vst.msk [vmem:[#allocation2 + $0x70] sm:$0xff] %vm407_vm0, %v7556_v0  ;;  %423 = vst.msk [vmem:[#allocation2 + $0x78] sm:$0xff] %vm407_vm0, %v7556_v0 }
  0xaa   : > { %424 = vst.msk [vmem:[#allocation2 + $0x80] sm:$0xff] %vm407_vm0, %v7556_v0  ;;  %425 = vst.msk [vmem:[#allocation2 + $0x88] sm:$0xff] %vm407_vm0, %v7556_v0 }
  0xab   : > { %426 = vst.msk [vmem:[#allocation2 + $0x90] sm:$0xff] %vm407_vm0, %v7556_v0  ;;  %427 = vst.msk [vmem:[#allocation2 + $0x98] sm:$0xff] %vm407_vm0, %v7556_v0 }
  0xac   : > { %428 = vst.msk [vmem:[#allocation2 + $0xa0] sm:$0xff] %vm407_vm0, %v7556_v0  ;;  %429 = vst.msk [vmem:[#allocation2 + $0xa8] sm:$0xff] %vm407_vm0, %v7556_v0 }
  0xad   : > { %430 = vst.msk [vmem:[#allocation2 + $0xb0] sm:$0xff] %vm407_vm0, %v7556_v0  ;;  %431 = vst.msk [vmem:[#allocation2 + $0xb8] sm:$0xff] %vm407_vm0, %v7556_v0 }
  0xae   : > { %432 = vst.msk [vmem:[#allocation2 + $0xc0] sm:$0xff] %vm407_vm0, %v7556_v0  ;;  %433 = vst.msk [vmem:[#allocation2 + $0xc8] sm:$0xff] %vm407_vm0, %v7556_v0 }
  0xaf   : > { %434 = vst.msk [vmem:[#allocation2 + $0xd0] sm:$0xff] %vm407_vm0, %v7556_v0  ;;  %435 = vst.msk [vmem:[#allocation2 + $0xd8] sm:$0xff] %vm407_vm0, %v7556_v0 }
  0xb0   : > { %436 = vst.msk [vmem:[#allocation2 + $0xe0] sm:$0xff] %vm407_vm0, %v7556_v0  ;;  %437 = vst.msk [vmem:[#allocation2 + $0xe8] sm:$0xff] %vm407_vm0, %v7556_v0 }
  0xb1   : > { %438 = vst.msk [vmem:[#allocation2 + $0xf0] sm:$0xff] %vm407_vm0, %v7556_v0  ;;  %439 = vst.msk [vmem:[#allocation2 + $0xf8] sm:$0xff] %vm407_vm0, %v7556_v0 }
  0xb2   : > { %440 = vst.msk [vmem:[#allocation2 + $0x100] sm:$0xff] %vm407_vm0, %v7556_v0  ;;  %441 = vst.msk [vmem:[#allocation2 + $0x108] sm:$0xff] %vm407_vm0, %v7556_v0 }
  0xb3   : > { %442 = vst.msk [vmem:[#allocation2 + $0x110] sm:$0xff] %vm407_vm0, %v7556_v0  ;;  %443 = vst.msk [vmem:[#allocation2 + $0x118] sm:$0xff] %vm407_vm0, %v7556_v0 }
  0xb4   : > { %444 = vst.msk [vmem:[#allocation2 + $0x120] sm:$0xff] %vm407_vm0, %v7556_v0  ;;  %445 = vst.msk [vmem:[#allocation2 + $0x128] sm:$0xff] %vm407_vm0, %v7556_v0 }
  0xb5   : > { %446 = vst.msk [vmem:[#allocation2 + $0x130] sm:$0xff] %vm407_vm0, %v7556_v0  ;;  %447 = vst.msk [vmem:[#allocation2 + $0x138] sm:$0xff] %vm407_vm0, %v7556_v0 }
  0xb6   : > { %448 = vst.msk [vmem:[#allocation2 + $0x140] sm:$0xff] %vm407_vm0, %v7556_v0  ;;  %449 = vst.msk [vmem:[#allocation2 + $0x148] sm:$0xff] %vm407_vm0, %v7556_v0 }
  0xb7   : > { %450 = vst.msk [vmem:[#allocation2 + $0x150] sm:$0xff] %vm407_vm0, %v7556_v0  ;;  %451 = vst.msk [vmem:[#allocation2 + $0x158] sm:$0xff] %vm407_vm0, %v7556_v0 }
  0xb8   : > { %452 = vst.msk [vmem:[#allocation2 + $0x160] sm:$0xff] %vm407_vm0, %v7556_v0  ;;  %453 = vst.msk [vmem:[#allocation2 + $0x168] sm:$0xff] %vm407_vm0, %v7556_v0 }
  0xb9   : > { %454 = vst.msk [vmem:[#allocation2 + $0x170] sm:$0xff] %vm407_vm0, %v7556_v0  ;;  %455 = vst.msk [vmem:[#allocation2 + $0x178] sm:$0xff] %vm407_vm0, %v7556_v0 }
  0xba   : > { %456 = vst.msk [vmem:[#allocation2 + $0x180] sm:$0xff] %vm407_vm0, %v7556_v0  ;;  %457 = vst.msk [vmem:[#allocation2 + $0x188] sm:$0xff] %vm407_vm0, %v7556_v0 }
  0xbb   : > { %458 = vst.msk [vmem:[#allocation2 + $0x190] sm:$0xff] %vm407_vm0, %v7556_v0  ;;  %459 = vst.msk [vmem:[#allocation2 + $0x198] sm:$0xff] %vm407_vm0, %v7556_v0 }
  0xbc   : > { %460 = vst.msk [vmem:[#allocation2 + $0x1a0] sm:$0xff] %vm407_vm0, %v7556_v0  ;;  %461 = vst.msk [vmem:[#allocation2 + $0x1a8] sm:$0xff] %vm407_vm0, %v7556_v0 }
  0xbd   : > { %462 = vst.msk [vmem:[#allocation2 + $0x1b0] sm:$0xff] %vm407_vm0, %v7556_v0  ;;  %463 = vst.msk [vmem:[#allocation2 + $0x1b8] sm:$0xff] %vm407_vm0, %v7556_v0 }
  0xbe   : > { %464 = vst.msk [vmem:[#allocation2 + $0x1c0] sm:$0xff] %vm407_vm0, %v7556_v0  ;;  %465 = vst.msk [vmem:[#allocation2 + $0x1c8] sm:$0xff] %vm407_vm0, %v7556_v0 }
  0xbf   : > { %466 = vst.msk [vmem:[#allocation2 + $0x1d0] sm:$0xff] %vm407_vm0, %v7556_v0  ;;  %467 = vst.msk [vmem:[#allocation2 + $0x1d8] sm:$0xff] %vm407_vm0, %v7556_v0 }
  0xc0   : > { %468 = vst.msk [vmem:[#allocation2 + $0x1e0] sm:$0xff] %vm407_vm0, %v7556_v0  ;;  %469 = vst.msk [vmem:[#allocation2 + $0x1e8] sm:$0xff] %vm407_vm0, %v7556_v0 }
  0xc1   : > { %470 = vst.msk [vmem:[#allocation2 + $0x1f0] sm:$0xff] %vm407_vm0, %v7556_v0  ;;  %471 = vst.msk [vmem:[#allocation2 + $0x1f8] sm:$0xff] %vm407_vm0, %v7556_v0 }
  0xc2   : > { %472 = vst.msk [vmem:[#allocation3] sm:$0xff] %vm407_vm0, %v7557_v1  ;;  %473 = vst.msk [vmem:[#allocation3 + $0x8] sm:$0xff] %vm407_vm0, %v7557_v1 }
  0xc3   : > { %474 = vst.msk [vmem:[#allocation3 + $0x10] sm:$0xff] %vm407_vm0, %v7557_v1  ;;  %475 = vst.msk [vmem:[#allocation3 + $0x18] sm:$0xff] %vm407_vm0, %v7557_v1 }
  0xc4   : > { %476 = vst.msk [vmem:[#allocation3 + $0x20] sm:$0xff] %vm407_vm0, %v7557_v1  ;;  %477 = vst.msk [vmem:[#allocation3 + $0x28] sm:$0xff] %vm407_vm0, %v7557_v1 }
  0xc5   : > { %478 = vst.msk [vmem:[#allocation3 + $0x30] sm:$0xff] %vm407_vm0, %v7557_v1  ;;  %479 = vst.msk [vmem:[#allocation3 + $0x38] sm:$0xff] %vm407_vm0, %v7557_v1 }
  0xc6   : > { %480 = vst.msk [vmem:[#allocation3 + $0x40] sm:$0xff] %vm407_vm0, %v7557_v1  ;;  %481 = vst.msk [vmem:[#allocation3 + $0x48] sm:$0xff] %vm407_vm0, %v7557_v1 }
  0xc7   : > { %482 = vst.msk [vmem:[#allocation3 + $0x50] sm:$0xff] %vm407_vm0, %v7557_v1  ;;  %483 = vst.msk [vmem:[#allocation3 + $0x58] sm:$0xff] %vm407_vm0, %v7557_v1 }
  0xc8   : > { %484 = vst.msk [vmem:[#allocation3 + $0x60] sm:$0xff] %vm407_vm0, %v7557_v1  ;;  %485 = vst.msk [vmem:[#allocation3 + $0x68] sm:$0xff] %vm407_vm0, %v7557_v1 }
  0xc9   : > { %486 = vst.msk [vmem:[#allocation3 + $0x70] sm:$0xff] %vm407_vm0, %v7557_v1  ;;  %487 = vst.msk [vmem:[#allocation3 + $0x78] sm:$0xff] %vm407_vm0, %v7557_v1 }
  0xca   : > { %488 = vst.msk [vmem:[#allocation3 + $0x80] sm:$0xff] %vm407_vm0, %v7557_v1  ;;  %489 = vst.msk [vmem:[#allocation3 + $0x88] sm:$0xff] %vm407_vm0, %v7557_v1 }
  0xcb   : > { %490 = vst.msk [vmem:[#allocation3 + $0x90] sm:$0xff] %vm407_vm0, %v7557_v1  ;;  %491 = vst.msk [vmem:[#allocation3 + $0x98] sm:$0xff] %vm407_vm0, %v7557_v1 }
  0xcc   : > { %492 = vst.msk [vmem:[#allocation3 + $0xa0] sm:$0xff] %vm407_vm0, %v7557_v1  ;;  %493 = vst.msk [vmem:[#allocation3 + $0xa8] sm:$0xff] %vm407_vm0, %v7557_v1 }
  0xcd   : > { %494 = vst.msk [vmem:[#allocation3 + $0xb0] sm:$0xff] %vm407_vm0, %v7557_v1  ;;  %495 = vst.msk [vmem:[#allocation3 + $0xb8] sm:$0xff] %vm407_vm0, %v7557_v1 }
  0xce   : > { %496 = vst.msk [vmem:[#allocation3 + $0xc0] sm:$0xff] %vm407_vm0, %v7557_v1  ;;  %497 = vst.msk [vmem:[#allocation3 + $0xc8] sm:$0xff] %vm407_vm0, %v7557_v1 }
  0xcf   : > { %498 = vst.msk [vmem:[#allocation3 + $0xd0] sm:$0xff] %vm407_vm0, %v7557_v1  ;;  %499 = vst.msk [vmem:[#allocation3 + $0xd8] sm:$0xff] %vm407_vm0, %v7557_v1 }
  0xd0   : > { %500 = vst.msk [vmem:[#allocation3 + $0xe0] sm:$0xff] %vm407_vm0, %v7557_v1  ;;  %501 = vst.msk [vmem:[#allocation3 + $0xe8] sm:$0xff] %vm407_vm0, %v7557_v1 }
  0xd1   : > { %502 = vst.msk [vmem:[#allocation3 + $0xf0] sm:$0xff] %vm407_vm0, %v7557_v1  ;;  %503 = vst.msk [vmem:[#allocation3 + $0xf8] sm:$0xff] %vm407_vm0, %v7557_v1 }
  0xd2   : > { %504 = vst.msk [vmem:[#allocation3 + $0x100] sm:$0xff] %vm407_vm0, %v7557_v1  ;;  %505 = vst.msk [vmem:[#allocation3 + $0x108] sm:$0xff] %vm407_vm0, %v7557_v1 }
  0xd3   : > { %506 = vst.msk [vmem:[#allocation3 + $0x110] sm:$0xff] %vm407_vm0, %v7557_v1  ;;  %507 = vst.msk [vmem:[#allocation3 + $0x118] sm:$0xff] %vm407_vm0, %v7557_v1 }
  0xd4   : > { %508 = vst.msk [vmem:[#allocation3 + $0x120] sm:$0xff] %vm407_vm0, %v7557_v1  ;;  %509 = vst.msk [vmem:[#allocation3 + $0x128] sm:$0xff] %vm407_vm0, %v7557_v1 }
  0xd5   : > { %510 = vst.msk [vmem:[#allocation3 + $0x130] sm:$0xff] %vm407_vm0, %v7557_v1  ;;  %511 = vst.msk [vmem:[#allocation3 + $0x138] sm:$0xff] %vm407_vm0, %v7557_v1 }
  0xd6   : > { %512 = vst.msk [vmem:[#allocation3 + $0x140] sm:$0xff] %vm407_vm0, %v7557_v1  ;;  %513 = vst.msk [vmem:[#allocation3 + $0x148] sm:$0xff] %vm407_vm0, %v7557_v1 }
  0xd7   : > { %514 = vst.msk [vmem:[#allocation3 + $0x150] sm:$0xff] %vm407_vm0, %v7557_v1  ;;  %515 = vst.msk [vmem:[#allocation3 + $0x158] sm:$0xff] %vm407_vm0, %v7557_v1 }
  0xd8   : > { %516 = vst.msk [vmem:[#allocation3 + $0x160] sm:$0xff] %vm407_vm0, %v7557_v1  ;;  %517 = vst.msk [vmem:[#allocation3 + $0x168] sm:$0xff] %vm407_vm0, %v7557_v1 }
  0xd9   : > { %518 = vst.msk [vmem:[#allocation3 + $0x170] sm:$0xff] %vm407_vm0, %v7557_v1  ;;  %519 = vst.msk [vmem:[#allocation3 + $0x178] sm:$0xff] %vm407_vm0, %v7557_v1 }
  0xda   : > { %520 = vst.msk [vmem:[#allocation3 + $0x180] sm:$0xff] %vm407_vm0, %v7557_v1  ;;  %521 = vst.msk [vmem:[#allocation3 + $0x188] sm:$0xff] %vm407_vm0, %v7557_v1 }
  0xdb   : > { %522 = vst.msk [vmem:[#allocation3 + $0x190] sm:$0xff] %vm407_vm0, %v7557_v1  ;;  %523 = vst.msk [vmem:[#allocation3 + $0x198] sm:$0xff] %vm407_vm0, %v7557_v1 }
  0xdc   : > { %524 = vst.msk [vmem:[#allocation3 + $0x1a0] sm:$0xff] %vm407_vm0, %v7557_v1  ;;  %525 = vst.msk [vmem:[#allocation3 + $0x1a8] sm:$0xff] %vm407_vm0, %v7557_v1 }
  0xdd   : > { %526 = vst.msk [vmem:[#allocation3 + $0x1b0] sm:$0xff] %vm407_vm0, %v7557_v1  ;;  %527 = vst.msk [vmem:[#allocation3 + $0x1b8] sm:$0xff] %vm407_vm0, %v7557_v1 }
  0xde   : > { %528 = vst.msk [vmem:[#allocation3 + $0x1c0] sm:$0xff] %vm407_vm0, %v7557_v1  ;;  %529 = vst.msk [vmem:[#allocation3 + $0x1c8] sm:$0xff] %vm407_vm0, %v7557_v1 }
  0xdf   : > { %530 = vst.msk [vmem:[#allocation3 + $0x1d0] sm:$0xff] %vm407_vm0, %v7557_v1  ;;  %531 = vst.msk [vmem:[#allocation3 + $0x1d8] sm:$0xff] %vm407_vm0, %v7557_v1 }
  0xe0   : > { %532 = vst.msk [vmem:[#allocation3 + $0x1e0] sm:$0xff] %vm407_vm0, %v7557_v1  ;;  %533 = vst.msk [vmem:[#allocation3 + $0x1e8] sm:$0xff] %vm407_vm0, %v7557_v1 }
  0xe1   : > { %534 = vst.msk [vmem:[#allocation3 + $0x1f0] sm:$0xff] %vm407_vm0, %v7557_v1  ;;  %535 = vst.msk [vmem:[#allocation3 + $0x1f8] sm:$0xff] %vm407_vm0, %v7557_v1 }
  0xe2   : > { %537 = vst.msk [vmem:[#allocation4] sm:$0xff] %vm536_vm1, %v7557_v1  ;;  %538 = vst.msk [vmem:[#allocation4 + $0x8] sm:$0xff] %vm536_vm1, %v7557_v1 }
  0xe3   : > { %539 = vst.msk [vmem:[#allocation4 + $0x10] sm:$0xff] %vm536_vm1, %v7557_v1  ;;  %540 = vst.msk [vmem:[#allocation4 + $0x18] sm:$0xff] %vm536_vm1, %v7557_v1 }
  0xe4   : > { %541 = vst.msk [vmem:[#allocation4 + $0x20] sm:$0xff] %vm536_vm1, %v7557_v1  ;;  %542 = vst.msk [vmem:[#allocation4 + $0x28] sm:$0xff] %vm536_vm1, %v7557_v1 }
  0xe5   : > { %543 = vst.msk [vmem:[#allocation4 + $0x30] sm:$0xff] %vm536_vm1, %v7557_v1  ;;  %544 = vst.msk [vmem:[#allocation4 + $0x38] sm:$0xff] %vm536_vm1, %v7557_v1 }
  0xe6   : > { %545 = vst.msk [vmem:[#allocation4 + $0x40] sm:$0xff] %vm536_vm1, %v7557_v1  ;;  %546 = vst.msk [vmem:[#allocation4 + $0x48] sm:$0xff] %vm536_vm1, %v7557_v1 }
  0xe7   : > { %547 = vst.msk [vmem:[#allocation4 + $0x50] sm:$0xff] %vm536_vm1, %v7557_v1  ;;  %548 = vst.msk [vmem:[#allocation4 + $0x58] sm:$0xff] %vm536_vm1, %v7557_v1 }
  0xe8   : > { %549 = vst.msk [vmem:[#allocation4 + $0x60] sm:$0xff] %vm536_vm1, %v7557_v1  ;;  %550 = vst.msk [vmem:[#allocation4 + $0x68] sm:$0xff] %vm536_vm1, %v7557_v1 }
  0xe9   : > { %551 = vst.msk [vmem:[#allocation4 + $0x70] sm:$0xff] %vm536_vm1, %v7557_v1  ;;  %552 = vst.msk [vmem:[#allocation4 + $0x78] sm:$0xff] %vm536_vm1, %v7557_v1 }
  0xea   : > { %553 = vst.msk [vmem:[#allocation4 + $0x80] sm:$0xff] %vm536_vm1, %v7557_v1  ;;  %554 = vst.msk [vmem:[#allocation4 + $0x88] sm:$0xff] %vm536_vm1, %v7557_v1 }
  0xeb   : > { %555 = vst.msk [vmem:[#allocation4 + $0x90] sm:$0xff] %vm536_vm1, %v7557_v1  ;;  %556 = vst.msk [vmem:[#allocation4 + $0x98] sm:$0xff] %vm536_vm1, %v7557_v1 }
  0xec   : > { %557 = vst.msk [vmem:[#allocation4 + $0xa0] sm:$0xff] %vm536_vm1, %v7557_v1  ;;  %558 = vst.msk [vmem:[#allocation4 + $0xa8] sm:$0xff] %vm536_vm1, %v7557_v1 }
  0xed   : > { %559 = vst.msk [vmem:[#allocation4 + $0xb0] sm:$0xff] %vm536_vm1, %v7557_v1  ;;  %560 = vst.msk [vmem:[#allocation4 + $0xb8] sm:$0xff] %vm536_vm1, %v7557_v1 }
  0xee   : > { %561 = vst.msk [vmem:[#allocation4 + $0xc0] sm:$0xff] %vm536_vm1, %v7557_v1  ;;  %562 = vst.msk [vmem:[#allocation4 + $0xc8] sm:$0xff] %vm536_vm1, %v7557_v1 }
  0xef   : > { %563 = vst.msk [vmem:[#allocation4 + $0xd0] sm:$0xff] %vm536_vm1, %v7557_v1  ;;  %564 = vst.msk [vmem:[#allocation4 + $0xd8] sm:$0xff] %vm536_vm1, %v7557_v1 }
  0xf0   : > { %565 = vst.msk [vmem:[#allocation4 + $0xe0] sm:$0xff] %vm536_vm1, %v7557_v1  ;;  %566 = vst.msk [vmem:[#allocation4 + $0xe8] sm:$0xff] %vm536_vm1, %v7557_v1 }
  0xf1   : > { %567 = vst.msk [vmem:[#allocation4 + $0xf0] sm:$0xff] %vm536_vm1, %v7557_v1  ;;  %568 = vst.msk [vmem:[#allocation4 + $0xf8] sm:$0xff] %vm536_vm1, %v7557_v1 }
  0xf2   : > { %569 = vst.msk [vmem:[#allocation4 + $0x100] sm:$0xff] %vm536_vm1, %v7557_v1  ;;  %570 = vst.msk [vmem:[#allocation4 + $0x108] sm:$0xff] %vm536_vm1, %v7557_v1 }
  0xf3   : > { %571 = vst.msk [vmem:[#allocation4 + $0x110] sm:$0xff] %vm536_vm1, %v7557_v1  ;;  %572 = vst.msk [vmem:[#allocation4 + $0x118] sm:$0xff] %vm536_vm1, %v7557_v1 }
  0xf4   : > { %573 = vst.msk [vmem:[#allocation4 + $0x120] sm:$0xff] %vm536_vm1, %v7557_v1  ;;  %574 = vst.msk [vmem:[#allocation4 + $0x128] sm:$0xff] %vm536_vm1, %v7557_v1 }
  0xf5   : > { %575 = vst.msk [vmem:[#allocation4 + $0x130] sm:$0xff] %vm536_vm1, %v7557_v1  ;;  %576 = vst.msk [vmem:[#allocation4 + $0x138] sm:$0xff] %vm536_vm1, %v7557_v1 }
  0xf6   : > { %577 = vst.msk [vmem:[#allocation4 + $0x140] sm:$0xff] %vm536_vm1, %v7557_v1  ;;  %578 = vst.msk [vmem:[#allocation4 + $0x148] sm:$0xff] %vm536_vm1, %v7557_v1 }
  0xf7   : > { %579 = vst.msk [vmem:[#allocation4 + $0x150] sm:$0xff] %vm536_vm1, %v7557_v1  ;;  %580 = vst.msk [vmem:[#allocation4 + $0x158] sm:$0xff] %vm536_vm1, %v7557_v1 }
  0xf8   : > { %581 = vst.msk [vmem:[#allocation4 + $0x160] sm:$0xff] %vm536_vm1, %v7557_v1  ;;  %582 = vst.msk [vmem:[#allocation4 + $0x168] sm:$0xff] %vm536_vm1, %v7557_v1 }
  0xf9   : > { %583 = vst.msk [vmem:[#allocation4 + $0x170] sm:$0xff] %vm536_vm1, %v7557_v1  ;;  %584 = vst.msk [vmem:[#allocation4 + $0x178] sm:$0xff] %vm536_vm1, %v7557_v1 }
  0xfa   : > { %585 = vst.msk [vmem:[#allocation4 + $0x180] sm:$0xff] %vm536_vm1, %v7557_v1  ;;  %586 = vst.msk [vmem:[#allocation4 + $0x188] sm:$0xff] %vm536_vm1, %v7557_v1 }
  0xfb   : > { %587 = vst.msk [vmem:[#allocation4 + $0x190] sm:$0xff] %vm536_vm1, %v7557_v1  ;;  %588 = vst.msk [vmem:[#allocation4 + $0x198] sm:$0xff] %vm536_vm1, %v7557_v1 }
  0xfc   : > { %589 = vst.msk [vmem:[#allocation4 + $0x1a0] sm:$0xff] %vm536_vm1, %v7557_v1  ;;  %590 = vst.msk [vmem:[#allocation4 + $0x1a8] sm:$0xff] %vm536_vm1, %v7557_v1 }
  0xfd   : > { %591 = vst.msk [vmem:[#allocation4 + $0x1b0] sm:$0xff] %vm536_vm1, %v7557_v1  ;;  %592 = vst.msk [vmem:[#allocation4 + $0x1b8] sm:$0xff] %vm536_vm1, %v7557_v1 }
  0xfe   : > { %593 = vst.msk [vmem:[#allocation4 + $0x1c0] sm:$0xff] %vm536_vm1, %v7557_v1  ;;  %594 = vst.msk [vmem:[#allocation4 + $0x1c8] sm:$0xff] %vm536_vm1, %v7557_v1 }
  0xff   : > { %595 = vst.msk [vmem:[#allocation4 + $0x1d0] sm:$0xff] %vm536_vm1, %v7557_v1  ;;  %596 = vst.msk [vmem:[#allocation4 + $0x1d8] sm:$0xff] %vm536_vm1, %v7557_v1 }
 0x100   : > { %597 = vst.msk [vmem:[#allocation4 + $0x1e0] sm:$0xff] %vm536_vm1, %v7557_v1  ;;  %598 = vst.msk [vmem:[#allocation4 + $0x1e8] sm:$0xff] %vm536_vm1, %v7557_v1 }
 0x101   : > { %599 = vst.msk [vmem:[#allocation4 + $0x1f0] sm:$0xff] %vm536_vm1, %v7557_v1  ;;  %600 = vst.msk [vmem:[#allocation4 + $0x1f8] sm:$0xff] %vm536_vm1, %v7557_v1 }
 0x102 PF: > { %v6599_v2 = vld [vmem:[%s7865_s29 + $0x78] sm:$0xff]   ;;  %vm869_vm2 = vcmask 523264   ;;  %v6601_v4 = vld [vmem:[%s7865_s29 + $0x70] sm:$0xff]   ;;  %v6603_v8 = vld [vmem:[%s7865_s29 + $0x68] sm:$0xff]   ;;  %v699_v42 = vlaneseq  ;;  %vm1959_vm3 = vcmask 7168   ;;  %s7559_s22 = smov 64  }
 0x103   : > { %v6600_v3 = vld [vmem:[%s7865_s29 + $0x38] sm:$0xff]   ;;  %6436 = vmatprep.subr.msk.bf16.mxu0 %vm869_vm2, %v6599_v2  ;;  %v6602_v6 = vld [vmem:[%s7865_s29 + $0x30] sm:$0xff]   ;;  %v6604_v9 = vld [vmem:[%s7865_s29 + $0x28] sm:$0xff]   ;;  %s11857_s14 = sld [smem:[#allocation20_spill]] }
 0x104   : > { %v940_v5 = vsel %vm869_vm2, %v6600_v3, 0  ;;  %v937_v7 = vsel %vm869_vm2, %v6602_v6, 0  ;;  %v6615_v10 = vld [vmem:[%s7857_s3] sm:$0xff]   ;;  %v934_v11 = vsel %vm869_vm2, %v6604_v9, 0  ;;  %v6608_v14 = vld [vmem:[%s7865_s29 + $0x18] sm:$0xff]   ;;  %v6610_v18 = vld [vmem:[%s7865_s29 + $0x10] sm:$0xff]  }
 0x105   : > { %6101 = vmatpush3.bf16.xpose.msra.mxu0 %v940_v5  ;;  %v6605_v12 = vld [vmem:[%s7865_s29 + $0x60] sm:$0xff]   ;;  %6116 = vmatprep.mubr.msk.bf16.mxu0 %vm869_vm2, %v6615_v10  ;;  %v6607_v16 = vld [vmem:[%s7865_s29 + $0x58] sm:$0xff]   ;;  %v928_v17 = vsel %vm869_vm2, %v6608_v14, 0  ;;  %v6609_v19 = vld [vmem:[%s7865_s29 + $0x50] sm:$0xff]   ;;  %v925_v20 = vsel %vm869_vm2, %v6610_v18, 0  ;;  %v700_v43 = vshrl.u32 %v699_v42, 7 }
 0x106   : > { %6437 = vmatprep.subr.msk.bf16.mxu0 %vm869_vm2, %v6601_v4  ;;  %v6606_v13 = vld [vmem:[%s7865_s29 + $0x20] sm:$0xff]   ;;  %v6612_v21 = vld [vmem:[%s7865_s29 + $0x8] sm:$0xff]   ;;  %v6617_v28 = vld [vmem:[%s7857_s3 + $0x10] sm:$0xff]  }
 0x107   : > { %v931_v15 = vsel %vm869_vm2, %v6606_v13, 0  ;;  %v6611_v22 = vld [vmem:[%s7865_s29 + $0x48] sm:$0xff]   ;;  %v922_v23 = vsel %vm869_vm2, %v6612_v21, 0  ;;  %v6614_v24 = vld [vmem:[%s7865_s29] sm:$0xff]   ;;  %v6618_v29 = vld [vmem:[%s7857_s3 + $0x18] sm:$0xff]   ;;  %v701_v44 = vsub.s32 0, %v700_v43 }
 0x108   : > { %v6613_v25 = vld [vmem:[%s7865_s29 + $0x40] sm:$0xff]   ;;  %v919_v26 = vsel %vm869_vm2, %v6614_v24, 0  ;;  %v6616_v27 = vld [vmem:[%s7857_s3 + $0x8] sm:$0xff]   ;;  %v6621_v32 = vld [vmem:[%s7857_s3 + $0x30] sm:$0xff]   ;;  %v705_v45 = vsub.s32 1, %v700_v43 }
 0x109   : > { %v6619_v30 = vld [vmem:[%s7857_s3 + $0x20] sm:$0xff]   ;;  %v6620_v31 = vld [vmem:[%s7857_s3 + $0x28] sm:$0xff]   ;;  %v6622_v33 = vld [vmem:[%s7857_s3 + $0x38] sm:$0xff]   ;;  %p5934_p9 = scmp.ne.s32.totalorder %s11857_s14, 1 }
 0x10a   : > { %v6623_v34 = vld [vmem:[%s7857_s3 + $0x40] sm:$0xff]   ;;  %v6624_v35 = vld [vmem:[%s7857_s3 + $0x48] sm:$0xff]   ;;  %v6625_v36 = vld [vmem:[%s7857_s3 + $0x50] sm:$0xff]   ;;  %s7561_s9 = smov (!%p5934_p9), 64  }
 0x10b   : > { %v6626_v37 = vld [vmem:[%s7857_s3 + $0x58] sm:$0xff]   ;;  %v6627_v38 = vld [vmem:[%s7857_s3 + $0x60] sm:$0xff]   ;;  %v6628_v39 = vld [vmem:[%s7857_s3 + $0x68] sm:$0xff]  }
 0x10c   : > { %v6629_v40 = vld [vmem:[%s7857_s3 + $0x70] sm:$0xff]   ;;  %v6630_v41 = vld [vmem:[%s7857_s3 + $0x78] sm:$0xff]   ;;  %v601_v46 = vld [vmem:[%s7873_s8] sm:$0x3] }
 0x10d   : > { %6103 = vmatpush3.bf16.xpose.msra.mxu0 %v937_v7  ;;  %v8347_v47 = vrot.slane %v601_v46, %v701_v44  ;;  %v8349_v48 = vrot.slane %v601_v46, %v705_v45 }
 0x10e   : > { %6438 = vmatprep.subr.msk.bf16.mxu0 %vm869_vm2, %v6603_v8 }
 0x10f   : > { %11383 = vst [vmem:[#allocation31_spill] sm:$0xff] %v8347_v47  ;;  %11384 = vst [vmem:[#allocation32_spill] sm:$0xff] %v8349_v48 }
 0x115   : > { %6105 = vmatpush3.bf16.xpose.msra.mxu0 %v934_v11 }
 0x116   : > { %6439 = vmatprep.subr.msk.bf16.mxu0 %vm869_vm2, %v6605_v12 }
 0x11d   : > { %6107 = vmatpush3.bf16.xpose.msra.mxu0 %v931_v15 }
 0x11e   : > { %6440 = vmatprep.subr.msk.bf16.mxu0 %vm869_vm2, %v6607_v16 }
 0x125   : > { %6109 = vmatpush3.bf16.xpose.msra.mxu0 %v928_v17 }
 0x126   : > { %6441 = vmatprep.subr.msk.bf16.mxu0 %vm869_vm2, %v6609_v19 }
 0x12d   : > { %6111 = vmatpush3.bf16.xpose.msra.mxu0 %v925_v20 }
 0x12e   : > { %6442 = vmatprep.subr.msk.bf16.mxu0 %vm869_vm2, %v6611_v22 }
 0x135   : > { %6113 = vmatpush3.bf16.xpose.msra.mxu0 %v922_v23 }
 0x136   : > { %6443 = vmatprep.subr.msk.bf16.mxu0 %vm869_vm2, %v6613_v25 }
 0x13d   : > { %6115 = vmatpush3.bf16.xpose.msra.mxu0 %v919_v26 }
 0x144   : > { %6117 = vmatmul.mubr.msk.bf16.vlgmr.msra.gmra.mxu0 %vm869_vm2, %v6615_v10  ;;  %v7558_v10 = vmov 0  }
 0x145   : > { %6118 = vmatprep.mubr.msk.bf16.mxu0 %vm869_vm2, %v6616_v27  ;;  %6597 = vset.pattern.permute.xlu0 %v7558_v10 }
 0x146   : > { %6598 = vset.pattern.permute.xlu1 %v7558_v10 }
 0x14c   : > { %6119 = vmatmul.mubr.msk.bf16.gmra.mxu0 %vm869_vm2, %v6616_v27 }
 0x14d   : > { %6120 = vmatprep.mubr.msk.bf16.mxu0 %vm869_vm2, %v6617_v28 }
 0x154   : > { %6121 = vmatmul.mubr.msk.bf16.gmra.mxu0 %vm869_vm2, %v6617_v28 }
 0x155   : > { %6122 = vmatprep.mubr.msk.bf16.mxu0 %vm869_vm2, %v6618_v29 }
 0x15c   : > { %6123 = vmatmul.mubr.msk.bf16.gmra.mxu0 %vm869_vm2, %v6618_v29 }
 0x15d   : > { %6124 = vmatprep.mubr.msk.bf16.mxu0 %vm869_vm2, %v6619_v30 }
 0x164   : > { %6125 = vmatmul.mubr.msk.bf16.gmra.mxu0 %vm869_vm2, %v6619_v30 }
 0x165   : > { %6126 = vmatprep.mubr.msk.bf16.mxu0 %vm869_vm2, %v6620_v31 }
 0x16c   : > { %6127 = vmatmul.mubr.msk.bf16.gmra.mxu0 %vm869_vm2, %v6620_v31 }
 0x16d   : > { %6128 = vmatprep.mubr.msk.bf16.mxu0 %vm869_vm2, %v6621_v32 }
 0x174   : > { %6129 = vmatmul.mubr.msk.bf16.gmra.mxu0 %vm869_vm2, %v6621_v32 }
 0x175   : > { %6130 = vmatprep.mubr.msk.bf16.mxu0 %vm869_vm2, %v6622_v33 }
 0x17c   : > { %6131 = vmatmul.mubr.msk.bf16.gmra.mxu0 %vm869_vm2, %v6622_v33 }
 0x17d   : > { %6132 = vmatprep.mubr.msk.bf16.mxu0 %vm869_vm2, %v6623_v34 }
 0x184   : > { %6133 = vmatmul.mubr.msk.bf16.gmra.mxu0 %vm869_vm2, %v6623_v34 }
 0x185   : > { %6134 = vmatprep.mubr.msk.bf16.mxu0 %vm869_vm2, %v6624_v35 }
 0x18c   : > { %6135 = vmatmul.mubr.msk.bf16.gmra.mxu0 %vm869_vm2, %v6624_v35 }
 0x18d   : > { %6136 = vmatprep.mubr.msk.bf16.mxu0 %vm869_vm2, %v6625_v36 }
 0x194   : > { %6137 = vmatmul.mubr.msk.bf16.gmra.mxu0 %vm869_vm2, %v6625_v36 }
 0x195   : > { %6138 = vmatprep.mubr.msk.bf16.mxu0 %vm869_vm2, %v6626_v37 }
 0x19c   : > { %6139 = vmatmul.mubr.msk.bf16.gmra.mxu0 %vm869_vm2, %v6626_v37 }
 0x19d   : > { %6140 = vmatprep.mubr.msk.bf16.mxu0 %vm869_vm2, %v6627_v38 }
 0x1a4   : > { %6141 = vmatmul.mubr.msk.bf16.gmra.mxu0 %vm869_vm2, %v6627_v38 }
 0x1a5   : > { %6142 = vmatprep.mubr.msk.bf16.mxu0 %vm869_vm2, %v6628_v39 }
 0x1ac   : > { %6143 = vmatmul.mubr.msk.bf16.gmra.mxu0 %vm869_vm2, %v6628_v39 }
 0x1ad   : > { %6144 = vmatprep.mubr.msk.bf16.mxu0 %vm869_vm2, %v6629_v40 }
 0x1b4   : > { %6145 = vmatmul.mubr.msk.bf16.gmra.mxu0 %vm869_vm2, %v6629_v40 }
 0x1b5   : > { %6146 = vmatprep.mubr.msk.bf16.mxu0 %vm869_vm2, %v6630_v41 }
 0x1bc   : > { %6147 = vmatmul.mubr.msk.bf16.gmra.mxu0 %vm869_vm2, %v6630_v41 }
 0x204   : > { %v1000_v49 = vpop.f32.mrf.mxu0 }
 0x205   : > { %v8352_v51 = vadd.f32 %v1000_v49, %v8347_v47 }
 0x206   : > { %v1002_v50 = vpop.f32.mrf.mxu0 }
 0x207   : > { %v8355_v52 = vadd.f32 %v1002_v50, %v8349_v48 }
 0x208   : > { %v1004_v53 = vpop.f32.mrf.mxu0 }
 0x209   : > { %v1191_v54 = vmax.f32 %v8352_v51, %v8355_v52  ;;  %v8360_v56 = vadd.f32 %v1004_v53, %v8347_v47 }
 0x20a   : > { %v1006_v55 = vpop.f32.mrf.mxu0 }
 0x20b   : > { %v8363_v57 = vadd.f32 %v1006_v55, %v8349_v48  ;;  %1192 = vmax.xlane.f32.xlu0 %v1191_v54 }
 0x20c   : > { %v1010_v58 = vpop.f32.mrf.mxu0 }
 0x20d   : > { %v1194_v59 = vmax.f32 %v8360_v56, %v8363_v57  ;;  %v8368_v61 = vadd.f32 %v1010_v58, %v8347_v47 }
 0x20e   : > { %v1012_v60 = vpop.f32.mrf.mxu0 }
 0x20f   : > { %v8371_v62 = vadd.f32 %v1012_v60, %v8349_v48  ;;  %1195 = vmax.xlane.f32.xlu0 %v1194_v59 }
 0x210   : > { %v1014_v63 = vpop.f32.mrf.mxu0 }
 0x211   : > { %v1197_v0 = vmax.f32 %v8368_v61, %v8371_v62  ;;  %v8376_v2 = vadd.f32 %v1014_v63, %v8347_v47 }
 0x212   : > { %v1016_v1 = vpop.f32.mrf.mxu0 }
 0x213   : > { %v8379_v3 = vadd.f32 %v1016_v1, %v8349_v48  ;;  %1198 = vmax.xlane.f32.xlu1 %v1197_v0 }
 0x214   : > { %v1020_v4 = vpop.f32.mrf.mxu0 }
 0x215   : > { %v1200_v5 = vmax.f32 %v8376_v2, %v8379_v3  ;;  %v8384_v7 = vadd.f32 %v1020_v4, %v8347_v47 }
 0x216   : > { %v1022_v6 = vpop.f32.mrf.mxu0 }
 0x217   : > { %v8387_v8 = vadd.f32 %v1022_v6, %v8349_v48  ;;  %1201 = vmax.xlane.f32.xlu1 %v1200_v5 }
 0x218   : > { %v1024_v9 = vpop.f32.mrf.mxu0 }
 0x219   : > { %v1203_v11 = vmax.f32 %v8384_v7, %v8387_v8  ;;  %v8392_v13 = vadd.f32 %v1024_v9, %v8347_v47 }
 0x21a   : > { %v1026_v12 = vpop.f32.mrf.mxu0 }
 0x21b   : > { %v8395_v14 = vadd.f32 %v1026_v12, %v8349_v48  ;;  %1204 = vmax.xlane.f32.xlu0 %v1203_v11 }
 0x21c   : > { %v1030_v15 = vpop.f32.mrf.mxu0 }
 0x21d   : > { %v1206_v16 = vmax.f32 %v8392_v13, %v8395_v14  ;;  %v8400_v18 = vadd.f32 %v1030_v15, %v8347_v47 }
 0x21e   : > { %v1032_v17 = vpop.f32.mrf.mxu0 }
 0x21f   : > { %v8403_v19 = vadd.f32 %v1032_v17, %v8349_v48  ;;  %1207 = vmax.xlane.f32.xlu1 %v1206_v16 }
 0x220   : > { %v1034_v20 = vpop.f32.mrf.mxu0 }
 0x221   : > { %v1209_v21 = vmax.f32 %v8400_v18, %v8403_v19  ;;  %v8408_v23 = vadd.f32 %v1034_v20, %v8347_v47 }
 0x222   : > { %v1036_v22 = vpop.f32.mrf.mxu0 }
 0x223   : > { %v8411_v24 = vadd.f32 %v1036_v22, %v8349_v48  ;;  %1210 = vmax.xlane.f32.xlu0 %v1209_v21 }
 0x224   : > { %v1040_v25 = vpop.f32.mrf.mxu0 }
 0x225   : > { %v1212_v26 = vmax.f32 %v8408_v23, %v8411_v24  ;;  %v8416_v28 = vadd.f32 %v1040_v25, %v8347_v47 }
 0x226   : > { %v1042_v27 = vpop.f32.mrf.mxu0 }
 0x227   : > { %v8419_v29 = vadd.f32 %v1042_v27, %v8349_v48  ;;  %1213 = vmax.xlane.f32.xlu1 %v1212_v26 }
 0x228   : > { %v1044_v30 = vpop.f32.mrf.mxu0 }
 0x229   : > { %v1215_v31 = vmax.f32 %v8416_v28, %v8419_v29  ;;  %v8424_v33 = vadd.f32 %v1044_v30, %v8347_v47 }
 0x22a   : > { %v1046_v32 = vpop.f32.mrf.mxu0 }
 0x22b   : > { %v8427_v34 = vadd.f32 %v1046_v32, %v8349_v48  ;;  %1216 = vmax.xlane.f32.xlu0 %v1215_v31 }
 0x22c   : > { %v1050_v35 = vpop.f32.mrf.mxu0 }
 0x22d   : > { %v1218_v36 = vmax.f32 %v8424_v33, %v8427_v34  ;;  %v8432_v38 = vadd.f32 %v1050_v35, %v8347_v47 }
 0x22e   : > { %v1052_v37 = vpop.f32.mrf.mxu0 }
 0x22f   : > { %v8435_v39 = vadd.f32 %v1052_v37, %v8349_v48  ;;  %1219 = vmax.xlane.f32.xlu1 %v1218_v36 }
 0x230   : > { %v1054_v40 = vpop.f32.mrf.mxu0 }
 0x231   : > { %v1221_v41 = vmax.f32 %v8432_v38, %v8435_v39  ;;  %v8440_v43 = vadd.f32 %v1054_v40, %v8347_v47 }
 0x232   : > { %v1056_v42 = vpop.f32.mrf.mxu0 }
 0x233   : > { %v8443_v44 = vadd.f32 %v1056_v42, %v8349_v48  ;;  %1222 = vmax.xlane.f32.xlu0 %v1221_v41 }
 0x234   : > { %v1060_v45 = vpop.f32.mrf.mxu0 }
 0x235   : > { %v1224_v46 = vmax.f32 %v8440_v43, %v8443_v44  ;;  %v8448_v50 = vadd.f32 %v1060_v45, %v8347_v47 }
 0x236   : > { %v1062_v49 = vpop.f32.mrf.mxu0 }
 0x237   : > { %v8451_v53 = vadd.f32 %v1062_v49, %v8349_v48  ;;  %1225 = vmax.xlane.f32.xlu1 %v1224_v46 }
 0x238   : > { %v1064_v54 = vpop.f32.mrf.mxu0 }
 0x239   : > { %v1227_v55 = vmax.f32 %v8448_v50, %v8451_v53  ;;  %v8456_v59 = vadd.f32 %v1064_v54, %v8347_v47 }
 0x23a   : > { %v1066_v58 = vpop.f32.mrf.mxu0 }
 0x23b   : > { %v8459_v60 = vadd.f32 %v1066_v58, %v8349_v48  ;;  %1228 = vmax.xlane.f32.xlu0 %v1227_v55 }
 0x23c   : > { %v1070_v63 = vpop.f32.mrf.mxu0 }
 0x23d   : > { %v1230_v0 = vmax.f32 %v8456_v59, %v8459_v60  ;;  %v8464_v4 = vadd.f32 %v1070_v63, %v8347_v47 }
 0x23e   : > { %v1072_v1 = vpop.f32.mrf.mxu0 }
 0x23f   : > { %v8467_v5 = vadd.f32 %v1072_v1, %v8349_v48  ;;  %1231 = vmax.xlane.f32.xlu1 %v1230_v0 }
 0x240   : > { %v1074_v6 = vpop.f32.mrf.mxu0 }
 0x241   : > { %11385 = vst [vmem:[#allocation33_spill] sm:$0xff] %v8467_v5  ;;  %v1233_v9 = vmax.f32 %v8464_v4, %v8467_v5  ;;  %v8472_v11 = vadd.f32 %v1074_v6, %v8347_v47 }
 0x242   : > { %v1076_v10 = vpop.f32.mrf.mxu0 }
 0x243   : > { %11386 = vst [vmem:[#allocation34_spill] sm:$0xff] %v8472_v11  ;;  %v8475_v12 = vadd.f32 %v1076_v10, %v8349_v48  ;;  %1234 = vmax.xlane.f32.xlu0 %v1233_v9 }
 0x244   : > { %v1080_v15 = vpop.f32.mrf.mxu0 }
 0x245   : > { %11387 = vst [vmem:[#allocation35_spill] sm:$0xff] %v8475_v12  ;;  %v1236_v16 = vmax.f32 %v8472_v11, %v8475_v12  ;;  %v8480_v20 = vadd.f32 %v1080_v15, %v8347_v47 }
 0x246   : > { %v1082_v17 = vpop.f32.mrf.mxu0 }
 0x247   : > { %11388 = vst [vmem:[#allocation36_spill] sm:$0xff] %v8480_v20  ;;  %v8483_v21 = vadd.f32 %v1082_v17, %v8349_v48  ;;  %1237 = vmax.xlane.f32.xlu1 %v1236_v16 }
 0x248   : > { %v1084_v22 = vpop.f32.mrf.mxu0 }
 0x249   : > { %11389 = vst [vmem:[#allocation37_spill] sm:$0xff] %v8483_v21  ;;  %v1239_v25 = vmax.f32 %v8480_v20, %v8483_v21  ;;  %v8488_v27 = vadd.f32 %v1084_v22, %v8347_v47  ;;  %v8758_v20 = vld [vmem:[#allocation2 + $0x70] sm:$0xff] }
 0x24a   : > { %v1086_v26 = vpop.f32.mrf.mxu0  ;;  %11426 = vst [vmem:[#allocation74_spill] sm:$0xff] %v8758_v20 }
 0x24b   : > { %11390 = vst [vmem:[#allocation38_spill] sm:$0xff] %v8488_v27  ;;  %v8491_v30 = vadd.f32 %v1086_v26, %v8349_v48  ;;  %1240 = vmax.xlane.f32.xlu0 %v1239_v25 }
 0x24c   : > { %v1090_v31 = vpop.f32.mrf.mxu0 }
 0x24d   : > { %11391 = vst [vmem:[#allocation39_spill] sm:$0xff] %v8491_v30  ;;  %v1242_v32 = vmax.f32 %v8488_v27, %v8491_v30  ;;  %v8496_v36 = vadd.f32 %v1090_v31, %v8347_v47  ;;  %v8748_v27 = vld [vmem:[#allocation2 + $0x68] sm:$0xff] }
 0x24e   : > { %v1092_v35 = vpop.f32.mrf.mxu0  ;;  %11424 = vst [vmem:[#allocation72_spill] sm:$0xff] %v8748_v27 }
 0x24f   : > { %11392 = vst [vmem:[#allocation40_spill] sm:$0xff] %v8496_v36  ;;  %v8499_v37 = vadd.f32 %v1092_v35, %v8349_v48  ;;  %1243 = vmax.xlane.f32.xlu1 %v1242_v32 }
 0x250   : > { %v1094_v40 = vpop.f32.mrf.mxu0 }
 0x251   : > { %11393 = vst [vmem:[#allocation41_spill] sm:$0xff] %v8499_v37  ;;  %v1245_v41 = vmax.f32 %v8496_v36, %v8499_v37  ;;  %v8504_v45 = vadd.f32 %v1094_v40, %v8347_v47  ;;  %v8738_v36 = vld [vmem:[#allocation2 + $0x60] sm:$0xff] }
 0x252   : > { %v1096_v42 = vpop.f32.mrf.mxu0 }
 0x253   : > { %11394 = vst [vmem:[#allocation42_spill] sm:$0xff] %v8504_v45  ;;  %v8507_v46 = vadd.f32 %v1096_v42, %v8349_v48  ;;  %1246 = vmax.xlane.f32.xlu0 %v1245_v41 }
 0x254   : > { %v1100_v49 = vpop.f32.mrf.mxu0 }
 0x255   : > { %11395 = vst [vmem:[#allocation43_spill] sm:$0xff] %v8507_v46  ;;  %v1248_v54 = vmax.f32 %v8504_v45, %v8507_v46  ;;  %v8512_v58 = vadd.f32 %v1100_v49, %v8347_v47  ;;  %v8728_v45 = vld [vmem:[#allocation2 + $0x58] sm:$0xff] }
 0x256   : > { %v1102_v55 = vpop.f32.mrf.mxu0  ;;  %11422 = vst [vmem:[#allocation70_spill] sm:$0xff] %v8728_v45 }
 0x257   : > { %11396 = vst [vmem:[#allocation44_spill] sm:$0xff] %v8512_v58  ;;  %v8515_v63 = vadd.f32 %v1102_v55, %v8349_v48  ;;  %1249 = vmax.xlane.f32.xlu1 %v1248_v54 }
 0x258   : > { %v1104_v0 = vpop.f32.mrf.mxu0 }
 0x259   : > { %11397 = vst [vmem:[#allocation45_spill] sm:$0xff] %v8515_v63  ;;  %v1251_v1 = vmax.f32 %v8512_v58, %v8515_v63  ;;  %v8520_v9 = vadd.f32 %v1104_v0, %v8347_v47  ;;  %v8718_v58 = vld [vmem:[#allocation2 + $0x50] sm:$0xff] }
 0x25a   : > { %v1106_v6 = vpop.f32.mrf.mxu0 }
 0x25b   : > { %11398 = vst [vmem:[#allocation46_spill] sm:$0xff] %v8520_v9  ;;  %v8523_v10 = vadd.f32 %v1106_v6, %v8349_v48  ;;  %1252 = vmax.xlane.f32.xlu0 %v1251_v1 }
 0x25c   : > { %v1110_v15 = vpop.f32.mrf.mxu0 }
 0x25d   : > { %11399 = vst [vmem:[#allocation47_spill] sm:$0xff] %v8523_v10  ;;  %v1254_v16 = vmax.f32 %v8520_v9, %v8523_v10  ;;  %v8528_v22 = vadd.f32 %v1110_v15, %v8347_v47  ;;  %v8708_v9 = vld [vmem:[#allocation2 + $0x48] sm:$0xff] }
 0x25e   : > { %v1112_v17 = vpop.f32.mrf.mxu0  ;;  %11420 = vst [vmem:[#allocation68_spill] sm:$0xff] %v8708_v9 }
 0x25f   : > { %11400 = vst [vmem:[#allocation48_spill] sm:$0xff] %v8528_v22  ;;  %v8531_v25 = vadd.f32 %v1112_v17, %v8349_v48  ;;  %1255 = vmax.xlane.f32.xlu1 %v1254_v16 }
 0x260   : > { %v1114_v26 = vpop.f32.mrf.mxu0 }
 0x261   : > { %11401 = vst [vmem:[#allocation49_spill] sm:$0xff] %v8531_v25  ;;  %v1257_v31 = vmax.f32 %v8528_v22, %v8531_v25  ;;  %v8536_v35 = vadd.f32 %v1114_v26, %v8347_v47  ;;  %v8688_v22 = vld [vmem:[#allocation2 + $0x38] sm:$0xff] }
 0x262   : > { %v1116_v32 = vpop.f32.mrf.mxu0 }
 0x263   : > { %11402 = vst [vmem:[#allocation50_spill] sm:$0xff] %v8536_v35  ;;  %v8539_v40 = vadd.f32 %v1116_v32, %v8349_v48  ;;  %1258 = vmax.xlane.f32.xlu0 %v1257_v31 }
 0x264   : > { %v1120_v41 = vpop.f32.mrf.mxu0 }
 0x265   : > { %11403 = vst [vmem:[#allocation51_spill] sm:$0xff] %v8539_v40  ;;  %v1260_v42 = vmax.f32 %v8536_v35, %v8539_v40  ;;  %v8544_v54 = vadd.f32 %v1120_v41, %v8347_v47  ;;  %v6665_v35 = vld [vmem:[%s7871_s2] sm:$0xff]  }
 0x266   : > { %v1122_v49 = vpop.f32.mrf.mxu0 }
 0x267   : > { %11404 = vst [vmem:[#allocation52_spill] sm:$0xff] %v8544_v54  ;;  %v8547_v55 = vadd.f32 %v1122_v49, %v8349_v48  ;;  %1261 = vmax.xlane.f32.xlu1 %v1260_v42 }
 0x268   : > { %v1124_v0 = vpop.f32.mrf.mxu0 }
 0x269   : > { %11405 = vst [vmem:[#allocation53_spill] sm:$0xff] %v8547_v55  ;;  %v1263_v1 = vmax.f32 %v8544_v54, %v8547_v55  ;;  %v8552_v15 = vadd.f32 %v1124_v0, %v8347_v47  ;;  %v6661_v54 = vld [vmem:[%s7871_s2 + $0x8] sm:$0xff]  }
 0x26a   : > { %v1126_v6 = vpop.f32.mrf.mxu0 }
 0x26b   : > { %11406 = vst [vmem:[#allocation54_spill] sm:$0xff] %v8552_v15  ;;  %v8555_v16 = vadd.f32 %v1126_v6, %v8349_v48  ;;  %1264 = vmax.xlane.f32.xlu0 %v1263_v1 }
 0x26c   : > { %v1130_v17 = vpop.f32.mrf.mxu0 }
 0x26d   : > { %11407 = vst [vmem:[#allocation55_spill] sm:$0xff] %v8555_v16  ;;  %v1266_v26 = vmax.f32 %v8552_v15, %v8555_v16  ;;  %v8560_v32 = vadd.f32 %v1130_v17, %v8347_v47 }
 0x26e   : > { %v1132_v31 = vpop.f32.mrf.mxu0 }
 0x26f   : > { %11408 = vst [vmem:[#allocation56_spill] sm:$0xff] %v8560_v32  ;;  %v8563_v41 = vadd.f32 %v1132_v31, %v8349_v48  ;;  %1267 = vmax.xlane.f32.xlu1 %v1266_v26 }
 0x270   : > { %v1134_v42 = vpop.f32.mrf.mxu0 }
 0x271   : > { %11409 = vst [vmem:[#allocation57_spill] sm:$0xff] %v8563_v41  ;;  %v1269_v49 = vmax.f32 %v8560_v32, %v8563_v41  ;;  %v8568_v6 = vadd.f32 %v1134_v42, %v8347_v47 }
 0x272   : > { %v1136_v0 = vpop.f32.mrf.mxu0 }
 0x273   : > { %11410 = vst [vmem:[#allocation58_spill] sm:$0xff] %v8568_v6  ;;  %v8571_v1 = vadd.f32 %v1136_v0, %v8349_v48  ;;  %1270 = vmax.xlane.f32.xlu0 %v1269_v49 }
 0x274   : > { %v1140_v16 = vpop.f32.mrf.mxu0 }
 0x275   : > { %11411 = vst [vmem:[#allocation59_spill] sm:$0xff] %v8571_v1  ;;  %v1272_v17 = vmax.f32 %v8568_v6, %v8571_v1  ;;  %v8576_v31 = vadd.f32 %v1140_v16, %v8347_v47  ;;  %v6657_v6 = vld [vmem:[%s7871_s2 + $0x10] sm:$0xff]  }
 0x276   : > { %v1142_v15 = vpop.f32.mrf.mxu0 }
 0x277   : > { %11412 = vst [vmem:[#allocation60_spill] sm:$0xff] %v8576_v31  ;;  %v8579_v26 = vadd.f32 %v1142_v15, %v8349_v48  ;;  %1273 = vmax.xlane.f32.xlu1 %v1272_v17 }
 0x278   : > { %v1144_v41 = vpop.f32.mrf.mxu0 }
 0x279   : > { %11413 = vst [vmem:[#allocation61_spill] sm:$0xff] %v8579_v26  ;;  %v1275_v42 = vmax.f32 %v8576_v31, %v8579_v26  ;;  %v8584_v0 = vadd.f32 %v1144_v41, %v8347_v47 }
 0x27a   : > { %v1146_v32 = vpop.f32.mrf.mxu0 }
 0x27b   : > { %11414 = vst [vmem:[#allocation62_spill] sm:$0xff] %v8584_v0  ;;  %v8587_v49 = vadd.f32 %v1146_v32, %v8349_v48  ;;  %1276 = vmax.xlane.f32.xlu0 %v1275_v42 }
 0x27c   : > { %v1150_v16 = vpop.f32.mrf.mxu0 }
 0x27d   : > { %11415 = vst [vmem:[#allocation63_spill] sm:$0xff] %v8587_v49  ;;  %v1278_v15 = vmax.f32 %v8584_v0, %v8587_v49  ;;  %v8592_v17 = vadd.f32 %v1150_v16, %v8347_v47 }
 0x27e   : > { %v1152_v1 = vpop.f32.mrf.mxu0 }
 0x27f   : > { %11416 = vst [vmem:[#allocation64_spill] sm:$0xff] %v8592_v17  ;;  %v8595_v26 = vadd.f32 %v1152_v1, %v8349_v48  ;;  %1279 = vmax.xlane.f32.xlu1 %v1278_v15  ;;  %v6638_v1 = vld [vmem:[%s7871_s2 + $0x78] sm:$0xff]  }
 0x280   : > { %v1154_v41 = vpop.f32.mrf.mxu0  ;;  %v6639_v15 = vld [vmem:[%s7871_s2 + $0x38] sm:$0xff]   ;;  %6148 = vmatprep.subr.bf16.mxu1 %v6638_v1 }
 0x281   : > { %11417 = vst [vmem:[#allocation65_spill] sm:$0xff] %v8595_v26  ;;  %v1281_v32 = vmax.f32 %v8592_v17, %v8595_v26  ;;  %v8600_v31 = vadd.f32 %v1154_v41, %v8347_v47  ;;  %6149 = vmatpush3.bf16.msra.mxu1 %v6639_v15  ;;  %v6641_v26 = vld [vmem:[%s7871_s2 + $0x70] sm:$0xff]   ;;  %v8611_v41 = vld [vmem:[#allocation2] sm:$0xff]  ;;  %v6652_v1 = vld [vmem:[%s7871_s2 + $0x58] sm:$0xff]  }
 0x282   : > { %v1156_v42 = vpop.f32.mrf.mxu0  ;;  %v6642_v17 = vld [vmem:[%s7871_s2 + $0x30] sm:$0xff]   ;;  %6150 = vmatprep.subr.bf16.mxu1 %v6641_v26  ;;  %v6648_v26 = vld [vmem:[%s7871_s2 + $0x60] sm:$0xff]  }
 0x283   : > { %11418 = vst [vmem:[#allocation66_spill] sm:$0xff] %v8600_v31  ;;  %v8603_v49 = vadd.f32 %v1156_v42, %v8349_v48  ;;  %1282 = vmax.xlane.f32.xlu0 %v1281_v32  ;;  %v6644_v42 = vld [vmem:[%s7871_s2 + $0x68] sm:$0xff]   ;;  %v6649_v15 = vld [vmem:[%s7871_s2 + $0x20] sm:$0xff]  }
 0x284   : > { %v6645_v48 = vld [vmem:[%s7871_s2 + $0x28] sm:$0xff]  }
 0x285   : > { %11419 = vst [vmem:[#allocation67_spill] sm:$0xff] %v8603_v49  ;;  %v1284_v16 = vmax.f32 %v8600_v31, %v8603_v49  ;;  %6151 = vmatpush3.bf16.msra.mxu1 %v6642_v17 }
 0x286   : > { %6152 = vmatprep.subr.bf16.mxu1 %v6644_v42 }
 0x287   : > { %1285 = vmax.xlane.f32.xlu1 %v1284_v16  ;;  %v8618_v16 = vld [vmem:[#allocation2 + $0x8] sm:$0xff] }
 0x289   : > { %6153 = vmatpush3.bf16.msra.mxu1 %v6645_v48  ;;  %v6656_v48 = vld [vmem:[%s7871_s2 + $0x50] sm:$0xff]  }
 0x28a   : > { %6154 = vmatprep.subr.bf16.mxu1 %v6648_v26  ;;  %v8642_v26 = vld [vmem:[#allocation2 + $0x18] sm:$0xff] }
 0x28d   : > { %6155 = vmatpush3.bf16.msra.mxu1 %v6649_v15  ;;  %v6660_v15 = vld [vmem:[%s7871_s2 + $0x48] sm:$0xff]  }
 0x28e   : > { %6156 = vmatprep.subr.bf16.mxu1 %v6652_v1  ;;  %v8654_v1 = vld [vmem:[#allocation2 + $0x20] sm:$0xff] }
 0x294   : > { %v1193_v32 = vpop.xlane.xlu0 %1192 }
 0x295   : > { %v8616_v47 = vmax.f32 %v8611_v41, %v1193_v32  ;;  %v8630_v32 = vld [vmem:[#allocation2 + $0x10] sm:$0xff] }
 0x297   : > { %2569 = vst.msk [vmem:[#allocation2] sm:$0xff] %vm1959_vm3, %v8616_v47 }
 0x298   : > { %v1196_v17 = vpop.xlane.xlu0 %1195 }
 0x299   : > { %v8627_v42 = vmax.f32 %v8618_v16, %v1196_v17  ;;  %1417 = vperm.xlu0 %6597, %v8616_v47   ;;  %v6653_v17 = vld [vmem:[%s7871_s2 + $0x18] sm:$0xff]  }
 0x29a   : > { %6157 = vmatpush3.bf16.msra.mxu1 %v6653_v17  ;;  %v6664_v17 = vld [vmem:[%s7871_s2 + $0x40] sm:$0xff]  }
 0x29b   : > { %2570 = vst.msk [vmem:[#allocation2 + $0x8] sm:$0xff] %vm1959_vm3, %v8627_v42  ;;  %1422 = vperm.xlu1 %6598, %v8627_v42   ;;  %6158 = vmatprep.subr.bf16.mxu1 %v6656_v48  ;;  %v8666_v48 = vld [vmem:[#allocation2 + $0x28] sm:$0xff] }
 0x29c   : > { %v1199_v49 = vpop.xlane.xlu1 %1198 }
 0x29d   : > { %v8640_v31 = vmax.f32 %v8630_v32, %v1199_v49 }
 0x29e   : > { %6159 = vmatpush3.bf16.msra.mxu1 %v6657_v6 }
 0x29f   : > { %2571 = vst.msk [vmem:[#allocation2 + $0x10] sm:$0xff] %vm1959_vm3, %v8640_v31  ;;  %1427 = vperm.xlu1 %6598, %v8640_v31   ;;  %6160 = vmatprep.subr.bf16.mxu1 %v6660_v15 }
 0x2a0   : > { %v1202_v0 = vpop.xlane.xlu1 %1201 }
 0x2a1   : > { %v8652_v49 = vmax.f32 %v8642_v26, %v1202_v0 }
 0x2a2   : > { %6161 = vmatpush3.bf16.msra.mxu1 %v6661_v54  ;;  %v8698_v54 = vld [vmem:[#allocation2 + $0x40] sm:$0xff] }
 0x2a3   : > { %2572 = vst.msk [vmem:[#allocation2 + $0x18] sm:$0xff] %vm1959_vm3, %v8652_v49  ;;  %1432 = vperm.xlu1 %6598, %v8652_v49   ;;  %6162 = vmatprep.subr.bf16.mxu1 %v6664_v17 }
 0x2a4   : > { %v1205_v55 = vpop.xlane.xlu0 %1204 }
 0x2a5   : > { %v8664_v0 = vmax.f32 %v8654_v1, %v1205_v55  ;;  %v8678_v55 = vld [vmem:[#allocation2 + $0x30] sm:$0xff] }
 0x2a6   : > { %6163 = vmatpush3.bf16.msra.mxu1 %v6665_v35 }
 0x2a7   : > { %2573 = vst.msk [vmem:[#allocation2 + $0x20] sm:$0xff] %vm1959_vm3, %v8664_v0  ;;  %1437 = vperm.xlu1 %6598, %v8664_v0  }
 0x2a8   : > { %v1208_v40 = vpop.xlane.xlu1 %1207 }
 0x2a9   : > { %v8676_v25 = vmax.f32 %v8666_v48, %v1208_v40 }
 0x2ab   : > { %2574 = vst.msk [vmem:[#allocation2 + $0x28] sm:$0xff] %vm1959_vm3, %v8676_v25  ;;  %1442 = vperm.xlu1 %6598, %v8676_v25  }
 0x2ac   : > { %v1211_v15 = vpop.xlane.xlu0 %1210 }
 0x2ad   : > { %v8686_v6 = vmax.f32 %v8678_v55, %v1211_v15 }
 0x2af   : > { %2575 = vst.msk [vmem:[#allocation2 + $0x30] sm:$0xff] %vm1959_vm3, %v8686_v6  ;;  %1447 = vperm.xlu1 %6598, %v8686_v6  }
 0x2b0   : > { %v1214_v35 = vpop.xlane.xlu1 %1213 }
 0x2b1   : > { %v8696_v17 = vmax.f32 %v8688_v22, %v1214_v35 }
 0x2b3   : > { %2576 = vst.msk [vmem:[#allocation2 + $0x38] sm:$0xff] %vm1959_vm3, %v8696_v17  ;;  %1452 = vperm.xlu1 %6598, %v8696_v17  }
 0x2b4   : > { %v1217_v40 = vpop.xlane.xlu0 %1216 }
 0x2b5   : > { %v8706_v10 = vmax.f32 %v8698_v54, %v1217_v40 }
 0x2b7   : > { %2577 = vst.msk [vmem:[#allocation2 + $0x40] sm:$0xff] %vm1959_vm3, %v8706_v10  ;;  %1457 = vperm.xlu1 %6598, %v8706_v10  }
 0x2b8   : > { %v1220_v15 = vpop.xlane.xlu1 %1219 }
 0x2b9   : > { %v8716_v63 = vmax.f32 %v8708_v9, %v1220_v15 }
 0x2bb   : > { %11421 = vst [vmem:[#allocation69_spill] sm:$0xff] %v8716_v63  ;;  %2578 = vst.msk [vmem:[#allocation2 + $0x48] sm:$0xff] %vm1959_vm3, %v8716_v63  ;;  %1462 = vperm.xlu0 %6597, %v8716_v63   ;;  %v8778_v63 = vld [vmem:[#allocation2 + $0x80] sm:$0xff] }
 0x2bc   : > { %v1223_v35 = vpop.xlane.xlu0 %1222  ;;  %11430 = vst [vmem:[#allocation78_spill] sm:$0xff] %v8778_v63 }
 0x2bd   : > { %v8726_v46 = vmax.f32 %v8718_v58, %v1223_v35 }
 0x2bf   : > { %2579 = vst.msk [vmem:[#allocation2 + $0x50] sm:$0xff] %vm1959_vm3, %v8726_v46  ;;  %1467 = vperm.xlu1 %6598, %v8726_v46  }
 0x2c0   : > { %v1226_v40 = vpop.xlane.xlu1 %1225 }
 0x2c1   : > { %v8736_v37 = vmax.f32 %v8728_v45, %v1226_v40  ;;  %v8768_v45 = vld [vmem:[#allocation2 + $0x78] sm:$0xff] }
 0x2c2   : > { %11428 = vst [vmem:[#allocation76_spill] sm:$0xff] %v8768_v45 }
 0x2c3   : > { %11423 = vst [vmem:[#allocation71_spill] sm:$0xff] %v8736_v37  ;;  %2580 = vst.msk [vmem:[#allocation2 + $0x58] sm:$0xff] %vm1959_vm3, %v8736_v37  ;;  %1472 = vperm.xlu0 %6597, %v8736_v37  }
 0x2c4   : > { %v1229_v15 = vpop.xlane.xlu0 %1228 }
 0x2c5   : > { %v8746_v30 = vmax.f32 %v8738_v36, %v1229_v15 }
 0x2c7   : > { %2581 = vst.msk [vmem:[#allocation2 + $0x60] sm:$0xff] %vm1959_vm3, %v8746_v30  ;;  %1477 = vperm.xlu1 %6598, %v8746_v30  }
 0x2c8   : > { %v1232_v35 = vpop.xlane.xlu1 %1231 }
 0x2c9   : > { %v8756_v21 = vmax.f32 %v8748_v27, %v1232_v35 }
 0x2cb   : > { %11425 = vst [vmem:[#allocation73_spill] sm:$0xff] %v8756_v21  ;;  %2582 = vst.msk [vmem:[#allocation2 + $0x68] sm:$0xff] %vm1959_vm3, %v8756_v21  ;;  %1482 = vperm.xlu0 %6597, %v8756_v21   ;;  %v8788_v21 = vld [vmem:[#allocation2 + $0x88] sm:$0xff] }
 0x2cc   : > { %v1235_v40 = vpop.xlane.xlu0 %1234  ;;  %11432 = vst [vmem:[#allocation80_spill] sm:$0xff] %v8788_v21 }
 0x2cd   : > { %v8766_v37 = vmax.f32 %v8758_v20, %v1235_v40 }
 0x2cf   : > { %11427 = vst [vmem:[#allocation75_spill] sm:$0xff] %v8766_v37  ;;  %2583 = vst.msk [vmem:[#allocation2 + $0x70] sm:$0xff] %vm1959_vm3, %v8766_v37  ;;  %1487 = vperm.xlu1 %6598, %v8766_v37   ;;  %v8798_v37 = vld [vmem:[#allocation2 + $0x90] sm:$0xff] }
 0x2d0   : > { %v1238_v15 = vpop.xlane.xlu1 %1237  ;;  %11434 = vst [vmem:[#allocation82_spill] sm:$0xff] %v8798_v37 }
 0x2d1   : > { %v8776_v27 = vmax.f32 %v8768_v45, %v1238_v15 }
 0x2d3   : > { %11429 = vst [vmem:[#allocation77_spill] sm:$0xff] %v8776_v27  ;;  %2584 = vst.msk [vmem:[#allocation2 + $0x78] sm:$0xff] %vm1959_vm3, %v8776_v27  ;;  %1492 = vperm.xlu0 %6597, %v8776_v27   ;;  %v8808_v27 = vld [vmem:[#allocation2 + $0x98] sm:$0xff] }
 0x2d4   : > { %v1241_v35 = vpop.xlane.xlu0 %1240  ;;  %11436 = vst [vmem:[#allocation84_spill] sm:$0xff] %v8808_v27 }
 0x2d5   : > { %v8786_v20 = vmax.f32 %v8778_v63, %v1241_v35 }
 0x2d7   : > { %11431 = vst [vmem:[#allocation79_spill] sm:$0xff] %v8786_v20  ;;  %2585 = vst.msk [vmem:[#allocation2 + $0x80] sm:$0xff] %vm1959_vm3, %v8786_v20  ;;  %1497 = vperm.xlu1 %6598, %v8786_v20  }
 0x2d8   : > { %v1244_v40 = vpop.xlane.xlu1 %1243 }
 0x2d9   : > { %v8796_v45 = vmax.f32 %v8788_v21, %v1244_v40  ;;  %v8818_v21 = vld [vmem:[#allocation2 + $0xa0] sm:$0xff] }
 0x2da   : > { %11438 = vst [vmem:[#allocation86_spill] sm:$0xff] %v8818_v21 }
 0x2db   : > { %11433 = vst [vmem:[#allocation81_spill] sm:$0xff] %v8796_v45  ;;  %2586 = vst.msk [vmem:[#allocation2 + $0x88] sm:$0xff] %vm1959_vm3, %v8796_v45  ;;  %1502 = vperm.xlu0 %6597, %v8796_v45   ;;  %v8828_v45 = vld [vmem:[#allocation2 + $0xa8] sm:$0xff] }
 0x2dc   : > { %v1247_v15 = vpop.xlane.xlu0 %1246  ;;  %11440 = vst [vmem:[#allocation88_spill] sm:$0xff] %v8828_v45 }
 0x2dd   : > { %v8806_v63 = vmax.f32 %v8798_v37, %v1247_v15 }
 0x2df   : > { %11435 = vst [vmem:[#allocation83_spill] sm:$0xff] %v8806_v63  ;;  %2587 = vst.msk [vmem:[#allocation2 + $0x90] sm:$0xff] %vm1959_vm3, %v8806_v63  ;;  %1507 = vperm.xlu1 %6598, %v8806_v63  }
 0x2e0   : > { %v1250_v35 = vpop.xlane.xlu1 %1249 }
 0x2e1   : > { %v8816_v20 = vmax.f32 %v8808_v27, %v1250_v35  ;;  %v8859_v27 = vld [vmem:[#allocation2 + $0xc0] sm:$0xff] }
 0x2e2   : > { %11446 = vst [vmem:[#allocation94_spill] sm:$0xff] %v8859_v27 }
 0x2e3   : > { %11437 = vst [vmem:[#allocation85_spill] sm:$0xff] %v8816_v20  ;;  %2588 = vst.msk [vmem:[#allocation2 + $0x98] sm:$0xff] %vm1959_vm3, %v8816_v20  ;;  %1512 = vperm.xlu0 %6597, %v8816_v20   ;;  %v8838_v20 = vld [vmem:[#allocation2 + $0xb0] sm:$0xff] }
 0x2e4   : > { %v1253_v40 = vpop.xlane.xlu0 %1252  ;;  %11442 = vst [vmem:[#allocation90_spill] sm:$0xff] %v8838_v20 }
 0x2e5   : > { %v8826_v37 = vmax.f32 %v8818_v21, %v1253_v40  ;;  %v6631_v40 = vld [vmem:[%s7865_s29 + $0x38] sm:$0xff]  }
 0x2e7   : > { %11439 = vst [vmem:[#allocation87_spill] sm:$0xff] %v8826_v37  ;;  %2589 = vst.msk [vmem:[#allocation2 + $0xa0] sm:$0xff] %vm1959_vm3, %v8826_v37  ;;  %1517 = vperm.xlu1 %6598, %v8826_v37   ;;  %v8848_v37 = vld [vmem:[#allocation2 + $0xb8] sm:$0xff] }
 0x2e8   : > { %v1256_v15 = vpop.xlane.xlu1 %1255  ;;  %11444 = vst [vmem:[#allocation92_spill] sm:$0xff] %v8848_v37 }
 0x2e9   : > { %v8836_v63 = vmax.f32 %v8828_v45, %v1256_v15  ;;  %v6632_v15 = vld [vmem:[%s7865_s29 + $0x78] sm:$0xff]  }
 0x2eb   : > { %11441 = vst [vmem:[#allocation89_spill] sm:$0xff] %v8836_v63  ;;  %2590 = vst.msk [vmem:[#allocation2 + $0xa8] sm:$0xff] %vm1959_vm3, %v8836_v63  ;;  %1522 = vperm.xlu0 %6597, %v8836_v63  }
 0x2ec   : > { %v1259_v35 = vpop.xlane.xlu0 %1258 }
 0x2ed   : > { %v8846_v21 = vmax.f32 %v8838_v20, %v1259_v35  ;;  %v6633_v35 = vld [vmem:[%s7865_s29 + $0x30] sm:$0xff]  }
 0x2ef   : > { %11443 = vst [vmem:[#allocation91_spill] sm:$0xff] %v8846_v21  ;;  %2591 = vst.msk [vmem:[#allocation2 + $0xb0] sm:$0xff] %vm1959_vm3, %v8846_v21  ;;  %1527 = vperm.xlu1 %6598, %v8846_v21  }
 0x2f0   : > { %v1262_v45 = vpop.xlane.xlu1 %1261 }
 0x2f1   : > { %v8857_v63 = vmax.f32 %v8848_v37, %v1262_v45  ;;  %v8871_v45 = vld [vmem:[#allocation2 + $0xc8] sm:$0xff] }
 0x2f2   : > { %11448 = vst [vmem:[#allocation96_spill] sm:$0xff] %v8871_v45  ;;  %v6635_v37 = vld [vmem:[%s7865_s29 + $0x28] sm:$0xff]  }
 0x2f3   : > { %11445 = vst [vmem:[#allocation93_spill] sm:$0xff] %v8857_v63  ;;  %2592 = vst.msk [vmem:[#allocation2 + $0xb8] sm:$0xff] %vm1959_vm3, %v8857_v63  ;;  %1532 = vperm.xlu0 %6597, %v8857_v63   ;;  %2903 = vrot.lane.b32.xlu1 %v6631_v40, %s7559_s22 }
 0x2f4   : > { %v1265_v21 = vpop.xlane.xlu0 %1264 }
 0x2f5   : > { %v8869_v20 = vmax.f32 %v8859_v27, %v1265_v21  ;;  %v8883_v21 = vld [vmem:[#allocation2 + $0xd0] sm:$0xff] }
 0x2f6   : > { %11450 = vst [vmem:[#allocation98_spill] sm:$0xff] %v8883_v21 }
 0x2f7   : > { %11447 = vst [vmem:[#allocation95_spill] sm:$0xff] %v8869_v20  ;;  %2593 = vst.msk [vmem:[#allocation2 + $0xc0] sm:$0xff] %vm1959_vm3, %v8869_v20  ;;  %2919 = vrot.lane.b32.xlu0 %v6632_v15, %s7559_s22  ;;  %1537 = vperm.xlu1 %6598, %v8869_v20   ;;  %v6634_v15 = vld [vmem:[%s7865_s29 + $0x70] sm:$0xff]  }
 0x2f8   : > { %v1268_v40 = vpop.xlane.xlu1 %1267 }
 0x2f9   : > { %v8881_v63 = vmax.f32 %v8871_v45, %v1268_v40  ;;  %v8895_v40 = vld [vmem:[#allocation2 + $0xd8] sm:$0xff]  ;;  %v6637_v45 = vld [vmem:[%s7865_s29 + $0x20] sm:$0xff]  }
 0x2fa   : > { %11452 = vst [vmem:[#allocation100_spill] sm:$0xff] %v8895_v40 }
 0x2fb   : > { %11449 = vst [vmem:[#allocation97_spill] sm:$0xff] %v8881_v63  ;;  %2594 = vst.msk [vmem:[#allocation2 + $0xc8] sm:$0xff] %vm1959_vm3, %v8881_v63  ;;  %1542 = vperm.xlu0 %6597, %v8881_v63   ;;  %2901 = vrot.lane.b32.xlu1 %v6633_v35, %s7559_s22 }
 0x2fc   : > { %v1271_v9 = vpop.xlane.xlu0 %1270 }
 0x2fd   : > { %v8893_v20 = vmax.f32 %v8883_v21, %v1271_v9  ;;  %v8907_v9 = vld [vmem:[#allocation2 + $0xe0] sm:$0xff] }
 0x2fe   : > { %11454 = vst [vmem:[#allocation102_spill] sm:$0xff] %v8907_v9 }
 0x2ff   : > { %11451 = vst [vmem:[#allocation99_spill] sm:$0xff] %v8893_v20  ;;  %2595 = vst.msk [vmem:[#allocation2 + $0xd0] sm:$0xff] %vm1959_vm3, %v8893_v20  ;;  %2917 = vrot.lane.b32.xlu0 %v6634_v15, %s7559_s22  ;;  %1547 = vperm.xlu1 %6598, %v8893_v20   ;;  %v6636_v15 = vld [vmem:[%s7865_s29 + $0x68] sm:$0xff]  }
 0x300   : > { %v1274_v35 = vpop.xlane.xlu1 %1273 }
 0x301   : > { %v8905_v63 = vmax.f32 %v8895_v40, %v1274_v35  ;;  %v8919_v35 = vld [vmem:[#allocation2 + $0xe8] sm:$0xff] }
 0x302   : > { %11456 = vst [vmem:[#allocation104_spill] sm:$0xff] %v8919_v35 }
 0x303   : > { %11453 = vst [vmem:[#allocation101_spill] sm:$0xff] %v8905_v63  ;;  %2596 = vst.msk [vmem:[#allocation2 + $0xd8] sm:$0xff] %vm1959_vm3, %v8905_v63  ;;  %1552 = vperm.xlu0 %6597, %v8905_v63   ;;  %2899 = vrot.lane.b32.xlu1 %v6635_v37, %s7559_s22 }
 0x304   : > { %v1277_v27 = vpop.xlane.xlu0 %1276 }
 0x305   : > { %v8917_v20 = vmax.f32 %v8907_v9, %v1277_v27  ;;  %v8931_v27 = vld [vmem:[#allocation2 + $0xf0] sm:$0xff] }
 0x306   : > { %11458 = vst [vmem:[#allocation106_spill] sm:$0xff] %v8931_v27  ;;  %v6647_v9 = vld [vmem:[%s7865_s29 + $0x10] sm:$0xff]  }
 0x307   : > { %11455 = vst [vmem:[#allocation103_spill] sm:$0xff] %v8917_v20  ;;  %2597 = vst.msk [vmem:[#allocation2 + $0xe0] sm:$0xff] %vm1959_vm3, %v8917_v20  ;;  %2915 = vrot.lane.b32.xlu0 %v6636_v15, %s7559_s22  ;;  %1557 = vperm.xlu1 %6598, %v8917_v20   ;;  %v6640_v15 = vld [vmem:[%s7865_s29 + $0x60] sm:$0xff]  }
 0x308   : > { %v1280_v37 = vpop.xlane.xlu1 %1279 }
 0x309   : > { %v8929_v63 = vmax.f32 %v8919_v35, %v1280_v37  ;;  %v8943_v37 = vld [vmem:[#allocation2 + $0xf8] sm:$0xff] }
 0x30a   : > { %11460 = vst [vmem:[#allocation108_spill] sm:$0xff] %v8943_v37 }
 0x30b   : > { %11457 = vst [vmem:[#allocation105_spill] sm:$0xff] %v8929_v63  ;;  %2598 = vst.msk [vmem:[#allocation2 + $0xe8] sm:$0xff] %vm1959_vm3, %v8929_v63  ;;  %1562 = vperm.xlu0 %6597, %v8929_v63   ;;  %2897 = vrot.lane.b32.xlu1 %v6637_v45, %s7559_s22  ;;  %v6643_v45 = vld [vmem:[%s7865_s29 + $0x18] sm:$0xff]  }
 0x30c   : > { %v1283_v21 = vpop.xlane.xlu0 %1282 }
 0x30d   : > { %v8941_v20 = vmax.f32 %v8931_v27, %v1283_v21 }
 0x30f   : > { %11459 = vst [vmem:[#allocation107_spill] sm:$0xff] %v8941_v20  ;;  %2599 = vst.msk [vmem:[#allocation2 + $0xf0] sm:$0xff] %vm1959_vm3, %v8941_v20  ;;  %2913 = vrot.lane.b32.xlu0 %v6640_v15, %s7559_s22  ;;  %1567 = vperm.xlu1 %6598, %v8941_v20   ;;  %v6646_v15 = vld [vmem:[%s7865_s29 + $0x58] sm:$0xff]  }
 0x310   : > { %v1286_v40 = vpop.xlane.xlu1 %1285 }
 0x311   : > { %v8953_v63 = vmax.f32 %v8943_v37, %v1286_v40 }
 0x313   : > { %11461 = vst [vmem:[#allocation109_spill] sm:$0xff] %v8953_v63  ;;  %2600 = vst.msk [vmem:[#allocation2 + $0xf8] sm:$0xff] %vm1959_vm3, %v8953_v63  ;;  %1572 = vperm.xlu0 %6597, %v8953_v63   ;;  %2895 = vrot.lane.b32.xlu1 %v6643_v45, %s7559_s22  ;;  %v6650_v63 = vld [vmem:[%s7865_s29 + $0x50] sm:$0xff]   ;;  %v6651_v45 = vld [vmem:[%s7865_s29 + $0x8] sm:$0xff]  }
 0x314   : > { %v1418_v20 = vpop.permute.xlu0 %1417 }
 0x315   : > { %v1575_v27 = vsub.f32 %v8352_v51, %v1418_v20  ;;  %v1576_v40 = vsub.f32 %v8355_v52, %v1418_v20 }
 0x316   : > { %v1423_v35 = vpop.permute.xlu1 %1422 }
 0x317   : > { %v1639_v12 = vmul.f32 1.442695, %v1575_v27  ;;  %v1641_v11 = vmul.f32 1.442695, %v1576_v40  ;;  %v1577_v21 = vsub.f32 %v8360_v56, %v1423_v35  ;;  %2911 = vrot.lane.b32.xlu0 %v6646_v15, %s7559_s22  ;;  %2893 = vrot.lane.b32.xlu1 %v6647_v9, %s7559_s22  ;;  %v1578_v37 = vsub.f32 %v8363_v57, %v1423_v35  ;;  %v6654_v9 = vld [vmem:[%s7865_s29 + $0x48] sm:$0xff]   ;;  %v6655_v27 = vld [vmem:[%s7865_s29] sm:$0xff]  }
 0x319   : > { %6695 = vpow2.f32 %v1639_v12  ;;  %v1643_v5 = vmul.f32 1.442695, %v1577_v21  ;;  %v1645_v51 = vmul.f32 1.442695, %v1578_v37 }
 0x31a   : > { %6697 = vpow2.f32 %v1641_v11  ;;  %v1428_v52 = vpop.permute.xlu1 %1427  ;;  %v6659_v11 = vld [vmem:[%s7857_s3] sm:$0xff]  }
 0x31b   : > { %6699 = vpow2.f32 %v1643_v5  ;;  %v1579_v20 = vsub.f32 %v8368_v61, %v1428_v52  ;;  %v1580_v56 = vsub.f32 %v8371_v62, %v1428_v52  ;;  %2909 = vrot.lane.b32.xlu0 %v6650_v63, %s7559_s22  ;;  %2891 = vrot.lane.b32.xlu1 %v6651_v45, %s7559_s22  ;;  %v6658_v62 = vld [vmem:[%s7865_s29 + $0x40] sm:$0xff]  }
 0x31c   : > { %6701 = vpow2.f32 %v1645_v51 }
 0x31d   : > { %v1647_v57 = vmul.f32 1.442695, %v1579_v20  ;;  %v1649_v12 = vmul.f32 1.442695, %v1580_v56 }
 0x31e   : > { %v1433_v35 = vpop.permute.xlu1 %1432 }
 0x31f   : > { %6703 = vpow2.f32 %v1647_v57  ;;  %v1581_v5 = vsub.f32 %v8376_v2, %v1433_v35  ;;  %v1582_v61 = vsub.f32 %v8379_v3, %v1433_v35  ;;  %2907 = vrot.lane.b32.xlu0 %v6654_v9, %s7559_s22  ;;  %2889 = vrot.lane.b32.xlu1 %v6655_v27, %s7559_s22  ;;  %v6662_v2 = vld [vmem:[%s7857_s3 + $0x30] sm:$0xff]   ;;  %v6663_v3 = vld [vmem:[%s7857_s3 + $0x8] sm:$0xff]  }
 0x320   : > { %6705 = vpow2.f32 %v1649_v12  ;;  %v6667_v27 = vld [vmem:[%s7857_s3 + $0x10] sm:$0xff]  }
 0x321   : > { %v1651_v63 = vmul.f32 1.442695, %v1581_v5  ;;  %v1653_v37 = vmul.f32 1.442695, %v1582_v61  ;;  %v11462_v5 = vsub.f32 %v8618_v16, %v8627_v42  ;;  %v6668_v16 = vld [vmem:[%s7857_s3 + $0x40] sm:$0xff]   ;;  %v6669_v42 = vld [vmem:[%s7857_s3 + $0x18] sm:$0xff]  }
 0x322   : > { %v1438_v21 = vpop.permute.xlu1 %1437 }
 0x323   : > { %6707 = vpow2.f32 %v1651_v63  ;;  %v1583_v15 = vsub.f32 %v8384_v7, %v1438_v21  ;;  %v1584_v40 = vsub.f32 %v8387_v8, %v1438_v21  ;;  %2905 = vrot.lane.b32.xlu0 %v6658_v62, %s7559_s22  ;;  %2777 = vrot.lane.b32.xlu1 %v6659_v11, %s7559_s22  ;;  %v6666_v8 = vld [vmem:[%s7857_s3 + $0x38] sm:$0xff]   ;;  %v1353_v61 = vmul.f32 1.442695, %v11462_v5 }
 0x324   : > { %6709 = vpow2.f32 %v1653_v37  ;;  %v11463_v11 = vsub.f32 %v8654_v1, %v8664_v0 }
 0x325   : > { %v1655_v45 = vmul.f32 1.442695, %v1583_v15  ;;  %v1657_v51 = vmul.f32 1.442695, %v1584_v40 }
 0x326   : > { %v6696_v52 = vpop.eup %6695  ;;  %v1443_v20 = vpop.permute.xlu1 %1442  ;;  %v1359_v63 = vmul.f32 1.442695, %v11463_v11 }
 0x327   : > { %v6698_v56 = vpop.eup %6697  ;;  %6711 = vpow2.f32 %v1655_v45  ;;  %v1585_v9 = vsub.f32 %v8392_v13, %v1443_v20  ;;  %v1586_v7 = vsub.f32 %v8395_v14, %v1443_v20  ;;  %2789 = vrot.lane.b32.xlu0 %v6662_v2, %s7559_s22  ;;  %2779 = vrot.lane.b32.xlu1 %v6663_v3, %s7559_s22  ;;  %v6670_v20 = vld [vmem:[%s7857_s3 + $0x70] sm:$0xff]  }
 0x328   : > { %v6700_v57 = vpop.eup %6699  ;;  %6713 = vpow2.f32 %v1657_v51  ;;  %v8995_v12 = vadd.f32 %v6698_v56, %v6696_v52 }
 0x329   : > { %v6702_v35 = vpop.eup %6701  ;;  %v1659_v13 = vmul.f32 1.442695, %v1585_v9  ;;  %v1661_v62 = vmul.f32 1.442695, %v1586_v7  ;;  %v2216_v14 = vpack.c.bf16 %v6700_v57, %v6696_v52 }
 0x32a   : > { %v1448_v37 = vpop.permute.xlu1 %1447  ;;  %v2217_v21 = vpack.c.bf16 %v6702_v35, %v6698_v56  ;;  %v9003_v15 = vadd.f32 %v6702_v35, %v6700_v57  ;;  %v6671_v56 = vld [vmem:[%s7857_s3 + $0x20] sm:$0xff]  }
 0x32b   : > { %6715 = vpow2.f32 %v1659_v13  ;;  %v1587_v40 = vsub.f32 %v8400_v18, %v1448_v37  ;;  %v1588_v2 = vsub.f32 %v8403_v19, %v1448_v37  ;;  %2791 = vrot.lane.b32.xlu0 %v6666_v8, %s7559_s22  ;;  %2781 = vrot.lane.b32.xlu1 %v6667_v27, %s7559_s22  ;;  %v11464_v8 = vsub.f32 %v8678_v55, %v8686_v6  ;;  %v6672_v6 = vld [vmem:[%s7857_s3 + $0x78] sm:$0xff]   ;;  %v6673_v55 = vld [vmem:[%s7857_s3 + $0x28] sm:$0xff]  }
 0x32c   : > { %v6704_v3 = vpop.eup %6703  ;;  %6717 = vpow2.f32 %v1661_v62  ;;  %2376 = vmatprep.mubr.bf16.mxu1 %v2217_v21 }
 0x32d   : > { %v6706_v1 = vpop.eup %6705  ;;  %6719 = vpow2.f32 %v1353_v61  ;;  %v1663_v0 = vmul.f32 1.442695, %v1587_v40  ;;  %v1665_v45 = vmul.f32 1.442695, %v1588_v2  ;;  %2377 = vmatmul.mubr.bf16.vlgmr.msra.gmra.mxu1 %v2216_v14  ;;  %v1363_v27 = vmul.f32 1.442695, %v11464_v8 }
 0x32e   : > { %6721 = vpow2.f32 %v1359_v63  ;;  %v1453_v18 = vpop.permute.xlu1 %1452  ;;  %v9011_v51 = vadd.f32 %v6706_v1, %v6704_v3  ;;  %v6674_v2 = vld [vmem:[%s7857_s3 + $0x48] sm:$0xff]  }
 0x32f   : > { %6723 = vpow2.f32 %v1663_v0  ;;  %v1589_v19 = vsub.f32 %v8408_v23, %v1453_v18  ;;  %v1590_v52 = vsub.f32 %v8411_v24, %v1453_v18  ;;  %2793 = vrot.lane.b32.xlu0 %v6668_v16, %s7559_s22  ;;  %2783 = vrot.lane.b32.xlu1 %v6669_v42, %s7559_s22  ;;  %v11465_v24 = vsub.f32 %v8698_v54, %v8706_v10 }
 0x330   : > { %v6708_v9 = vpop.eup %6707  ;;  %6725 = vpow2.f32 %v1665_v45 }
 0x331   : > { %v6710_v7 = vpop.eup %6709  ;;  %v1667_v57 = vmul.f32 1.442695, %v1589_v19  ;;  %v1669_v35 = vmul.f32 1.442695, %v1590_v52  ;;  %v2218_v23 = vpack.c.bf16 %v6708_v9, %v6704_v3  ;;  %v1367_v5 = vmul.f32 1.442695, %v11465_v24 }
 0x332   : > { %v1458_v61 = vpop.permute.xlu1 %1457  ;;  %v2219_v13 = vpack.c.bf16 %v6710_v7, %v6706_v1  ;;  %v9025_v62 = vadd.f32 %v6710_v7, %v6708_v9  ;;  %v11466_v3 = vsub.f32 %v8718_v58, %v8726_v46  ;;  %v6675_v7 = vld [vmem:[%s7857_s3 + $0x50] sm:$0xff]  }
 0x333   : > { %6727 = vpow2.f32 %v1667_v57  ;;  %v1591_v14 = vsub.f32 %v8416_v28, %v1458_v61  ;;  %v1592_v11 = vsub.f32 %v8419_v29, %v1458_v61  ;;  %2805 = vrot.lane.b32.xlu0 %v6670_v20, %s7559_s22  ;;  %2785 = vrot.lane.b32.xlu1 %v6671_v56, %s7559_s22 }
 0x334   : > { %v6712_v63 = vpop.eup %6711  ;;  %6729 = vpow2.f32 %v1669_v35  ;;  %2384 = vmatprep.mubr.bf16.mxu1 %v2219_v13  ;;  %v1371_v1 = vmul.f32 1.442695, %v11466_v3 }
 0x335   : > { %v6714_v10 = vpop.eup %6713  ;;  %6731 = vpow2.f32 %v1363_v27  ;;  %v1671_v54 = vmul.f32 1.442695, %v1591_v14  ;;  %v1673_v37 = vmul.f32 1.442695, %v1592_v11  ;;  %2385 = vmatmul.mubr.bf16.gmra.mxu1 %v2218_v23 }
 0x336   : > { %6733 = vpow2.f32 %v1367_v5  ;;  %v1463_v21 = vpop.permute.xlu0 %1462  ;;  %v9033_v28 = vadd.f32 %v6714_v10, %v6712_v63  ;;  %v6676_v5 = vld [vmem:[%s7857_s3 + $0x58] sm:$0xff]  }
 0x337   : > { %6735 = vpow2.f32 %v1671_v54  ;;  %v1593_v29 = vsub.f32 %v8424_v33, %v1463_v21  ;;  %v1594_v40 = vsub.f32 %v8427_v34, %v1463_v21  ;;  %2807 = vrot.lane.b32.xlu0 %v6672_v6, %s7559_s22  ;;  %2787 = vrot.lane.b32.xlu1 %v6673_v55, %s7559_s22  ;;  %v11467_v33 = vsub.f32 %v8611_v41, %v8616_v47  ;;  %v6677_v21 = vld [vmem:[%s7857_s3 + $0x60] sm:$0xff]  }
 0x338   : > { %v6716_v16 = vpop.eup %6715  ;;  %6737 = vpow2.f32 %v1673_v37  ;;  %v11468_v41 = vsub.f32 %v8738_v36, %v8746_v30  ;;  %v11469_v30 = vsub.f32 %v8630_v32, %v8640_v31 }
 0x339   : > { %v6718_v42 = vpop.eup %6717  ;;  %v1675_v0 = vmul.f32 1.442695, %v1593_v29  ;;  %v1677_v45 = vmul.f32 1.442695, %v1594_v40  ;;  %v2220_v18 = vpack.c.bf16 %v6716_v16, %v6712_v63  ;;  %v1351_v34 = vmul.f32 1.442695, %v11467_v33 }
 0x33a   : > { %v9043_v19 = vpop.eup %6719  ;;  %v1468_v52 = vpop.permute.xlu1 %1467  ;;  %v2221_v20 = vpack.c.bf16 %v6718_v42, %v6714_v10  ;;  %v9048_v56 = vadd.f32 %v6718_v42, %v6716_v16  ;;  %v1375_v27 = vmul.f32 1.442695, %v11468_v41  ;;  %v1355_v36 = vmul.f32 1.442695, %v11469_v30  ;;  %v6678_v42 = vld [vmem:[%s7857_s3 + $0x68] sm:$0xff]  }
 0x33b   : > { %v9050_v9 = vpop.eup %6721  ;;  %6739 = vpow2.f32 %v1675_v0  ;;  %v1595_v46 = vsub.f32 %v8432_v38, %v1468_v52  ;;  %v1596_v58 = vsub.f32 %v8435_v39, %v1468_v52  ;;  %2031 = vperm.xlu0 %6597, %v9043_v19   ;;  %2795 = vrot.lane.b32.xlu1 %v6674_v2, %s7559_s22  ;;  %v11471_v0 = vsub.f32 %v8666_v48, %v8676_v25  ;;  %v11473_v25 = vld [vmem:[#allocation33_spill] sm:$0xff] }
 0x33c   : > { %v6724_v8 = vpop.eup %6723  ;;  %6741 = vpow2.f32 %v1677_v45  ;;  %2392 = vmatprep.mubr.bf16.mxu1 %v2221_v20 }
 0x33d   : > { %v6726_v47 = vpop.eup %6725  ;;  %6743 = vpow2.f32 %v1371_v1  ;;  %v1679_v57 = vmul.f32 1.442695, %v1595_v46  ;;  %v1681_v35 = vmul.f32 1.442695, %v1596_v58  ;;  %2393 = vmatmul.mubr.bf16.gmra.mxu1 %v2220_v18  ;;  %v1361_v45 = vmul.f32 1.442695, %v11471_v0 }
 0x33e   : > { %6745 = vpow2.f32 %v1351_v34  ;;  %v1473_v38 = vpop.permute.xlu0 %1472  ;;  %v9060_v39 = vadd.f32 %v6726_v47, %v6724_v8 }
 0x33f   : > { %6747 = vpow2.f32 %v1679_v57  ;;  %v1597_v23 = vsub.f32 %v8440_v43, %v1473_v38  ;;  %v1598_v24 = vsub.f32 %v8443_v44, %v1473_v38  ;;  %2046 = vperm.xlu0 %6597, %v9050_v9   ;;  %2797 = vrot.lane.b32.xlu1 %v6675_v7, %s7559_s22  ;;  %v11470_v44 = vsub.f32 %v8642_v26, %v8652_v49 }
 0x340   : > { %v6728_v61 = vpop.eup %6727  ;;  %6749 = vpow2.f32 %v1681_v35  ;;  %v11474_v35 = vld [vmem:[#allocation34_spill] sm:$0xff] }
 0x341   : > { %v6730_v13 = vpop.eup %6729  ;;  %6751 = vpow2.f32 %v1375_v27  ;;  %v1683_v14 = vmul.f32 1.442695, %v1597_v23  ;;  %v1685_v11 = vmul.f32 1.442695, %v1598_v24  ;;  %v2222_v6 = vpack.c.bf16 %v6728_v61, %v6724_v8  ;;  %v11475_v23 = vld [vmem:[#allocation35_spill] sm:$0xff] }
 0x342   : > { %v9070_v43 = vpop.eup %6731  ;;  %v1357_v55 = vmul.f32 1.442695, %v11470_v44  ;;  %v1478_v63 = vpop.permute.xlu1 %1477  ;;  %v2223_v10 = vpack.c.bf16 %v6730_v13, %v6726_v47  ;;  %v9075_v54 = vadd.f32 %v6730_v13, %v6728_v61  ;;  %v11477_v13 = vld [vmem:[#allocation69_spill] sm:$0xff] }
 0x343   : > { %v9077_v37 = vpop.eup %6733  ;;  %6753 = vpow2.f32 %v1683_v14  ;;  %v1599_v31 = vsub.f32 %v8448_v50, %v1478_v63  ;;  %v1600_v32 = vsub.f32 %v8451_v53, %v1478_v63  ;;  %2056 = vperm.xlu0 %6597, %v9070_v43   ;;  %2799 = vrot.lane.b32.xlu1 %v6676_v5, %s7559_s22  ;;  %v6679_v5 = vld [vmem:[%s7871_s2 + $0x78] sm:$0xff]  }
 0x344   : > { %v6736_v29 = vpop.eup %6735  ;;  %6755 = vpow2.f32 %v1685_v11  ;;  %2400 = vmatprep.mubr.bf16.mxu1 %v2223_v10  ;;  %v11479_v10 = vld [vmem:[#allocation70_spill] sm:$0xff] }
 0x345   : > { %v6738_v26 = vpop.eup %6737  ;;  %6757 = vpow2.f32 %v1355_v36  ;;  %v1687_v49 = vmul.f32 1.442695, %v1599_v31  ;;  %v1689_v40 = vmul.f32 1.442695, %v1600_v32  ;;  %2401 = vmatmul.mubr.bf16.gmra.mxu1 %v2222_v6  ;;  %v11476_v36 = vld [vmem:[#allocation68_spill] sm:$0xff]  ;;  %v11480_v31 = vld [vmem:[#allocation71_spill] sm:$0xff] }
 0x346   : > { %6759 = vpow2.f32 %v1357_v55  ;;  %v1483_v2 = vpop.permute.xlu0 %1482  ;;  %v9084_v16 = vadd.f32 %v6738_v26, %v6736_v29  ;;  %v11478_v14 = vsub.f32 %v11476_v36, %v11477_v13  ;;  %v11481_v32 = vsub.f32 %v11479_v10, %v11480_v31  ;;  %v11489_v36 = vld [vmem:[#allocation40_spill] sm:$0xff]  ;;  %v11491_v10 = vld [vmem:[#allocation74_spill] sm:$0xff]  ;;  %v11492_v31 = vld [vmem:[#allocation75_spill] sm:$0xff] }
 0x347   : > { %6761 = vpow2.f32 %v1687_v49  ;;  %v1601_v50 = vsub.f32 %v8456_v59, %v1483_v2  ;;  %v1602_v53 = vsub.f32 %v8459_v60, %v1483_v2  ;;  %2066 = vperm.xlu0 %6597, %v9077_v37   ;;  %2801 = vrot.lane.b32.xlu1 %v6677_v21, %s7559_s22  ;;  %v11472_v59 = vsub.f32 %v8688_v22, %v8696_v17  ;;  %v11482_v2 = vld [vmem:[#allocation36_spill] sm:$0xff] }
 0x348   : > { %v6740_v3 = vpop.eup %6739  ;;  %6763 = vpow2.f32 %v1689_v40  ;;  %v1369_v11 = vmul.f32 1.442695, %v11478_v14  ;;  %v1373_v21 = vmul.f32 1.442695, %v11481_v32  ;;  %v11490_v14 = vld [vmem:[#allocation41_spill] sm:$0xff]  ;;  %v11493_v32 = vsub.f32 %v11491_v10, %v11492_v31 }
 0x349   : > { %v6742_v1 = vpop.eup %6741  ;;  %v1691_v18 = vmul.f32 1.442695, %v1601_v50  ;;  %v1693_v33 = vmul.f32 1.442695, %v1602_v53  ;;  %v2224_v34 = vpack.c.bf16 %v6740_v3, %v6736_v29  ;;  %v1365_v60 = vmul.f32 1.442695, %v11472_v59 }
 0x34a   : > { %v9094_v52 = vpop.eup %6743  ;;  %v1488_v20 = vpop.permute.xlu1 %1487  ;;  %v2225_v46 = vpack.c.bf16 %v6742_v1, %v6738_v26  ;;  %v9099_v58 = vadd.f32 %v6742_v1, %v6740_v3  ;;  %v11483_v53 = vld [vmem:[#allocation37_spill] sm:$0xff]  ;;  %v11484_v59 = vld [vmem:[#allocation38_spill] sm:$0xff] }
 0x34b   : > { %v9101_v7 = vpop.eup %6745  ;;  %6765 = vpow2.f32 %v1691_v18  ;;  %v1603_v8 = vsub.f32 %v8464_v4, %v1488_v20  ;;  %v1604_v48 = vsub.f32 %v11473_v25, %v1488_v20  ;;  %2076 = vperm.xlu0 %6597, %v9094_v52   ;;  %2803 = vrot.lane.b32.xlu1 %v6678_v42, %s7559_s22  ;;  %v6680_v3 = vld [vmem:[%s7871_s2 + $0x38] sm:$0xff]   ;;  %v11485_v20 = vld [vmem:[#allocation39_spill] sm:$0xff] }
 0x34c   : > { %v6748_v47 = vpop.eup %6747  ;;  %6767 = vpow2.f32 %v1693_v33  ;;  %2408 = vmatprep.mubr.bf16.mxu1 %v2225_v46 }
 0x34d   : > { %v6750_v22 = vpop.eup %6749  ;;  %6769 = vpow2.f32 %v1361_v45  ;;  %v1695_v17 = vmul.f32 1.442695, %v1603_v8  ;;  %v1697_v41 = vmul.f32 1.442695, %v1604_v48  ;;  %2409 = vmatmul.mubr.bf16.gmra.mxu1 %v2224_v34  ;;  %v6681_v8 = vld [vmem:[%s7871_s2 + $0x30] sm:$0xff]  }
 0x34e   : > { %v9107_v27 = vpop.eup %6751  ;;  %6771 = vpow2.f32 %v1365_v60  ;;  %v1493_v57 = vpop.permute.xlu0 %1492  ;;  %v9109_v4 = vadd.f32 %v6750_v22, %v6748_v47 }
 0x34f   : > { %6773 = vpow2.f32 %v1695_v17  ;;  %v1605_v38 = vsub.f32 %v11474_v35, %v1493_v57  ;;  %v1606_v24 = vsub.f32 %v11475_v23, %v1493_v57  ;;  %2086 = vperm.xlu0 %6597, %v9107_v27   ;;  %2026 = vperm.xlu1 %6598, %v9101_v7  }
 0x350   : > { %v6754_v61 = vpop.eup %6753  ;;  %6775 = vpow2.f32 %v1697_v41 }
 0x351   : > { %v6756_v30 = vpop.eup %6755  ;;  %v1699_v6 = vmul.f32 1.442695, %v1605_v38  ;;  %v1701_v44 = vmul.f32 1.442695, %v1606_v24  ;;  %v2226_v55 = vpack.c.bf16 %v6754_v61, %v6748_v47  ;;  %v11486_v47 = vld [vmem:[#allocation72_spill] sm:$0xff] }
 0x352   : > { %v9119_v63 = vpop.eup %6757  ;;  %v1498_v29 = vpop.permute.xlu1 %1497  ;;  %v2227_v26 = vpack.c.bf16 %v6756_v30, %v6750_v22  ;;  %v9124_v49 = vadd.f32 %v6756_v30, %v6754_v61  ;;  %v11487_v22 = vld [vmem:[#allocation73_spill] sm:$0xff] }
 0x353   : > { %v9126_v40 = vpop.eup %6759  ;;  %6777 = vpow2.f32 %v1699_v6  ;;  %v1607_v50 = vsub.f32 %v11482_v2, %v1498_v29  ;;  %v1608_v42 = vsub.f32 %v11483_v53, %v1498_v29  ;;  %4411 = vrot.lane.b32.xlu0 %v6679_v5, %s7559_s22  ;;  %2036 = vperm.xlu1 %6598, %v9119_v63   ;;  %v11488_v17 = vsub.f32 %v11486_v47, %v11487_v22  ;;  %v6682_v6 = vld [vmem:[%s7871_s2 + $0x68] sm:$0xff]   ;;  %v11494_v53 = vld [vmem:[#allocation42_spill] sm:$0xff] }
 0x354   : > { %v6762_v1 = vpop.eup %6761  ;;  %6779 = vpow2.f32 %v1701_v44  ;;  %2416 = vmatprep.mubr.bf16.mxu1 %v2227_v26  ;;  %v11496_v47 = vld [vmem:[#allocation44_spill] sm:$0xff] }
 0x355   : > { %v6764_v0 = vpop.eup %6763  ;;  %6781 = vpow2.f32 %v1369_v11  ;;  %v1703_v45 = vmul.f32 1.442695, %v1607_v50  ;;  %v1705_v18 = vmul.f32 1.442695, %v1608_v42  ;;  %2417 = vmatmul.mubr.bf16.gmra.mxu1 %v2226_v55  ;;  %v1377_v41 = vmul.f32 1.442695, %v11488_v17 }
 0x356   : > { %6783 = vpow2.f32 %v1373_v21  ;;  %v1503_v33 = vpop.permute.xlu0 %1502  ;;  %v9133_v34 = vadd.f32 %v6764_v0, %v6762_v1  ;;  %v1379_v21 = vmul.f32 1.442695, %v11493_v32  ;;  %v11497_v17 = vld [vmem:[#allocation45_spill] sm:$0xff] }
 0x357   : > { %6785 = vpow2.f32 %v1703_v45  ;;  %v1609_v60 = vsub.f32 %v11484_v59, %v1503_v33  ;;  %v1610_v46 = vsub.f32 %v11485_v20, %v1503_v33  ;;  %4395 = vrot.lane.b32.xlu0 %v6680_v3, %s7559_s22  ;;  %2041 = vperm.xlu1 %6598, %v9126_v40   ;;  %v11495_v3 = vld [vmem:[#allocation43_spill] sm:$0xff] }
 0x358   : > { %v6766_v25 = vpop.eup %6765  ;;  %6787 = vpow2.f32 %v1705_v18 }
 0x359   : > { %v6768_v48 = vpop.eup %6767  ;;  %v1707_v57 = vmul.f32 1.442695, %v1609_v60  ;;  %v1709_v35 = vmul.f32 1.442695, %v1610_v46  ;;  %v2228_v38 = vpack.c.bf16 %v6766_v25, %v6762_v1 }
 0x35a   : > { %v9143_v23 = vpop.eup %6769  ;;  %v1508_v24 = vpop.permute.xlu1 %1507  ;;  %v2229_v5 = vpack.c.bf16 %v6768_v48, %v6764_v0  ;;  %v9145_v61 = vadd.f32 %v6768_v48, %v6766_v25  ;;  %v6683_v0 = vld [vmem:[%s7871_s2 + $0x28] sm:$0xff]  }
 0x35b   : > { %v9147_v30 = vpop.eup %6771  ;;  %6789 = vpow2.f32 %v1707_v57  ;;  %v1611_v13 = vsub.f32 %v11489_v36, %v1508_v24  ;;  %v1612_v11 = vsub.f32 %v11490_v14, %v1508_v24  ;;  %4393 = vrot.lane.b32.xlu0 %v6681_v8, %s7559_s22  ;;  %2051 = vperm.xlu1 %6598, %v9143_v23   ;;  %v6684_v57 = vld [vmem:[%s7871_s2 + $0x60] sm:$0xff]  }
 0x35c   : > { %v6774_v44 = vpop.eup %6773  ;;  %6791 = vpow2.f32 %v1709_v35  ;;  %2424 = vmatprep.mubr.bf16.mxu1 %v2229_v5  ;;  %v11498_v14 = vld [vmem:[#allocation46_spill] sm:$0xff] }
 0x35d   : > { %v6776_v55 = vpop.eup %6775  ;;  %6793 = vpow2.f32 %v1377_v41  ;;  %v1711_v29 = vmul.f32 1.442695, %v1611_v13  ;;  %v1713_v26 = vmul.f32 1.442695, %v1612_v11  ;;  %2425 = vmatmul.mubr.bf16.gmra.mxu1 %v2228_v38 }
 0x35e   : > { %v1513_v2 = vpop.permute.xlu0 %1512  ;;  %v9157_v50 = vadd.f32 %v6776_v55, %v6774_v44 }
 0x35f   : > { %6795 = vpow2.f32 %v1711_v29  ;;  %v1613_v42 = vsub.f32 %v11494_v53, %v1513_v2  ;;  %v1614_v1 = vsub.f32 %v11495_v3, %v1513_v2  ;;  %4407 = vrot.lane.b32.xlu0 %v6682_v6, %s7559_s22  ;;  %2061 = vperm.xlu1 %6598, %v9147_v30   ;;  %v11499_v6 = vld [vmem:[#allocation47_spill] sm:$0xff]  ;;  %v11500_v3 = vld [vmem:[#allocation48_spill] sm:$0xff] }
 0x360   : > { %v6778_v45 = vpop.eup %6777  ;;  %6797 = vpow2.f32 %v1713_v26 }
 0x361   : > { %v6780_v18 = vpop.eup %6779  ;;  %6799 = vpow2.f32 %v1379_v21  ;;  %v1715_v33 = vmul.f32 1.442695, %v1613_v42  ;;  %v1717_v59 = vmul.f32 1.442695, %v1614_v1  ;;  %v2230_v60 = vpack.c.bf16 %v6778_v45, %v6774_v44 }
 0x362   : > { %v9164_v20 = vpop.eup %6781  ;;  %v1518_v46 = vpop.permute.xlu1 %1517  ;;  %v2231_v8 = vpack.c.bf16 %v6780_v18, %v6776_v55  ;;  %v9166_v25 = vadd.f32 %v6780_v18, %v6778_v45  ;;  %v6685_v55 = vld [vmem:[%s7871_s2 + $0x58] sm:$0xff]   ;;  %v6686_v18 = vld [vmem:[%s7871_s2 + $0x50] sm:$0xff]  }
 0x363   : > { %v9168_v48 = vpop.eup %6783  ;;  %6801 = vpow2.f32 %v1715_v33  ;;  %v1615_v22 = vsub.f32 %v11496_v47, %v1518_v46  ;;  %v1616_v41 = vsub.f32 %v11497_v17, %v1518_v46  ;;  %4391 = vrot.lane.b32.xlu0 %v6683_v0, %s7559_s22  ;;  %2071 = vperm.xlu1 %6598, %v9164_v20   ;;  %v11501_v0 = vld [vmem:[#allocation49_spill] sm:$0xff] }
 0x364   : > { %v6786_v35 = vpop.eup %6785  ;;  %6803 = vpow2.f32 %v1717_v59  ;;  %2432 = vmatprep.mubr.bf16.mxu1 %v2231_v8 }
 0x365   : > { %v6788_v38 = vpop.eup %6787  ;;  %v1719_v24 = vmul.f32 1.442695, %v1615_v22  ;;  %v1721_v5 = vmul.f32 1.442695, %v1616_v41  ;;  %2433 = vmatmul.mubr.bf16.gmra.mxu1 %v2230_v60  ;;  %v11502_v41 = vld [vmem:[#allocation50_spill] sm:$0xff] }
 0x366   : > { %v1523_v36 = vpop.permute.xlu0 %1522  ;;  %v9175_v13 = vadd.f32 %v6788_v38, %v6786_v35 }
 0x367   : > { %6805 = vpow2.f32 %v1719_v24  ;;  %v1617_v11 = vsub.f32 %v11498_v14, %v1523_v36  ;;  %v1618_v44 = vsub.f32 %v11499_v6, %v1523_v36  ;;  %4405 = vrot.lane.b32.xlu0 %v6684_v57, %s7559_s22  ;;  %2081 = vperm.xlu1 %6598, %v9168_v48   ;;  %v6687_v24 = vld [vmem:[%s7871_s2 + $0x48] sm:$0xff]  }
 0x368   : > { %v6790_v10 = vpop.eup %6789  ;;  %6807 = vpow2.f32 %v1721_v5  ;;  %v6688_v5 = vld [vmem:[%s7871_s2 + $0x70] sm:$0xff]  }
 0x369   : > { %v6792_v31 = vpop.eup %6791  ;;  %v1723_v32 = vmul.f32 1.442695, %v1617_v11  ;;  %v1725_v21 = vmul.f32 1.442695, %v1618_v44  ;;  %v2232_v29 = vpack.c.bf16 %v6790_v10, %v6786_v35  ;;  %v11503_v35 = vld [vmem:[#allocation51_spill] sm:$0xff] }
 0x36a   : > { %v9182_v26 = vpop.eup %6793  ;;  %v1528_v2 = vpop.permute.xlu1 %1527  ;;  %v2233_v53 = vpack.c.bf16 %v6792_v31, %v6788_v38  ;;  %v9184_v42 = vadd.f32 %v6792_v31, %v6790_v10 }
 0x36b   : > { %6809 = vpow2.f32 %v1723_v32  ;;  %v1619_v1 = vsub.f32 %v11500_v3, %v1528_v2  ;;  %v1620_v45 = vsub.f32 %v11501_v0, %v1528_v2  ;;  %4403 = vrot.lane.b32.xlu0 %v6685_v55, %s7559_s22  ;;  %2091 = vperm.xlu1 %6598, %v9182_v26   ;;  %v11505_v2 = vld [vmem:[#allocation53_spill] sm:$0xff]  ;;  %v6689_v3 = vld [vmem:[%s7871_s2 + $0x40] sm:$0xff]  }
 0x36c   : > { %v6796_v33 = vpop.eup %6795  ;;  %6811 = vpow2.f32 %v1725_v21  ;;  %2440 = vmatprep.mubr.bf16.mxu1 %v2233_v53  ;;  %v11504_v21 = vld [vmem:[#allocation52_spill] sm:$0xff] }
 0x36d   : > { %v6798_v59 = vpop.eup %6797  ;;  %v1727_v60 = vmul.f32 1.442695, %v1619_v1  ;;  %v1729_v46 = vmul.f32 1.442695, %v1620_v45  ;;  %2441 = vmatmul.mubr.bf16.gmra.mxu1 %v2232_v29  ;;  %v6690_v1 = vld [vmem:[%s7871_s2 + $0x20] sm:$0xff]  }
 0x36e   : > { %v9191_v8 = vpop.eup %6799  ;;  %v2904_v47 = vpop.permute.xlu1 %2903  ;;  %v9193_v17 = vadd.f32 %v6798_v59, %v6796_v33 }
 0x36f   : > { %v1533_v22 = vpop.permute.xlu0 %1532  ;;  %6813 = vpow2.f32 %v1727_v60  ;;  %4401 = vrot.lane.b32.xlu0 %v6686_v18, %s7559_s22  ;;  %2096 = vperm.xlu1 %6598, %v9191_v8   ;;  %v2991_v18 = vsel %vm869_vm2, %v2904_v47, 0 }
 0x370   : > { %v1621_v57 = vsub.f32 %v11502_v41, %v1533_v22  ;;  %v1622_v38 = vsub.f32 %v11503_v35, %v1533_v22  ;;  %v6802_v36 = vpop.eup %6801  ;;  %6815 = vpow2.f32 %v1729_v46  ;;  %v11506_v41 = vld [vmem:[#allocation54_spill] sm:$0xff]  ;;  %v11507_v35 = vld [vmem:[#allocation55_spill] sm:$0xff] }
 0x371   : > { %v6804_v14 = vpop.eup %6803  ;;  %v2234_v44 = vpack.c.bf16 %v6802_v36, %v6796_v33 }
 0x372   : > { %v1731_v11 = vmul.f32 1.442695, %v1621_v57  ;;  %v1733_v6 = vmul.f32 1.442695, %v1622_v38  ;;  %v1538_v55 = vpop.permute.xlu1 %1537  ;;  %v2235_v31 = vpack.c.bf16 %v6804_v14, %v6798_v59  ;;  %v9201_v32 = vadd.f32 %v6804_v14, %v6802_v36 }
 0x373   : > { %v2920_v10 = vpop.permute.xlu0 %2919  ;;  %v1623_v29 = vsub.f32 %v11504_v21, %v1538_v55  ;;  %v1624_v53 = vsub.f32 %v11505_v2, %v1538_v55  ;;  %4399 = vrot.lane.b32.xlu0 %v6687_v24, %s7559_s22  ;;  %4409 = vrot.lane.b32.xlu1 %v6688_v5, %s7559_s22  ;;  %v6691_v24 = vld [vmem:[%s7871_s2 + $0x18] sm:$0xff]  }
 0x374   : > { %6817 = vpow2.f32 %v1731_v11  ;;  %v6806_v0 = vpop.eup %6805  ;;  %2448 = vmatprep.mubr.bf16.mxu1 %v2235_v31  ;;  %6444 = vmatprep.subr.msk.bf16.mxu1 %vm869_vm2, %v2920_v10  ;;  %v11508_v31 = vld [vmem:[#allocation56_spill] sm:$0xff] }
 0x375   : > { %6819 = vpow2.f32 %v1733_v6  ;;  %v6808_v45 = vpop.eup %6807  ;;  %v1735_v33 = vmul.f32 1.442695, %v1623_v29  ;;  %v1737_v59 = vmul.f32 1.442695, %v1624_v53  ;;  %2449 = vmatmul.mubr.bf16.gmra.mxu1 %v2234_v44  ;;  %v11509_v29 = vld [vmem:[#allocation57_spill] sm:$0xff] }
 0x376   : > { %6261 = vmatpush3.bf16.xpose.msra.mxu1 %v2991_v18  ;;  %v2902_v60 = vpop.permute.xlu1 %2901  ;;  %v9211_v22 = vadd.f32 %v6808_v45, %v6806_v0  ;;  %v6692_v53 = vld [vmem:[%s7871_s2 + $0x10] sm:$0xff]  }
 0x377   : > { %v1543_v46 = vpop.permute.xlu0 %1542  ;;  %6821 = vpow2.f32 %v1735_v33  ;;  %4397 = vrot.lane.b32.xlu0 %v6689_v3, %s7559_s22  ;;  %4389 = vrot.lane.b32.xlu1 %v6690_v1, %s7559_s22 }
 0x378   : > { %v1625_v57 = vsub.f32 %v11506_v41, %v1543_v46  ;;  %v1626_v38 = vsub.f32 %v11507_v35, %v1543_v46  ;;  %v6810_v47 = vpop.eup %6809  ;;  %6823 = vpow2.f32 %v1737_v59  ;;  %v11510_v41 = vld [vmem:[#allocation58_spill] sm:$0xff]  ;;  %v11511_v35 = vld [vmem:[#allocation59_spill] sm:$0xff] }
 0x379   : > { %v6812_v5 = vpop.eup %6811  ;;  %v2236_v11 = vpack.c.bf16 %v6810_v47, %v6806_v0  ;;  %v2988_v0 = vsel %vm869_vm2, %v2902_v60, 0 }
 0x37a   : > { %v1739_v36 = vmul.f32 1.442695, %v1625_v57  ;;  %v1741_v14 = vmul.f32 1.442695, %v1626_v38  ;;  %v1548_v6 = vpop.permute.xlu1 %1547  ;;  %v2237_v55 = vpack.c.bf16 %v6812_v5, %v6808_v45  ;;  %v9218_v10 = vadd.f32 %v6812_v5, %v6810_v47 }
 0x37b   : > { %v2918_v44 = vpop.permute.xlu0 %2917  ;;  %v1627_v21 = vsub.f32 %v11508_v31, %v1548_v6  ;;  %v1628_v2 = vsub.f32 %v11509_v29, %v1548_v6  ;;  %4387 = vrot.lane.b32.xlu1 %v6691_v24, %s7559_s22  ;;  %v6693_v24 = vld [vmem:[%s7871_s2 + $0x8] sm:$0xff]   ;;  %v11513_v29 = vld [vmem:[#allocation61_spill] sm:$0xff] }
 0x37c   : > { %6825 = vpow2.f32 %v1739_v36  ;;  %6445 = vmatprep.subr.msk.bf16.mxu1 %vm869_vm2, %v2918_v44  ;;  %v6814_v3 = vpop.eup %6813  ;;  %2456 = vmatprep.mubr.bf16.mxu1 %v2237_v55  ;;  %v11512_v31 = vld [vmem:[#allocation60_spill] sm:$0xff] }
 0x37d   : > { %6827 = vpow2.f32 %v1741_v14  ;;  %v6816_v1 = vpop.eup %6815  ;;  %v1743_v45 = vmul.f32 1.442695, %v1627_v21  ;;  %v1745_v18 = vmul.f32 1.442695, %v1628_v2  ;;  %2457 = vmatmul.mubr.bf16.gmra.mxu1 %v2236_v11 }
 0x37e   : > { %6263 = vmatpush3.bf16.xpose.msra.mxu1 %v2988_v0  ;;  %v2900_v33 = vpop.permute.xlu1 %2899  ;;  %v9226_v46 = vadd.f32 %v6816_v1, %v6814_v3 }
 0x37f   : > { %v1553_v59 = vpop.permute.xlu0 %1552  ;;  %6829 = vpow2.f32 %v1743_v45  ;;  %4385 = vrot.lane.b32.xlu1 %v6692_v53, %s7559_s22  ;;  %v6694_v53 = vld [vmem:[%s7871_s2] sm:$0xff]  }
 0x380   : > { %v1629_v57 = vsub.f32 %v11510_v41, %v1553_v59  ;;  %v1630_v38 = vsub.f32 %v11511_v35, %v1553_v59  ;;  %6831 = vpow2.f32 %v1745_v18  ;;  %v11514_v35 = vld [vmem:[#allocation62_spill] sm:$0xff] }
 0x381   : > { %v6818_v47 = vpop.eup %6817 }
 0x382   : > { %v6820_v60 = vpop.eup %6819  ;;  %v1747_v5 = vmul.f32 1.442695, %v1629_v57  ;;  %v1749_v36 = vmul.f32 1.442695, %v1630_v38  ;;  %v2238_v14 = vpack.c.bf16 %v6818_v47, %v6814_v3  ;;  %v1558_v11 = vpop.permute.xlu1 %1557  ;;  %v2985_v3 = vsel %vm869_vm2, %v2900_v33, 0 }
 0x383   : > { %v2916_v6 = vpop.permute.xlu0 %2915  ;;  %v2239_v44 = vpack.c.bf16 %v6820_v60, %v6816_v1  ;;  %v9232_v55 = vadd.f32 %v6820_v60, %v6818_v47  ;;  %v1631_v21 = vsub.f32 %v11512_v31, %v1558_v11  ;;  %v1632_v2 = vsub.f32 %v11513_v29, %v1558_v11  ;;  %4383 = vrot.lane.b32.xlu1 %v6693_v24, %s7559_s22  ;;  %v11515_v24 = vld [vmem:[#allocation63_spill] sm:$0xff]  ;;  %v11516_v31 = vld [vmem:[#allocation64_spill] sm:$0xff]  ;;  %v11517_v29 = vld [vmem:[#allocation65_spill] sm:$0xff] }
 0x384   : > { %6833 = vpow2.f32 %v1747_v5  ;;  %6446 = vmatprep.subr.msk.bf16.mxu1 %vm869_vm2, %v2916_v6  ;;  %v6822_v0 = vpop.eup %6821 }
 0x385   : > { %6835 = vpow2.f32 %v1749_v36  ;;  %2464 = vmatprep.mubr.bf16.mxu1 %v2239_v44  ;;  %v6824_v45 = vpop.eup %6823  ;;  %v1751_v18 = vmul.f32 1.442695, %v1631_v21  ;;  %v1753_v1 = vmul.f32 1.442695, %v1632_v2 }
 0x386   : > { %2465 = vmatmul.mubr.bf16.gmra.mxu1 %v2238_v14  ;;  %v2898_v59 = vpop.permute.xlu1 %2897  ;;  %v9240_v57 = vadd.f32 %v6824_v45, %v6822_v0 }
 0x387   : > { %6265 = vmatpush3.bf16.xpose.msra.mxu1 %v2985_v3  ;;  %v1563_v41 = vpop.permute.xlu0 %1562  ;;  %6837 = vpow2.f32 %v1751_v18  ;;  %4381 = vrot.lane.b32.xlu1 %v6694_v53, %s7559_s22  ;;  %v2982_v18 = vsel %vm869_vm2, %v2898_v59, 0 }
 0x388   : > { %v1633_v38 = vsub.f32 %v11514_v35, %v1563_v41  ;;  %v1634_v47 = vsub.f32 %v11515_v24, %v1563_v41  ;;  %6839 = vpow2.f32 %v1753_v1 }
 0x389   : > { %v9245_v60 = vpop.eup %6825 }
 0x38a   : > { %v9247_v5 = vpop.eup %6827  ;;  %v1755_v33 = vmul.f32 1.442695, %v1633_v38  ;;  %v1757_v36 = vmul.f32 1.442695, %v1634_v47  ;;  %v2240_v14 = vpack.c.bf16 %v9245_v60, %v6822_v0  ;;  %v1568_v11 = vpop.permute.xlu1 %1567  ;;  %v11518_v38 = vld [vmem:[#allocation66_spill] sm:$0xff]  ;;  %v11519_v47 = vld [vmem:[#allocation67_spill] sm:$0xff] }
 0x38b   : > { %v2914_v6 = vpop.permute.xlu0 %2913  ;;  %v2241_v44 = vpack.c.bf16 %v9247_v5, %v6824_v45  ;;  %v1635_v21 = vsub.f32 %v11516_v31, %v1568_v11  ;;  %v1636_v2 = vsub.f32 %v11517_v29, %v1568_v11 }
 0x38c   : > { %6841 = vpow2.f32 %v1755_v33  ;;  %6447 = vmatprep.subr.msk.bf16.mxu1 %vm869_vm2, %v2914_v6  ;;  %v6830_v53 = vpop.eup %6829 }
 0x38d   : > { %6843 = vpow2.f32 %v1757_v36  ;;  %2472 = vmatprep.mubr.bf16.mxu1 %v2241_v44  ;;  %v6832_v3 = vpop.eup %6831  ;;  %v1759_v1 = vmul.f32 1.442695, %v1635_v21  ;;  %v1761_v41 = vmul.f32 1.442695, %v1636_v2 }
 0x38e   : > { %2473 = vmatmul.mubr.bf16.gmra.mxu1 %v2240_v14  ;;  %v2896_v0 = vpop.permute.xlu1 %2895  ;;  %v9255_v45 = vadd.f32 %v6832_v3, %v6830_v53 }
 0x38f   : > { %6267 = vmatpush3.bf16.xpose.msra.mxu1 %v2982_v18  ;;  %v1573_v35 = vpop.permute.xlu0 %1572  ;;  %6845 = vpow2.f32 %v1759_v1  ;;  %v2979_v29 = vsel %vm869_vm2, %v2896_v0, 0 }
 0x390   : > { %v1637_v24 = vsub.f32 %v11518_v38, %v1573_v35  ;;  %v1638_v33 = vsub.f32 %v11519_v47, %v1573_v35  ;;  %6847 = vpow2.f32 %v1761_v41 }
 0x391   : > { %v9259_v11 = vpop.eup %6833 }
 0x392   : > { %v9261_v36 = vpop.eup %6835  ;;  %v1763_v6 = vmul.f32 1.442695, %v1637_v24  ;;  %v1765_v59 = vmul.f32 1.442695, %v1638_v33  ;;  %v2242_v44 = vpack.c.bf16 %v9259_v11, %v6830_v53  ;;  %v2894_v14 = vpop.permute.xlu1 %2893 }
 0x393   : > { %v2912_v31 = vpop.permute.xlu0 %2911  ;;  %v2243_v21 = vpack.c.bf16 %v9261_v36, %v6832_v3  ;;  %v2976_v33 = vsel %vm869_vm2, %v2894_v14, 0 }
 0x394   : > { %6849 = vpow2.f32 %v1763_v6  ;;  %6448 = vmatprep.subr.msk.bf16.mxu1 %vm869_vm2, %v2912_v31  ;;  %v6838_v2 = vpop.eup %6837 }
 0x395   : > { %6851 = vpow2.f32 %v1765_v59  ;;  %2480 = vmatprep.mubr.bf16.mxu1 %v2243_v21  ;;  %v6840_v18 = vpop.eup %6839 }
 0x396   : > { %2481 = vmatmul.mubr.bf16.gmra.mxu1 %v2242_v44  ;;  %v2892_v1 = vpop.permute.xlu1 %2891  ;;  %1832 = vadd.xlane.f32.xlu0 %v8995_v12  ;;  %v9268_v53 = vadd.f32 %v6840_v18, %v6838_v2 }
 0x397   : > { %6269 = vmatpush3.bf16.xpose.msra.mxu1 %v2979_v29  ;;  %v2910_v41 = vpop.permute.xlu0 %2909 }
 0x398   : > { %6449 = vmatprep.subr.msk.bf16.mxu1 %vm869_vm2, %v2910_v41  ;;  %v2973_v41 = vsel %vm869_vm2, %v2892_v1, 0 }
 0x399   : > { %v9271_v3 = vpop.eup %6841 }
 0x39a   : > { %v9273_v0 = vpop.eup %6843  ;;  %v2244_v35 = vpack.c.bf16 %v9271_v3, %v6838_v2  ;;  %v2890_v38 = vpop.permute.xlu1 %2889  ;;  %1838 = vadd.xlane.f32.xlu0 %v9011_v51 }
 0x39b   : > { %v2908_v24 = vpop.permute.xlu0 %2907  ;;  %v2245_v47 = vpack.c.bf16 %v9273_v0, %v6840_v18 }
 0x39c   : > { %v6846_v12 = vpop.eup %6845 }
 0x39d   : > { %2488 = vmatprep.mubr.bf16.mxu1 %v2245_v47  ;;  %v6848_v6 = vpop.eup %6847  ;;  %v2970_v47 = vsel %vm869_vm2, %v2890_v38, 0 }
 0x39e   : > { %2489 = vmatmul.mubr.bf16.gmra.mxu1 %v2244_v35  ;;  %v2778_v59 = vpop.permute.xlu1 %2777  ;;  %1844 = vadd.xlane.f32.xlu0 %v9033_v28  ;;  %v9280_v31 = vadd.f32 %v6848_v6, %v6846_v12 }
 0x39f   : > { %6271 = vmatpush3.bf16.xpose.msra.mxu1 %v2976_v33  ;;  %v2906_v44 = vpop.permute.xlu0 %2905 }
 0x3a0   : > { %6450 = vmatprep.subr.msk.bf16.mxu1 %vm869_vm2, %v2908_v24 }
 0x3a1   : > { %v6850_v21 = vpop.eup %6849 }
 0x3a2   : > { %v6852_v51 = vpop.eup %6851  ;;  %v2246_v29 = vpack.c.bf16 %v6850_v21, %v6846_v12  ;;  %v2780_v2 = vpop.permute.xlu1 %2779  ;;  %1865 = vadd.xlane.f32.xlu0 %v9124_v49 }
 0x3a3   : > { %v9284_v14 = vpop.permute.xlu0 %2789  ;;  %v2247_v18 = vpack.c.bf16 %v6852_v51, %v6848_v6 }
 0x3a5   : > { %2496 = vmatprep.mubr.bf16.mxu1 %v2247_v18  ;;  %v1993_v18 = vld [vmem:[#allocation4 + $0x8] sm:$0xff] }
 0x3a6   : > { %2497 = vmatmul.mubr.bf16.gmra.mxu1 %v2246_v29  ;;  %v2782_v28 = vpop.permute.xlu1 %2781  ;;  %1871 = vadd.xlane.f32.xlu0 %v9145_v61 }
 0x3a7   : > { %6273 = vmatpush3.bf16.xpose.msra.mxu1 %v2973_v41  ;;  %v9288_v35 = vpop.permute.xlu0 %2791  ;;  %6276 = vmatprep.mubr.msk.bf16.mxu1 %vm869_vm2, %v2778_v59 }
 0x3a8   : > { %6451 = vmatprep.subr.msk.bf16.mxu1 %vm869_vm2, %v2906_v44 }
 0x3aa   : > { %v2784_v24 = vpop.permute.xlu1 %2783  ;;  %1877 = vadd.xlane.f32.xlu0 %v9166_v25 }
 0x3ab   : > { %v9293_v49 = vpop.permute.xlu0 %2793  ;;  %1835 = vadd.xlane.f32.xlu1 %v9003_v15 }
 0x3ae   : > { %v2786_v1 = vpop.permute.xlu1 %2785  ;;  %1883 = vadd.xlane.f32.xlu0 %v9184_v42 }
 0x3af   : > { %6275 = vmatpush3.bf16.xpose.msra.mxu1 %v2970_v47  ;;  %v9298_v61 = vpop.permute.xlu0 %2805  ;;  %1841 = vadd.xlane.f32.xlu1 %v9025_v62 }
 0x3b2   : > { %v2788_v33 = vpop.permute.xlu1 %2787  ;;  %1889 = vadd.xlane.f32.xlu0 %v9201_v32 }
 0x3b3   : > { %v9302_v12 = vpop.permute.xlu0 %2807  ;;  %1847 = vadd.xlane.f32.xlu1 %v9048_v56  ;;  %v1906_v56 = vadd.f32 %v9247_v5, %v9245_v60  ;;  %v1918_v60 = vadd.f32 %v9273_v0, %v9271_v3 }
 0x3b6   : > { %6277 = vmatmul.mubr.msk.bf16.vlgmr.msra.gmra.mxu1 %vm869_vm2, %v2778_v59  ;;  %v9306_v25 = vpop.permute.xlu1 %2795  ;;  %1895 = vadd.xlane.f32.xlu0 %v9218_v10 }
 0x3b7   : > { %v9309_v15 = vpop.permute.xlu0 %2031  ;;  %6278 = vmatprep.mubr.msk.bf16.mxu1 %vm869_vm2, %v2780_v2  ;;  %1850 = vadd.xlane.f32.xlu1 %v9060_v39  ;;  %v1912_v39 = vadd.f32 %v9261_v36, %v9259_v11 }
 0x3b8   : > { %v2185_v47 = vmul.f32 %v9309_v15, %v1993_v18 }
 0x3ba   : > { %v9313_v62 = vpop.permute.xlu1 %2797  ;;  %1901 = vadd.xlane.f32.xlu0 %v9232_v55 }
 0x3bb   : > { %v9316_v42 = vpop.permute.xlu0 %2046  ;;  %1853 = vadd.xlane.f32.xlu1 %v9075_v54 }
 0x3be   : > { %6279 = vmatmul.mubr.msk.bf16.gmra.mxu1 %vm869_vm2, %v2780_v2  ;;  %v9322_v32 = vpop.permute.xlu1 %2799  ;;  %1907 = vadd.xlane.f32.xlu0 %v1906_v56 }
 0x3bf   : > { %v9324_v10 = vpop.permute.xlu0 %2056  ;;  %6280 = vmatprep.mubr.msk.bf16.mxu1 %vm869_vm2, %v2782_v28  ;;  %1856 = vadd.xlane.f32.xlu1 %v9084_v16  ;;  %v1924_v16 = vadd.f32 %v6852_v51, %v6850_v21  ;;  %v1992_v51 = vld [vmem:[#allocation4] sm:$0xff] }
 0x3c2   : > { %v9330_v55 = vpop.permute.xlu1 %2801  ;;  %1913 = vadd.xlane.f32.xlu0 %v1912_v39 }
 0x3c3   : > { %v9332_v54 = vpop.permute.xlu0 %2066  ;;  %1859 = vadd.xlane.f32.xlu1 %v9099_v58 }
 0x3c6   : > { %6281 = vmatmul.mubr.msk.bf16.gmra.mxu1 %vm869_vm2, %v2782_v28  ;;  %v9338_v5 = vpop.permute.xlu1 %2803  ;;  %1919 = vadd.xlane.f32.xlu0 %v1918_v60 }
 0x3c7   : > { %v9340_v38 = vpop.permute.xlu0 %2076  ;;  %6282 = vmatprep.mubr.msk.bf16.mxu1 %vm869_vm2, %v2784_v24  ;;  %1862 = vadd.xlane.f32.xlu1 %v9109_v4 }
 0x3ca   : > { %v2027_v11 = vpop.permute.xlu1 %2026  ;;  %1925 = vadd.xlane.f32.xlu0 %v1924_v16 }
 0x3cb   : > { %v9344_v36 = vpop.permute.xlu0 %2086  ;;  %1868 = vadd.xlane.f32.xlu1 %v9133_v34 }
 0x3ce   : > { %6283 = vmatmul.mubr.msk.bf16.gmra.mxu1 %vm869_vm2, %v2784_v24  ;;  %v9348_v58 = vpop.permute.xlu1 %2036 }
 0x3cf   : > { %6284 = vmatprep.mubr.msk.bf16.mxu1 %vm869_vm2, %v2786_v1  ;;  %v4412_v3 = vpop.permute.xlu0 %4411  ;;  %1874 = vadd.xlane.f32.xlu1 %v9157_v50 }
 0x3d0   : > { %6308 = vmatprep.subr.bf16.mxu0 %v4412_v3  ;;  %6420 = vmatprep.subr.bf16.mxu1 %v4412_v3  ;;  %v1995_v3 = vld [vmem:[#allocation4 + $0x18] sm:$0xff] }
 0x3d2   : > { %v9352_v0 = vpop.permute.xlu1 %2041 }
 0x3d3   : > { %v4396_v4 = vpop.permute.xlu0 %4395  ;;  %1880 = vadd.xlane.f32.xlu1 %v9175_v13 }
 0x3d4   : > { %6309 = vmatpush3.bf16.msra.mxu0 %v4396_v4  ;;  %6428 = vmatpush3.bf16.msra.mxu1 %v4396_v4 }
 0x3d6   : > { %6285 = vmatmul.mubr.msk.bf16.gmra.mxu1 %vm869_vm2, %v2786_v1  ;;  %v9356_v34 = vpop.permute.xlu1 %2051 }
 0x3d7   : > { %6286 = vmatprep.mubr.msk.bf16.mxu1 %vm869_vm2, %v2788_v33  ;;  %1886 = vadd.xlane.f32.xlu1 %v9193_v17  ;;  %v4394_v50 = vpop.permute.xlu0 %4393 }
 0x3da   : > { %v9360_v6 = vpop.permute.xlu1 %2061 }
 0x3db   : > { %1892 = vadd.xlane.f32.xlu1 %v9211_v22  ;;  %v4408_v13 = vpop.permute.xlu0 %4407 }
 0x3de   : > { %6287 = vmatmul.mubr.msk.bf16.gmra.mxu1 %vm869_vm2, %v2788_v33  ;;  %v9364_v59 = vpop.permute.xlu1 %2071 }
 0x3df   : > { %6288 = vmatprep.mubr.msk.bf16.mxu1 %vm869_vm2, %v9284_v14  ;;  %1898 = vadd.xlane.f32.xlu1 %v9226_v46  ;;  %v4392_v22 = vpop.permute.xlu0 %4391 }
 0x3e2   : > { %v9369_v44 = vpop.permute.xlu1 %2081 }
 0x3e3   : > { %1904 = vadd.xlane.f32.xlu1 %v9240_v57  ;;  %v4406_v46 = vpop.permute.xlu0 %4405 }
 0x3e6   : > { %6289 = vmatmul.mubr.msk.bf16.gmra.mxu1 %vm869_vm2, %v9284_v14  ;;  %v9374_v17 = vpop.permute.xlu1 %2091  ;;  %v2184_v14 = vmul.f32 %v2027_v11, %v1992_v51  ;;  %v2187_v51 = vmul.f32 %v9352_v0, %v1995_v3  ;;  %v2000_v3 = vld [vmem:[#allocation4 + $0x40] sm:$0xff] }
 0x3e7   : > { %6290 = vmatprep.mubr.msk.bf16.mxu1 %vm869_vm2, %v9288_v35  ;;  %1910 = vadd.xlane.f32.xlu1 %v9255_v45  ;;  %v4404_v28 = vpop.permute.xlu0 %4403 }
 0x3ea   : > { %v9379_v21 = vpop.permute.xlu1 %2096 }
 0x3eb   : > { %1916 = vadd.xlane.f32.xlu1 %v9268_v53  ;;  %v4402_v11 = vpop.permute.xlu0 %4401 }
 0x3ed   : > { %v6164_v29 = vpop.f32.mrf.mxu1 }
 0x3ee   : > { %6291 = vmatmul.mubr.msk.bf16.gmra.mxu1 %vm869_vm2, %v9288_v35  ;;  %v4410_v57 = vpop.permute.xlu1 %4409 }
 0x3ef   : > { %6292 = vmatprep.mubr.msk.bf16.mxu1 %vm869_vm2, %v9293_v49  ;;  %v6165_v2 = vpop.f32.mrf.mxu1  ;;  %1922 = vadd.xlane.f32.xlu1 %v9280_v31  ;;  %v1994_v31 = vld [vmem:[#allocation4 + $0x10] sm:$0xff] }
 0x3f0   : > { %6310 = vmatprep.subr.bf16.mxu0 %v4410_v57  ;;  %v6166_v45 = vadd.f32 %v6165_v2, %v6164_v29  ;;  %6421 = vmatprep.subr.bf16.mxu1 %v4410_v57  ;;  %v2186_v15 = vmul.f32 %v9348_v58, %v1994_v31  ;;  %v1996_v58 = vld [vmem:[#allocation4 + $0x20] sm:$0xff]  ;;  %v4400_v57 = vpop.permute.xlu0 %4399 }
 0x3f1   : > { %6311 = vmatpush3.bf16.msra.mxu0 %v4394_v50  ;;  %v6167_v53 = vpop.f32.mrf.mxu1  ;;  %6429 = vmatpush3.bf16.msra.mxu1 %v4394_v50  ;;  %v2188_v0 = vmul.f32 %v9316_v42, %v1996_v58  ;;  %v1998_v42 = vld [vmem:[#allocation4 + $0x30] sm:$0xff] }
 0x3f2   : > { %6312 = vmatprep.subr.bf16.mxu0 %v4408_v13  ;;  %v2505_v41 = vadd.f32 %v6166_v45, %v2184_v14  ;;  %v4390_v24 = vpop.permute.xlu1 %4389  ;;  %6422 = vmatprep.subr.bf16.mxu1 %v4408_v13  ;;  %v1997_v45 = vld [vmem:[#allocation4 + $0x28] sm:$0xff] }
 0x3f3   : > { %v6168_v35 = vpop.f32.mrf.mxu1 }
 0x3f4   : > { %2537 = vst.msk [vmem:[#allocation4] sm:$0xff] %vm869_vm2, %v2505_v41  ;;  %v6169_v1 = vadd.f32 %v6168_v35, %v6167_v53  ;;  %v4398_v35 = vpop.permute.xlu0 %4397 }
 0x3f5   : > { %6313 = vmatpush3.bf16.msra.mxu0 %v4392_v22  ;;  %v6170_v33 = vpop.f32.mrf.mxu1  ;;  %6430 = vmatpush3.bf16.msra.mxu1 %v4392_v22 }
 0x3f6   : > { %6293 = vmatmul.mubr.msk.bf16.gmra.mxu1 %vm869_vm2, %v9293_v49  ;;  %6314 = vmatprep.subr.bf16.mxu0 %v4406_v46  ;;  %v2506_v56 = vadd.f32 %v6169_v1, %v2185_v47  ;;  %v4388_v39 = vpop.permute.xlu1 %4387 }
 0x3f7   : > { %6294 = vmatprep.mubr.msk.bf16.mxu1 %vm869_vm2, %v9306_v25  ;;  %v6171_v60 = vpop.f32.mrf.mxu1  ;;  %6423 = vmatprep.subr.bf16.mxu1 %v4406_v46 }
 0x3f8   : > { %2538 = vst.msk [vmem:[#allocation4 + $0x8] sm:$0xff] %vm869_vm2, %v2506_v56  ;;  %v6172_v16 = vadd.f32 %v6171_v60, %v6170_v33 }
 0x3f9   : > { %6315 = vmatpush3.bf16.msra.mxu0 %v4390_v24  ;;  %v6173_v4 = vpop.f32.mrf.mxu1  ;;  %6431 = vmatpush3.bf16.msra.mxu1 %v4390_v24 }
 0x3fa   : > { %6316 = vmatprep.subr.bf16.mxu0 %v4404_v28  ;;  %v2507_v49 = vadd.f32 %v6172_v16, %v2186_v15  ;;  %v4386_v13 = vpop.permute.xlu1 %4385  ;;  %6424 = vmatprep.subr.bf16.mxu1 %v4404_v28  ;;  %v2189_v28 = vmul.f32 %v9356_v34, %v1997_v45  ;;  %v2190_v34 = vmul.f32 %v9324_v10, %v1998_v42  ;;  %v2003_v45 = vld [vmem:[#allocation4 + $0x58] sm:$0xff] }
 0x3fb   : > { %v6174_v50 = vpop.f32.mrf.mxu1 }
 0x3fc   : > { %2539 = vst.msk [vmem:[#allocation4 + $0x10] sm:$0xff] %vm869_vm2, %v2507_v49  ;;  %v6175_v22 = vadd.f32 %v6174_v50, %v6173_v4  ;;  %v2192_v50 = vmul.f32 %v9332_v54, %v2000_v3 }
 0x3fd   : > { %6317 = vmatpush3.bf16.msra.mxu0 %v4388_v39  ;;  %v6176_v46 = vpop.f32.mrf.mxu1  ;;  %6432 = vmatpush3.bf16.msra.mxu1 %v4388_v39  ;;  %v1999_v39 = vld [vmem:[#allocation4 + $0x38] sm:$0xff] }
 0x3fe   : > { %6295 = vmatmul.mubr.msk.bf16.gmra.mxu1 %vm869_vm2, %v9306_v25  ;;  %6318 = vmatprep.subr.bf16.mxu0 %v4402_v11  ;;  %v2508_v29 = vadd.f32 %v6175_v22, %v2187_v51  ;;  %v4384_v53 = vpop.permute.xlu1 %4383  ;;  %v2191_v16 = vmul.f32 %v9360_v6, %v1999_v39  ;;  %v2001_v51 = vld [vmem:[#allocation4 + $0x48] sm:$0xff] }
 0x3ff   : > { %6296 = vmatprep.mubr.msk.bf16.mxu1 %vm869_vm2, %v9313_v62  ;;  %v6177_v2 = vpop.f32.mrf.mxu1  ;;  %6425 = vmatprep.subr.bf16.mxu1 %v4402_v11 }
 0x400   : > { %2540 = vst.msk [vmem:[#allocation4 + $0x18] sm:$0xff] %vm869_vm2, %v2508_v29  ;;  %v6178_v14 = vadd.f32 %v6177_v2, %v6176_v46  ;;  %v2193_v46 = vmul.f32 %v9364_v59, %v2001_v51 }
 0x401   : > { %6319 = vmatpush3.bf16.msra.mxu0 %v4386_v13  ;;  %v6179_v18 = vpop.f32.mrf.mxu1  ;;  %6433 = vmatpush3.bf16.msra.mxu1 %v4386_v13 }
 0x402   : > { %6320 = vmatprep.subr.bf16.mxu0 %v4400_v57  ;;  %v2509_v25 = vadd.f32 %v6178_v14, %v2188_v0  ;;  %6426 = vmatprep.subr.bf16.mxu1 %v4400_v57  ;;  %v4382_v33 = vpop.permute.xlu1 %4381 }
 0x403   : > { %v6180_v41 = vpop.f32.mrf.mxu1 }
 0x404   : > { %2541 = vst.msk [vmem:[#allocation4 + $0x20] sm:$0xff] %vm869_vm2, %v2509_v25  ;;  %v6181_v24 = vadd.f32 %v6180_v41, %v6179_v18  ;;  %v1767_v25 = vld [vmem:[#allocation3] sm:$0xff]  ;;  %v2195_v41 = vmul.f32 %v9369_v44, %v2003_v45 }
 0x405   : > { %6321 = vmatpush3.bf16.msra.mxu0 %v4384_v53  ;;  %v6182_v47 = vpop.f32.mrf.mxu1  ;;  %6434 = vmatpush3.bf16.msra.mxu1 %v4384_v53 }
 0x406   : > { %6297 = vmatmul.mubr.msk.bf16.gmra.mxu1 %vm869_vm2, %v9313_v62  ;;  %6322 = vmatprep.subr.bf16.mxu0 %v4398_v35  ;;  %v2510_v1 = vadd.f32 %v6181_v24, %v2189_v28  ;;  %v2004_v28 = vld [vmem:[#allocation4 + $0x60] sm:$0xff] }
 0x407   : > { %6298 = vmatprep.mubr.msk.bf16.mxu1 %vm869_vm2, %v9322_v32  ;;  %v6183_v31 = vpop.f32.mrf.mxu1  ;;  %6427 = vmatprep.subr.bf16.mxu1 %v4398_v35  ;;  %v11520_v35 = vld [vmem:[#allocation76_spill] sm:$0xff] }
 0x408   : > { %2542 = vst.msk [vmem:[#allocation4 + $0x28] sm:$0xff] %vm869_vm2, %v2510_v1  ;;  %v6184_v56 = vadd.f32 %v6183_v31, %v6182_v47  ;;  %v1799_v31 = vmul.f32 %v9101_v7, %v1767_v25 }
 0x409   : > { %6323 = vmatpush3.bf16.msra.mxu0 %v4382_v33  ;;  %v6185_v60 = vpop.f32.mrf.mxu1  ;;  %6435 = vmatpush3.bf16.msra.mxu1 %v4382_v33 }
 0x40a   : > { %v2511_v15 = vadd.f32 %v6184_v56, %v2190_v34  ;;  %v1769_v34 = vld [vmem:[#allocation3 + $0x10] sm:$0xff]  ;;  %v2196_v56 = vmul.f32 %v9344_v36, %v2004_v28 }
 0x40b   : > { %v6186_v62 = vpop.f32.mrf.mxu1 }
 0x40c   : > { %2543 = vst.msk [vmem:[#allocation4 + $0x30] sm:$0xff] %vm869_vm2, %v2511_v15  ;;  %v6187_v11 = vadd.f32 %v6186_v62, %v6185_v60  ;;  %v11523_v62 = vld [vmem:[#allocation80_spill] sm:$0xff] }
 0x40d   : > { %v6188_v4 = vpop.f32.mrf.mxu1 }
 0x40e   : > { %6299 = vmatmul.mubr.msk.bf16.gmra.mxu1 %vm869_vm2, %v9322_v32  ;;  %v2512_v10 = vadd.f32 %v6187_v11, %v2191_v16  ;;  %v2002_v32 = vld [vmem:[#allocation4 + $0x50] sm:$0xff] }
 0x40f   : > { %6300 = vmatprep.mubr.msk.bf16.mxu1 %vm869_vm2, %v9330_v55  ;;  %v6189_v49 = vpop.f32.mrf.mxu1  ;;  %v2194_v0 = vmul.f32 %v9340_v38, %v2002_v32  ;;  %v11521_v38 = vld [vmem:[#allocation77_spill] sm:$0xff] }
 0x410   : > { %2544 = vst.msk [vmem:[#allocation4 + $0x38] sm:$0xff] %vm869_vm2, %v2512_v10  ;;  %v6190_v13 = vadd.f32 %v6189_v49, %v6188_v4  ;;  %v11522_v42 = vsub.f32 %v11520_v35, %v11521_v38  ;;  %v11524_v16 = vld [vmem:[#allocation81_spill] sm:$0xff]  ;;  %v1801_v4 = vmul.f32 %v9119_v63, %v1769_v34 }
 0x411   : > { %v6191_v6 = vpop.f32.mrf.mxu1  ;;  %v11525_v11 = vsub.f32 %v11523_v62, %v11524_v16  ;;  %v11538_v62 = vld [vmem:[#allocation97_spill] sm:$0xff] }
 0x412   : > { %v2513_v22 = vadd.f32 %v6190_v13, %v2192_v50  ;;  %v1381_v47 = vmul.f32 1.442695, %v11522_v42  ;;  %v1771_v50 = vld [vmem:[#allocation3 + $0x20] sm:$0xff]  ;;  %v11533_v42 = vld [vmem:[#allocation92_spill] sm:$0xff] }
 0x413   : > { %v6192_v58 = vpop.f32.mrf.mxu1  ;;  %v1385_v3 = vmul.f32 1.442695, %v11525_v11 }
 0x414   : > { %2545 = vst.msk [vmem:[#allocation4 + $0x40] sm:$0xff] %vm869_vm2, %v2513_v22  ;;  %v6193_v29 = vadd.f32 %v6192_v58, %v6191_v6  ;;  %6853 = vpow2.f32 %v1381_v47  ;;  %v2006_v6 = vld [vmem:[#allocation4 + $0x70] sm:$0xff] }
 0x415   : > { %v6194_v57 = vpop.f32.mrf.mxu1  ;;  %6855 = vpow2.f32 %v1385_v3  ;;  %v11526_v58 = vld [vmem:[#allocation84_spill] sm:$0xff]  ;;  %v11534_v47 = vld [vmem:[#allocation93_spill] sm:$0xff] }
 0x416   : > { %6301 = vmatmul.mubr.msk.bf16.gmra.mxu1 %vm869_vm2, %v9330_v55  ;;  %v2514_v2 = vadd.f32 %v6193_v29, %v2193_v46  ;;  %v11527_v46 = vld [vmem:[#allocation85_spill] sm:$0xff] }
 0x417   : > { %6302 = vmatprep.mubr.msk.bf16.mxu1 %vm869_vm2, %v9338_v5  ;;  %v6195_v54 = vpop.f32.mrf.mxu1  ;;  %v11528_v29 = vsub.f32 %v11526_v58, %v11527_v46  ;;  %v11542_v58 = vld [vmem:[#allocation100_spill] sm:$0xff]  ;;  %v11543_v46 = vld [vmem:[#allocation101_spill] sm:$0xff] }
 0x418   : > { %2546 = vst.msk [vmem:[#allocation4 + $0x48] sm:$0xff] %vm869_vm2, %v2514_v2  ;;  %v6196_v14 = vadd.f32 %v6195_v54, %v6194_v57  ;;  %v1803_v57 = vmul.f32 %v9050_v9, %v1771_v50  ;;  %v1778_v54 = vld [vmem:[#allocation3 + $0x58] sm:$0xff] }
 0x419   : > { %v6197_v59 = vpop.f32.mrf.mxu1  ;;  %v1389_v32 = vmul.f32 1.442695, %v11528_v29  ;;  %v1810_v9 = vmul.f32 %v9168_v48, %v1778_v54  ;;  %v11544_v29 = vsub.f32 %v11542_v58, %v11543_v46  ;;  %v1786_v54 = vld [vmem:[#allocation3 + $0x98] sm:$0xff]  ;;  %v1792_v58 = vld [vmem:[#allocation3 + $0xc8] sm:$0xff] }
 0x41a   : > { %v2515_v18 = vadd.f32 %v6196_v14, %v2194_v0  ;;  %v2198_v0 = vmul.f32 %v9379_v21, %v2006_v6 }
 0x41b   : > { %v6198_v53 = vpop.f32.mrf.mxu1  ;;  %6857 = vpow2.f32 %v1389_v32  ;;  %v1405_v32 = vmul.f32 1.442695, %v11544_v29 }
 0x41c   : > { %2547 = vst.msk [vmem:[#allocation4 + $0x50] sm:$0xff] %vm869_vm2, %v2515_v18  ;;  %v6199_v55 = vadd.f32 %v6198_v53, %v6197_v59  ;;  %v11529_v59 = vld [vmem:[#allocation88_spill] sm:$0xff]  ;;  %v11530_v18 = vld [vmem:[#allocation89_spill] sm:$0xff] }
 0x41d   : > { %v6200_v24 = vpop.f32.mrf.mxu1  ;;  %v11531_v53 = vsub.f32 %v11529_v59, %v11530_v18 }
 0x41e   : > { %6303 = vmatmul.mubr.msk.bf16.gmra.mxu1 %vm869_vm2, %v9338_v5  ;;  %v2516_v1 = vadd.f32 %v6199_v55, %v2195_v41  ;;  %v2005_v5 = vld [vmem:[#allocation4 + $0x68] sm:$0xff] }
 0x41f   : > { %6304 = vmatprep.mubr.msk.bf16.mxu1 %vm869_vm2, %v9298_v61  ;;  %v6201_v33 = vpop.f32.mrf.mxu1  ;;  %v1833_v44 = vpop.xlane.xlu0 %1832  ;;  %v2197_v36 = vmul.f32 %v9374_v17, %v2005_v5  ;;  %v1393_v25 = vmul.f32 1.442695, %v11531_v53  ;;  %v1768_v5 = vld [vmem:[#allocation3 + $0x8] sm:$0xff] }
 0x420   : > { %2548 = vst.msk [vmem:[#allocation4 + $0x58] sm:$0xff] %vm869_vm2, %v2516_v1  ;;  %v6202_v39 = vadd.f32 %v6201_v33, %v6200_v24  ;;  %v1927_v60 = vadd.f32 %v1833_v44, %v1799_v31  ;;  %v1780_v24 = vld [vmem:[#allocation3 + $0x68] sm:$0xff]  ;;  %v11535_v1 = vsub.f32 %v11533_v42, %v11534_v47 }
 0x421   : > { %v6203_v15 = vpop.f32.mrf.mxu1  ;;  %6859 = vpow2.f32 %v1393_v25  ;;  %v1812_v48 = vmul.f32 %v9182_v26, %v1780_v24  ;;  %v9472_v33 = vpop.eup %6853  ;;  %v11547_v53 = vld [vmem:[#allocation104_spill] sm:$0xff]  ;;  %v11548_v25 = vld [vmem:[#allocation105_spill] sm:$0xff] }
 0x422   : > { %v2517_v7 = vadd.f32 %v6202_v39, %v2196_v56  ;;  %1960 = vst.msk [vmem:[#allocation3] sm:$0xff] %vm1959_vm3, %v1927_v60  ;;  %v1397_v31 = vmul.f32 1.442695, %v11535_v1  ;;  %v1782_v56 = vld [vmem:[#allocation3 + $0x78] sm:$0xff]  ;;  %v9481_v26 = vpop.eup %6855 }
 0x423   : > { %v6204_v10 = vpop.f32.mrf.mxu1  ;;  %v1839_v49 = vpop.xlane.xlu0 %1838  ;;  %v1814_v3 = vmul.f32 %v9472_v33, %v1782_v56  ;;  %11540 = vst [vmem:[#allocation35_spill] sm:$0xff] %v9481_v26  ;;  %v11553_v56 = vld [vmem:[#allocation109_spill] sm:$0xff] }
 0x424   : > { %2549 = vst.msk [vmem:[#allocation4 + $0x60] sm:$0xff] %vm869_vm2, %v2517_v7  ;;  %v6205_v13 = vadd.f32 %v6204_v10, %v6203_v15  ;;  %v1929_v51 = vadd.f32 %v1839_v49, %v1801_v4  ;;  %6861 = vpow2.f32 %v1397_v31  ;;  %v1800_v10 = vmul.f32 %v9043_v19, %v1768_v5  ;;  %v1784_v49 = vld [vmem:[#allocation3 + $0x88] sm:$0xff]  ;;  %v1773_v31 = vld [vmem:[#allocation3 + $0x30] sm:$0xff] }
 0x425   : > { %v6206_v22 = vpop.f32.mrf.mxu1 }
 0x426   : > { %6305 = vmatmul.mubr.msk.bf16.gmra.mxu1 %vm869_vm2, %v9298_v61  ;;  %v2518_v63 = vadd.f32 %v6205_v13, %v2197_v36  ;;  %1962 = vst.msk [vmem:[#allocation3 + $0x10] sm:$0xff] %vm1959_vm3, %v1929_v51  ;;  %v1770_v51 = vld [vmem:[#allocation3 + $0x18] sm:$0xff] }
 0x427   : > { %6306 = vmatprep.mubr.msk.bf16.mxu1 %vm869_vm2, %v9302_v12  ;;  %v6207_v17 = vpop.f32.mrf.mxu1  ;;  %v1845_v2 = vpop.xlane.xlu0 %1844 }
 0x428   : > { %2550 = vst.msk [vmem:[#allocation4 + $0x68] sm:$0xff] %vm869_vm2, %v2518_v63  ;;  %v6208_v61 = vadd.f32 %v6207_v17, %v6206_v22  ;;  %v1931_v14 = vadd.f32 %v1845_v2, %v1803_v57  ;;  %v1816_v63 = vmul.f32 %v9481_v26, %v1784_v49  ;;  %v9491_v57 = vpop.eup %6857  ;;  %v1802_v2 = vmul.f32 %v9126_v40, %v1770_v51 }
 0x429   : > { %v6209_v45 = vpop.f32.mrf.mxu1  ;;  %11545 = vst [vmem:[#allocation69_spill] sm:$0xff] %v9491_v57 }
 0x42a   : > { %v2519_v41 = vadd.f32 %v6208_v61, %v2198_v0  ;;  %1964 = vst.msk [vmem:[#allocation3 + $0x20] sm:$0xff] %vm1959_vm3, %v1931_v14 }
 0x42b   : > { %v6210_v55 = vpop.f32.mrf.mxu1  ;;  %v1866_v28 = vpop.xlane.xlu0 %1865 }
 0x42c   : > { %2551 = vst.msk [vmem:[#allocation4 + $0x70] sm:$0xff] %vm869_vm2, %v2519_v41  ;;  %v9463_v21 = vadd.f32 %v6210_v55, %v6209_v45  ;;  %v1938_v35 = vadd.f32 %v1866_v28, %v1810_v9  ;;  %v1772_v45 = vld [vmem:[#allocation3 + $0x28] sm:$0xff]  ;;  %v11549_v41 = vsub.f32 %v11547_v53, %v11548_v25  ;;  %v1818_v55 = vmul.f32 %v9491_v57, %v1786_v54  ;;  %v1794_v25 = vld [vmem:[#allocation3 + $0xd8] sm:$0xff] }
 0x42d   : > { %v6212_v38 = vpop.f32.mrf.mxu1  ;;  %v10020_v57 = vld [vmem:[#allocation2 + $0x178] sm:$0xff] }
 0x42e   : > { %11532 = vst [vmem:[#allocation33_spill] sm:$0xff] %v9463_v21  ;;  %6307 = vmatmul.mubr.msk.bf16.gmra.mxu1 %vm869_vm2, %v9302_v12  ;;  %1971 = vst.msk [vmem:[#allocation3 + $0x58] sm:$0xff] %vm1959_vm3, %v1938_v35  ;;  %v11537_v12 = vld [vmem:[#allocation96_spill] sm:$0xff]  ;;  %v1409_v9 = vmul.f32 1.442695, %v11549_v41  ;;  %v9502_v28 = vpop.eup %6859  ;;  %v1804_v35 = vmul.f32 %v9143_v23, %v1772_v45 }
 0x42f   : > { %v6213_v44 = vpop.f32.mrf.mxu1  ;;  %v1872_v34 = vpop.xlane.xlu0 %1871  ;;  %v11539_v16 = vsub.f32 %v11537_v12, %v11538_v62  ;;  %11550 = vst [vmem:[#allocation71_spill] sm:$0xff] %v9502_v28  ;;  %11653 = vst [vmem:[#allocation111_spill] sm:$0xff] %v10020_v57 }
 0x430   : > { %v9474_v39 = vadd.f32 %v6213_v44, %v6212_v38  ;;  %v1940_v60 = vadd.f32 %v1872_v34, %v1812_v48  ;;  %v1788_v38 = vld [vmem:[#allocation3 + $0xa8] sm:$0xff] }
 0x431   : > { %v6215_v15 = vpop.f32.mrf.mxu1  ;;  %v1401_v11 = vmul.f32 1.442695, %v11539_v16  ;;  %v11552_v34 = vld [vmem:[#allocation108_spill] sm:$0xff]  ;;  %v9513_v12 = vpop.eup %6861  ;;  %v1805_v16 = vmul.f32 %v9070_v43, %v1773_v31  ;;  %v11566_v31 = vld [vmem:[#allocation83_spill] sm:$0xff] }
 0x432   : > { %11536 = vst [vmem:[#allocation34_spill] sm:$0xff] %v9474_v39  ;;  %1973 = vst.msk [vmem:[#allocation3 + $0x68] sm:$0xff] %vm1959_vm3, %v1940_v60  ;;  %v11554_v60 = vsub.f32 %v11552_v34, %v11553_v56 }
 0x433   : > { %v6216_v7 = vpop.f32.mrf.mxu1  ;;  %v1878_v4 = vpop.xlane.xlu0 %1877  ;;  %6863 = vpow2.f32 %v1401_v11  ;;  %11555 = vst [vmem:[#allocation37_spill] sm:$0xff] %v9513_v12  ;;  %v1790_v11 = vld [vmem:[#allocation3 + $0xb8] sm:$0xff] }
 0x434   : > { %v9484_v50 = vadd.f32 %v6216_v7, %v6215_v15  ;;  %v1942_v36 = vadd.f32 %v1878_v4, %v1814_v3  ;;  %v1836_v13 = vpop.xlane.xlu1 %1835  ;;  %6865 = vpow2.f32 %v1405_v32  ;;  %v1413_v5 = vmul.f32 1.442695, %v11554_v60  ;;  %v1796_v60 = vld [vmem:[#allocation3 + $0xe8] sm:$0xff] }
 0x435   : > { %v1928_v6 = vadd.f32 %v1836_v13, %v1800_v10  ;;  %v6218_v22 = vpop.f32.mrf.mxu1  ;;  %6867 = vpow2.f32 %v1409_v9  ;;  %v1820_v15 = vmul.f32 %v9502_v28, %v1788_v38  ;;  %v1774_v10 = vld [vmem:[#allocation3 + $0x38] sm:$0xff]  ;;  %v1822_v13 = vmul.f32 %v9513_v12, %v1790_v11 }
 0x436   : > { %11541 = vst [vmem:[#allocation68_spill] sm:$0xff] %v9484_v50  ;;  %1975 = vst.msk [vmem:[#allocation3 + $0x78] sm:$0xff] %vm1959_vm3, %v1942_v36  ;;  %6869 = vpow2.f32 %v1413_v5  ;;  %v1806_v43 = vmul.f32 %v9147_v30, %v1774_v10  ;;  %v11570_v10 = vld [vmem:[#allocation86_spill] sm:$0xff] }
 0x437   : > { %1961 = vst.msk [vmem:[#allocation3 + $0x8] sm:$0xff] %vm1959_vm3, %v1928_v6  ;;  %v6219_v19 = vpop.f32.mrf.mxu1  ;;  %v1884_v17 = vpop.xlane.xlu0 %1883 }
 0x438   : > { %v9495_v0 = vadd.f32 %v6219_v19, %v6218_v22  ;;  %v1944_v61 = vadd.f32 %v1884_v17, %v1816_v63  ;;  %v1842_v14 = vpop.xlane.xlu1 %1841  ;;  %v1775_v63 = vld [vmem:[#allocation3 + $0x40] sm:$0xff] }
 0x439   : > { %v1930_v59 = vadd.f32 %v1842_v14, %v1802_v2  ;;  %v6221_v18 = vpop.f32.mrf.mxu1  ;;  %v11561_v14 = vld [vmem:[#allocation79_spill] sm:$0xff]  ;;  %v1807_v53 = vmul.f32 %v9077_v37, %v1775_v63 }
 0x43a   : > { %11546 = vst [vmem:[#allocation70_spill] sm:$0xff] %v9495_v0  ;;  %1977 = vst.msk [vmem:[#allocation3 + $0x88] sm:$0xff] %vm1959_vm3, %v1944_v61  ;;  %v11560_v61 = vld [vmem:[#allocation78_spill] sm:$0xff] }
 0x43b   : > { %1963 = vst.msk [vmem:[#allocation3 + $0x18] sm:$0xff] %vm1959_vm3, %v1930_v59  ;;  %v6222_v40 = vpop.f32.mrf.mxu1  ;;  %v1890_v24 = vpop.xlane.xlu0 %1889  ;;  %v11562_v45 = vsub.f32 %v11560_v61, %v11561_v14  ;;  %v1779_v63 = vld [vmem:[#allocation3 + $0x60] sm:$0xff] }
 0x43c   : > { %v9506_v42 = vadd.f32 %v6222_v40, %v6221_v18  ;;  %v1946_v47 = vadd.f32 %v1890_v24, %v1818_v55  ;;  %v1848_v1 = vpop.xlane.xlu1 %1847  ;;  %v1776_v40 = vld [vmem:[#allocation3 + $0x48] sm:$0xff]  ;;  %v11574_v61 = vld [vmem:[#allocation90_spill] sm:$0xff] }
 0x43d   : > { %v1932_v48 = vadd.f32 %v1848_v1, %v1804_v35  ;;  %v6224_v44 = vpop.f32.mrf.mxu1  ;;  %v1383_v59 = vmul.f32 1.442695, %v11562_v45  ;;  %v11565_v1 = vld [vmem:[#allocation82_spill] sm:$0xff]  ;;  %v1808_v56 = vmul.f32 %v9164_v20, %v1776_v40  ;;  %v11575_v14 = vld [vmem:[#allocation91_spill] sm:$0xff] }
 0x43e   : > { %11551 = vst [vmem:[#allocation36_spill] sm:$0xff] %v9506_v42  ;;  %1979 = vst.msk [vmem:[#allocation3 + $0x98] sm:$0xff] %vm1959_vm3, %v1946_v47  ;;  %v11576_v45 = vsub.f32 %v11574_v61, %v11575_v14  ;;  %v1787_v14 = vld [vmem:[#allocation3 + $0xa0] sm:$0xff] }
 0x43f   : > { %1965 = vst.msk [vmem:[#allocation3 + $0x28] sm:$0xff] %vm1959_vm3, %v1932_v48  ;;  %v6225_v23 = vpop.f32.mrf.mxu1  ;;  %v1896_v62 = vpop.xlane.xlu0 %1895  ;;  %6871 = vpow2.f32 %v1383_v59  ;;  %v11567_v48 = vsub.f32 %v11565_v1, %v11566_v31 }
 0x440   : > { %v9517_v3 = vadd.f32 %v6225_v23, %v6224_v44  ;;  %v1948_v7 = vadd.f32 %v1896_v62, %v1820_v15  ;;  %v1851_v4 = vpop.xlane.xlu1 %1850  ;;  %v9521_v51 = vpop.eup %6863  ;;  %v1777_v62 = vld [vmem:[#allocation3 + $0x50] sm:$0xff]  ;;  %v1395_v59 = vmul.f32 1.442695, %v11576_v45 }
 0x441   : > { %v1933_v49 = vadd.f32 %v1851_v4, %v1805_v16  ;;  %v6227_v36 = vpop.f32.mrf.mxu1  ;;  %11557 = vst [vmem:[#allocation39_spill] sm:$0xff] %v9521_v51  ;;  %v1824_v2 = vmul.f32 %v9521_v51, %v1792_v58  ;;  %v9529_v54 = vpop.eup %6865  ;;  %v1387_v44 = vmul.f32 1.442695, %v11567_v48 }
 0x442   : > { %11556 = vst [vmem:[#allocation38_spill] sm:$0xff] %v9517_v3  ;;  %1981 = vst.msk [vmem:[#allocation3 + $0xa8] sm:$0xff] %vm1959_vm3, %v1948_v7  ;;  %v1826_v38 = vmul.f32 %v9529_v54, %v1794_v25  ;;  %v9540_v47 = vpop.eup %6867 }
 0x443   : > { %1966 = vst.msk [vmem:[#allocation3 + $0x30] sm:$0xff] %vm1959_vm3, %v1933_v49  ;;  %v6228_v6 = vpop.f32.mrf.mxu1  ;;  %v1902_v22 = vpop.xlane.xlu0 %1901  ;;  %11559 = vst [vmem:[#allocation73_spill] sm:$0xff] %v9529_v54  ;;  %v1828_v7 = vmul.f32 %v9540_v47, %v1796_v60  ;;  %6873 = vpow2.f32 %v1387_v44  ;;  %v11571_v49 = vld [vmem:[#allocation87_spill] sm:$0xff] }
 0x444   : > { %v9525_v46 = vadd.f32 %v6228_v6, %v6227_v36  ;;  %v1950_v29 = vadd.f32 %v1902_v22, %v1822_v13  ;;  %v1854_v32 = vpop.xlane.xlu1 %1853  ;;  %11564 = vst [vmem:[#allocation41_spill] sm:$0xff] %v9540_v47  ;;  %v9551_v4 = vpop.eup %6869  ;;  %v11572_v36 = vsub.f32 %v11570_v10, %v11571_v49  ;;  %v1809_v22 = vmul.f32 %v9094_v52, %v1777_v62  ;;  %v11583_v62 = vld [vmem:[#allocation99_spill] sm:$0xff] }
 0x445   : > { %v1934_v19 = vadd.f32 %v1854_v32, %v1806_v43  ;;  %11569 = vst [vmem:[#allocation75_spill] sm:$0xff] %v9551_v4  ;;  %v1798_v43 = vld [vmem:[#allocation3 + $0xf8] sm:$0xff] }
 0x446   : > { %11558 = vst [vmem:[#allocation72_spill] sm:$0xff] %v9525_v46  ;;  %v6230_v17 = vpop.f32.mrf.mxu1  ;;  %1983 = vst.msk [vmem:[#allocation3 + $0xb8] sm:$0xff] %vm1959_vm3, %v1950_v29  ;;  %v1391_v13 = vmul.f32 1.442695, %v11572_v36 }
 0x447   : > { %1967 = vst.msk [vmem:[#allocation3 + $0x38] sm:$0xff] %vm1959_vm3, %v1934_v19  ;;  %v1908_v18 = vpop.xlane.xlu0 %1907 }
 0x448   : > { %v6231_v30 = vpop.f32.mrf.mxu1  ;;  %v1952_v9 = vadd.f32 %v1908_v18, %v1824_v2  ;;  %v1857_v55 = vpop.xlane.xlu1 %1856  ;;  %v1830_v2 = vmul.f32 %v9551_v4, %v1798_v43  ;;  %6875 = vpow2.f32 %v1391_v13  ;;  %v1811_v18 = vmul.f32 %v9107_v27, %v1779_v63  ;;  %v1785_v13 = vld [vmem:[#allocation3 + $0x90] sm:$0xff]  ;;  %v11588_v43 = vld [vmem:[#allocation103_spill] sm:$0xff] }
 0x449   : > { %v9536_v41 = vadd.f32 %v6231_v30, %v6230_v17  ;;  %v1935_v24 = vadd.f32 %v1857_v55, %v1807_v53  ;;  %v1781_v55 = vld [vmem:[#allocation3 + $0x70] sm:$0xff]  ;;  %6877 = vpow2.f32 %v1395_v59 }
 0x44a   : > { %v6233_v35 = vpop.f32.mrf.mxu1  ;;  %1985 = vst.msk [vmem:[#allocation3 + $0xc8] sm:$0xff] %vm1959_vm3, %v1952_v9  ;;  %v1813_v44 = vmul.f32 %v9191_v8, %v1781_v55 }
 0x44b   : > { %11563 = vst [vmem:[#allocation40_spill] sm:$0xff] %v9536_v41  ;;  %1968 = vst.msk [vmem:[#allocation3 + $0x40] sm:$0xff] %vm1959_vm3, %v1935_v24  ;;  %v1914_v34 = vpop.xlane.xlu0 %1913 }
 0x44c   : > { %v6234_v37 = vpop.f32.mrf.mxu1  ;;  %v1954_v15 = vadd.f32 %v1914_v34, %v1826_v38  ;;  %v1860_v23 = vpop.xlane.xlu1 %1859  ;;  %v11579_v38 = vld [vmem:[#allocation95_spill] sm:$0xff] }
 0x44d   : > { %v9547_v5 = vadd.f32 %v6234_v37, %v6233_v35  ;;  %v1936_v16 = vadd.f32 %v1860_v23, %v1808_v56  ;;  %v11578_v35 = vld [vmem:[#allocation94_spill] sm:$0xff]  ;;  %v9575_v27 = vpop.eup %6871 }
 0x44e   : > { %v6236_v11 = vpop.f32.mrf.mxu1  ;;  %1987 = vst.msk [vmem:[#allocation3 + $0xd8] sm:$0xff] %vm1959_vm3, %v1954_v15  ;;  %v11580_v1 = vsub.f32 %v11578_v35, %v11579_v38  ;;  %v1783_v56 = vld [vmem:[#allocation3 + $0x80] sm:$0xff]  ;;  %v1789_v38 = vld [vmem:[#allocation3 + $0xb0] sm:$0xff] }
 0x44f   : > { %11568 = vst [vmem:[#allocation74_spill] sm:$0xff] %v9547_v5  ;;  %1969 = vst.msk [vmem:[#allocation3 + $0x48] sm:$0xff] %vm1959_vm3, %v1936_v16  ;;  %v1920_v6 = vpop.xlane.xlu0 %1919  ;;  %v11582_v23 = vld [vmem:[#allocation98_spill] sm:$0xff]  ;;  %v1815_v10 = vmul.f32 %v9575_v27, %v1783_v56 }
 0x450   : > { %v6237_v20 = vpop.f32.mrf.mxu1  ;;  %v1956_v29 = vadd.f32 %v1920_v6, %v1828_v7  ;;  %v1863_v32 = vpop.xlane.xlu1 %1862  ;;  %v1399_v31 = vmul.f32 1.442695, %v11580_v1  ;;  %v11584_v16 = vsub.f32 %v11582_v23, %v11583_v62 }
 0x451   : > { %v9558_v58 = vadd.f32 %v6237_v20, %v6236_v11  ;;  %v1937_v19 = vadd.f32 %v1863_v32, %v1809_v22  ;;  %v9584_v49 = vpop.eup %6873  ;;  %v11587_v22 = vld [vmem:[#allocation102_spill] sm:$0xff] }
 0x452   : > { %v6239_v17 = vpop.f32.mrf.mxu1  ;;  %1989 = vst.msk [vmem:[#allocation3 + $0xe8] sm:$0xff] %vm1959_vm3, %v1956_v29  ;;  %6879 = vpow2.f32 %v1399_v31  ;;  %v1403_v11 = vmul.f32 1.442695, %v11584_v16  ;;  %11585 = vst [vmem:[#allocation45_spill] sm:$0xff] %v9584_v49  ;;  %v11589_v29 = vsub.f32 %v11587_v22, %v11588_v43 }
 0x453   : > { %11573 = vst [vmem:[#allocation42_spill] sm:$0xff] %v9558_v58  ;;  %1970 = vst.msk [vmem:[#allocation3 + $0x50] sm:$0xff] %vm1959_vm3, %v1937_v19  ;;  %v1926_v30 = vpop.xlane.xlu0 %1925  ;;  %v1817_v19 = vmul.f32 %v9584_v49, %v1785_v13  ;;  %v1793_v13 = vld [vmem:[#allocation3 + $0xd0] sm:$0xff] }
 0x454   : > { %v6240_v52 = vpop.f32.mrf.mxu1  ;;  %v1958_v25 = vadd.f32 %v1926_v30, %v1830_v2  ;;  %v1869_v9 = vpop.xlane.xlu1 %1868  ;;  %6881 = vpow2.f32 %v1403_v11  ;;  %v1407_v32 = vmul.f32 1.442695, %v11589_v29  ;;  %v11593_v30 = vld [vmem:[#allocation107_spill] sm:$0xff] }
 0x455   : > { %v9567_v53 = vadd.f32 %v6240_v52, %v6239_v17  ;;  %v1939_v40 = vadd.f32 %v1869_v9, %v1811_v18  ;;  %v9593_v17 = vpop.eup %6875  ;;  %v11592_v52 = vld [vmem:[#allocation106_spill] sm:$0xff] }
 0x456   : > { %v6242_v24 = vpop.f32.mrf.mxu1  ;;  %1991 = vst.msk [vmem:[#allocation3 + $0xf8] sm:$0xff] %vm1959_vm3, %v1958_v25  ;;  %11590 = vst [vmem:[#allocation47_spill] sm:$0xff] %v9593_v17  ;;  %6883 = vpow2.f32 %v1407_v32  ;;  %v11594_v18 = vsub.f32 %v11592_v52, %v11593_v30  ;;  %v1819_v55 = vmul.f32 %v9593_v17, %v1787_v14  ;;  %v1795_v29 = vld [vmem:[#allocation3 + $0xe0] sm:$0xff]  ;;  %v1797_v14 = vld [vmem:[#allocation3 + $0xf0] sm:$0xff] }
 0x457   : > { %11577 = vst [vmem:[#allocation43_spill] sm:$0xff] %v9567_v53  ;;  %1972 = vst.msk [vmem:[#allocation3 + $0x60] sm:$0xff] %vm1959_vm3, %v1939_v40  ;;  %v9602_v40 = vpop.eup %6877 }
 0x458   : > { %v6243_v48 = vpop.f32.mrf.mxu1  ;;  %v1875_v34 = vpop.xlane.xlu1 %1874  ;;  %v1411_v25 = vmul.f32 1.442695, %v11594_v18  ;;  %11595 = vst [vmem:[#allocation49_spill] sm:$0xff] %v9602_v40  ;;  %v11603_v18 = vld [vmem:[#allocation31_spill] sm:$0xff] }
 0x459   : > { %v9577_v37 = vadd.f32 %v6243_v48, %v6242_v24  ;;  %v1941_v60 = vadd.f32 %v1875_v34, %v1813_v44  ;;  %v1821_v44 = vmul.f32 %v9602_v40, %v1789_v38  ;;  %v9944_v40 = vld [vmem:[#allocation2 + $0x140] sm:$0xff] }
 0x45a   : > { %v6245_v15 = vpop.f32.mrf.mxu1  ;;  %6885 = vpow2.f32 %v1411_v25 }
 0x45b   : > { %11581 = vst [vmem:[#allocation44_spill] sm:$0xff] %v9577_v37  ;;  %1974 = vst.msk [vmem:[#allocation3 + $0x70] sm:$0xff] %vm1959_vm3, %v1941_v60 }
 0x45c   : > { %v6246_v7 = vpop.f32.mrf.mxu1  ;;  %v1881_v36 = vpop.xlane.xlu1 %1880 }
 0x45d   : > { %v9586_v8 = vadd.f32 %v6246_v7, %v6245_v15  ;;  %v1943_v20 = vadd.f32 %v1881_v36, %v1815_v10  ;;  %v1791_v15 = vld [vmem:[#allocation3 + $0xc0] sm:$0xff] }
 0x45e   : > { %v6248_v6 = vpop.f32.mrf.mxu1 }
 0x45f   : > { %11586 = vst [vmem:[#allocation46_spill] sm:$0xff] %v9586_v8  ;;  %1976 = vst.msk [vmem:[#allocation3 + $0x80] sm:$0xff] %vm1959_vm3, %v1943_v20  ;;  %v9608_v34 = vpop.eup %6879 }
 0x460   : > { %v6249_v63 = vpop.f32.mrf.mxu1  ;;  %v1887_v61 = vpop.xlane.xlu1 %1886  ;;  %11597 = vst [vmem:[#allocation51_spill] sm:$0xff] %v9608_v34  ;;  %v1823_v11 = vmul.f32 %v9608_v34, %v1791_v15  ;;  %v9914_v34 = vld [vmem:[#allocation2 + $0x128] sm:$0xff] }
 0x461   : > { %v9595_v2 = vadd.f32 %v6249_v63, %v6248_v6  ;;  %v1945_v45 = vadd.f32 %v1887_v61, %v1817_v19  ;;  %v9614_v7 = vpop.eup %6881 }
 0x462   : > { %v6251_v59 = vpop.f32.mrf.mxu1  ;;  %11599 = vst [vmem:[#allocation53_spill] sm:$0xff] %v9614_v7  ;;  %v1825_v6 = vmul.f32 %v9614_v7, %v1793_v13 }
 0x463   : > { %11591 = vst [vmem:[#allocation48_spill] sm:$0xff] %v9595_v2  ;;  %1978 = vst.msk [vmem:[#allocation3 + $0x90] sm:$0xff] %vm1959_vm3, %v1945_v45  ;;  %v9620_v22 = vpop.eup %6883 }
 0x464   : > { %v6252_v9 = vpop.f32.mrf.mxu1  ;;  %v1893_v35 = vpop.xlane.xlu1 %1892  ;;  %11601 = vst [vmem:[#allocation55_spill] sm:$0xff] %v9620_v22  ;;  %v1827_v63 = vmul.f32 %v9620_v22, %v1795_v29 }
 0x465   : > { %v9604_v24 = vadd.f32 %v6252_v9, %v6251_v59  ;;  %v1947_v1 = vadd.f32 %v1893_v35, %v1819_v55  ;;  %v11604_v9 = vld [vmem:[#allocation32_spill] sm:$0xff] }
 0x466   : > { %v6254_v31 = vpop.f32.mrf.mxu1 }
 0x467   : > { %11596 = vst [vmem:[#allocation50_spill] sm:$0xff] %v9604_v24  ;;  %1980 = vst.msk [vmem:[#allocation3 + $0xa0] sm:$0xff] %vm1959_vm3, %v1947_v1  ;;  %v9624_v19 = vpop.eup %6885 }
 0x468   : > { %v6255_v48 = vpop.f32.mrf.mxu1  ;;  %v1899_v60 = vpop.xlane.xlu1 %1898  ;;  %11602 = vst [vmem:[#allocation56_spill] sm:$0xff] %v9624_v19  ;;  %v1829_v30 = vmul.f32 %v9624_v19, %v1797_v14 }
 0x469   : > { %v9610_v56 = vadd.f32 %v6255_v48, %v6254_v31  ;;  %v1949_v23 = vadd.f32 %v1899_v60, %v1821_v44 }
 0x46a   : > { %v6257_v62 = vpop.f32.mrf.mxu1 }
 0x46b   : > { %11598 = vst [vmem:[#allocation52_spill] sm:$0xff] %v9610_v56  ;;  %1982 = vst.msk [vmem:[#allocation3 + $0xb0] sm:$0xff] %vm1959_vm3, %v1949_v23 }
 0x46c   : > { %v6258_v16 = vpop.f32.mrf.mxu1  ;;  %v1905_v36 = vpop.xlane.xlu1 %1904 }
 0x46d   : > { %v9616_v10 = vadd.f32 %v6258_v16, %v6257_v62  ;;  %v1951_v20 = vadd.f32 %v1905_v36, %v1823_v11 }
 0x46f   : > { %11600 = vst [vmem:[#allocation54_spill] sm:$0xff] %v9616_v10  ;;  %1984 = vst.msk [vmem:[#allocation3 + $0xc0] sm:$0xff] %vm1959_vm3, %v1951_v20 }
 0x470   : > { %v1911_v43 = vpop.xlane.xlu1 %1910 }
 0x471   : > { %v1953_v32 = vadd.f32 %v1911_v43, %v1825_v6 }
 0x473   : > { %1986 = vst.msk [vmem:[#allocation3 + $0xd0] sm:$0xff] %vm1959_vm3, %v1953_v32 }
 0x474   : > { %v1917_v61 = vpop.xlane.xlu1 %1916 }
 0x475   : > { %v1955_v59 = vadd.f32 %v1917_v61, %v1827_v63 }
 0x476   : > { %v3051_v45 = vpop.f32.mrf.mxu1 }
 0x477   : > { %1988 = vst.msk [vmem:[#allocation3 + $0xe0] sm:$0xff] %vm1959_vm3, %v1955_v59  ;;  %v9629_v25 = vadd.f32 %v3051_v45, %v11603_v18 }
 0x478   : > { %v3053_v52 = vpop.f32.mrf.mxu1  ;;  %v1923_v35 = vpop.xlane.xlu1 %1922 }
 0x479   : > { %v9632_v55 = vadd.f32 %v3053_v52, %v11604_v9  ;;  %v1957_v1 = vadd.f32 %v1923_v35, %v1829_v30 }
 0x47a   : > { %v3055_v38 = vpop.f32.mrf.mxu1 }
 0x47b   : > { %v3243_v31 = vmax.f32 %v9629_v25, %v9632_v55  ;;  %1990 = vst.msk [vmem:[#allocation3 + $0xf0] sm:$0xff] %vm1959_vm3, %v1957_v1  ;;  %v9638_v44 = vadd.f32 %v3055_v38, %v11603_v18 }
 0x47c   : > { %v3057_v48 = vpop.f32.mrf.mxu1 }
 0x47d   : > { %v9641_v60 = vadd.f32 %v3057_v48, %v11604_v9  ;;  %3244 = vmax.xlane.f32.xlu0 %v3243_v31 }
 0x47e   : > { %v3061_v15 = vpop.f32.mrf.mxu1 }
 0x47f   : > { %v3246_v23 = vmax.f32 %v9638_v44, %v9641_v60  ;;  %v9646_v16 = vadd.f32 %v3061_v15, %v11603_v18 }
 0x480   : > { %v3063_v62 = vpop.f32.mrf.mxu1 }
 0x481   : > { %v9649_v11 = vadd.f32 %v3063_v62, %v11604_v9  ;;  %3247 = vmax.xlane.f32.xlu1 %v3246_v23 }
 0x482   : > { %v3065_v36 = vpop.f32.mrf.mxu1 }
 0x483   : > { %v3249_v13 = vmax.f32 %v9646_v16, %v9649_v11  ;;  %v9654_v6 = vadd.f32 %v3065_v36, %v11603_v18 }
 0x484   : > { %v3067_v20 = vpop.f32.mrf.mxu1 }
 0x485   : > { %v9657_v43 = vadd.f32 %v3067_v20, %v11604_v9  ;;  %3250 = vmax.xlane.f32.xlu0 %v3249_v13 }
 0x486   : > { %v3071_v29 = vpop.f32.mrf.mxu1 }
 0x487   : > { %v3252_v32 = vmax.f32 %v9654_v6, %v9657_v43  ;;  %v9662_v61 = vadd.f32 %v3071_v29, %v11603_v18 }
 0x488   : > { %v3073_v63 = vpop.f32.mrf.mxu1 }
 0x489   : > { %v9665_v14 = vadd.f32 %v3073_v63, %v11604_v9  ;;  %3253 = vmax.xlane.f32.xlu0 %v3252_v32 }
 0x48a   : > { %v3075_v45 = vpop.f32.mrf.mxu1 }
 0x48b   : > { %v3255_v59 = vmax.f32 %v9662_v61, %v9665_v14  ;;  %v9670_v30 = vadd.f32 %v3075_v45, %v11603_v18 }
 0x48c   : > { %v3077_v52 = vpop.f32.mrf.mxu1 }
 0x48d   : > { %v9673_v35 = vadd.f32 %v3077_v52, %v11604_v9  ;;  %3256 = vmax.xlane.f32.xlu1 %v3255_v59 }
 0x48e   : > { %v3081_v38 = vpop.f32.mrf.mxu1 }
 0x48f   : > { %v3258_v1 = vmax.f32 %v9670_v30, %v9673_v35  ;;  %v9678_v48 = vadd.f32 %v3081_v38, %v11603_v18 }
 0x490   : > { %v3083_v31 = vpop.f32.mrf.mxu1 }
 0x491   : > { %v9681_v15 = vadd.f32 %v3083_v31, %v11604_v9  ;;  %3259 = vmax.xlane.f32.xlu0 %v3258_v1 }
 0x492   : > { %v3085_v23 = vpop.f32.mrf.mxu1 }
 0x493   : > { %v3261_v62 = vmax.f32 %v9678_v48, %v9681_v15  ;;  %v9686_v13 = vadd.f32 %v3085_v23, %v11603_v18 }
 0x494   : > { %v3087_v36 = vpop.f32.mrf.mxu1 }
 0x495   : > { %v9689_v20 = vadd.f32 %v3087_v36, %v11604_v9  ;;  %3262 = vmax.xlane.f32.xlu1 %v3261_v62 }
 0x496   : > { %v3091_v29 = vpop.f32.mrf.mxu1 }
 0x497   : > { %v3264_v32 = vmax.f32 %v9686_v13, %v9689_v20  ;;  %v9694_v63 = vadd.f32 %v3091_v29, %v11603_v18 }
 0x498   : > { %v3093_v45 = vpop.f32.mrf.mxu1 }
 0x499   : > { %v9697_v59 = vadd.f32 %v3093_v45, %v11604_v9  ;;  %3265 = vmax.xlane.f32.xlu0 %v3264_v32 }
 0x49a   : > { %v3095_v52 = vpop.f32.mrf.mxu1 }
 0x49b   : > { %v3267_v38 = vmax.f32 %v9694_v63, %v9697_v59  ;;  %v9702_v1 = vadd.f32 %v3095_v52, %v11603_v18 }
 0x49c   : > { %v3097_v31 = vpop.f32.mrf.mxu1 }
 0x49d   : > { %11605 = vst [vmem:[#allocation57_spill] sm:$0xff] %v9702_v1  ;;  %v9705_v23 = vadd.f32 %v3097_v31, %v11604_v9  ;;  %3268 = vmax.xlane.f32.xlu1 %v3267_v38 }
 0x49e   : > { %v3101_v62 = vpop.f32.mrf.mxu1 }
 0x49f   : > { %11606 = vst [vmem:[#allocation58_spill] sm:$0xff] %v9705_v23  ;;  %v3270_v36 = vmax.f32 %v9702_v1, %v9705_v23  ;;  %v9710_v29 = vadd.f32 %v3101_v62, %v11603_v18  ;;  %v10112_v1 = vld [vmem:[#allocation2 + $0x1c0] sm:$0xff] }
 0x4a0   : > { %v3103_v32 = vpop.f32.mrf.mxu1  ;;  %11668 = vst [vmem:[#allocation126_spill] sm:$0xff] %v10112_v1 }
 0x4a1   : > { %11607 = vst [vmem:[#allocation59_spill] sm:$0xff] %v9710_v29  ;;  %v9713_v45 = vadd.f32 %v3103_v32, %v11604_v9  ;;  %3271 = vmax.xlane.f32.xlu0 %v3270_v36 }
 0x4a2   : > { %v3105_v56 = vpop.f32.mrf.mxu1 }
 0x4a3   : > { %11608 = vst [vmem:[#allocation60_spill] sm:$0xff] %v9713_v45  ;;  %v3273_v52 = vmax.f32 %v9710_v29, %v9713_v45  ;;  %v9718_v31 = vadd.f32 %v3105_v56, %v11603_v18 }
 0x4a4   : > { %v3107_v38 = vpop.f32.mrf.mxu1 }
 0x4a5   : > { %11609 = vst [vmem:[#allocation61_spill] sm:$0xff] %v9718_v31  ;;  %v9721_v10 = vadd.f32 %v3107_v38, %v11604_v9  ;;  %3274 = vmax.xlane.f32.xlu0 %v3273_v52 }
 0x4a6   : > { %v3111_v2 = vpop.f32.mrf.mxu1 }
 0x4a7   : > { %11610 = vst [vmem:[#allocation62_spill] sm:$0xff] %v9721_v10  ;;  %v3276_v62 = vmax.f32 %v9718_v31, %v9721_v10  ;;  %v9726_v32 = vadd.f32 %v3111_v2, %v11603_v18  ;;  %v9990_v10 = vld [vmem:[#allocation2 + $0x168] sm:$0xff] }
 0x4a8   : > { %v3113_v36 = vpop.f32.mrf.mxu1 }
 0x4a9   : > { %11611 = vst [vmem:[#allocation63_spill] sm:$0xff] %v9726_v32  ;;  %v9729_v24 = vadd.f32 %v3113_v36, %v11604_v9  ;;  %3277 = vmax.xlane.f32.xlu0 %v3276_v62 }
 0x4aa   : > { %v3115_v37 = vpop.f32.mrf.mxu1 }
 0x4ab   : > { %11612 = vst [vmem:[#allocation64_spill] sm:$0xff] %v9729_v24  ;;  %v3279_v56 = vmax.f32 %v9726_v32, %v9729_v24  ;;  %v9734_v38 = vadd.f32 %v3115_v37, %v11603_v18  ;;  %v9999_v32 = vld [vmem:[#allocation2 + $0x170] sm:$0xff] }
 0x4ac   : > { %v3117_v52 = vpop.f32.mrf.mxu1  ;;  %11647 = vst [vmem:[#allocation103_spill] sm:$0xff] %v9999_v32 }
 0x4ad   : > { %11613 = vst [vmem:[#allocation65_spill] sm:$0xff] %v9734_v38  ;;  %v9737_v8 = vadd.f32 %v3117_v52, %v11604_v9  ;;  %3280 = vmax.xlane.f32.xlu0 %v3279_v56 }
 0x4ae   : > { %v3121_v58 = vpop.f32.mrf.mxu1 }
 0x4af   : > { %11614 = vst [vmem:[#allocation66_spill] sm:$0xff] %v9737_v8  ;;  %v3282_v2 = vmax.f32 %v9734_v38, %v9737_v8  ;;  %v9742_v36 = vadd.f32 %v3121_v58, %v11603_v18 }
 0x4b0   : > { %v3123_v62 = vpop.f32.mrf.mxu1 }
 0x4b1   : > { %11615 = vst [vmem:[#allocation67_spill] sm:$0xff] %v9742_v36  ;;  %v9745_v53 = vadd.f32 %v3123_v62, %v11604_v9  ;;  %3283 = vmax.xlane.f32.xlu0 %v3282_v2 }
 0x4b2   : > { %v3125_v41 = vpop.f32.mrf.mxu1 }
 0x4b3   : > { %11616 = vst [vmem:[#allocation76_spill] sm:$0xff] %v9745_v53  ;;  %v3285_v37 = vmax.f32 %v9742_v36, %v9745_v53  ;;  %v9750_v52 = vadd.f32 %v3125_v41, %v11603_v18  ;;  %v9981_v36 = vld [vmem:[#allocation2 + $0x160] sm:$0xff] }
 0x4b4   : > { %v3127_v56 = vpop.f32.mrf.mxu1 }
 0x4b5   : > { %11617 = vst [vmem:[#allocation77_spill] sm:$0xff] %v9750_v52  ;;  %v9753_v5 = vadd.f32 %v3127_v56, %v11604_v9  ;;  %3286 = vmax.xlane.f32.xlu1 %v3285_v37 }
 0x4b6   : > { %v3131_v3 = vpop.f32.mrf.mxu1 }
 0x4b7   : > { %11618 = vst [vmem:[#allocation80_spill] sm:$0xff] %v9753_v5  ;;  %v3288_v58 = vmax.f32 %v9750_v52, %v9753_v5  ;;  %v9758_v62 = vadd.f32 %v3131_v3, %v11603_v18  ;;  %v9954_v52 = vld [vmem:[#allocation2 + $0x148] sm:$0xff] }
 0x4b8   : > { %v3133_v2 = vpop.f32.mrf.mxu1 }
 0x4b9   : > { %11619 = vst [vmem:[#allocation81_spill] sm:$0xff] %v9758_v62  ;;  %v9761_v46 = vadd.f32 %v3133_v2, %v11604_v9  ;;  %3289 = vmax.xlane.f32.xlu0 %v3288_v58 }
 0x4ba   : > { %v3135_v0 = vpop.f32.mrf.mxu1 }
 0x4bb   : > { %11620 = vst [vmem:[#allocation84_spill] sm:$0xff] %v9761_v46  ;;  %v3291_v41 = vmax.f32 %v9758_v62, %v9761_v46  ;;  %v9766_v56 = vadd.f32 %v3135_v0, %v11603_v18  ;;  %v9963_v62 = vld [vmem:[#allocation2 + $0x150] sm:$0xff] }
 0x4bc   : > { %v3137_v37 = vpop.f32.mrf.mxu1 }
 0x4bd   : > { %11621 = vst [vmem:[#allocation85_spill] sm:$0xff] %v9766_v56  ;;  %v9769_v42 = vadd.f32 %v3137_v37, %v11604_v9  ;;  %3292 = vmax.xlane.f32.xlu0 %v3291_v41 }
 0x4be   : > { %v3141_v50 = vpop.f32.mrf.mxu1 }
 0x4bf   : > { %11622 = vst [vmem:[#allocation88_spill] sm:$0xff] %v9769_v42  ;;  %v3294_v3 = vmax.f32 %v9766_v56, %v9769_v42  ;;  %v9774_v2 = vadd.f32 %v3141_v50, %v11603_v18  ;;  %v9924_v56 = vld [vmem:[#allocation2 + $0x130] sm:$0xff] }
 0x4c0   : > { %v3143_v58 = vpop.f32.mrf.mxu1 }
 0x4c1   : > { %11623 = vst [vmem:[#allocation89_spill] sm:$0xff] %v9774_v2  ;;  %v9777_v39 = vadd.f32 %v3143_v58, %v11604_v9  ;;  %3295 = vmax.xlane.f32.xlu0 %v3294_v3 }
 0x4c2   : > { %v3145_v21 = vpop.f32.mrf.mxu1 }
 0x4c3   : > { %11624 = vst [vmem:[#allocation92_spill] sm:$0xff] %v9777_v39  ;;  %v3297_v0 = vmax.f32 %v9774_v2, %v9777_v39  ;;  %v9782_v37 = vadd.f32 %v3145_v21, %v11603_v18  ;;  %v9934_v2 = vld [vmem:[#allocation2 + $0x138] sm:$0xff] }
 0x4c4   : > { %v3147_v41 = vpop.f32.mrf.mxu1 }
 0x4c5   : > { %11625 = vst [vmem:[#allocation93_spill] sm:$0xff] %v9782_v37  ;;  %v9785_v19 = vadd.f32 %v3147_v41, %v11604_v9  ;;  %3298 = vmax.xlane.f32.xlu0 %v3297_v0 }
 0x4c6   : > { %v3151_v4 = vpop.f32.mrf.mxu1 }
 0x4c7   : > { %11626 = vst [vmem:[#allocation96_spill] sm:$0xff] %v9785_v19  ;;  %v3300_v50 = vmax.f32 %v9782_v37, %v9785_v19  ;;  %v9790_v58 = vadd.f32 %v3151_v4, %v11603_v18 }
 0x4c8   : > { %v3153_v3 = vpop.f32.mrf.mxu1 }
 0x4c9   : > { %11627 = vst [vmem:[#allocation97_spill] sm:$0xff] %v9790_v58  ;;  %v9793_v22 = vadd.f32 %v3153_v3, %v11604_v9  ;;  %3301 = vmax.xlane.f32.xlu1 %v3300_v50 }
 0x4ca   : > { %v3155_v47 = vpop.f32.mrf.mxu1 }
 0x4cb   : > { %11628 = vst [vmem:[#allocation100_spill] sm:$0xff] %v9793_v22  ;;  %v3303_v21 = vmax.f32 %v9790_v58, %v9793_v22  ;;  %v9798_v41 = vadd.f32 %v3155_v47, %v11603_v18 }
 0x4cc   : > { %v3157_v0 = vpop.f32.mrf.mxu1 }
 0x4cd   : > { %11629 = vst [vmem:[#allocation101_spill] sm:$0xff] %v9798_v41  ;;  %v9801_v7 = vadd.f32 %v3157_v0, %v11604_v9  ;;  %3304 = vmax.xlane.f32.xlu0 %v3303_v21 }
 0x4ce   : > { %v3161_v19 = vpop.f32.mrf.mxu1 }
 0x4cf   : > { %11630 = vst [vmem:[#allocation104_spill] sm:$0xff] %v9801_v7  ;;  %v3306_v4 = vmax.f32 %v9798_v41, %v9801_v7  ;;  %v9806_v3 = vadd.f32 %v3161_v19, %v11603_v18 }
 0x4d0   : > { %v3163_v50 = vpop.f32.mrf.mxu1 }
 0x4d1   : > { %11631 = vst [vmem:[#allocation105_spill] sm:$0xff] %v9806_v3  ;;  %v9809_v37 = vadd.f32 %v3163_v50, %v11604_v9  ;;  %3307 = vmax.xlane.f32.xlu1 %v3306_v4 }
 0x4d2   : > { %v3165_v22 = vpop.f32.mrf.mxu1 }
 0x4d3   : > { %11632 = vst [vmem:[#allocation108_spill] sm:$0xff] %v9809_v37  ;;  %v3309_v47 = vmax.f32 %v9806_v3, %v9809_v37  ;;  %v9814_v0 = vadd.f32 %v3165_v22, %v11603_v18 }
 0x4d4   : > { %v3167_v21 = vpop.f32.mrf.mxu1 }
 0x4d5   : > { %11633 = vst [vmem:[#allocation109_spill] sm:$0xff] %v9814_v0  ;;  %v9817_v58 = vadd.f32 %v3167_v21, %v11604_v9  ;;  %3310 = vmax.xlane.f32.xlu0 %v3309_v47 }
 0x4d6   : > { %v3171_v7 = vpop.f32.mrf.mxu1 }
 0x4d7   : > { %11634 = vst [vmem:[#allocation78_spill] sm:$0xff] %v9817_v58  ;;  %v3312_v19 = vmax.f32 %v9814_v0, %v9817_v58  ;;  %v9822_v50 = vadd.f32 %v3171_v7, %v11603_v18 }
 0x4d8   : > { %v3173_v4 = vpop.f32.mrf.mxu1 }
 0x4d9   : > { %11635 = vst [vmem:[#allocation79_spill] sm:$0xff] %v9822_v50  ;;  %v9825_v41 = vadd.f32 %v3173_v4, %v11604_v9  ;;  %3313 = vmax.xlane.f32.xlu1 %v3312_v19 }
 0x4da   : > { %v3175_v37 = vpop.f32.mrf.mxu1 }
 0x4db   : > { %11636 = vst [vmem:[#allocation82_spill] sm:$0xff] %v9825_v41  ;;  %v3315_v22 = vmax.f32 %v9822_v50, %v9825_v41  ;;  %v9830_v21 = vadd.f32 %v3175_v37, %v11603_v18 }
 0x4dc   : > { %v3177_v47 = vpop.f32.mrf.mxu1 }
 0x4dd   : > { %11637 = vst [vmem:[#allocation83_spill] sm:$0xff] %v9830_v21  ;;  %v9833_v3 = vadd.f32 %v3177_v47, %v11604_v9  ;;  %3316 = vmax.xlane.f32.xlu0 %v3315_v22 }
 0x4de   : > { %v3181_v58 = vpop.f32.mrf.mxu1 }
 0x4df   : > { %11638 = vst [vmem:[#allocation86_spill] sm:$0xff] %v9833_v3  ;;  %v3318_v7 = vmax.f32 %v9830_v21, %v9833_v3  ;;  %v9838_v4 = vadd.f32 %v3181_v58, %v11603_v18 }
 0x4e0   : > { %v3183_v19 = vpop.f32.mrf.mxu1 }
 0x4e1   : > { %11639 = vst [vmem:[#allocation87_spill] sm:$0xff] %v9838_v4  ;;  %v9841_v0 = vadd.f32 %v3183_v19, %v11604_v9  ;;  %3319 = vmax.xlane.f32.xlu1 %v3318_v7 }
 0x4e2   : > { %v3185_v41 = vpop.f32.mrf.mxu1 }
 0x4e3   : > { %11640 = vst [vmem:[#allocation90_spill] sm:$0xff] %v9841_v0  ;;  %v3321_v37 = vmax.f32 %v9838_v4, %v9841_v0  ;;  %v9846_v47 = vadd.f32 %v3185_v41, %v11603_v18 }
 0x4e4   : > { %v3187_v22 = vpop.f32.mrf.mxu1 }
 0x4e5   : > { %11641 = vst [vmem:[#allocation91_spill] sm:$0xff] %v9846_v47  ;;  %v9849_v50 = vadd.f32 %v3187_v22, %v11604_v9  ;;  %3322 = vmax.xlane.f32.xlu1 %v3321_v37 }
 0x4e6   : > { %v3191_v3 = vpop.f32.mrf.mxu1 }
 0x4e7   : > { %11642 = vst [vmem:[#allocation94_spill] sm:$0xff] %v9849_v50  ;;  %v3324_v58 = vmax.f32 %v9846_v47, %v9849_v50  ;;  %v9854_v19 = vadd.f32 %v3191_v3, %v11603_v18  ;;  %v9869_v50 = vld [vmem:[#allocation2 + $0x100] sm:$0xff]  ;;  %v9874_v47 = vld [vmem:[#allocation2 + $0x108] sm:$0xff] }
 0x4e8   : > { %v3193_v7 = vpop.f32.mrf.mxu1 }
 0x4e9   : > { %11643 = vst [vmem:[#allocation95_spill] sm:$0xff] %v9854_v19  ;;  %v9857_v21 = vadd.f32 %v3193_v7, %v11604_v9  ;;  %3325 = vmax.xlane.f32.xlu0 %v3324_v58 }
 0x4ea   : > { %v3195_v0 = vpop.f32.mrf.mxu1 }
 0x4eb   : > { %11644 = vst [vmem:[#allocation98_spill] sm:$0xff] %v9857_v21  ;;  %v3327_v41 = vmax.f32 %v9854_v19, %v9857_v21  ;;  %v9862_v22 = vadd.f32 %v3195_v0, %v11603_v18  ;;  %v9904_v19 = vld [vmem:[#allocation2 + $0x120] sm:$0xff] }
 0x4ec   : > { %v3197_v37 = vpop.f32.mrf.mxu1 }
 0x4ed   : > { %11645 = vst [vmem:[#allocation99_spill] sm:$0xff] %v9862_v22  ;;  %v9865_v4 = vadd.f32 %v3197_v37, %v11604_v9  ;;  %3328 = vmax.xlane.f32.xlu0 %v3327_v41 }
 0x4ee   : > { %v3201_v17 = vpop.f32.mrf.mxu1 }
 0x4ef   : > { %11646 = vst [vmem:[#allocation102_spill] sm:$0xff] %v9865_v4  ;;  %v3330_v3 = vmax.f32 %v9862_v22, %v9865_v4  ;;  %v9894_v22 = vld [vmem:[#allocation2 + $0x118] sm:$0xff]  ;;  %v10012_v45 = vadd.f32 %v3201_v17, %v11603_v18 }
 0x4f0   : > { %v3203_v53 = vpop.f32.mrf.mxu1 }
 0x4f1   : > { %3331 = vmax.xlane.f32.xlu0 %v3330_v3  ;;  %v9884_v3 = vld [vmem:[#allocation2 + $0x110] sm:$0xff]  ;;  %11650 = vst [vmem:[#allocation31_spill] sm:$0xff] %v10012_v45 }
 0x4f2   : > { %v3205_v49 = vpop.f32.mrf.mxu1 }
 0x4f4   : > { %v3207_v24 = vpop.f32.mrf.mxu1 }
 0x4f5   : > { %v10009_v31 = vadd.f32 %v3207_v24, %v11604_v9 }
 0x4f7   : > { %11649 = vst [vmem:[#allocation107_spill] sm:$0xff] %v10009_v31 }
 0x506   : > { %v3245_v7 = vpop.xlane.xlu0 %3244 }
 0x507   : > { %v9872_v58 = vmax.f32 %v9869_v50, %v3245_v7 }
 0x509   : > { %4654 = vst.msk [vmem:[#allocation2 + $0x100] sm:$0xff] %vm1959_vm3, %v9872_v58  ;;  %3469 = vperm.xlu0 %6597, %v9872_v58  }
 0x50a   : > { %v3248_v41 = vpop.xlane.xlu1 %3247 }
 0x50b   : > { %v9882_v37 = vmax.f32 %v9874_v47, %v3248_v41 }
 0x50d   : > { %4655 = vst.msk [vmem:[#allocation2 + $0x108] sm:$0xff] %vm1959_vm3, %v9882_v37  ;;  %3474 = vperm.xlu1 %6598, %v9882_v37  }
 0x50e   : > { %v3251_v0 = vpop.xlane.xlu0 %3250 }
 0x50f   : > { %v9892_v4 = vmax.f32 %v9884_v3, %v3251_v0 }
 0x511   : > { %4656 = vst.msk [vmem:[#allocation2 + $0x110] sm:$0xff] %vm1959_vm3, %v9892_v4  ;;  %3479 = vperm.xlu0 %6597, %v9892_v4  }
 0x512   : > { %v3254_v7 = vpop.xlane.xlu0 %3253 }
 0x513   : > { %v9902_v21 = vmax.f32 %v9894_v22, %v3254_v7 }
 0x515   : > { %4657 = vst.msk [vmem:[#allocation2 + $0x118] sm:$0xff] %vm1959_vm3, %v9902_v21  ;;  %3484 = vperm.xlu1 %6598, %v9902_v21  }
 0x516   : > { %v3257_v41 = vpop.xlane.xlu1 %3256 }
 0x517   : > { %v9912_v54 = vmax.f32 %v9904_v19, %v3257_v41 }
 0x519   : > { %4658 = vst.msk [vmem:[#allocation2 + $0x120] sm:$0xff] %vm1959_vm3, %v9912_v54  ;;  %3489 = vperm.xlu0 %6597, %v9912_v54  }
 0x51a   : > { %v3260_v0 = vpop.xlane.xlu0 %3259 }
 0x51b   : > { %v9922_v42 = vmax.f32 %v9914_v34, %v3260_v0 }
 0x51d   : > { %4659 = vst.msk [vmem:[#allocation2 + $0x128] sm:$0xff] %vm1959_vm3, %v9922_v42  ;;  %3494 = vperm.xlu1 %6598, %v9922_v42  }
 0x51e   : > { %v3263_v7 = vpop.xlane.xlu1 %3262 }
 0x51f   : > { %v9932_v39 = vmax.f32 %v9924_v56, %v3263_v7 }
 0x521   : > { %4660 = vst.msk [vmem:[#allocation2 + $0x130] sm:$0xff] %vm1959_vm3, %v9932_v39  ;;  %3499 = vperm.xlu1 %6598, %v9932_v39  }
 0x522   : > { %v3266_v41 = vpop.xlane.xlu0 %3265 }
 0x523   : > { %v9942_v51 = vmax.f32 %v9934_v2, %v3266_v41  ;;  %v9972_v41 = vld [vmem:[#allocation2 + $0x158] sm:$0xff] }
 0x525   : > { %4661 = vst.msk [vmem:[#allocation2 + $0x138] sm:$0xff] %vm1959_vm3, %v9942_v51  ;;  %3504 = vperm.xlu0 %6597, %v9942_v51  }
 0x526   : > { %v3269_v0 = vpop.xlane.xlu1 %3268 }
 0x527   : > { %v9952_v5 = vmax.f32 %v9944_v40, %v3269_v0 }
 0x529   : > { %4662 = vst.msk [vmem:[#allocation2 + $0x140] sm:$0xff] %vm1959_vm3, %v9952_v5 }
 0x52a   : > { %v3272_v46 = vpop.xlane.xlu0 %3271 }
 0x52b   : > { %v9961_v7 = vmax.f32 %v9954_v52, %v3272_v46 }
 0x52d   : > { %4663 = vst.msk [vmem:[#allocation2 + $0x148] sm:$0xff] %vm1959_vm3, %v9961_v7 }
 0x52e   : > { %v3275_v0 = vpop.xlane.xlu0 %3274 }
 0x52f   : > { %v9970_v8 = vmax.f32 %v9963_v62, %v3275_v0 }
 0x531   : > { %4664 = vst.msk [vmem:[#allocation2 + $0x150] sm:$0xff] %vm1959_vm3, %v9970_v8 }
 0x532   : > { %v3278_v46 = vpop.xlane.xlu0 %3277 }
 0x533   : > { %v9979_v12 = vmax.f32 %v9972_v41, %v3278_v46 }
 0x535   : > { %4665 = vst.msk [vmem:[#allocation2 + $0x158] sm:$0xff] %vm1959_vm3, %v9979_v12 }
 0x536   : > { %v3281_v0 = vpop.xlane.xlu0 %3280 }
 0x537   : > { %v9988_v38 = vmax.f32 %v9981_v36, %v3281_v0  ;;  %v10006_v0 = vadd.f32 %v3205_v49, %v11603_v18  ;;  %v10051_v18 = vld [vmem:[#allocation2 + $0x190] sm:$0xff] }
 0x538   : > { %11657 = vst [vmem:[#allocation115_spill] sm:$0xff] %v10051_v18 }
 0x539   : > { %4666 = vst.msk [vmem:[#allocation2 + $0x160] sm:$0xff] %vm1959_vm3, %v9988_v38  ;;  %11648 = vst [vmem:[#allocation106_spill] sm:$0xff] %v10006_v0  ;;  %v3336_v49 = vmax.f32 %v10006_v0, %v10009_v31  ;;  %v10042_v31 = vld [vmem:[#allocation2 + $0x188] sm:$0xff] }
 0x53a   : > { %v3284_v46 = vpop.xlane.xlu0 %3283  ;;  %11656 = vst [vmem:[#allocation114_spill] sm:$0xff] %v10042_v31 }
 0x53b   : > { %v9997_v28 = vmax.f32 %v9990_v10, %v3284_v46  ;;  %v10015_v46 = vadd.f32 %v3203_v53, %v11604_v9 }
 0x53d   : > { %4667 = vst.msk [vmem:[#allocation2 + $0x168] sm:$0xff] %vm1959_vm3, %v9997_v28  ;;  %11651 = vst [vmem:[#allocation32_spill] sm:$0xff] %v10015_v46  ;;  %v3333_v17 = vmax.f32 %v10012_v45, %v10015_v46  ;;  %v10069_v46 = vld [vmem:[#allocation2 + $0x1a0] sm:$0xff] }
 0x53e   : > { %v3287_v26 = vpop.xlane.xlu1 %3286  ;;  %11660 = vst [vmem:[#allocation118_spill] sm:$0xff] %v10069_v46 }
 0x53f   : > { %v10018_v29 = vmax.f32 %v9999_v32, %v3287_v26  ;;  %v10033_v26 = vld [vmem:[#allocation2 + $0x180] sm:$0xff]  ;;  %v10090_v32 = vld [vmem:[#allocation2 + $0x1b0] sm:$0xff] }
 0x540   : > { %11654 = vst [vmem:[#allocation112_spill] sm:$0xff] %v10033_v26  ;;  %11664 = vst [vmem:[#allocation122_spill] sm:$0xff] %v10090_v32 }
 0x541   : > { %11652 = vst [vmem:[#allocation110_spill] sm:$0xff] %v10018_v29  ;;  %4668 = vst.msk [vmem:[#allocation2 + $0x170] sm:$0xff] %vm1959_vm3, %v10018_v29 }
 0x542   : > { %v3290_v24 = vpop.xlane.xlu0 %3289 }
 0x543   : > { %v10031_v53 = vmax.f32 %v10020_v57, %v3290_v24  ;;  %v10060_v24 = vld [vmem:[#allocation2 + $0x198] sm:$0xff] }
 0x544   : > { %3337 = vmax.xlane.f32.xlu0 %v3336_v49  ;;  %11659 = vst [vmem:[#allocation117_spill] sm:$0xff] %v10060_v24  ;;  %v10101_v57 = vld [vmem:[#allocation2 + $0x1b8] sm:$0xff] }
 0x545   : > { %3334 = vmax.xlane.f32.xlu1 %v3333_v17  ;;  %4669 = vst.msk [vmem:[#allocation2 + $0x178] sm:$0xff] %vm1959_vm3, %v10031_v53  ;;  %11666 = vst [vmem:[#allocation124_spill] sm:$0xff] %v10101_v57 }
 0x546   : > { %v3293_v9 = vpop.xlane.xlu0 %3292 }
 0x547   : > { %v10040_v23 = vmax.f32 %v10033_v26, %v3293_v9 }
 0x549   : > { %11655 = vst [vmem:[#allocation113_spill] sm:$0xff] %v10040_v23  ;;  %4670 = vst.msk [vmem:[#allocation2 + $0x180] sm:$0xff] %vm1959_vm3, %v10040_v23 }
 0x54a   : > { %v3296_v49 = vpop.xlane.xlu0 %3295 }
 0x54b   : > { %v10049_v17 = vmax.f32 %v10042_v31, %v3296_v49 }
 0x54d   : > { %4671 = vst.msk [vmem:[#allocation2 + $0x188] sm:$0xff] %vm1959_vm3, %v10049_v17 }
 0x54e   : > { %v3299_v9 = vpop.xlane.xlu0 %3298 }
 0x54f   : > { %v10058_v45 = vmax.f32 %v10051_v18, %v3299_v9  ;;  %v10079_v18 = vld [vmem:[#allocation2 + $0x1a8] sm:$0xff] }
 0x550   : > { %11662 = vst [vmem:[#allocation120_spill] sm:$0xff] %v10079_v18 }
 0x551   : > { %11658 = vst [vmem:[#allocation116_spill] sm:$0xff] %v10058_v45  ;;  %4672 = vst.msk [vmem:[#allocation2 + $0x190] sm:$0xff] %vm1959_vm3, %v10058_v45 }
 0x552   : > { %v3302_v49 = vpop.xlane.xlu1 %3301 }
 0x553   : > { %v10067_v26 = vmax.f32 %v10060_v24, %v3302_v49 }
 0x555   : > { %4673 = vst.msk [vmem:[#allocation2 + $0x198] sm:$0xff] %vm1959_vm3, %v10067_v26 }
 0x556   : > { %3509 = vperm.xlu1 %6598, %v9952_v5   ;;  %v3305_v9 = vpop.xlane.xlu0 %3304 }
 0x557   : > { %v10077_v0 = vmax.f32 %v10069_v46, %v3305_v9 }
 0x559   : > { %11661 = vst [vmem:[#allocation119_spill] sm:$0xff] %v10077_v0  ;;  %4674 = vst.msk [vmem:[#allocation2 + $0x1a0] sm:$0xff] %vm1959_vm3, %v10077_v0 }
 0x55a   : > { %3514 = vperm.xlu0 %6597, %v9961_v7   ;;  %3519 = vperm.xlu1 %6598, %v9970_v8   ;;  %v3308_v31 = vpop.xlane.xlu1 %3307 }
 0x55b   : > { %v10088_v24 = vmax.f32 %v10079_v18, %v3308_v31 }
 0x55d   : > { %11663 = vst [vmem:[#allocation121_spill] sm:$0xff] %v10088_v24  ;;  %4675 = vst.msk [vmem:[#allocation2 + $0x1a8] sm:$0xff] %vm1959_vm3, %v10088_v24 }
 0x55e   : > { %3524 = vperm.xlu1 %6598, %v9979_v12   ;;  %3529 = vperm.xlu0 %6597, %v9988_v38   ;;  %v3311_v49 = vpop.xlane.xlu0 %3310 }
 0x55f   : > { %v10099_v46 = vmax.f32 %v10090_v32, %v3311_v49 }
 0x561   : > { %11665 = vst [vmem:[#allocation123_spill] sm:$0xff] %v10099_v46  ;;  %4676 = vst.msk [vmem:[#allocation2 + $0x1b0] sm:$0xff] %vm1959_vm3, %v10099_v46 }
 0x562   : > { %3539 = vperm.xlu0 %6597, %v10018_v29   ;;  %3534 = vperm.xlu1 %6598, %v9997_v28   ;;  %v3314_v9 = vpop.xlane.xlu1 %3313  ;;  %v10123_v29 = vld [vmem:[#allocation2 + $0x1c8] sm:$0xff] }
 0x563   : > { %v10110_v18 = vmax.f32 %v10101_v57, %v3314_v9  ;;  %11670 = vst [vmem:[#allocation128_spill] sm:$0xff] %v10123_v29 }
 0x565   : > { %11667 = vst [vmem:[#allocation125_spill] sm:$0xff] %v10110_v18  ;;  %4677 = vst.msk [vmem:[#allocation2 + $0x1b8] sm:$0xff] %vm1959_vm3, %v10110_v18 }
 0x566   : > { %3544 = vperm.xlu1 %6598, %v10031_v53   ;;  %3549 = vperm.xlu0 %6597, %v10040_v23   ;;  %v3317_v31 = vpop.xlane.xlu0 %3316  ;;  %v10134_v23 = vld [vmem:[#allocation2 + $0x1d0] sm:$0xff] }
 0x567   : > { %v10121_v32 = vmax.f32 %v10112_v1, %v3317_v31  ;;  %11672 = vst [vmem:[#allocation130_spill] sm:$0xff] %v10134_v23 }
 0x569   : > { %11669 = vst [vmem:[#allocation127_spill] sm:$0xff] %v10121_v32  ;;  %4678 = vst.msk [vmem:[#allocation2 + $0x1c0] sm:$0xff] %vm1959_vm3, %v10121_v32 }
 0x56a   : > { %3554 = vperm.xlu1 %6598, %v10049_v17   ;;  %3559 = vperm.xlu0 %6597, %v10058_v45   ;;  %v3320_v49 = vpop.xlane.xlu1 %3319  ;;  %v10145_v45 = vld [vmem:[#allocation2 + $0x1d8] sm:$0xff] }
 0x56b   : > { %v10132_v57 = vmax.f32 %v10123_v29, %v3320_v49  ;;  %11674 = vst [vmem:[#allocation132_spill] sm:$0xff] %v10145_v45 }
 0x56d   : > { %11671 = vst [vmem:[#allocation129_spill] sm:$0xff] %v10132_v57  ;;  %4679 = vst.msk [vmem:[#allocation2 + $0x1c8] sm:$0xff] %vm1959_vm3, %v10132_v57 }
 0x56e   : > { %3564 = vperm.xlu1 %6598, %v10067_v26   ;;  %3569 = vperm.xlu0 %6597, %v10077_v0   ;;  %v3323_v9 = vpop.xlane.xlu1 %3322  ;;  %v10156_v0 = vld [vmem:[#allocation2 + $0x1e0] sm:$0xff] }
 0x56f   : > { %v10143_v1 = vmax.f32 %v10134_v23, %v3323_v9  ;;  %11676 = vst [vmem:[#allocation134_spill] sm:$0xff] %v10156_v0 }
 0x571   : > { %11673 = vst [vmem:[#allocation131_spill] sm:$0xff] %v10143_v1  ;;  %4680 = vst.msk [vmem:[#allocation2 + $0x1d0] sm:$0xff] %vm1959_vm3, %v10143_v1 }
 0x572   : > { %3574 = vperm.xlu1 %6598, %v10088_v24   ;;  %3579 = vperm.xlu0 %6597, %v10099_v46   ;;  %v3326_v31 = vpop.xlane.xlu0 %3325  ;;  %v10167_v46 = vld [vmem:[#allocation2 + $0x1e8] sm:$0xff] }
 0x573   : > { %v10154_v29 = vmax.f32 %v10145_v45, %v3326_v31  ;;  %11678 = vst [vmem:[#allocation136_spill] sm:$0xff] %v10167_v46 }
 0x575   : > { %11675 = vst [vmem:[#allocation133_spill] sm:$0xff] %v10154_v29  ;;  %4681 = vst.msk [vmem:[#allocation2 + $0x1d8] sm:$0xff] %vm1959_vm3, %v10154_v29 }
 0x576   : > { %3584 = vperm.xlu1 %6598, %v10110_v18   ;;  %3589 = vperm.xlu0 %6597, %v10121_v32   ;;  %v3329_v49 = vpop.xlane.xlu0 %3328 }
 0x577   : > { %v10165_v23 = vmax.f32 %v10156_v0, %v3329_v49 }
 0x579   : > { %11677 = vst [vmem:[#allocation135_spill] sm:$0xff] %v10165_v23  ;;  %4682 = vst.msk [vmem:[#allocation2 + $0x1e0] sm:$0xff] %vm1959_vm3, %v10165_v23 }
 0x57a   : > { %3594 = vperm.xlu1 %6598, %v10132_v57   ;;  %3609 = vperm.xlu0 %6597, %v10165_v23   ;;  %v3332_v9 = vpop.xlane.xlu0 %3331 }
 0x57b   : > { %v10176_v45 = vmax.f32 %v10167_v46, %v3332_v9 }
 0x57d   : > { %11679 = vst [vmem:[#allocation137_spill] sm:$0xff] %v10176_v45  ;;  %4683 = vst.msk [vmem:[#allocation2 + $0x1e8] sm:$0xff] %vm1959_vm3, %v10176_v45 }
 0x57e   : > { %3599 = vperm.xlu0 %6597, %v10143_v1   ;;  %3614 = vperm.xlu1 %6598, %v10176_v45  }
 0x582   : > { %3604 = vperm.xlu1 %6598, %v10154_v29  }
 0x584   : > { %v3470_v31 = vpop.permute.xlu0 %3469 }
 0x585   : > { %v3627_v0 = vsub.f32 %v9629_v25, %v3470_v31  ;;  %v3628_v23 = vsub.f32 %v9632_v55, %v3470_v31 }
 0x587   : > { %v3691_v32 = vmul.f32 1.442695, %v3627_v0  ;;  %v3693_v9 = vmul.f32 1.442695, %v3628_v23 }
 0x588   : > { %v3475_v57 = vpop.permute.xlu1 %3474 }
 0x589   : > { %6887 = vpow2.f32 %v3691_v32  ;;  %v3629_v49 = vsub.f32 %v9638_v44, %v3475_v57  ;;  %v3630_v46 = vsub.f32 %v9641_v60, %v3475_v57 }
 0x58a   : > { %6889 = vpow2.f32 %v3693_v9 }
 0x58b   : > { %v3695_v18 = vmul.f32 1.442695, %v3629_v49  ;;  %v3697_v1 = vmul.f32 1.442695, %v3630_v46 }
 0x58c   : > { %v3480_v24 = vpop.permute.xlu0 %3479 }
 0x58d   : > { %6891 = vpow2.f32 %v3695_v18  ;;  %v3631_v45 = vsub.f32 %v9646_v16, %v3480_v24  ;;  %v3632_v29 = vsub.f32 %v9649_v11, %v3480_v24 }
 0x58e   : > { %6893 = vpow2.f32 %v3697_v1 }
 0x58f   : > { %v3699_v25 = vmul.f32 1.442695, %v3631_v45  ;;  %v3701_v55 = vmul.f32 1.442695, %v3632_v29 }
 0x590   : > { %v3485_v0 = vpop.permute.xlu1 %3484 }
 0x591   : > { %6895 = vpow2.f32 %v3699_v25  ;;  %v3633_v23 = vsub.f32 %v9654_v6, %v3485_v0  ;;  %v3634_v44 = vsub.f32 %v9657_v43, %v3485_v0 }
 0x592   : > { %6897 = vpow2.f32 %v3701_v55 }
 0x593   : > { %v3703_v57 = vmul.f32 1.442695, %v3633_v23  ;;  %v3705_v60 = vmul.f32 1.442695, %v3634_v44 }
 0x594   : > { %v3490_v32 = vpop.permute.xlu0 %3489 }
 0x595   : > { %6899 = vpow2.f32 %v3703_v57  ;;  %v3635_v46 = vsub.f32 %v9662_v61, %v3490_v32  ;;  %v3636_v16 = vsub.f32 %v9665_v14, %v3490_v32 }
 0x596   : > { %v6888_v18 = vpop.eup %6887  ;;  %6901 = vpow2.f32 %v3705_v60 }
 0x597   : > { %v6890_v11 = vpop.eup %6889  ;;  %v3707_v1 = vmul.f32 1.442695, %v3635_v46  ;;  %v3709_v29 = vmul.f32 1.442695, %v3636_v16 }
 0x598   : > { %v3495_v45 = vpop.permute.xlu1 %3494  ;;  %v10195_v24 = vadd.f32 %v6890_v11, %v6888_v18 }
 0x599   : > { %6903 = vpow2.f32 %v3707_v1  ;;  %v3637_v6 = vsub.f32 %v9670_v30, %v3495_v45  ;;  %v3638_v43 = vsub.f32 %v9673_v35, %v3495_v45 }
 0x59a   : > { %v6892_v31 = vpop.eup %6891  ;;  %6905 = vpow2.f32 %v3709_v29 }
 0x59b   : > { %v6894_v49 = vpop.eup %6893  ;;  %v3711_v9 = vmul.f32 1.442695, %v3637_v6  ;;  %v3713_v61 = vmul.f32 1.442695, %v3638_v43  ;;  %v4269_v25 = vpack.c.bf16 %v6892_v31, %v6888_v18 }
 0x59c   : > { %v3500_v14 = vpop.permute.xlu1 %3499  ;;  %v4270_v55 = vpack.c.bf16 %v6894_v49, %v6890_v11  ;;  %v10199_v0 = vadd.f32 %v6894_v49, %v6892_v31 }
 0x59d   : > { %6907 = vpow2.f32 %v3711_v9  ;;  %v3639_v23 = vsub.f32 %v9678_v48, %v3500_v14  ;;  %v3640_v44 = vsub.f32 %v9681_v15, %v3500_v14 }
 0x59e   : > { %v6896_v57 = vpop.eup %6895  ;;  %6909 = vpow2.f32 %v3713_v61  ;;  %4461 = vmatprep.mubr.bf16.mxu0 %v4270_v55 }
 0x59f   : > { %v6898_v30 = vpop.eup %6897  ;;  %v3715_v35 = vmul.f32 1.442695, %v3639_v23  ;;  %v3717_v60 = vmul.f32 1.442695, %v3640_v44  ;;  %4462 = vmatmul.mubr.bf16.vlgmr.msra.gmra.mxu0 %v4269_v25 }
 0x5a0   : > { %v3505_v32 = vpop.permute.xlu0 %3504  ;;  %v10203_v46 = vadd.f32 %v6898_v30, %v6896_v57 }
 0x5a1   : > { %6911 = vpow2.f32 %v3715_v35  ;;  %v3641_v16 = vsub.f32 %v9686_v13, %v3505_v32  ;;  %v3642_v18 = vsub.f32 %v9689_v20, %v3505_v32  ;;  %v11680_v32 = vsub.f32 %v9869_v50, %v9872_v58 }
 0x5a2   : > { %v6900_v11 = vpop.eup %6899  ;;  %6913 = vpow2.f32 %v3717_v60  ;;  %v11685_v50 = vsub.f32 %v9914_v34, %v9922_v42  ;;  %v11690_v42 = vsub.f32 %v9944_v40, %v9952_v5  ;;  %v11695_v40 = vsub.f32 %v9972_v41, %v9979_v12 }
 0x5a3   : > { %v6902_v48 = vpop.eup %6901  ;;  %v3719_v1 = vmul.f32 1.442695, %v3641_v16  ;;  %v3721_v15 = vmul.f32 1.442695, %v3642_v18  ;;  %v4271_v29 = vpack.c.bf16 %v6900_v11, %v6896_v57  ;;  %v3403_v16 = vmul.f32 1.442695, %v11680_v32 }
 0x5a4   : > { %v4272_v45 = vpack.c.bf16 %v6902_v48, %v6898_v30  ;;  %v10207_v6 = vadd.f32 %v6902_v48, %v6900_v11  ;;  %v11681_v18 = vsub.f32 %v9874_v47, %v9882_v37  ;;  %v11682_v48 = vsub.f32 %v9884_v3, %v9892_v4  ;;  %v10235_v47 = vld [vmem:[#allocation2 + $0x1f8] sm:$0xff]  ;;  %v10240_v3 = vld [vmem:[#allocation2 + $0x1f0] sm:$0xff] }
 0x5a5   : > { %6915 = vpow2.f32 %v3719_v1  ;;  %v3413_v58 = vmul.f32 1.442695, %v11685_v50  ;;  %11686 = vst [vmem:[#allocation138_spill] sm:$0xff] %v10235_v47  ;;  %v11687_v4 = vsub.f32 %v9924_v56, %v9932_v39  ;;  %11688 = vst [vmem:[#allocation139_spill] sm:$0xff] %v10240_v3  ;;  %v3419_v34 = vmul.f32 1.442695, %v11690_v42 }
 0x5a6   : > { %v6904_v43 = vpop.eup %6903  ;;  %6917 = vpow2.f32 %v3721_v15  ;;  %4469 = vmatprep.mubr.bf16.mxu0 %v4272_v45  ;;  %v3405_v11 = vmul.f32 1.442695, %v11681_v18  ;;  %v3407_v1 = vmul.f32 1.442695, %v11682_v48  ;;  %v11683_v15 = vsub.f32 %v9894_v22, %v9902_v21  ;;  %v11702_v32 = vld [vmem:[#allocation60_spill] sm:$0xff]  ;;  %v11712_v42 = vld [vmem:[#allocation62_spill] sm:$0xff] }
 0x5a7   : > { %v6906_v31 = vpop.eup %6905  ;;  %4470 = vmatmul.mubr.bf16.gmra.mxu0 %v4271_v29  ;;  %6919 = vpow2.f32 %v3403_v16  ;;  %v11684_v45 = vsub.f32 %v9904_v19, %v9912_v54  ;;  %v3415_v37 = vmul.f32 1.442695, %v11687_v4  ;;  %v11689_v21 = vsub.f32 %v9934_v2, %v9942_v51 }
 0x5a8   : > { %v10209_v49 = vadd.f32 %v6906_v31, %v6904_v43  ;;  %v3409_v29 = vmul.f32 1.442695, %v11683_v15  ;;  %6921 = vpow2.f32 %v3405_v11  ;;  %v11692_v39 = vsub.f32 %v9954_v52, %v9961_v7  ;;  %v11706_v15 = vld [vmem:[#allocation69_spill] sm:$0xff] }
 0x5a9   : > { %6923 = vpow2.f32 %v3407_v1  ;;  %v3417_v54 = vmul.f32 1.442695, %v11689_v21  ;;  %v11694_v51 = vsub.f32 %v9963_v62, %v9970_v8  ;;  %v3425_v52 = vmul.f32 1.442695, %v11695_v40 }
 0x5aa   : > { %v6908_v13 = vpop.eup %6907  ;;  %6925 = vpow2.f32 %v3409_v29  ;;  %v3421_v56 = vmul.f32 1.442695, %v11692_v39  ;;  %v11696_v8 = vsub.f32 %v9981_v36, %v9988_v38  ;;  %v11697_v41 = vsub.f32 %v9990_v10, %v9997_v28  ;;  %v11698_v36 = vld [vmem:[#allocation57_spill] sm:$0xff] }
 0x5ab   : > { %v6910_v9 = vpop.eup %6909  ;;  %v4273_v20 = vpack.c.bf16 %v6908_v13, %v6904_v43  ;;  %v3411_v43 = vmul.f32 1.442695, %v11684_v45  ;;  %v3423_v2 = vmul.f32 1.442695, %v11694_v51  ;;  %v11714_v51 = vld [vmem:[#allocation45_spill] sm:$0xff] }
 0x5ac   : > { %v4274_v61 = vpack.c.bf16 %v6910_v9, %v6906_v31  ;;  %v10211_v25 = vadd.f32 %v6910_v9, %v6908_v13  ;;  %v3427_v62 = vmul.f32 1.442695, %v11696_v8  ;;  %v11716_v8 = vld [vmem:[#allocation71_spill] sm:$0xff] }
 0x5ad   : > { %6927 = vpow2.f32 %v3411_v43  ;;  %v11708_v43 = vld [vmem:[#allocation63_spill] sm:$0xff] }
 0x5ae   : > { %v6912_v14 = vpop.eup %6911  ;;  %4477 = vmatprep.mubr.bf16.mxu0 %v4274_v61  ;;  %6929 = vpow2.f32 %v3413_v58  ;;  %v3429_v61 = vmul.f32 1.442695, %v11697_v41  ;;  %v11709_v58 = vld [vmem:[#allocation64_spill] sm:$0xff] }
 0x5af   : > { %v6914_v55 = vpop.eup %6913  ;;  %4478 = vmatmul.mubr.bf16.gmra.mxu0 %v4273_v20  ;;  %6931 = vpow2.f32 %v3415_v37  ;;  %v11719_v41 = vld [vmem:[#allocation76_spill] sm:$0xff] }
 0x5b0   : > { %v10213_v23 = vadd.f32 %v6914_v55, %v6912_v14  ;;  %6933 = vpow2.f32 %v3417_v54  ;;  %v11711_v54 = vld [vmem:[#allocation61_spill] sm:$0xff] }
 0x5b1   : > { %6935 = vpow2.f32 %v3419_v34 }
 0x5b2   : > { %v6916_v44 = vpop.eup %6915  ;;  %6937 = vpow2.f32 %v3421_v56 }
 0x5b3   : > { %v6918_v57 = vpop.eup %6917  ;;  %v4275_v30 = vpack.c.bf16 %v6916_v44, %v6912_v14  ;;  %6939 = vpow2.f32 %v3423_v2 }
 0x5b4   : > { %v4276_v35 = vpack.c.bf16 %v6918_v57, %v6914_v55  ;;  %v10215_v60 = vadd.f32 %v6918_v57, %v6916_v44  ;;  %6941 = vpow2.f32 %v3425_v52  ;;  %v11699_v57 = vld [vmem:[#allocation58_spill] sm:$0xff] }
 0x5b5   : > { %6943 = vpow2.f32 %v3427_v62 }
 0x5b6   : > { %4485 = vmatprep.mubr.bf16.mxu0 %v4276_v35 }
 0x5b7   : > { %4486 = vmatmul.mubr.bf16.gmra.mxu0 %v4275_v30 }
 0x5cd   : > { %v3338_v19 = vpop.xlane.xlu0 %3337 }
 0x5ce   : > { %v10249_v22 = vmax.f32 %v10235_v47, %v3338_v19  ;;  %v3335_v31 = vpop.xlane.xlu1 %3334 }
 0x5cf   : > { %v10255_v13 = vmax.f32 %v10240_v3, %v3335_v31 }
 0x5d0   : > { %11691 = vst [vmem:[#allocation140_spill] sm:$0xff] %v10249_v22  ;;  %4685 = vst.msk [vmem:[#allocation2 + $0x1f8] sm:$0xff] %vm1959_vm3, %v10249_v22  ;;  %3624 = vperm.xlu1 %6598, %v10249_v22  }
 0x5d1   : > { %11693 = vst [vmem:[#allocation141_spill] sm:$0xff] %v10255_v13  ;;  %4684 = vst.msk [vmem:[#allocation2 + $0x1f0] sm:$0xff] %vm1959_vm3, %v10255_v13  ;;  %3619 = vperm.xlu0 %6597, %v10255_v13  }
 0x5d2   : > { %v3510_v9 = vpop.permute.xlu1 %3509 }
 0x5d3   : > { %v3643_v20 = vsub.f32 %v9694_v63, %v3510_v9  ;;  %v3644_v12 = vsub.f32 %v9697_v59, %v3510_v9  ;;  %v10285_v59 = vpop.eup %6919 }
 0x5d4   : > { %2101 = vperm.xlu1 %6598, %v9472_v33   ;;  %11700 = vst [vmem:[#allocation57_spill] sm:$0xff] %v10285_v59  ;;  %v11701_v33 = vld [vmem:[#allocation59_spill] sm:$0xff]  ;;  %v10289_v28 = vpop.eup %6921 }
 0x5d5   : > { %v3723_v14 = vmul.f32 1.442695, %v3643_v20  ;;  %v3725_v55 = vmul.f32 1.442695, %v3644_v12  ;;  %2106 = vperm.xlu0 %6597, %v9575_v27   ;;  %v3515_v38 = vpop.permute.xlu0 %3514  ;;  %11703 = vst [vmem:[#allocation58_spill] sm:$0xff] %v10289_v28  ;;  %v11704_v27 = vld [vmem:[#allocation35_spill] sm:$0xff]  ;;  %v10292_v11 = vpop.eup %6923 }
 0x5d6   : > { %v3645_v44 = vsub.f32 %v11698_v36, %v3515_v38  ;;  %v3646_v63 = vsub.f32 %v11699_v57, %v3515_v38  ;;  %v3520_v30 = vpop.permute.xlu1 %3519  ;;  %11705 = vst [vmem:[#allocation59_spill] sm:$0xff] %v10292_v11  ;;  %v10295_v45 = vpop.eup %6925  ;;  %v11718_v20 = vld [vmem:[#allocation67_spill] sm:$0xff]  ;;  %v11721_v38 = vld [vmem:[#allocation65_spill] sm:$0xff] }
 0x5d7   : > { %6945 = vpow2.f32 %v3723_v14  ;;  %v3647_v35 = vsub.f32 %v11701_v33, %v3520_v30  ;;  %v3648_v16 = vsub.f32 %v11702_v32, %v3520_v30  ;;  %11707 = vst [vmem:[#allocation60_spill] sm:$0xff] %v10295_v45  ;;  %v10299_v21 = vpop.eup %6927 }
 0x5d8   : > { %6947 = vpow2.f32 %v3725_v55  ;;  %v3727_v10 = vmul.f32 1.442695, %v3645_v44  ;;  %v3729_v18 = vmul.f32 1.442695, %v3646_v63  ;;  %2111 = vperm.xlu1 %6598, %v11704_v27   ;;  %11710 = vst [vmem:[#allocation35_spill] sm:$0xff] %v10299_v21  ;;  %v10303_v31 = vpop.eup %6929  ;;  %v11722_v44 = vld [vmem:[#allocation66_spill] sm:$0xff] }
 0x5d9   : > { %6949 = vpow2.f32 %v3429_v61  ;;  %v3731_v48 = vmul.f32 1.442695, %v3647_v35  ;;  %v3733_v1 = vmul.f32 1.442695, %v3648_v16  ;;  %2121 = vperm.xlu0 %6597, %v11706_v15   ;;  %v3530_v29 = vpop.permute.xlu0 %3529  ;;  %11713 = vst [vmem:[#allocation69_spill] sm:$0xff] %v10303_v31  ;;  %v10306_v2 = vpop.eup %6931  ;;  %v11724_v35 = vld [vmem:[#allocation47_spill] sm:$0xff] }
 0x5da   : > { %6951 = vpow2.f32 %v3727_v10  ;;  %v3651_v50 = vsub.f32 %v11708_v43, %v3530_v29  ;;  %v3652_v4 = vsub.f32 %v11709_v58, %v3530_v29  ;;  %v3525_v37 = vpop.permute.xlu1 %3524  ;;  %11715 = vst [vmem:[#allocation63_spill] sm:$0xff] %v10306_v2  ;;  %v10309_v9 = vpop.eup %6933  ;;  %v11729_v29 = vld [vmem:[#allocation84_spill] sm:$0xff] }
 0x5db   : > { %6953 = vpow2.f32 %v3729_v18  ;;  %v3649_v19 = vsub.f32 %v11711_v54, %v3525_v37  ;;  %v3650_v34 = vsub.f32 %v11712_v42, %v3525_v37  ;;  %11717 = vst [vmem:[#allocation64_spill] sm:$0xff] %v10309_v9  ;;  %v10313_v55 = vpop.eup %6935  ;;  %v11726_v18 = vld [vmem:[#allocation37_spill] sm:$0xff]  ;;  %v11731_v54 = vld [vmem:[#allocation80_spill] sm:$0xff] }
 0x5dc   : > { %6955 = vpow2.f32 %v3731_v48  ;;  %v3739_v39 = vmul.f32 1.442695, %v3651_v50  ;;  %v3741_v56 = vmul.f32 1.442695, %v3652_v4  ;;  %2116 = vperm.xlu1 %6598, %v11714_v51   ;;  %11720 = vst [vmem:[#allocation61_spill] sm:$0xff] %v10313_v55  ;;  %v10317_v63 = vpop.eup %6937  ;;  %v11730_v4 = vld [vmem:[#allocation77_spill] sm:$0xff] }
 0x5dd   : > { %6957 = vpow2.f32 %v3733_v1  ;;  %v3735_v40 = vmul.f32 1.442695, %v3649_v19  ;;  %v3737_v52 = vmul.f32 1.442695, %v3650_v34  ;;  %2131 = vperm.xlu0 %6597, %v11716_v8   ;;  %v3540_v62 = vpop.permute.xlu0 %3539  ;;  %11723 = vst [vmem:[#allocation62_spill] sm:$0xff] %v10317_v63  ;;  %v10320_v32 = vpop.eup %6939  ;;  %v11728_v1 = vld [vmem:[#allocation81_spill] sm:$0xff] }
 0x5de   : > { %6959 = vpow2.f32 %v3739_v39  ;;  %v3655_v12 = vsub.f32 %v11718_v20, %v3540_v62  ;;  %v3656_v61 = vsub.f32 %v11719_v41, %v3540_v62  ;;  %v3535_v14 = vpop.permute.xlu1 %3534  ;;  %11725 = vst [vmem:[#allocation45_spill] sm:$0xff] %v10320_v32  ;;  %v10323_v48 = vpop.eup %6941  ;;  %v11733_v8 = vld [vmem:[#allocation39_spill] sm:$0xff] }
 0x5df   : > { %6961 = vpow2.f32 %v3741_v56  ;;  %v3653_v36 = vsub.f32 %v11721_v38, %v3535_v14  ;;  %v3654_v57 = vsub.f32 %v11722_v44, %v3535_v14  ;;  %11727 = vst [vmem:[#allocation71_spill] sm:$0xff] %v10323_v48  ;;  %v10327_v58 = vpop.eup %6943  ;;  %v11732_v56 = vld [vmem:[#allocation49_spill] sm:$0xff] }
 0x5e0   : > { %6963 = vpow2.f32 %v3735_v40  ;;  %v3747_v30 = vmul.f32 1.442695, %v3655_v12  ;;  %v3749_v33 = vmul.f32 1.442695, %v3656_v61  ;;  %2126 = vperm.xlu1 %6598, %v11724_v35   ;;  %v11735_v12 = vld [vmem:[#allocation89_spill] sm:$0xff]  ;;  %v11736_v61 = vld [vmem:[#allocation92_spill] sm:$0xff] }
 0x5e1   : > { %6965 = vpow2.f32 %v3737_v52  ;;  %v3743_v16 = vmul.f32 1.442695, %v3653_v36  ;;  %v3745_v10 = vmul.f32 1.442695, %v3654_v57  ;;  %2141 = vperm.xlu0 %6597, %v11726_v18   ;;  %v3550_v27 = vpop.permute.xlu0 %3549  ;;  %v11737_v57 = vld [vmem:[#allocation85_spill] sm:$0xff] }
 0x5e2   : > { %6967 = vpow2.f32 %v3747_v30  ;;  %v3659_v15 = vsub.f32 %v11728_v1, %v3550_v27  ;;  %v3660_v43 = vsub.f32 %v11729_v29, %v3550_v27  ;;  %v3545_v50 = vpop.permute.xlu1 %3544  ;;  %v11739_v27 = vld [vmem:[#allocation51_spill] sm:$0xff] }
 0x5e3   : > { %6969 = vpow2.f32 %v3749_v33  ;;  %v3657_v37 = vsub.f32 %v11730_v4, %v3545_v50  ;;  %v3658_v19 = vsub.f32 %v11731_v54, %v3545_v50  ;;  %v11738_v33 = vld [vmem:[#allocation88_spill] sm:$0xff]  ;;  %v11740_v50 = vld [vmem:[#allocation73_spill] sm:$0xff] }
 0x5e4   : > { %v6946_v42 = vpop.eup %6945  ;;  %6971 = vpow2.f32 %v3743_v16  ;;  %v3755_v34 = vmul.f32 1.442695, %v3659_v15  ;;  %v3757_v39 = vmul.f32 1.442695, %v3660_v43  ;;  %2136 = vperm.xlu1 %6598, %v11732_v56  }
 0x5e5   : > { %v6948_v51 = vpop.eup %6947  ;;  %6973 = vpow2.f32 %v3745_v10  ;;  %v3751_v40 = vmul.f32 1.442695, %v3657_v37  ;;  %v3753_v52 = vmul.f32 1.442695, %v3658_v19  ;;  %2151 = vperm.xlu0 %6597, %v11733_v8   ;;  %v3560_v62 = vpop.permute.xlu0 %3559  ;;  %v11741_v19 = vld [vmem:[#allocation97_spill] sm:$0xff] }
 0x5e6   : > { %v10333_v20 = vpop.eup %6949  ;;  %6975 = vpow2.f32 %v3755_v34  ;;  %v3663_v41 = vsub.f32 %v11735_v12, %v3560_v62  ;;  %v3664_v14 = vsub.f32 %v11736_v61, %v3560_v62  ;;  %v3555_v38 = vpop.permute.xlu1 %3554  ;;  %v10337_v36 = vadd.f32 %v6948_v51, %v6946_v42  ;;  %v11744_v12 = vld [vmem:[#allocation96_spill] sm:$0xff] }
 0x5e7   : > { %11734 = vst [vmem:[#allocation67_spill] sm:$0xff] %v10333_v20  ;;  %v6952_v44 = vpop.eup %6951  ;;  %6977 = vpow2.f32 %v3757_v39  ;;  %v3661_v30 = vsub.f32 %v11737_v57, %v3555_v38  ;;  %v3662_v35 = vsub.f32 %v11738_v33, %v3555_v38  ;;  %v11742_v39 = vld [vmem:[#allocation100_spill] sm:$0xff]  ;;  %v11745_v57 = vld [vmem:[#allocation53_spill] sm:$0xff] }
 0x5e8   : > { %v6954_v16 = vpop.eup %6953  ;;  %6979 = vpow2.f32 %v3751_v40  ;;  %v3763_v10 = vmul.f32 1.442695, %v3663_v41  ;;  %v3765_v18 = vmul.f32 1.442695, %v3664_v14  ;;  %2146 = vperm.xlu1 %6598, %v11739_v27   ;;  %v4277_v1 = vpack.c.bf16 %v6952_v44, %v6946_v42  ;;  %v11743_v42 = vld [vmem:[#allocation93_spill] sm:$0xff] }
 0x5e9   : > { %v10342_v15 = vpop.eup %6955  ;;  %6981 = vpow2.f32 %v3753_v52  ;;  %v3759_v29 = vmul.f32 1.442695, %v3661_v30  ;;  %v3761_v43 = vmul.f32 1.442695, %v3662_v35  ;;  %2161 = vperm.xlu0 %6597, %v11740_v50   ;;  %v3570_v4 = vpop.permute.xlu0 %3569  ;;  %v4278_v37 = vpack.c.bf16 %v6954_v16, %v6948_v51  ;;  %v11746_v35 = vld [vmem:[#allocation41_spill] sm:$0xff] }
 0x5ea   : > { %v6958_v54 = vpop.eup %6957  ;;  %6983 = vpow2.f32 %v3763_v10  ;;  %v3667_v34 = vsub.f32 %v11741_v19, %v3570_v4  ;;  %v3668_v56 = vsub.f32 %v11742_v39, %v3570_v4  ;;  %v3565_v40 = vpop.permute.xlu1 %3564  ;;  %v10347_v8 = vadd.f32 %v6954_v16, %v6952_v44  ;;  %v11747_v27 = vld [vmem:[#allocation105_spill] sm:$0xff] }
 0x5eb   : > { %v10349_v62 = vpop.eup %6959  ;;  %6985 = vpow2.f32 %v3765_v18  ;;  %v3665_v52 = vsub.f32 %v11743_v42, %v3565_v40  ;;  %v3666_v41 = vsub.f32 %v11744_v12, %v3565_v40  ;;  %4493 = vmatprep.mubr.bf16.mxu0 %v4278_v37  ;;  %v10354_v61 = vadd.f32 %v6958_v54, %v10342_v15  ;;  %v11749_v19 = vld [vmem:[#allocation101_spill] sm:$0xff]  ;;  %v11751_v12 = vld [vmem:[#allocation55_spill] sm:$0xff] }
 0x5ec   : > { %v6962_v51 = vpop.eup %6961  ;;  %6987 = vpow2.f32 %v3759_v29  ;;  %v3771_v14 = vmul.f32 1.442695, %v3667_v34  ;;  %v3773_v38 = vmul.f32 1.442695, %v3668_v56  ;;  %4494 = vmatmul.mubr.bf16.gmra.mxu0 %v4277_v1  ;;  %2156 = vperm.xlu1 %6598, %v11745_v57   ;;  %v11748_v29 = vld [vmem:[#allocation108_spill] sm:$0xff] }
 0x5ed   : > { %v6964_v44 = vpop.eup %6963  ;;  %6989 = vpow2.f32 %v3761_v43  ;;  %v3767_v30 = vmul.f32 1.442695, %v3665_v52  ;;  %v3769_v33 = vmul.f32 1.442695, %v3666_v41  ;;  %2171 = vperm.xlu0 %6597, %v11746_v35   ;;  %v3580_v16 = vpop.permute.xlu0 %3579  ;;  %v10359_v10 = vadd.f32 %v6962_v51, %v10349_v62  ;;  %v11750_v34 = vld [vmem:[#allocation104_spill] sm:$0xff] }
 0x5ee   : > { %v6966_v18 = vpop.eup %6965  ;;  %6991 = vpow2.f32 %v3771_v14  ;;  %v3671_v50 = vsub.f32 %v11747_v27, %v3580_v16  ;;  %v3672_v4 = vsub.f32 %v11748_v29, %v3580_v16  ;;  %v3575_v37 = vpop.permute.xlu1 %3574  ;;  %v11753_v27 = vld [vmem:[#allocation79_spill] sm:$0xff]  ;;  %v11754_v29 = vld [vmem:[#allocation82_spill] sm:$0xff] }
 0x5ef   : > { %v10363_v1 = vpop.eup %6967  ;;  %6993 = vpow2.f32 %v3773_v38  ;;  %v3669_v43 = vsub.f32 %v11749_v19, %v3575_v37  ;;  %v3670_v39 = vsub.f32 %v11750_v34, %v3575_v37  ;;  %v4280_v56 = vpack.c.bf16 %v6966_v18, %v6958_v54  ;;  %v11752_v38 = vld [vmem:[#allocation75_spill] sm:$0xff]  ;;  %v11755_v19 = vld [vmem:[#allocation109_spill] sm:$0xff]  ;;  %v11756_v34 = vld [vmem:[#allocation78_spill] sm:$0xff] }
 0x5f0   : > { %v10367_v40 = vpop.eup %6969  ;;  %6995 = vpow2.f32 %v3767_v30  ;;  %v3779_v42 = vmul.f32 1.442695, %v3671_v50  ;;  %v3781_v52 = vmul.f32 1.442695, %v3672_v4  ;;  %2166 = vperm.xlu1 %6598, %v11751_v12   ;;  %v10370_v41 = vadd.f32 %v6966_v18, %v6964_v44 }
 0x5f1   : > { %v10372_v14 = vpop.eup %6971  ;;  %6997 = vpow2.f32 %v3769_v33  ;;  %v3775_v57 = vmul.f32 1.442695, %v3669_v43  ;;  %v3777_v35 = vmul.f32 1.442695, %v3670_v39  ;;  %4501 = vmatprep.mubr.bf16.mxu0 %v4280_v56  ;;  %2181 = vperm.xlu0 %6597, %v11752_v38   ;;  %v3590_v16 = vpop.permute.xlu0 %3589  ;;  %v10377_v54 = vadd.f32 %v10367_v40, %v10363_v1 }
 0x5f2   : > { %v6974_v30 = vpop.eup %6973  ;;  %6999 = vpow2.f32 %v3779_v42  ;;  %v3675_v50 = vsub.f32 %v11753_v27, %v3590_v16  ;;  %v3676_v18 = vsub.f32 %v11754_v29, %v3590_v16  ;;  %v3585_v4 = vpop.permute.xlu1 %3584  ;;  %v4279_v37 = vpack.c.bf16 %v6964_v44, %v10342_v15  ;;  %v11757_v27 = vld [vmem:[#allocation56_spill] sm:$0xff]  ;;  %v11758_v29 = vld [vmem:[#allocation95_spill] sm:$0xff] }
 0x5f3   : > { %v10382_v33 = vpop.eup %6975  ;;  %7001 = vpow2.f32 %v3781_v52  ;;  %v3673_v43 = vsub.f32 %v11755_v19, %v3585_v4  ;;  %v3674_v39 = vsub.f32 %v11756_v34, %v3585_v4  ;;  %v4282_v56 = vpack.c.bf16 %v6974_v30, %v6962_v51  ;;  %v11759_v4 = vld [vmem:[#allocation98_spill] sm:$0xff] }
 0x5f4   : > { %v10386_v12 = vpop.eup %6977  ;;  %7003 = vpow2.f32 %v3775_v57  ;;  %v3787_v38 = vmul.f32 1.442695, %v3675_v50  ;;  %v3789_v42 = vmul.f32 1.442695, %v3676_v18  ;;  %4502 = vmatmul.mubr.bf16.gmra.mxu0 %v4279_v37  ;;  %2176 = vperm.xlu1 %6598, %v11757_v27   ;;  %v10390_v16 = vadd.f32 %v6974_v30, %v10372_v14  ;;  %v11761_v34 = vld [vmem:[#allocation86_spill] sm:$0xff] }
 0x5f5   : > { %v10392_v15 = vpop.eup %6979  ;;  %7005 = vpow2.f32 %v3777_v35  ;;  %v3783_v44 = vmul.f32 1.442695, %v3673_v43  ;;  %v3785_v52 = vmul.f32 1.442695, %v3674_v39  ;;  %4509 = vmatprep.mubr.bf16.mxu0 %v4282_v56  ;;  %4084 = vperm.xlu0 %6597, %v10289_v28   ;;  %v3610_v51 = vpop.permute.xlu0 %3609  ;;  %v10397_v57 = vadd.f32 %v10386_v12, %v10382_v33  ;;  %v11760_v35 = vld [vmem:[#allocation83_spill] sm:$0xff] }
 0x5f6   : > { %v6982_v50 = vpop.eup %6981  ;;  %7007 = vpow2.f32 %v3787_v38  ;;  %v3683_v18 = vsub.f32 %v11758_v29, %v3610_v51  ;;  %v3684_v30 = vsub.f32 %v11759_v4, %v3610_v51  ;;  %v3595_v37 = vpop.permute.xlu1 %3594  ;;  %v4281_v28 = vpack.c.bf16 %v10372_v14, %v10349_v62 }
 0x5f7   : > { %v10401_v19 = vpop.eup %6983  ;;  %7009 = vpow2.f32 %v3789_v42  ;;  %v3677_v43 = vsub.f32 %v11760_v35, %v3595_v37  ;;  %v3678_v39 = vsub.f32 %v11761_v34, %v3595_v37  ;;  %v10409_v38 = vadd.f32 %v6982_v50, %v10392_v15  ;;  %v11763_v35 = vld [vmem:[#allocation90_spill] sm:$0xff] }
 0x5f8   : > { %v10405_v56 = vpop.eup %6985  ;;  %7011 = vpow2.f32 %v3783_v44  ;;  %v3803_v27 = vmul.f32 1.442695, %v3683_v18  ;;  %v3805_v5 = vmul.f32 1.442695, %v3684_v30  ;;  %4079 = vperm.xlu1 %6598, %v10285_v59   ;;  %v11762_v18 = vld [vmem:[#allocation87_spill] sm:$0xff]  ;;  %v4284_v22 = vpack.c.bf16 %v6982_v50, %v10367_v40 }
 0x5f9   : > { %v10411_v29 = vpop.eup %6987  ;;  %7013 = vpow2.f32 %v3785_v52  ;;  %v3791_v51 = vmul.f32 1.442695, %v3677_v43  ;;  %v3793_v4 = vmul.f32 1.442695, %v3678_v39  ;;  %4094 = vperm.xlu0 %6597, %v10295_v45   ;;  %v3600_v42 = vpop.permute.xlu0 %3599  ;;  %v10416_v37 = vadd.f32 %v10405_v56, %v10401_v19  ;;  %v11764_v43 = vld [vmem:[#allocation99_spill] sm:$0xff]  ;;  %v11765_v45 = vld [vmem:[#allocation102_spill] sm:$0xff] }
 0x5fa   : > { %v6990_v44 = vpop.eup %6989  ;;  %7015 = vpow2.f32 %v3803_v27  ;;  %v3679_v30 = vsub.f32 %v11762_v18, %v3600_v42  ;;  %v3680_v34 = vsub.f32 %v11763_v35, %v3600_v42  ;;  %v3615_v7 = vpop.permute.xlu1 %3614  ;;  %v11766_v40 = vld [vmem:[#allocation111_spill] sm:$0xff] }
 0x5fb   : > { %v10422_v52 = vpop.eup %6991  ;;  %7017 = vpow2.f32 %v3805_v5  ;;  %v3685_v39 = vsub.f32 %v11764_v43, %v3615_v7  ;;  %v3686_v59 = vsub.f32 %v11765_v45, %v3615_v7  ;;  %v10431_v42 = vadd.f32 %v6990_v44, %v10411_v29 }
 0x5fc   : > { %v10427_v47 = vpop.eup %6993  ;;  %7019 = vpow2.f32 %v3791_v51  ;;  %v3795_v27 = vmul.f32 1.442695, %v3679_v30  ;;  %v3797_v18 = vmul.f32 1.442695, %v3680_v34  ;;  %4510 = vmatmul.mubr.bf16.gmra.mxu0 %v4281_v28  ;;  %4089 = vperm.xlu1 %6598, %v10292_v11   ;;  %v11767_v28 = vsub.f32 %v11766_v40, %v10031_v53 }
 0x5fd   : > { %v10433_v62 = vpop.eup %6995  ;;  %7021 = vpow2.f32 %v3793_v4  ;;  %v3807_v5 = vmul.f32 1.442695, %v3685_v39  ;;  %v3809_v14 = vmul.f32 1.442695, %v3686_v59  ;;  %4517 = vmatprep.mubr.bf16.mxu0 %v4284_v22  ;;  %4104 = vperm.xlu0 %6597, %v10303_v31   ;;  %v10438_v7 = vadd.f32 %v10427_v47, %v10422_v52  ;;  %v11768_v4 = vld [vmem:[#allocation91_spill] sm:$0xff]  ;;  %v11769_v59 = vld [vmem:[#allocation94_spill] sm:$0xff] }
 0x5fe   : > { %v6998_v45 = vpop.eup %6997  ;;  %v3433_v50 = vmul.f32 1.442695, %v11767_v28  ;;  %7023 = vpow2.f32 %v3795_v27  ;;  %v3605_v51 = vpop.permute.xlu1 %3604  ;;  %v11771_v28 = vld [vmem:[#allocation110_spill] sm:$0xff] }
 0x5ff   : > { %v10443_v30 = vpop.eup %6999  ;;  %7025 = vpow2.f32 %v3797_v18  ;;  %v3681_v35 = vsub.f32 %v11768_v4, %v3605_v51  ;;  %v3682_v22 = vsub.f32 %v11769_v59, %v3605_v51  ;;  %v10451_v43 = vadd.f32 %v6998_v45, %v10433_v62 }
 0x600   : > { %v10447_v34 = vpop.eup %7001  ;;  %7027 = vpow2.f32 %v3807_v5  ;;  %4099 = vperm.xlu1 %6598, %v10299_v21   ;;  %v11770_v5 = vld [vmem:[#allocation103_spill] sm:$0xff]  ;;  %v4283_v59 = vpack.c.bf16 %v10392_v15, %v10363_v1  ;;  %v11775_v15 = vld [vmem:[#allocation112_spill] sm:$0xff] }
 0x601   : > { %v10453_v39 = vpop.eup %7003  ;;  %7029 = vpow2.f32 %v3809_v14  ;;  %v3799_v53 = vmul.f32 1.442695, %v3681_v35  ;;  %v3801_v27 = vmul.f32 1.442695, %v3682_v22  ;;  %4114 = vperm.xlu0 %6597, %v10309_v9   ;;  %v10458_v18 = vadd.f32 %v10447_v34, %v10443_v30  ;;  %v11773_v14 = vld [vmem:[#allocation114_spill] sm:$0xff] }
 0x602   : > { %v10460_v40 = vpop.eup %7005  ;;  %7031 = vpow2.f32 %v3433_v50  ;;  %v11772_v51 = vsub.f32 %v11770_v5, %v11771_v28  ;;  %v11774_v35 = vsub.f32 %v11773_v14, %v10049_v17  ;;  %v4286_v9 = vpack.c.bf16 %v6990_v44, %v10386_v12  ;;  %v11776_v44 = vld [vmem:[#allocation113_spill] sm:$0xff] }
 0x603   : > { %v10467_v31 = vpop.eup %7007  ;;  %7033 = vpow2.f32 %v3799_v53  ;;  %v10475_v21 = vadd.f32 %v10460_v40, %v10453_v39  ;;  %v11777_v53 = vsub.f32 %v11775_v15, %v11776_v44  ;;  %v11778_v28 = vld [vmem:[#allocation117_spill] sm:$0xff]  ;;  %v11781_v44 = vld [vmem:[#allocation116_spill] sm:$0xff] }
 0x604   : > { %v3431_v4 = vmul.f32 1.442695, %v11772_v51  ;;  %v3437_v22 = vmul.f32 1.442695, %v11774_v35  ;;  %v10477_v50 = vpop.eup %7009  ;;  %7035 = vpow2.f32 %v3801_v27  ;;  %4518 = vmatmul.mubr.bf16.gmra.mxu0 %v4283_v59  ;;  %4109 = vperm.xlu1 %6598, %v10306_v2   ;;  %v11779_v51 = vsub.f32 %v11778_v28, %v10067_v26 }
 0x605   : > { %v10480_v1 = vpop.eup %7011  ;;  %4525 = vmatprep.mubr.bf16.mxu0 %v4286_v9  ;;  %4124 = vperm.xlu0 %6597, %v10317_v63   ;;  %v10485_v17 = vadd.f32 %v10477_v50, %v10467_v31  ;;  %v3435_v5 = vmul.f32 1.442695, %v11777_v53  ;;  %v4285_v28 = vpack.c.bf16 %v10411_v29, %v10382_v33  ;;  %v11783_v63 = vld [vmem:[#allocation120_spill] sm:$0xff] }
 0x606   : > { %v10487_v12 = vpop.eup %7013  ;;  %7037 = vpow2.f32 %v3431_v4  ;;  %v3441_v59 = vmul.f32 1.442695, %v11779_v51 }
 0x607   : > { %v7016_v27 = vpop.eup %7015  ;;  %7039 = vpow2.f32 %v3437_v22  ;;  %v10497_v9 = vadd.f32 %v10487_v12, %v10480_v1  ;;  %v11780_v22 = vld [vmem:[#allocation115_spill] sm:$0xff] }
 0x608   : > { %v7018_v14 = vpop.eup %7017  ;;  %4119 = vperm.xlu1 %6598, %v10313_v55   ;;  %7041 = vpow2.f32 %v3435_v5  ;;  %v11782_v26 = vsub.f32 %v11780_v22, %v11781_v44  ;;  %v11784_v55 = vld [vmem:[#allocation121_spill] sm:$0xff]  ;;  %v11789_v44 = vld [vmem:[#allocation124_spill] sm:$0xff] }
 0x609   : > { %v10500_v35 = vpop.eup %7019  ;;  %4134 = vperm.xlu0 %6597, %v10323_v48   ;;  %v10503_v15 = vadd.f32 %v7018_v14, %v7016_v27  ;;  %7043 = vpow2.f32 %v3441_v59  ;;  %v11785_v2 = vsub.f32 %v11783_v63, %v11784_v55  ;;  %v4288_v48 = vpack.c.bf16 %v6998_v45, %v10405_v56  ;;  %v11786_v55 = vld [vmem:[#allocation118_spill] sm:$0xff]  ;;  %v11787_v63 = vld [vmem:[#allocation119_spill] sm:$0xff] }
 0x60a   : > { %v10505_v4 = vpop.eup %7021  ;;  %v3439_v53 = vmul.f32 1.442695, %v11782_v26  ;;  %v11788_v56 = vsub.f32 %v11786_v55, %v11787_v63  ;;  %v11790_v26 = vld [vmem:[#allocation125_spill] sm:$0xff]  ;;  %v11793_v55 = vld [vmem:[#allocation123_spill] sm:$0xff] }
 0x60b   : > { %v10512_v51 = vpop.eup %7023  ;;  %v3445_v11 = vmul.f32 1.442695, %v11785_v2  ;;  %v10520_v13 = vadd.f32 %v10505_v4, %v10500_v35 }
 0x60c   : > { %v10522_v5 = vpop.eup %7025  ;;  %4526 = vmatmul.mubr.bf16.gmra.mxu0 %v4285_v28  ;;  %4129 = vperm.xlu1 %6598, %v10320_v32   ;;  %7045 = vpow2.f32 %v3439_v53  ;;  %v3443_v29 = vmul.f32 1.442695, %v11788_v56  ;;  %v11791_v28 = vsub.f32 %v11789_v44, %v11790_v26  ;;  %v11795_v56 = vld [vmem:[#allocation128_spill] sm:$0xff] }
 0x60d   : > { %v7028_v22 = vpop.eup %7027  ;;  %4533 = vmatprep.mubr.bf16.mxu0 %v4288_v48  ;;  %4144 = vperm.xlu0 %6597, %v10333_v20   ;;  %v10528_v33 = vadd.f32 %v10522_v5, %v10512_v51  ;;  %7047 = vpow2.f32 %v3445_v11 }
 0x60e   : > { %v7030_v2 = vpop.eup %7029  ;;  %v4297_v45 = vpack.c.bf16 %v7028_v22, %v7016_v27  ;;  %v3449_v48 = vmul.f32 1.442695, %v11791_v28  ;;  %7049 = vpow2.f32 %v3443_v29  ;;  %v11792_v27 = vld [vmem:[#allocation122_spill] sm:$0xff]  ;;  %v4290_v29 = vpack.c.bf16 %v10460_v40, %v10427_v47 }
 0x60f   : > { %v10533_v59 = vpop.eup %7031  ;;  %v4298_v32 = vpack.c.bf16 %v7030_v2, %v7018_v14  ;;  %v10538_v20 = vadd.f32 %v7030_v2, %v7028_v22  ;;  %v11794_v11 = vsub.f32 %v11792_v27, %v11793_v55  ;;  %v4287_v14 = vpack.c.bf16 %v10433_v62, %v10401_v19  ;;  %v11798_v19 = vld [vmem:[#allocation126_spill] sm:$0xff]  ;;  %v11799_v62 = vld [vmem:[#allocation127_spill] sm:$0xff]  ;;  %v11801_v55 = vld [vmem:[#allocation132_spill] sm:$0xff] }
 0x610   : > { %v10540_v3 = vpop.eup %7033  ;;  %4139 = vperm.xlu1 %6598, %v10327_v58   ;;  %7051 = vpow2.f32 %v3449_v48  ;;  %v11804_v40 = vld [vmem:[#allocation130_spill] sm:$0xff] }
 0x611   : > { %v10543_v53 = vpop.eup %7035  ;;  %4573 = vmatprep.mubr.bf16.mxu1 %v4298_v32  ;;  %4154 = vperm.xlu0 %6597, %v10533_v59   ;;  %v3447_v63 = vmul.f32 1.442695, %v11794_v11  ;;  %v11796_v32 = vld [vmem:[#allocation129_spill] sm:$0xff] }
 0x612   : > { %4574 = vmatmul.mubr.bf16.vlgmr.msra.gmra.mxu1 %v4297_v45  ;;  %v10553_v22 = vadd.f32 %v10543_v53, %v10540_v3  ;;  %v11797_v44 = vsub.f32 %v11795_v56, %v11796_v32  ;;  %v11800_v45 = vsub.f32 %v11798_v19, %v11799_v62  ;;  %v11802_v11 = vld [vmem:[#allocation133_spill] sm:$0xff]  ;;  %v11807_v62 = vld [vmem:[#allocation136_spill] sm:$0xff] }
 0x613   : > { %v10555_v2 = vpop.eup %7037  ;;  %7053 = vpow2.f32 %v3447_v63  ;;  %v11803_v56 = vsub.f32 %v11801_v55, %v11802_v11  ;;  %v11805_v63 = vld [vmem:[#allocation131_spill] sm:$0xff]  ;;  %v4292_v11 = vpack.c.bf16 %v10487_v12, %v10447_v34  ;;  %v4291_v34 = vpack.c.bf16 %v10480_v1, %v10443_v30 }
 0x614   : > { %v3453_v26 = vmul.f32 1.442695, %v11797_v44  ;;  %v10562_v28 = vpop.eup %7039  ;;  %4534 = vmatmul.mubr.bf16.gmra.mxu0 %v4287_v14  ;;  %4149 = vperm.xlu1 %6598, %v10555_v2   ;;  %v3451_v48 = vmul.f32 1.442695, %v11800_v45  ;;  %v11806_v14 = vsub.f32 %v11804_v40, %v11805_v63  ;;  %v11808_v45 = vld [vmem:[#allocation137_spill] sm:$0xff]  ;;  %v4293_v30 = vpack.c.bf16 %v10500_v35, %v10467_v31 }
 0x615   : > { %4541 = vmatprep.mubr.bf16.mxu0 %v4290_v29  ;;  %4164 = vperm.xlu0 %6597, %v10562_v28   ;;  %v10569_v27 = vpop.eup %7041  ;;  %v3457_v32 = vmul.f32 1.442695, %v11803_v56  ;;  %v4289_v29 = vpack.c.bf16 %v10453_v39, %v10422_v52  ;;  %v11811_v52 = vld [vmem:[#allocation135_spill] sm:$0xff]  ;;  %v4296_v1 = vpack.c.bf16 %v10543_v53, %v10522_v5  ;;  %v4295_v31 = vpack.c.bf16 %v10540_v3, %v10512_v51 }
 0x616   : > { %7055 = vpow2.f32 %v3453_v26  ;;  %v10574_v47 = vpop.eup %7043  ;;  %v3455_v44 = vmul.f32 1.442695, %v11806_v14  ;;  %v11809_v26 = vsub.f32 %v11807_v62, %v11808_v45  ;;  %v4294_v14 = vpack.c.bf16 %v10505_v4, %v10477_v50  ;;  %v11816_v5 = vld [vmem:[#allocation107_spill] sm:$0xff] }
 0x617   : > { %7057 = vpow2.f32 %v3451_v48  ;;  %v11810_v48 = vld [vmem:[#allocation134_spill] sm:$0xff] }
 0x618   : > { %4159 = vperm.xlu1 %6598, %v10569_v27   ;;  %7059 = vpow2.f32 %v3457_v32  ;;  %v3461_v55 = vmul.f32 1.442695, %v11809_v26  ;;  %v11812_v39 = vsub.f32 %v11810_v48, %v11811_v52  ;;  %v11815_v26 = vld [vmem:[#allocation106_spill] sm:$0xff]  ;;  %v11817_v48 = vld [vmem:[#allocation31_spill] sm:$0xff] }
 0x619   : > { %4174 = vperm.xlu0 %6597, %v10574_v47   ;;  %v10583_v19 = vpop.eup %7045  ;;  %7061 = vpow2.f32 %v3455_v44 }
 0x61a   : > { %v10590_v56 = vpop.eup %7047  ;;  %v3459_v40 = vmul.f32 1.442695, %v11812_v39  ;;  %7063 = vpow2.f32 %v3461_v55  ;;  %v11818_v39 = vld [vmem:[#allocation32_spill] sm:$0xff] }
 0x61b   : > { %v10597_v32 = vpop.eup %7049 }
 0x61c   : > { %4542 = vmatmul.mubr.bf16.gmra.mxu0 %v4289_v29  ;;  %4169 = vperm.xlu1 %6598, %v10583_v19   ;;  %7065 = vpow2.f32 %v3459_v40 }
 0x61d   : > { %4549 = vmatprep.mubr.bf16.mxu0 %v4292_v11  ;;  %4184 = vperm.xlu0 %6597, %v10590_v56   ;;  %v10599_v63 = vpop.eup %7051 }
 0x620   : > { %4179 = vperm.xlu1 %6598, %v10597_v32   ;;  %v10605_v12 = vpop.eup %7053 }
 0x621   : > { %4194 = vperm.xlu0 %6597, %v10599_v63  }
 0x623   : > { %v10609_v29 = vpop.eup %7055 }
 0x624   : > { %4550 = vmatmul.mubr.bf16.gmra.mxu0 %v4291_v34  ;;  %4189 = vperm.xlu1 %6598, %v10605_v12   ;;  %v10613_v44 = vpop.eup %7057  ;;  %v2007_v34 = vld [vmem:[#allocation4 + $0x78] sm:$0xff] }
 0x625   : > { %4557 = vmatprep.mubr.bf16.mxu0 %v4294_v14  ;;  %4204 = vperm.xlu0 %6597, %v10609_v29   ;;  %v10615_v62 = vpop.eup %7059 }
 0x626   : > { %v10621_v50 = vpop.eup %7061 }
 0x627   : > { %v10625_v4 = vpop.eup %7063 }
 0x628   : > { %4199 = vperm.xlu1 %6598, %v10613_v44   ;;  %11813 = vst [vmem:[#allocation76_spill] sm:$0xff] %v10625_v4 }
 0x629   : > { %4214 = vperm.xlu0 %6597, %v10615_v62   ;;  %v10629_v45 = vpop.eup %7065 }
 0x62a   : > { %11814 = vst [vmem:[#allocation65_spill] sm:$0xff] %v10629_v45 }
 0x62c   : > { %4558 = vmatmul.mubr.bf16.gmra.mxu0 %v4293_v30  ;;  %4209 = vperm.xlu1 %6598, %v10621_v50  }
 0x62d   : > { %4565 = vmatprep.mubr.bf16.mxu0 %v4296_v1  ;;  %4224 = vperm.xlu0 %6597, %v10625_v4   ;;  %v2008_v1 = vld [vmem:[#allocation4 + $0x80] sm:$0xff] }
 0x630   : > { %4219 = vperm.xlu1 %6598, %v10629_v45  }
 0x634   : > { %4566 = vmatmul.mubr.bf16.gmra.mxu0 %v4295_v31 }
 0x64b   : > { %v3625_v35 = vpop.permute.xlu1 %3624 }
 0x64c   : > { %v3689_v55 = vsub.f32 %v11815_v26, %v3625_v35  ;;  %v3690_v53 = vsub.f32 %v11816_v5, %v3625_v35  ;;  %3885 = vadd.xlane.f32.xlu0 %v10195_v24  ;;  %v3620_v11 = vpop.permute.xlu0 %3619  ;;  %v2009_v24 = vld [vmem:[#allocation4 + $0x88] sm:$0xff]  ;;  %v11819_v26 = vld [vmem:[#allocation33_spill] sm:$0xff] }
 0x64d   : > { %v3687_v52 = vsub.f32 %v11817_v48, %v3620_v11  ;;  %v3688_v40 = vsub.f32 %v11818_v39, %v3620_v11  ;;  %v2011_v48 = vld [vmem:[#allocation4 + $0x98] sm:$0xff] }
 0x64e   : > { %v3815_v14 = vmul.f32 1.442695, %v3689_v55  ;;  %v3817_v30 = vmul.f32 1.442695, %v3690_v53  ;;  %v11820_v11 = vld [vmem:[#allocation34_spill] sm:$0xff] }
 0x64f   : > { %v3811_v4 = vmul.f32 1.442695, %v3687_v52  ;;  %v3813_v45 = vmul.f32 1.442695, %v3688_v40  ;;  %v2102_v3 = vpop.permute.xlu1 %2101  ;;  %v2010_v40 = vld [vmem:[#allocation4 + $0x90] sm:$0xff] }
 0x650   : > { %7067 = vpow2.f32 %v3815_v14  ;;  %v2199_v51 = vmul.f32 %v2102_v3, %v2007_v34  ;;  %3891 = vadd.xlane.f32.xlu0 %v10203_v46  ;;  %v2107_v31 = vpop.permute.xlu0 %2106  ;;  %v2013_v14 = vld [vmem:[#allocation4 + $0xa8] sm:$0xff] }
 0x651   : > { %7069 = vpow2.f32 %v3817_v30  ;;  %v2200_v35 = vmul.f32 %v2107_v31, %v2008_v1  ;;  %v11822_v30 = vld [vmem:[#allocation36_spill] sm:$0xff]  ;;  %v11823_v31 = vld [vmem:[#allocation70_spill] sm:$0xff] }
 0x652   : > { %7071 = vpow2.f32 %v3811_v4  ;;  %v2520_v5 = vadd.f32 %v11819_v26, %v2199_v51  ;;  %v11821_v4 = vld [vmem:[#allocation68_spill] sm:$0xff]  ;;  %v2012_v51 = vld [vmem:[#allocation4 + $0xa0] sm:$0xff] }
 0x653   : > { %7073 = vpow2.f32 %v3813_v45  ;;  %v2521_v55 = vadd.f32 %v11820_v11, %v2200_v35  ;;  %v2112_v53 = vpop.permute.xlu1 %2111  ;;  %v11824_v26 = vld [vmem:[#allocation72_spill] sm:$0xff] }
 0x654   : > { %2552 = vst.msk [vmem:[#allocation4 + $0x78] sm:$0xff] %vm869_vm2, %v2520_v5  ;;  %v2201_v52 = vmul.f32 %v2112_v53, %v2009_v24  ;;  %3894 = vadd.xlane.f32.xlu0 %v10207_v6  ;;  %3888 = vadd.xlane.f32.xlu1 %v10199_v0  ;;  %v2122_v46 = vpop.permute.xlu0 %2121  ;;  %v2015_v24 = vld [vmem:[#allocation4 + $0xb8] sm:$0xff]  ;;  %v2014_v53 = vld [vmem:[#allocation4 + $0xb0] sm:$0xff] }
 0x655   : > { %2553 = vst.msk [vmem:[#allocation4 + $0x80] sm:$0xff] %vm869_vm2, %v2521_v55  ;;  %v2203_v39 = vmul.f32 %v2122_v46, %v2011_v48  ;;  %v11825_v46 = vld [vmem:[#allocation38_spill] sm:$0xff] }
 0x656   : > { %v2522_v34 = vadd.f32 %v11821_v4, %v2201_v52 }
 0x657   : > { %v2524_v45 = vadd.f32 %v11822_v30, %v2203_v39  ;;  %v2117_v1 = vpop.permute.xlu1 %2116 }
 0x658   : > { %2554 = vst.msk [vmem:[#allocation4 + $0x88] sm:$0xff] %vm869_vm2, %v2522_v34  ;;  %v2202_v3 = vmul.f32 %v2117_v1, %v2010_v40  ;;  %3900 = vadd.xlane.f32.xlu0 %v10211_v25  ;;  %3897 = vadd.xlane.f32.xlu1 %v10209_v49  ;;  %v2132_v6 = vpop.permute.xlu0 %2131  ;;  %v2017_v40 = vld [vmem:[#allocation4 + $0xc8] sm:$0xff]  ;;  %v11826_v34 = vld [vmem:[#allocation74_spill] sm:$0xff] }
 0x659   : > { %2556 = vst.msk [vmem:[#allocation4 + $0x98] sm:$0xff] %vm869_vm2, %v2524_v45  ;;  %v2205_v0 = vmul.f32 %v2132_v6, %v2013_v14 }
 0x65a   : > { %v2523_v35 = vadd.f32 %v11823_v31, %v2202_v3  ;;  %v2016_v31 = vld [vmem:[#allocation4 + $0xc0] sm:$0xff] }
 0x65b   : > { %v2526_v5 = vadd.f32 %v11824_v26, %v2205_v0  ;;  %v2127_v48 = vpop.permute.xlu1 %2126  ;;  %v2019_v26 = vld [vmem:[#allocation4 + $0xd8] sm:$0xff] }
 0x65c   : > { %2555 = vst.msk [vmem:[#allocation4 + $0x90] sm:$0xff] %vm869_vm2, %v2523_v35  ;;  %v2204_v11 = vmul.f32 %v2127_v48, %v2012_v51  ;;  %3906 = vadd.xlane.f32.xlu0 %v10215_v60  ;;  %3903 = vadd.xlane.f32.xlu1 %v10213_v23  ;;  %v2142_v25 = vpop.permute.xlu0 %2141  ;;  %v11827_v35 = vld [vmem:[#allocation40_spill] sm:$0xff] }
 0x65d   : > { %v10657_v49 = vpop.eup %7067  ;;  %2558 = vst.msk [vmem:[#allocation4 + $0xa8] sm:$0xff] %vm869_vm2, %v2526_v5  ;;  %v2207_v55 = vmul.f32 %v2142_v25, %v2015_v24  ;;  %v11828_v5 = vld [vmem:[#allocation43_spill] sm:$0xff] }
 0x65e   : > { %v10660_v52 = vpop.eup %7069  ;;  %v2525_v39 = vadd.f32 %v11825_v46, %v2204_v11  ;;  %v2018_v46 = vld [vmem:[#allocation4 + $0xd0] sm:$0xff] }
 0x65f   : > { %v10663_v4 = vpop.eup %7071  ;;  %v2528_v14 = vadd.f32 %v11826_v34, %v2207_v55  ;;  %v10666_v30 = vpop.f32.mrf.mxu0  ;;  %v2021_v34 = vld [vmem:[#allocation4 + $0xe8] sm:$0xff] }
 0x660   : > { %v2137_v60 = vpop.permute.xlu1 %2136  ;;  %v10668_v23 = vpop.eup %7073  ;;  %2557 = vst.msk [vmem:[#allocation4 + $0xa0] sm:$0xff] %vm869_vm2, %v2525_v39  ;;  %3909 = vadd.xlane.f32.xlu1 %v10337_v36  ;;  %3912 = vadd.xlane.f32.xlu0 %v10347_v8  ;;  %v4299_v3 = vpack.c.bf16 %v10657_v49, %v10663_v4  ;;  %v11829_v39 = vld [vmem:[#allocation42_spill] sm:$0xff] }
 0x661   : > { %v2206_v45 = vmul.f32 %v2137_v60, %v2014_v53  ;;  %v2152_v1 = vpop.permute.xlu0 %2151  ;;  %2560 = vst.msk [vmem:[#allocation4 + $0xb8] sm:$0xff] %vm869_vm2, %v2528_v14  ;;  %v10676_v6 = vpop.f32.mrf.mxu0  ;;  %v4300_v51 = vpack.c.bf16 %v10660_v52, %v10668_v23  ;;  %v11830_v14 = vld [vmem:[#allocation46_spill] sm:$0xff] }
 0x662   : > { %v2209_v0 = vmul.f32 %v2152_v1, %v2017_v40 }
 0x663   : > { %v2527_v24 = vadd.f32 %v11827_v35, %v2206_v45  ;;  %4581 = vmatprep.mubr.bf16.mxu1 %v4300_v51  ;;  %v6327_v8 = vpop.f32.mrf.mxu0  ;;  %v2020_v51 = vld [vmem:[#allocation4 + $0xe0] sm:$0xff] }
 0x664   : > { %v2530_v36 = vadd.f32 %v11828_v5, %v2209_v0  ;;  %v2147_v48 = vpop.permute.xlu1 %2146  ;;  %4582 = vmatmul.mubr.bf16.gmra.mxu1 %v4299_v3  ;;  %3915 = vadd.xlane.f32.xlu1 %v10354_v61 }
 0x665   : > { %2559 = vst.msk [vmem:[#allocation4 + $0xb0] sm:$0xff] %vm869_vm2, %v2527_v24  ;;  %v2208_v11 = vmul.f32 %v2147_v48, %v2016_v31  ;;  %v2162_v25 = vpop.permute.xlu0 %2161  ;;  %v6328_v55 = vpop.f32.mrf.mxu0  ;;  %3918 = vadd.xlane.f32.xlu0 %v10370_v41  ;;  %v11831_v31 = vld [vmem:[#allocation44_spill] sm:$0xff]  ;;  %v2023_v24 = vld [vmem:[#allocation4 + $0xf8] sm:$0xff] }
 0x666   : > { %2562 = vst.msk [vmem:[#allocation4 + $0xc8] sm:$0xff] %vm869_vm2, %v2530_v36  ;;  %v2211_v53 = vmul.f32 %v2162_v25, %v2019_v26  ;;  %v11832_v26 = vld [vmem:[#allocation50_spill] sm:$0xff] }
 0x667   : > { %v2529_v40 = vadd.f32 %v11829_v39, %v2208_v11  ;;  %v6330_v45 = vpop.f32.mrf.mxu0 }
 0x668   : > { %v2532_v60 = vadd.f32 %v11830_v14, %v2211_v53  ;;  %v2157_v1 = vpop.permute.xlu1 %2156  ;;  %3921 = vadd.xlane.f32.xlu1 %v10359_v10  ;;  %v2022_v53 = vld [vmem:[#allocation4 + $0xf0] sm:$0xff] }
 0x669   : > { %2561 = vst.msk [vmem:[#allocation4 + $0xc0] sm:$0xff] %vm869_vm2, %v2529_v40  ;;  %v2210_v3 = vmul.f32 %v2157_v1, %v2018_v46  ;;  %v2172_v61 = vpop.permute.xlu0 %2171  ;;  %v6331_v0 = vpop.f32.mrf.mxu0  ;;  %3924 = vadd.xlane.f32.xlu0 %v10390_v16  ;;  %v11833_v46 = vld [vmem:[#allocation48_spill] sm:$0xff] }
 0x66a   : > { %2564 = vst.msk [vmem:[#allocation4 + $0xd8] sm:$0xff] %vm869_vm2, %v2532_v60  ;;  %v2213_v41 = vmul.f32 %v2172_v61, %v2021_v34  ;;  %v4046_v40 = vld [vmem:[#allocation4 + $0x108] sm:$0xff]  ;;  %v11834_v34 = vld [vmem:[#allocation54_spill] sm:$0xff]  ;;  %v6329_v61 = vadd.f32 %v6328_v55, %v6327_v8 }
 0x66b   : > { %v2531_v35 = vadd.f32 %v11831_v31, %v2210_v3  ;;  %v6333_v36 = vpop.f32.mrf.mxu0  ;;  %v11835_v31 = vld [vmem:[#allocation52_spill] sm:$0xff] }
 0x66c   : > { %v2534_v5 = vadd.f32 %v11832_v26, %v2213_v41  ;;  %v2167_v48 = vpop.permute.xlu1 %2166  ;;  %3927 = vadd.xlane.f32.xlu1 %v10377_v54 }
 0x66d   : > { %2563 = vst.msk [vmem:[#allocation4 + $0xd0] sm:$0xff] %vm869_vm2, %v2531_v35  ;;  %v2212_v11 = vmul.f32 %v2167_v48, %v2020_v51  ;;  %v2182_v10 = vpop.permute.xlu0 %2181  ;;  %v6334_v25 = vpop.f32.mrf.mxu0  ;;  %3930 = vadd.xlane.f32.xlu0 %v10409_v38  ;;  %v4045_v51 = vld [vmem:[#allocation4 + $0x100] sm:$0xff] }
 0x66e   : > { %2566 = vst.msk [vmem:[#allocation4 + $0xe8] sm:$0xff] %vm869_vm2, %v2534_v5  ;;  %v2215_v16 = vmul.f32 %v2182_v10, %v2023_v24  ;;  %v4048_v24 = vld [vmem:[#allocation4 + $0x118] sm:$0xff]  ;;  %v6335_v55 = vadd.f32 %v6334_v25, %v6333_v36 }
 0x66f   : > { %v2533_v39 = vadd.f32 %v11833_v46, %v2212_v11  ;;  %v6336_v60 = vpop.f32.mrf.mxu0  ;;  %v6326_v11 = vadd.f32 %v10676_v6, %v10666_v30  ;;  %v4050_v46 = vld [vmem:[#allocation4 + $0x128] sm:$0xff]  ;;  %v6332_v30 = vadd.f32 %v6331_v0, %v6330_v45 }
 0x670   : > { %v2536_v14 = vadd.f32 %v11834_v34, %v2215_v16  ;;  %v2177_v1 = vpop.permute.xlu1 %2176  ;;  %3933 = vadd.xlane.f32.xlu1 %v10397_v57  ;;  %v4047_v16 = vld [vmem:[#allocation4 + $0x110] sm:$0xff] }
 0x671   : > { %2565 = vst.msk [vmem:[#allocation4 + $0xe0] sm:$0xff] %vm869_vm2, %v2533_v39  ;;  %v2214_v3 = vmul.f32 %v2177_v1, %v2022_v53  ;;  %v4085_v54 = vpop.permute.xlu0 %4084  ;;  %v6337_v41 = vpop.f32.mrf.mxu0  ;;  %3936 = vadd.xlane.f32.xlu0 %v10431_v42 }
 0x672   : > { %2568 = vst.msk [vmem:[#allocation4 + $0xf8] sm:$0xff] %vm869_vm2, %v2536_v14  ;;  %v4238_v38 = vmul.f32 %v4085_v54, %v4046_v40  ;;  %v4049_v14 = vld [vmem:[#allocation4 + $0x120] sm:$0xff]  ;;  %v6338_v45 = vadd.f32 %v6337_v41, %v6336_v60 }
 0x673   : > { %v2535_v35 = vadd.f32 %v11835_v31, %v2214_v3  ;;  %v6339_v5 = vpop.f32.mrf.mxu0  ;;  %v4052_v3 = vld [vmem:[#allocation4 + $0x138] sm:$0xff]  ;;  %v4051_v31 = vld [vmem:[#allocation4 + $0x130] sm:$0xff] }
 0x674   : > { %v4591_v26 = vadd.f32 %v6329_v61, %v4238_v38  ;;  %v4080_v48 = vpop.permute.xlu1 %4079  ;;  %3939 = vadd.xlane.f32.xlu1 %v10416_v37 }
 0x675   : > { %2567 = vst.msk [vmem:[#allocation4 + $0xf0] sm:$0xff] %vm869_vm2, %v2535_v35  ;;  %v4237_v57 = vmul.f32 %v4080_v48, %v4045_v51  ;;  %v4095_v8 = vpop.permute.xlu0 %4094  ;;  %v6340_v42 = vpop.f32.mrf.mxu0  ;;  %3942 = vadd.xlane.f32.xlu0 %v10451_v43  ;;  %v11836_v48 = vld [vmem:[#allocation139_spill] sm:$0xff] }
 0x676   : > { %4623 = vst.msk [vmem:[#allocation4 + $0x108] sm:$0xff] %vm869_vm2, %v4591_v26  ;;  %v4240_v10 = vmul.f32 %v4095_v8, %v4048_v24  ;;  %v6341_v36 = vadd.f32 %v6340_v42, %v6339_v5  ;;  %v11840_v8 = vld [vmem:[#allocation140_spill] sm:$0xff] }
 0x677   : > { %v4590_v53 = vadd.f32 %v6326_v11, %v4237_v57  ;;  %v6342_v40 = vpop.f32.mrf.mxu0  ;;  %v3977_v57 = vadd.f32 %v10660_v52, %v10657_v49 }
 0x678   : > { %v4593_v39 = vadd.f32 %v6335_v55, %v4240_v10  ;;  %v4090_v34 = vpop.permute.xlu1 %4089  ;;  %3945 = vadd.xlane.f32.xlu1 %v10438_v7 }
 0x679   : > { %4622 = vst.msk [vmem:[#allocation4 + $0x100] sm:$0xff] %vm869_vm2, %v4590_v53  ;;  %v4239_v6 = vmul.f32 %v4090_v34, %v4047_v16  ;;  %v4105_v37 = vpop.permute.xlu0 %4104  ;;  %v6343_v25 = vpop.f32.mrf.mxu0  ;;  %3948 = vadd.xlane.f32.xlu0 %v10475_v21 }
 0x67a   : > { %4625 = vst.msk [vmem:[#allocation4 + $0x118] sm:$0xff] %vm869_vm2, %v4593_v39  ;;  %v4242_v43 = vmul.f32 %v4105_v37, %v4050_v46  ;;  %v6344_v5 = vadd.f32 %v6343_v25, %v6342_v40  ;;  %v4053_v46 = vld [vmem:[#allocation4 + $0x140] sm:$0xff] }
 0x67b   : > { %v4592_v1 = vadd.f32 %v6332_v30, %v4239_v6  ;;  %v6345_v61 = vpop.f32.mrf.mxu0 }
 0x67c   : > { %v4595_v54 = vadd.f32 %v6341_v36, %v4242_v43  ;;  %v4100_v38 = vpop.permute.xlu1 %4099  ;;  %3951 = vadd.xlane.f32.xlu1 %v10458_v18  ;;  %v4054_v36 = vld [vmem:[#allocation4 + $0x148] sm:$0xff] }
 0x67d   : > { %4624 = vst.msk [vmem:[#allocation4 + $0x110] sm:$0xff] %vm869_vm2, %v4592_v1  ;;  %v4241_v0 = vmul.f32 %v4100_v38, %v4049_v14  ;;  %v4115_v7 = vpop.permute.xlu0 %4114  ;;  %v6346_v51 = vpop.f32.mrf.mxu0  ;;  %3954 = vadd.xlane.f32.xlu0 %v10497_v9  ;;  %v3974_v9 = vadd.f32 %v10668_v23, %v10663_v4  ;;  %v4055_v38 = vld [vmem:[#allocation4 + $0x150] sm:$0xff] }
 0x67e   : > { %4627 = vst.msk [vmem:[#allocation4 + $0x128] sm:$0xff] %vm869_vm2, %v4595_v54  ;;  %v4244_v21 = vmul.f32 %v4115_v7, %v4052_v3  ;;  %v6347_v24 = vadd.f32 %v6346_v51, %v6345_v61 }
 0x67f   : > { %v4594_v35 = vadd.f32 %v6338_v45, %v4241_v0 }
 0x680   : > { %v4110_v26 = vpop.permute.xlu1 %4109  ;;  %v4597_v60 = vadd.f32 %v6347_v24, %v4244_v21  ;;  %3957 = vadd.xlane.f32.xlu1 %v10485_v17  ;;  %v11837_v17 = vld [vmem:[#allocation141_spill] sm:$0xff] }
 0x681   : > { %4626 = vst.msk [vmem:[#allocation4 + $0x120] sm:$0xff] %vm869_vm2, %v4594_v35  ;;  %v4243_v41 = vmul.f32 %v4110_v26, %v4051_v31  ;;  %3960 = vadd.xlane.f32.xlu0 %v10520_v13  ;;  %v11838_v11 = vsub.f32 %v11836_v48, %v11837_v17  ;;  %v4056_v31 = vld [vmem:[#allocation4 + $0x158] sm:$0xff] }
 0x682   : > { %4629 = vst.msk [vmem:[#allocation4 + $0x138] sm:$0xff] %vm869_vm2, %v4597_v60 }
 0x683   : > { %v4596_v18 = vadd.f32 %v6344_v5, %v4243_v41  ;;  %v3463_v13 = vmul.f32 1.442695, %v11838_v11 }
 0x684   : > { %3963 = vadd.xlane.f32.xlu1 %v10528_v33  ;;  %v11839_v33 = vld [vmem:[#allocation138_spill] sm:$0xff] }
 0x685   : > { %4628 = vst.msk [vmem:[#allocation4 + $0x130] sm:$0xff] %vm869_vm2, %v4596_v18  ;;  %3966 = vadd.xlane.f32.xlu0 %v10553_v22  ;;  %7075 = vpow2.f32 %v3463_v13  ;;  %v11841_v22 = vsub.f32 %v11839_v33, %v11840_v8 }
 0x687   : > { %v3465_v55 = vmul.f32 1.442695, %v11841_v22  ;;  %v4058_v22 = vld [vmem:[#allocation4 + $0x168] sm:$0xff] }
 0x688   : > { %3969 = vadd.xlane.f32.xlu1 %v10503_v15  ;;  %v4125_v15 = vpop.permute.xlu0 %4124 }
 0x689   : > { %3972 = vadd.xlane.f32.xlu0 %v10538_v20  ;;  %7077 = vpow2.f32 %v3465_v55  ;;  %v4120_v20 = vpop.permute.xlu1 %4119  ;;  %v4246_v1 = vmul.f32 %v4125_v15, %v4054_v36 }
 0x68a   : > { %v4245_v6 = vmul.f32 %v4120_v20, %v4053_v46  ;;  %v4059_v46 = vld [vmem:[#allocation4 + $0x170] sm:$0xff] }
 0x68c   : > { %3975 = vadd.xlane.f32.xlu1 %v3974_v9  ;;  %v4135_v42 = vpop.permute.xlu0 %4134  ;;  %v4057_v9 = vld [vmem:[#allocation4 + $0x160] sm:$0xff] }
 0x68d   : > { %3978 = vadd.xlane.f32.xlu0 %v3977_v57  ;;  %v4130_v10 = vpop.permute.xlu1 %4129  ;;  %v4248_v41 = vmul.f32 %v4135_v42, %v4056_v31 }
 0x68e   : > { %v4247_v51 = vmul.f32 %v4130_v10, %v4055_v38 }
 0x690   : > { %v4145_v23 = vpop.permute.xlu0 %4144 }
 0x691   : > { %v4140_v16 = vpop.permute.xlu1 %4139  ;;  %v4250_v42 = vmul.f32 %v4145_v23, %v4058_v22  ;;  %v4063_v22 = vld [vmem:[#allocation4 + $0x190] sm:$0xff] }
 0x692   : > { %v10738_v4 = vpop.eup %7075  ;;  %v4249_v13 = vmul.f32 %v4140_v16, %v4057_v9  ;;  %v3820_v9 = vld [vmem:[#allocation3 + $0x100] sm:$0xff] }
 0x694   : > { %v10744_v49 = vpop.permute.xlu0 %4154 }
 0x695   : > { %v4150_v52 = vpop.permute.xlu1 %4149 }
 0x696   : > { %v10741_v53 = vpop.eup %7077  ;;  %v4251_v36 = vmul.f32 %v4150_v52, %v4059_v46 }
 0x698   : > { %v10746_v40 = vpop.permute.xlu0 %4164 }
 0x699   : > { %v10748_v34 = vpop.permute.xlu1 %4159 }
 0x69c   : > { %v10750_v3 = vpop.permute.xlu0 %4174 }
 0x69d   : > { %4229 = vperm.xlu1 %6598, %v10738_v4   ;;  %v10752_v54 = vpop.permute.xlu1 %4169 }
 0x6a0   : > { %v10756_v24 = vpop.permute.xlu0 %4184 }
 0x6a1   : > { %v10758_v26 = vpop.permute.xlu1 %4179 }
 0x6a3   : > { %4234 = vperm.xlu0 %6597, %v10741_v53  }
 0x6a4   : > { %v10761_v57 = vpop.permute.xlu0 %4194 }
 0x6a5   : > { %v10763_v33 = vpop.permute.xlu1 %4189 }
 0x6a9   : > { %v10769_v16 = vpop.permute.xlu1 %4199 }
 0x6ac   : > { %v6348_v39 = vpop.f32.mrf.mxu0 }
 0x6ae   : > { %v6349_v30 = vpop.f32.mrf.mxu0 }
 0x6af   : > { %v6350_v37 = vadd.f32 %v6349_v30, %v6348_v39  ;;  %v10767_v30 = vpop.permute.xlu0 %4204 }
 0x6b0   : > { %v6351_v25 = vpop.f32.mrf.mxu0 }
 0x6b1   : > { %v4598_v43 = vadd.f32 %v6350_v37, %v4245_v6 }
 0x6b2   : > { %v6352_v14 = vpop.f32.mrf.mxu0 }
 0x6b3   : > { %4630 = vst.msk [vmem:[#allocation4 + $0x140] sm:$0xff] %vm869_vm2, %v4598_v43  ;;  %v6353_v61 = vadd.f32 %v6352_v14, %v6351_v25  ;;  %v4060_v43 = vld [vmem:[#allocation4 + $0x178] sm:$0xff]  ;;  %v10773_v38 = vpop.permute.xlu0 %4214 }
 0x6b4   : > { %v6354_v45 = vpop.f32.mrf.mxu0  ;;  %v4252_v23 = vmul.f32 %v10744_v49, %v4060_v43 }
 0x6b5   : > { %v4599_v0 = vadd.f32 %v6353_v61, %v4246_v1 }
 0x6b6   : > { %v6355_v7 = vpop.f32.mrf.mxu0 }
 0x6b7   : > { %4631 = vst.msk [vmem:[#allocation4 + $0x148] sm:$0xff] %vm869_vm2, %v4599_v0  ;;  %v6356_v21 = vadd.f32 %v6355_v7, %v6354_v45  ;;  %v10775_v45 = vpop.permute.xlu1 %4209  ;;  %v4061_v7 = vld [vmem:[#allocation4 + $0x180] sm:$0xff] }
 0x6b8   : > { %v6357_v35 = vpop.f32.mrf.mxu0  ;;  %v4253_v31 = vmul.f32 %v10748_v34, %v4061_v7  ;;  %v11843_v7 = vld [vmem:[#allocation59_spill] sm:$0xff] }
 0x6b9   : > { %v4600_v5 = vadd.f32 %v6356_v21, %v4247_v51 }
 0x6ba   : > { %v6358_v60 = vpop.f32.mrf.mxu0 }
 0x6bb   : > { %4632 = vst.msk [vmem:[#allocation4 + $0x150] sm:$0xff] %vm869_vm2, %v4600_v5  ;;  %v6359_v18 = vadd.f32 %v6358_v60, %v6357_v35  ;;  %v4062_v5 = vld [vmem:[#allocation4 + $0x188] sm:$0xff]  ;;  %v4220_v49 = vpop.permute.xlu1 %4219 }
 0x6bc   : > { %v6360_v48 = vpop.f32.mrf.mxu0 }
 0x6bd   : > { %v4601_v17 = vadd.f32 %v6359_v18, %v4248_v41  ;;  %v4225_v41 = vpop.permute.xlu0 %4224 }
 0x6be   : > { %v6361_v11 = vpop.f32.mrf.mxu0 }
 0x6bf   : > { %4633 = vst.msk [vmem:[#allocation4 + $0x158] sm:$0xff] %vm869_vm2, %v4601_v17  ;;  %v6362_v8 = vadd.f32 %v6361_v11, %v6360_v48  ;;  %v4073_v48 = vld [vmem:[#allocation4 + $0x1e0] sm:$0xff] }
 0x6c0   : > { %v6363_v55 = vpop.f32.mrf.mxu0 }
 0x6c1   : > { %v4602_v15 = vadd.f32 %v6362_v8, %v4249_v13  ;;  %v4254_v13 = vmul.f32 %v10746_v40, %v4062_v5  ;;  %v3821_v5 = vld [vmem:[#allocation3 + $0x108] sm:$0xff] }
 0x6c2   : > { %v6364_v20 = vpop.f32.mrf.mxu0 }
 0x6c3   : > { %4634 = vst.msk [vmem:[#allocation4 + $0x160] sm:$0xff] %vm869_vm2, %v4602_v15  ;;  %v6365_v10 = vadd.f32 %v6364_v20, %v6363_v55  ;;  %v11842_v15 = vld [vmem:[#allocation57_spill] sm:$0xff] }
 0x6c4   : > { %v6366_v39 = vpop.f32.mrf.mxu0  ;;  %v3852_v20 = vmul.f32 %v11842_v15, %v3820_v9 }
 0x6c5   : > { %v4603_v6 = vadd.f32 %v6365_v10, %v4250_v42  ;;  %v4265_v42 = vmul.f32 %v4220_v49, %v4073_v48 }
 0x6c6   : > { %v6367_v37 = vpop.f32.mrf.mxu0 }
 0x6c7   : > { %4635 = vst.msk [vmem:[#allocation4 + $0x168] sm:$0xff] %vm869_vm2, %v4603_v6  ;;  %v6368_v25 = vadd.f32 %v6367_v37, %v6366_v39  ;;  %v3822_v6 = vld [vmem:[#allocation3 + $0x110] sm:$0xff]  ;;  %v4074_v37 = vld [vmem:[#allocation4 + $0x1e8] sm:$0xff] }
 0x6c8   : > { %v6369_v14 = vpop.f32.mrf.mxu0 }
 0x6c9   : > { %v4604_v1 = vadd.f32 %v6368_v25, %v4251_v36 }
 0x6ca   : > { %v6370_v61 = vpop.f32.mrf.mxu0 }
 0x6cb   : > { %4636 = vst.msk [vmem:[#allocation4 + $0x170] sm:$0xff] %vm869_vm2, %v4604_v1  ;;  %v6371_v0 = vadd.f32 %v6370_v61, %v6369_v14  ;;  %v4255_v14 = vmul.f32 %v10752_v54, %v4063_v22  ;;  %v4064_v61 = vld [vmem:[#allocation4 + $0x198] sm:$0xff] }
 0x6cc   : > { %v6372_v51 = vpop.f32.mrf.mxu0 }
 0x6cd   : > { %v4605_v21 = vadd.f32 %v6371_v0, %v4252_v23 }
 0x6ce   : > { %v6373_v52 = vpop.f32.mrf.mxu0 }
 0x6cf   : > { %4637 = vst.msk [vmem:[#allocation4 + $0x178] sm:$0xff] %vm869_vm2, %v4605_v21  ;;  %v6374_v35 = vadd.f32 %v6373_v52, %v6372_v51  ;;  %v3854_v51 = vmul.f32 %v11843_v7, %v3822_v6  ;;  %v4266_v21 = vmul.f32 %v4225_v41, %v4074_v37  ;;  %v11844_v41 = vld [vmem:[#allocation58_spill] sm:$0xff]  ;;  %v4066_v37 = vld [vmem:[#allocation4 + $0x1a8] sm:$0xff] }
 0x6d0   : > { %v6375_v60 = vpop.f32.mrf.mxu0  ;;  %v3827_v7 = vld [vmem:[#allocation3 + $0x138] sm:$0xff] }
 0x6d1   : > { %v4606_v18 = vadd.f32 %v6374_v35, %v4253_v31 }
 0x6d2   : > { %v6408_v17 = vpop.f32.mrf.mxu1  ;;  %v6376_v11 = vpop.f32.mrf.mxu0 }
 0x6d3   : > { %4638 = vst.msk [vmem:[#allocation4 + $0x180] sm:$0xff] %vm869_vm2, %v4606_v18  ;;  %v6377_v8 = vadd.f32 %v6376_v11, %v6375_v60  ;;  %v3823_v60 = vld [vmem:[#allocation3 + $0x118] sm:$0xff]  ;;  %v4256_v18 = vmul.f32 %v10750_v3, %v4064_v61 }
 0x6d4   : > { %v6409_v55 = vpop.f32.mrf.mxu1  ;;  %v6378_v34 = vpop.f32.mrf.mxu0 }
 0x6d5   : > { %v4607_v10 = vadd.f32 %v6377_v8, %v4254_v13  ;;  %v6410_v46 = vadd.f32 %v6409_v55, %v6408_v17  ;;  %v3886_v39 = vpop.xlane.xlu0 %3885  ;;  %v4065_v17 = vld [vmem:[#allocation4 + $0x1a0] sm:$0xff]  ;;  %v3853_v13 = vmul.f32 %v11844_v41, %v3821_v5  ;;  %v11845_v8 = vld [vmem:[#allocation60_spill] sm:$0xff] }
 0x6d6   : > { %v6411_v36 = vpop.f32.mrf.mxu1  ;;  %v6379_v25 = vpop.f32.mrf.mxu0  ;;  %v3980_v43 = vadd.f32 %v3886_v39, %v3852_v20  ;;  %v3855_v22 = vmul.f32 %v11845_v8, %v3823_v60  ;;  %v3824_v20 = vld [vmem:[#allocation3 + $0x120] sm:$0xff]  ;;  %v4257_v39 = vmul.f32 %v10758_v26, %v4065_v17  ;;  %v3829_v41 = vld [vmem:[#allocation3 + $0x148] sm:$0xff] }
 0x6d7   : > { %4639 = vst.msk [vmem:[#allocation4 + $0x188] sm:$0xff] %vm869_vm2, %v4607_v10  ;;  %v4618_v40 = vadd.f32 %v6410_v46, %v4265_v42  ;;  %v6380_v1 = vadd.f32 %v6379_v25, %v6378_v34  ;;  %v3825_v42 = vld [vmem:[#allocation3 + $0x128] sm:$0xff] }
 0x6d8   : > { %4012 = vst.msk [vmem:[#allocation3 + $0x100] sm:$0xff] %vm1959_vm3, %v3980_v43  ;;  %v6412_v23 = vpop.f32.mrf.mxu1  ;;  %v6381_v0 = vpop.f32.mrf.mxu0  ;;  %v11846_v25 = vld [vmem:[#allocation35_spill] sm:$0xff] }
 0x6d9   : > { %4650 = vst.msk [vmem:[#allocation4 + $0x1e0] sm:$0xff] %vm869_vm2, %v4618_v40  ;;  %v4608_v52 = vadd.f32 %v6380_v1, %v4255_v14  ;;  %v6413_v31 = vadd.f32 %v6412_v23, %v6411_v36  ;;  %v3892_v35 = vpop.xlane.xlu0 %3891  ;;  %v3856_v43 = vmul.f32 %v11846_v25, %v3824_v20  ;;  %v11847_v14 = vld [vmem:[#allocation69_spill] sm:$0xff]  ;;  %v11848_v60 = vld [vmem:[#allocation63_spill] sm:$0xff] }
 0x6da   : > { %v6382_v54 = vpop.f32.mrf.mxu0  ;;  %v3982_v49 = vadd.f32 %v3892_v35, %v3854_v51  ;;  %v3857_v40 = vmul.f32 %v11847_v14, %v3825_v42  ;;  %v4067_v35 = vld [vmem:[#allocation4 + $0x1b0] sm:$0xff] }
 0x6db   : > { %4640 = vst.msk [vmem:[#allocation4 + $0x190] sm:$0xff] %vm869_vm2, %v4608_v52  ;;  %v4619_v9 = vadd.f32 %v6413_v31, %v4266_v21  ;;  %v6383_v48 = vadd.f32 %v6382_v54, %v6381_v0  ;;  %v3826_v0 = vld [vmem:[#allocation3 + $0x130] sm:$0xff]  ;;  %v4258_v52 = vmul.f32 %v10756_v24, %v4066_v37 }
 0x6dc   : > { %4014 = vst.msk [vmem:[#allocation3 + $0x110] sm:$0xff] %vm1959_vm3, %v3982_v49  ;;  %v6384_v11 = vpop.f32.mrf.mxu0  ;;  %v3858_v54 = vmul.f32 %v11848_v60, %v3826_v0  ;;  %v11849_v49 = vld [vmem:[#allocation64_spill] sm:$0xff]  ;;  %v11850_v20 = vld [vmem:[#allocation61_spill] sm:$0xff] }
 0x6dd   : > { %4651 = vst.msk [vmem:[#allocation4 + $0x1e8] sm:$0xff] %vm869_vm2, %v4619_v9  ;;  %v4609_v55 = vadd.f32 %v6383_v48, %v4256_v18  ;;  %v3889_v34 = vpop.xlane.xlu1 %3888  ;;  %v3895_v15 = vpop.xlane.xlu0 %3894  ;;  %v3859_v18 = vmul.f32 %v11849_v49, %v3827_v7  ;;  %v3830_v37 = vld [vmem:[#allocation3 + $0x150] sm:$0xff] }
 0x6de   : > { %v3981_v3 = vadd.f32 %v3889_v34, %v3853_v13  ;;  %v6385_v10 = vpop.f32.mrf.mxu0  ;;  %v3983_v46 = vadd.f32 %v3895_v15, %v3855_v22  ;;  %v4259_v22 = vmul.f32 %v10763_v33, %v4067_v35  ;;  %v4068_v34 = vld [vmem:[#allocation4 + $0x1b8] sm:$0xff] }
 0x6df   : > { %4641 = vst.msk [vmem:[#allocation4 + $0x198] sm:$0xff] %vm869_vm2, %v4609_v55  ;;  %v6386_v6 = vadd.f32 %v6385_v10, %v6384_v11  ;;  %v3828_v11 = vld [vmem:[#allocation3 + $0x140] sm:$0xff]  ;;  %v4260_v14 = vmul.f32 %v10761_v57, %v4068_v34  ;;  %v3833_v57 = vld [vmem:[#allocation3 + $0x168] sm:$0xff] }
 0x6e0   : > { %4013 = vst.msk [vmem:[#allocation3 + $0x108] sm:$0xff] %vm1959_vm3, %v3981_v3  ;;  %4015 = vst.msk [vmem:[#allocation3 + $0x118] sm:$0xff] %vm1959_vm3, %v3983_v46  ;;  %v6387_v36 = vpop.f32.mrf.mxu0  ;;  %v3860_v42 = vmul.f32 %v11850_v20, %v3828_v11  ;;  %v11851_v3 = vld [vmem:[#allocation62_spill] sm:$0xff] }
 0x6e1   : > { %v4610_v1 = vadd.f32 %v6386_v6, %v4257_v39  ;;  %v3898_v61 = vpop.xlane.xlu1 %3897  ;;  %v3901_v23 = vpop.xlane.xlu0 %3900  ;;  %v3861_v10 = vmul.f32 %v11851_v3, %v3829_v41  ;;  %v11854_v41 = vld [vmem:[#allocation67_spill] sm:$0xff] }
 0x6e2   : > { %v3984_v51 = vadd.f32 %v3898_v61, %v3856_v43  ;;  %v6388_v26 = vpop.f32.mrf.mxu0  ;;  %v3985_v21 = vadd.f32 %v3901_v23, %v3857_v40  ;;  %v3831_v43 = vld [vmem:[#allocation3 + $0x158] sm:$0xff] }
 0x6e3   : > { %4642 = vst.msk [vmem:[#allocation4 + $0x1a0] sm:$0xff] %vm869_vm2, %v4610_v1  ;;  %v6389_v31 = vadd.f32 %v6388_v26, %v6387_v36  ;;  %v4069_v1 = vld [vmem:[#allocation4 + $0x1c0] sm:$0xff]  ;;  %v11852_v23 = vld [vmem:[#allocation45_spill] sm:$0xff] }
 0x6e4   : > { %4016 = vst.msk [vmem:[#allocation3 + $0x120] sm:$0xff] %vm1959_vm3, %v3984_v51  ;;  %4017 = vst.msk [vmem:[#allocation3 + $0x128] sm:$0xff] %vm1959_vm3, %v3985_v21  ;;  %v6390_v5 = vpop.f32.mrf.mxu0  ;;  %v3862_v0 = vmul.f32 %v11852_v23, %v3830_v37  ;;  %v11853_v26 = vld [vmem:[#allocation71_spill] sm:$0xff]  ;;  %v4261_v60 = vmul.f32 %v10769_v16, %v4069_v1 }
 0x6e5   : > { %v4611_v9 = vadd.f32 %v6389_v31, %v4258_v52  ;;  %v3904_v48 = vpop.xlane.xlu1 %3903  ;;  %v3907_v17 = vpop.xlane.xlu0 %3906  ;;  %v3863_v21 = vmul.f32 %v11853_v26, %v3831_v43  ;;  %v3832_v52 = vld [vmem:[#allocation3 + $0x160] sm:$0xff]  ;;  %v3839_v26 = vld [vmem:[#allocation3 + $0x198] sm:$0xff] }
 0x6e6   : > { %v3986_v13 = vadd.f32 %v3904_v48, %v3858_v54  ;;  %v6391_v24 = vpop.f32.mrf.mxu0  ;;  %v3987_v8 = vadd.f32 %v3907_v17, %v3859_v18  ;;  %v4070_v18 = vld [vmem:[#allocation4 + $0x1c8] sm:$0xff]  ;;  %v3864_v48 = vmul.f32 %v10327_v58, %v3832_v52 }
 0x6e7   : > { %4643 = vst.msk [vmem:[#allocation4 + $0x1a8] sm:$0xff] %vm869_vm2, %v4611_v9  ;;  %v6392_v55 = vadd.f32 %v6391_v24, %v6390_v5  ;;  %v3834_v24 = vld [vmem:[#allocation3 + $0x170] sm:$0xff]  ;;  %v4262_v34 = vmul.f32 %v10767_v30, %v4070_v18 }
 0x6e8   : > { %4018 = vst.msk [vmem:[#allocation3 + $0x130] sm:$0xff] %vm1959_vm3, %v3986_v13  ;;  %4019 = vst.msk [vmem:[#allocation3 + $0x138] sm:$0xff] %vm1959_vm3, %v3987_v8  ;;  %v6393_v15 = vpop.f32.mrf.mxu0  ;;  %v3865_v13 = vmul.f32 %v11854_v41, %v3833_v57  ;;  %v3866_v3 = vmul.f32 %v10555_v2, %v3834_v24  ;;  %v3840_v57 = vld [vmem:[#allocation3 + $0x1a0] sm:$0xff] }
 0x6e9   : > { %v4612_v46 = vadd.f32 %v6392_v55, %v4259_v22  ;;  %v3910_v39 = vpop.xlane.xlu1 %3909  ;;  %v3913_v6 = vpop.xlane.xlu0 %3912  ;;  %v3835_v55 = vld [vmem:[#allocation3 + $0x178] sm:$0xff]  ;;  %v3872_v18 = vmul.f32 %v10597_v32, %v3840_v57  ;;  %v3844_v32 = vld [vmem:[#allocation3 + $0x1c0] sm:$0xff] }
 0x6ea   : > { %v3988_v36 = vadd.f32 %v3910_v39, %v3860_v42  ;;  %v6394_v25 = vpop.f32.mrf.mxu0  ;;  %v3989_v33 = vadd.f32 %v3913_v6, %v3861_v10  ;;  %v4071_v42 = vld [vmem:[#allocation4 + $0x1d0] sm:$0xff]  ;;  %v3867_v39 = vmul.f32 %v10533_v59, %v3835_v55  ;;  %v3836_v6 = vld [vmem:[#allocation3 + $0x180] sm:$0xff]  ;;  %v3845_v55 = vld [vmem:[#allocation3 + $0x1c8] sm:$0xff] }
 0x6eb   : > { %4644 = vst.msk [vmem:[#allocation4 + $0x1b0] sm:$0xff] %vm869_vm2, %v4612_v46  ;;  %v6395_v40 = vadd.f32 %v6394_v25, %v6393_v15  ;;  %v3837_v25 = vld [vmem:[#allocation3 + $0x188] sm:$0xff]  ;;  %v3868_v1 = vmul.f32 %v10569_v27, %v3836_v6 }
 0x6ec   : > { %4020 = vst.msk [vmem:[#allocation3 + $0x140] sm:$0xff] %vm1959_vm3, %v3988_v36  ;;  %4021 = vst.msk [vmem:[#allocation3 + $0x148] sm:$0xff] %vm1959_vm3, %v3989_v33  ;;  %v6396_v61 = vpop.f32.mrf.mxu0  ;;  %v4263_v33 = vmul.f32 %v10775_v45, %v4071_v42  ;;  %v3869_v23 = vmul.f32 %v10562_v28, %v3837_v25  ;;  %v3871_v28 = vmul.f32 %v10574_v47, %v3839_v26  ;;  %v3843_v47 = vld [vmem:[#allocation3 + $0x1b8] sm:$0xff] }
 0x6ed   : > { %v4613_v7 = vadd.f32 %v6395_v40, %v4260_v14  ;;  %v3916_v51 = vpop.xlane.xlu1 %3915  ;;  %v4072_v40 = vld [vmem:[#allocation4 + $0x1d8] sm:$0xff] }
 0x6ee   : > { %v3990_v31 = vadd.f32 %v3916_v51, %v3862_v0  ;;  %v6397_v35 = vpop.f32.mrf.mxu0  ;;  %v3919_v5 = vpop.xlane.xlu0 %3918  ;;  %v3838_v0 = vld [vmem:[#allocation3 + $0x190] sm:$0xff] }
 0x6ef   : > { %4645 = vst.msk [vmem:[#allocation4 + $0x1b8] sm:$0xff] %vm869_vm2, %v4613_v7  ;;  %v6398_v54 = vadd.f32 %v6397_v35, %v6396_v61  ;;  %v3991_v49 = vadd.f32 %v3919_v5, %v3863_v21  ;;  %v4264_v21 = vmul.f32 %v10773_v38, %v4072_v40  ;;  %v3870_v27 = vmul.f32 %v10583_v19, %v3838_v0 }
 0x6f0   : > { %4022 = vst.msk [vmem:[#allocation3 + $0x150] sm:$0xff] %vm1959_vm3, %v3990_v31  ;;  %v6399_v9 = vpop.f32.mrf.mxu0 }
 0x6f1   : > { %v4614_v17 = vadd.f32 %v6398_v54, %v4261_v60  ;;  %4023 = vst.msk [vmem:[#allocation3 + $0x158] sm:$0xff] %vm1959_vm3, %v3991_v49  ;;  %v3922_v11 = vpop.xlane.xlu1 %3921  ;;  %v3841_v49 = vld [vmem:[#allocation3 + $0x1a8] sm:$0xff] }
 0x6f2   : > { %v3992_v8 = vadd.f32 %v3922_v11, %v3864_v48  ;;  %v6400_v22 = vpop.f32.mrf.mxu0  ;;  %v3925_v16 = vpop.xlane.xlu0 %3924  ;;  %v3842_v48 = vld [vmem:[#allocation3 + $0x1b0] sm:$0xff] }
 0x6f3   : > { %4646 = vst.msk [vmem:[#allocation4 + $0x1c0] sm:$0xff] %vm869_vm2, %v4614_v17  ;;  %v6401_v15 = vadd.f32 %v6400_v22, %v6399_v9  ;;  %v3993_v20 = vadd.f32 %v3925_v16, %v3865_v13  ;;  %v3873_v9 = vmul.f32 %v10590_v56, %v3841_v49  ;;  %v3874_v13 = vmul.f32 %v10605_v12, %v3842_v48  ;;  %v3846_v12 = vld [vmem:[#allocation3 + $0x1d0] sm:$0xff] }
 0x6f4   : > { %4024 = vst.msk [vmem:[#allocation3 + $0x160] sm:$0xff] %vm1959_vm3, %v3992_v8  ;;  %v6402_v58 = vpop.f32.mrf.mxu0  ;;  %v3875_v8 = vmul.f32 %v10599_v63, %v3843_v47  ;;  %v3876_v56 = vmul.f32 %v10613_v44, %v3844_v32  ;;  %v3878_v63 = vmul.f32 %v10621_v50, %v3846_v12  ;;  %v3848_v44 = vld [vmem:[#allocation3 + $0x1e0] sm:$0xff]  ;;  %v3850_v50 = vld [vmem:[#allocation3 + $0x1f0] sm:$0xff] }
 0x6f5   : > { %v4615_v10 = vadd.f32 %v6401_v15, %v4262_v34  ;;  %4025 = vst.msk [vmem:[#allocation3 + $0x168] sm:$0xff] %vm1959_vm3, %v3993_v20  ;;  %v3928_v46 = vpop.xlane.xlu1 %3927  ;;  %v3877_v20 = vmul.f32 %v10609_v29, %v3845_v55  ;;  %v11855_v29 = vld [vmem:[#allocation65_spill] sm:$0xff] }
 0x6f6   : > { %v3994_v37 = vadd.f32 %v3928_v46, %v3866_v3  ;;  %v6403_v36 = vpop.f32.mrf.mxu0  ;;  %v3931_v30 = vpop.xlane.xlu0 %3930  ;;  %v3847_v3 = vld [vmem:[#allocation3 + $0x1d8] sm:$0xff]  ;;  %v3880_v25 = vmul.f32 %v11855_v29, %v3848_v44 }
 0x6f7   : > { %4647 = vst.msk [vmem:[#allocation4 + $0x1c8] sm:$0xff] %vm869_vm2, %v4615_v10  ;;  %v6404_v43 = vadd.f32 %v6403_v36, %v6402_v58  ;;  %v3995_v14 = vadd.f32 %v3931_v30, %v3867_v39  ;;  %v3879_v39 = vmul.f32 %v10615_v62, %v3847_v3  ;;  %v3849_v36 = vld [vmem:[#allocation3 + $0x1e8] sm:$0xff]  ;;  %v3882_v62 = vmul.f32 %v10738_v4, %v3850_v50 }
 0x6f8   : > { %4026 = vst.msk [vmem:[#allocation3 + $0x170] sm:$0xff] %vm1959_vm3, %v3994_v37  ;;  %v6405_v2 = vpop.f32.mrf.mxu0 }
 0x6f9   : > { %v4616_v61 = vadd.f32 %v6404_v43, %v4263_v33  ;;  %4027 = vst.msk [vmem:[#allocation3 + $0x178] sm:$0xff] %vm1959_vm3, %v3995_v14  ;;  %v3934_v59 = vpop.xlane.xlu1 %3933  ;;  %v11856_v43 = vld [vmem:[#allocation76_spill] sm:$0xff] }
 0x6fa   : > { %v3996_v7 = vadd.f32 %v3934_v59, %v3868_v1  ;;  %v6406_v51 = vpop.f32.mrf.mxu0  ;;  %v3937_v45 = vpop.xlane.xlu0 %3936  ;;  %v3881_v14 = vmul.f32 %v11856_v43, %v3849_v36  ;;  %v3851_v1 = vld [vmem:[#allocation3 + $0x1f8] sm:$0xff] }
 0x6fb   : > { %4648 = vst.msk [vmem:[#allocation4 + $0x1d0] sm:$0xff] %vm869_vm2, %v4616_v61  ;;  %v6407_v52 = vadd.f32 %v6406_v51, %v6405_v2  ;;  %v3997_v31 = vadd.f32 %v3937_v45, %v3869_v23  ;;  %v3883_v23 = vmul.f32 %v10741_v53, %v3851_v1  ;;  %v4075_v45 = vld [vmem:[#allocation4 + $0x1f0] sm:$0xff] }
 0x6fc   : > { %4028 = vst.msk [vmem:[#allocation3 + $0x180] sm:$0xff] %vm1959_vm3, %v3996_v7 }
 0x6fd   : > { %v4617_v35 = vadd.f32 %v6407_v52, %v4264_v21  ;;  %4029 = vst.msk [vmem:[#allocation3 + $0x188] sm:$0xff] %vm1959_vm3, %v3997_v31  ;;  %v3940_v5 = vpop.xlane.xlu1 %3939 }
 0x6fe   : > { %v3998_v60 = vadd.f32 %v3940_v5, %v3870_v27  ;;  %v3943_v54 = vpop.xlane.xlu0 %3942 }
 0x6ff   : > { %4649 = vst.msk [vmem:[#allocation4 + $0x1d8] sm:$0xff] %vm869_vm2, %v4617_v35  ;;  %v3999_v38 = vadd.f32 %v3943_v54, %v3871_v28  ;;  %v4076_v35 = vld [vmem:[#allocation4 + $0x1f8] sm:$0xff] }
 0x700   : > { %4030 = vst.msk [vmem:[#allocation3 + $0x190] sm:$0xff] %vm1959_vm3, %v3998_v60 }
 0x701   : > { %4031 = vst.msk [vmem:[#allocation3 + $0x198] sm:$0xff] %vm1959_vm3, %v3999_v38  ;;  %v3946_v19 = vpop.xlane.xlu1 %3945 }
 0x702   : > { %v4000_v17 = vadd.f32 %v3946_v19, %v3872_v18  ;;  %v3949_v11 = vpop.xlane.xlu0 %3948 }
 0x703   : > { %v4001_v41 = vadd.f32 %v3949_v11, %v3873_v9 }
 0x704   : > { %4032 = vst.msk [vmem:[#allocation3 + $0x1a0] sm:$0xff] %vm1959_vm3, %v4000_v17 }
 0x705   : > { %4033 = vst.msk [vmem:[#allocation3 + $0x1a8] sm:$0xff] %vm1959_vm3, %v4001_v41  ;;  %v3952_v24 = vpop.xlane.xlu1 %3951 }
 0x706   : > { %v4002_v22 = vadd.f32 %v3952_v24, %v3874_v13  ;;  %v3955_v16 = vpop.xlane.xlu0 %3954 }
 0x707   : > { %v4003_v34 = vadd.f32 %v3955_v16, %v3875_v8 }
 0x708   : > { %4034 = vst.msk [vmem:[#allocation3 + $0x1b0] sm:$0xff] %vm1959_vm3, %v4002_v22 }
 0x709   : > { %4035 = vst.msk [vmem:[#allocation3 + $0x1b8] sm:$0xff] %vm1959_vm3, %v4003_v34  ;;  %v3958_v15 = vpop.xlane.xlu1 %3957 }
 0x70a   : > { %v4004_v42 = vadd.f32 %v3958_v15, %v3876_v56  ;;  %v3961_v58 = vpop.xlane.xlu0 %3960 }
 0x70b   : > { %v4005_v10 = vadd.f32 %v3961_v58, %v3877_v20 }
 0x70c   : > { %4036 = vst.msk [vmem:[#allocation3 + $0x1c0] sm:$0xff] %vm1959_vm3, %v4004_v42 }
 0x70d   : > { %4037 = vst.msk [vmem:[#allocation3 + $0x1c8] sm:$0xff] %vm1959_vm3, %v4005_v10  ;;  %v3964_v46 = vpop.xlane.xlu1 %3963 }
 0x70e   : > { %v4006_v6 = vadd.f32 %v3964_v46, %v3878_v63  ;;  %v3967_v37 = vpop.xlane.xlu0 %3966 }
 0x70f   : > { %v4007_v30 = vadd.f32 %v3967_v37, %v3879_v39 }
 0x710   : > { %4038 = vst.msk [vmem:[#allocation3 + $0x1d0] sm:$0xff] %vm1959_vm3, %v4006_v6 }
 0x711   : > { %4039 = vst.msk [vmem:[#allocation3 + $0x1d8] sm:$0xff] %vm1959_vm3, %v4007_v30  ;;  %v3970_v33 = vpop.xlane.xlu1 %3969 }
 0x712   : > { %v4008_v40 = vadd.f32 %v3970_v33, %v3880_v25  ;;  %v3973_v2 = vpop.xlane.xlu0 %3972 }
 0x713   : > { %v4009_v61 = vadd.f32 %v3973_v2, %v3881_v14 }
 0x714   : > { %4040 = vst.msk [vmem:[#allocation3 + $0x1e0] sm:$0xff] %vm1959_vm3, %v4008_v40 }
 0x715   : > { %4041 = vst.msk [vmem:[#allocation3 + $0x1e8] sm:$0xff] %vm1959_vm3, %v4009_v61  ;;  %v3976_v59 = vpop.xlane.xlu1 %3975 }
 0x716   : > { %v4010_v0 = vadd.f32 %v3976_v59, %v3882_v62  ;;  %v3979_v7 = vpop.xlane.xlu0 %3978 }
 0x717   : > { %v4011_v51 = vadd.f32 %v3979_v7, %v3883_v23 }
 0x718   : > { %4042 = vst.msk [vmem:[#allocation3 + $0x1f0] sm:$0xff] %vm1959_vm3, %v4010_v0 }
 0x719   : > { %4043 = vst.msk [vmem:[#allocation3 + $0x1f8] sm:$0xff] %vm1959_vm3, %v4011_v51  ;;  %v4230_v26 = vpop.permute.xlu1 %4229 }
 0x71a   : > { %v4267_v31 = vmul.f32 %v4230_v26, %v4075_v45 }
 0x71e   : > { %v4235_v4 = vpop.permute.xlu0 %4234 }
 0x71f   : > { %v4268_v60 = vmul.f32 %v4235_v4, %v4076_v35 }
 0x724   : > { %v6414_v21 = vpop.f32.mrf.mxu1 }
 0x726   : > { %v6415_v52 = vpop.f32.mrf.mxu1 }
 0x727   : > { %v6416_v27 = vadd.f32 %v6415_v52, %v6414_v21 }
 0x728   : > { %v6417_v5 = vpop.f32.mrf.mxu1 }
 0x729   : > { %v4620_v28 = vadd.f32 %v6416_v27, %v4267_v31 }
 0x72a   : > { %v6418_v57 = vpop.f32.mrf.mxu1 }
 0x72b   : > { %4652 = vst.msk [vmem:[#allocation4 + $0x1f0] sm:$0xff] %vm869_vm2, %v4620_v28  ;;  %v6419_v53 = vadd.f32 %v6418_v57, %v6417_v5  ;;  %4689 = sbr.rel (%p5934_p9) target bundleno = 2229 (0x8b5), region = 60 }
 0x72d   : > { %v4621_v54 = vadd.f32 %v6419_v53, %v4268_v60 }
 0x72f   : > { %4653 = vst.msk [vmem:[#allocation4 + $0x1f8] sm:$0xff] %vm869_vm2, %v4621_v54 }
 0x730   : > { %v4724_v49 = vld [vmem:[#allocation3 + $0x10] sm:$0xff]  ;;  %v4722_v38 = vld [vmem:[#allocation3] sm:$0xff]  ;;  %v4725_v18 = vld [vmem:[#allocation3 + $0x18] sm:$0xff]  ;;  %v7560_v19 = vmov 0  }
 0x731   : > { %7080 = vset.pattern.permute.xlu1 %v7560_v19  ;;  %7079 = vset.pattern.permute.xlu0 %v7560_v19  ;;  %7161 = vrcp.f32 %v4724_v49  ;;  %v4723_v9 = vld [vmem:[#allocation3 + $0x8] sm:$0xff]  ;;  %v4726_v17 = vld [vmem:[#allocation3 + $0x20] sm:$0xff]  ;;  %v4729_v11 = vld [vmem:[#allocation3 + $0x38] sm:$0xff] }
 0x732   : > { %7163 = vrcp.f32 %v4722_v38  ;;  %v4727_v48 = vld [vmem:[#allocation3 + $0x28] sm:$0xff]  ;;  %v4728_v47 = vld [vmem:[#allocation3 + $0x30] sm:$0xff]  ;;  %v4730_v13 = vld [vmem:[#allocation3 + $0x40] sm:$0xff] }
 0x733   : > { %7165 = vrcp.f32 %v4725_v18  ;;  %v4731_v41 = vld [vmem:[#allocation3 + $0x48] sm:$0xff]  ;;  %v4733_v22 = vld [vmem:[#allocation3 + $0x58] sm:$0xff]  ;;  %v4732_v55 = vld [vmem:[#allocation3 + $0x50] sm:$0xff] }
 0x734   : > { %7167 = vrcp.f32 %v4723_v9  ;;  %v4735_v56 = vld [vmem:[#allocation3 + $0x68] sm:$0xff]  ;;  %v4734_v20 = vld [vmem:[#allocation3 + $0x60] sm:$0xff]  ;;  %v4737_v42 = vld [vmem:[#allocation3 + $0x78] sm:$0xff] }
 0x735   : > { %7169 = vrcp.f32 %v4727_v48  ;;  %v4736_v3 = vld [vmem:[#allocation3 + $0x70] sm:$0xff]  ;;  %v4739_v63 = vld [vmem:[#allocation3 + $0x88] sm:$0xff]  ;;  %v4738_v39 = vld [vmem:[#allocation3 + $0x80] sm:$0xff] }
 0x736   : > { %7171 = vrcp.f32 %v4726_v17  ;;  %v4741_v6 = vld [vmem:[#allocation3 + $0x98] sm:$0xff]  ;;  %v4740_v36 = vld [vmem:[#allocation3 + $0x90] sm:$0xff]  ;;  %v4743_v29 = vld [vmem:[#allocation3 + $0xa8] sm:$0xff] }
 0x737   : > { %7173 = vrcp.f32 %v4729_v11  ;;  %v4742_v33 = vld [vmem:[#allocation3 + $0xa0] sm:$0xff]  ;;  %v4745_v14 = vld [vmem:[#allocation3 + $0xb8] sm:$0xff]  ;;  %v4744_v40 = vld [vmem:[#allocation3 + $0xb0] sm:$0xff] }
 0x738   : > { %7175 = vrcp.f32 %v4728_v47  ;;  %v4747_v1 = vld [vmem:[#allocation3 + $0xc8] sm:$0xff]  ;;  %v4746_v62 = vld [vmem:[#allocation3 + $0xc0] sm:$0xff]  ;;  %v4749_v23 = vld [vmem:[#allocation3 + $0xd8] sm:$0xff] }
 0x739   : > { %7177 = vrcp.f32 %v4731_v41  ;;  %v4748_v7 = vld [vmem:[#allocation3 + $0xd0] sm:$0xff]  ;;  %v4751_v45 = vld [vmem:[#allocation3 + $0xe8] sm:$0xff]  ;;  %v4750_v21 = vld [vmem:[#allocation3 + $0xe0] sm:$0xff] }
 0x73a   : > { %7179 = vrcp.f32 %v4730_v13  ;;  %v4753_v31 = vld [vmem:[#allocation3 + $0xf8] sm:$0xff]  ;;  %v4752_v35 = vld [vmem:[#allocation3 + $0xf0] sm:$0xff]  ;;  %v5011_v5 = vld [vmem:[#allocation3 + $0x108] sm:$0xff] }
 0x73b   : > { %7181 = vrcp.f32 %v4733_v22  ;;  %v5010_v57 = vld [vmem:[#allocation3 + $0x100] sm:$0xff]  ;;  %v5013_v53 = vld [vmem:[#allocation3 + $0x118] sm:$0xff]  ;;  %v5012_v49 = vld [vmem:[#allocation3 + $0x110] sm:$0xff] }
 0x73c   : > { %7183 = vrcp.f32 %v4732_v55  ;;  %v5015_v18 = vld [vmem:[#allocation3 + $0x128] sm:$0xff]  ;;  %v5014_v9 = vld [vmem:[#allocation3 + $0x120] sm:$0xff]  ;;  %v5017_v17 = vld [vmem:[#allocation3 + $0x138] sm:$0xff] }
 0x73d   : > { %7185 = vrcp.f32 %v4735_v56  ;;  %v5016_v47 = vld [vmem:[#allocation3 + $0x130] sm:$0xff]  ;;  %v5019_v13 = vld [vmem:[#allocation3 + $0x148] sm:$0xff]  ;;  %v5021_v22 = vld [vmem:[#allocation3 + $0x158] sm:$0xff] }
 0x73e   : > { %v7162_v24 = vpop.eup %7161  ;;  %7187 = vrcp.f32 %v4734_v20  ;;  %v5020_v55 = vld [vmem:[#allocation3 + $0x150] sm:$0xff]  ;;  %v5023_v56 = vld [vmem:[#allocation3 + $0x168] sm:$0xff]  ;;  %v5022_v20 = vld [vmem:[#allocation3 + $0x160] sm:$0xff] }
 0x73f   : > { %v7164_v8 = vpop.eup %7163  ;;  %4798 = vperm.xlu1 %7080, %v7162_v24   ;;  %7189 = vrcp.f32 %v4737_v42  ;;  %v5025_v42 = vld [vmem:[#allocation3 + $0x178] sm:$0xff] }
 0x740   : > { %v7166_v32 = vpop.eup %7165  ;;  %4788 = vperm.xlu0 %7079, %v7164_v8   ;;  %7191 = vrcp.f32 %v4736_v3  ;;  %v5018_v8 = vld [vmem:[#allocation3 + $0x140] sm:$0xff]  ;;  %v5024_v3 = vld [vmem:[#allocation3 + $0x170] sm:$0xff] }
 0x741   : > { %v7168_v16 = vpop.eup %7167  ;;  %7193 = vrcp.f32 %v4739_v63  ;;  %v5027_v63 = vld [vmem:[#allocation3 + $0x188] sm:$0xff] }
 0x742   : > { %v7170_v34 = vpop.eup %7169  ;;  %7195 = vrcp.f32 %v4738_v39  ;;  %v5026_v39 = vld [vmem:[#allocation3 + $0x180] sm:$0xff] }
 0x743   : > { %4803 = vperm.xlu1 %7080, %v7166_v32   ;;  %v7172_v15 = vpop.eup %7171  ;;  %7197 = vrcp.f32 %v4741_v6  ;;  %v5029_v6 = vld [vmem:[#allocation3 + $0x198] sm:$0xff] }
 0x744   : > { %4793 = vperm.xlu0 %7079, %v7168_v16   ;;  %v7174_v12 = vpop.eup %7173  ;;  %7199 = vrcp.f32 %v4740_v36  ;;  %v5028_v36 = vld [vmem:[#allocation3 + $0x190] sm:$0xff] }
 0x745   : > { %v7176_v58 = vpop.eup %7175  ;;  %7201 = vrcp.f32 %v4743_v29  ;;  %v5031_v29 = vld [vmem:[#allocation3 + $0x1a8] sm:$0xff] }
 0x746   : > { %v7178_v10 = vpop.eup %7177  ;;  %7203 = vrcp.f32 %v4742_v33  ;;  %v5030_v33 = vld [vmem:[#allocation3 + $0x1a0] sm:$0xff] }
 0x747   : > { %4813 = vperm.xlu1 %7080, %v7170_v34   ;;  %v7180_v46 = vpop.eup %7179  ;;  %7205 = vrcp.f32 %v4745_v14  ;;  %v5033_v14 = vld [vmem:[#allocation3 + $0x1b8] sm:$0xff] }
 0x748   : > { %4808 = vperm.xlu0 %7079, %v7172_v15   ;;  %v7182_v44 = vpop.eup %7181  ;;  %7207 = vrcp.f32 %v4744_v40  ;;  %v5032_v40 = vld [vmem:[#allocation3 + $0x1b0] sm:$0xff] }
 0x749   : > { %v7184_v37 = vpop.eup %7183  ;;  %7209 = vrcp.f32 %v4747_v1  ;;  %v5035_v1 = vld [vmem:[#allocation3 + $0x1c8] sm:$0xff] }
 0x74a   : > { %v7186_v30 = vpop.eup %7185  ;;  %7211 = vrcp.f32 %v4746_v62  ;;  %v5034_v62 = vld [vmem:[#allocation3 + $0x1c0] sm:$0xff] }
 0x74b   : > { %4823 = vperm.xlu1 %7080, %v7174_v12   ;;  %v7188_v25 = vpop.eup %7187  ;;  %7213 = vrcp.f32 %v4749_v23  ;;  %v5037_v23 = vld [vmem:[#allocation3 + $0x1d8] sm:$0xff] }
 0x74c   : > { %4818 = vperm.xlu0 %7079, %v7176_v58   ;;  %v7190_v43 = vpop.eup %7189  ;;  %7215 = vrcp.f32 %v4748_v7  ;;  %v5036_v7 = vld [vmem:[#allocation3 + $0x1d0] sm:$0xff] }
 0x74d   : > { %v7192_v50 = vpop.eup %7191  ;;  %7217 = vrcp.f32 %v4751_v45  ;;  %v5039_v45 = vld [vmem:[#allocation3 + $0x1e8] sm:$0xff] }
 0x74e   : > { %v7194_v2 = vpop.eup %7193  ;;  %7219 = vrcp.f32 %v4750_v21  ;;  %v5038_v21 = vld [vmem:[#allocation3 + $0x1e0] sm:$0xff] }
 0x74f   : > { %4833 = vperm.xlu1 %7080, %v7178_v10   ;;  %v7196_v61 = vpop.eup %7195  ;;  %7221 = vrcp.f32 %v4753_v31  ;;  %v5041_v31 = vld [vmem:[#allocation3 + $0x1f8] sm:$0xff] }
 0x750   : > { %4828 = vperm.xlu0 %7079, %v7180_v46   ;;  %v7198_v59 = vpop.eup %7197  ;;  %7223 = vrcp.f32 %v4752_v35  ;;  %v5040_v35 = vld [vmem:[#allocation3 + $0x1f0] sm:$0xff] }
 0x751   : > { %v7200_v0 = vpop.eup %7199  ;;  %7225 = vrcp.f32 %v5011_v5 }
 0x752   : > { %v7202_v51 = vpop.eup %7201  ;;  %7227 = vrcp.f32 %v5010_v57 }
 0x753   : > { %4843 = vperm.xlu1 %7080, %v7182_v44   ;;  %v7204_v26 = vpop.eup %7203  ;;  %7229 = vrcp.f32 %v5013_v53 }
 0x754   : > { %4838 = vperm.xlu0 %7079, %v7184_v37   ;;  %v7206_v52 = vpop.eup %7205  ;;  %7231 = vrcp.f32 %v5012_v49 }
 0x755   : > { %v7208_v27 = vpop.eup %7207  ;;  %7233 = vrcp.f32 %v5015_v18 }
 0x756   : > { %v7210_v4 = vpop.eup %7209  ;;  %7235 = vrcp.f32 %v5014_v9 }
 0x757   : > { %4853 = vperm.xlu1 %7080, %v7186_v30   ;;  %v7212_v28 = vpop.eup %7211  ;;  %7237 = vrcp.f32 %v5017_v17 }
 0x758   : > { %4848 = vperm.xlu0 %7079, %v7188_v25   ;;  %v7214_v60 = vpop.eup %7213  ;;  %7239 = vrcp.f32 %v5016_v47 }
 0x759   : > { %v7216_v54 = vpop.eup %7215  ;;  %7241 = vrcp.f32 %v5019_v13 }
 0x75a   : > { %v7218_v38 = vpop.eup %7217  ;;  %7243 = vrcp.f32 %v5018_v8 }
 0x75b   : > { %4863 = vperm.xlu1 %7080, %v7190_v43   ;;  %v7220_v19 = vpop.eup %7219  ;;  %7245 = vrcp.f32 %v5021_v22 }
 0x75c   : > { %4858 = vperm.xlu0 %7079, %v7192_v50   ;;  %v7222_v48 = vpop.eup %7221  ;;  %7247 = vrcp.f32 %v5020_v55 }
 0x75d   : > { %v7224_v11 = vpop.eup %7223  ;;  %7249 = vrcp.f32 %v5023_v56 }
 0x75e   : > { %v7226_v41 = vpop.eup %7225  ;;  %7251 = vrcp.f32 %v5022_v20 }
 0x75f   : > { %4873 = vperm.xlu1 %7080, %v7194_v2   ;;  %v7228_v24 = vpop.eup %7227  ;;  %7253 = vrcp.f32 %v5025_v42 }
 0x760   : > { %4868 = vperm.xlu0 %7079, %v7196_v61   ;;  %v7230_v32 = vpop.eup %7229  ;;  %7255 = vrcp.f32 %v5024_v3 }
 0x761   : > { %v7232_v16 = vpop.eup %7231  ;;  %7257 = vrcp.f32 %v5027_v63 }
 0x762   : > { %v7234_v34 = vpop.eup %7233  ;;  %7259 = vrcp.f32 %v5026_v39 }
 0x763   : > { %4883 = vperm.xlu1 %7080, %v7198_v59   ;;  %v7236_v15 = vpop.eup %7235  ;;  %7261 = vrcp.f32 %v5029_v6 }
 0x764   : > { %4878 = vperm.xlu0 %7079, %v7200_v0   ;;  %v7238_v12 = vpop.eup %7237  ;;  %7263 = vrcp.f32 %v5028_v36 }
 0x765   : > { %v7240_v58 = vpop.eup %7239  ;;  %7265 = vrcp.f32 %v5031_v29  ;;  %v4978_v29 = vld [vmem:[#allocation4 + $0x100] sm:$0xff] }
 0x766   : > { %v7242_v10 = vpop.eup %7241  ;;  %7267 = vrcp.f32 %v5030_v33 }
 0x767   : > { %4893 = vperm.xlu1 %7080, %v7202_v51   ;;  %v7244_v46 = vpop.eup %7243  ;;  %7269 = vrcp.f32 %v5033_v14 }
 0x768   : > { %4888 = vperm.xlu0 %7079, %v7204_v26   ;;  %v7246_v44 = vpop.eup %7245  ;;  %7271 = vrcp.f32 %v5032_v40  ;;  %v4980_v40 = vld [vmem:[#allocation4 + $0x110] sm:$0xff] }
 0x769   : > { %v7248_v37 = vpop.eup %7247  ;;  %7273 = vrcp.f32 %v5035_v1 }
 0x76a   : > { %v7250_v30 = vpop.eup %7249  ;;  %7275 = vrcp.f32 %v5034_v62 }
 0x76b   : > { %4903 = vperm.xlu1 %7080, %v7206_v52   ;;  %v7252_v25 = vpop.eup %7251  ;;  %7277 = vrcp.f32 %v5037_v23  ;;  %v4983_v23 = vld [vmem:[#allocation4 + $0x128] sm:$0xff] }
 0x76c   : > { %4898 = vperm.xlu0 %7079, %v7208_v27   ;;  %v7254_v43 = vpop.eup %7253  ;;  %7279 = vrcp.f32 %v5036_v7 }
 0x76d   : > { %v7256_v50 = vpop.eup %7255  ;;  %7281 = vrcp.f32 %v5039_v45 }
 0x76e   : > { %v7258_v2 = vpop.eup %7257  ;;  %7283 = vrcp.f32 %v5038_v21 }
 0x76f   : > { %4913 = vperm.xlu1 %7080, %v7210_v4   ;;  %v7260_v61 = vpop.eup %7259  ;;  %7285 = vrcp.f32 %v5041_v31  ;;  %v4984_v31 = vld [vmem:[#allocation4 + $0x130] sm:$0xff] }
 0x770   : > { %4908 = vperm.xlu0 %7079, %v7212_v28   ;;  %v7262_v59 = vpop.eup %7261  ;;  %7287 = vrcp.f32 %v5040_v35 }
 0x771   : > { %v7264_v0 = vpop.eup %7263 }
 0x772   : > { %v7266_v51 = vpop.eup %7265 }
 0x773   : > { %4923 = vperm.xlu1 %7080, %v7214_v60   ;;  %v7268_v26 = vpop.eup %7267 }
 0x774   : > { %4918 = vperm.xlu0 %7079, %v7216_v54   ;;  %v7270_v52 = vpop.eup %7269 }
 0x775   : > { %v7272_v27 = vpop.eup %7271 }
 0x776   : > { %v7274_v4 = vpop.eup %7273 }
 0x777   : > { %4933 = vperm.xlu1 %7080, %v7218_v38   ;;  %v7276_v5 = vpop.eup %7275 }
 0x778   : > { %4928 = vperm.xlu0 %7079, %v7220_v19   ;;  %v7278_v28 = vpop.eup %7277 }
 0x779   : > { %v7280_v57 = vpop.eup %7279 }
 0x77a   : > { %v7282_v60 = vpop.eup %7281 }
 0x77b   : > { %4943 = vperm.xlu1 %7080, %v7222_v48   ;;  %v7284_v53 = vpop.eup %7283 }
 0x77c   : > { %4938 = vperm.xlu0 %7079, %v7224_v11   ;;  %v7286_v54 = vpop.eup %7285 }
 0x77d   : > { %v7288_v49 = vpop.eup %7287 }
 0x77f   : > { %5081 = vperm.xlu1 %7080, %v7226_v41  }
 0x780   : > { %5076 = vperm.xlu0 %7079, %v7228_v24  }
 0x783   : > { %5091 = vperm.xlu1 %7080, %v7230_v32  }
 0x784   : > { %5086 = vperm.xlu0 %7079, %v7232_v16  }
 0x787   : > { %5101 = vperm.xlu1 %7080, %v7234_v34  }
 0x788   : > { %5096 = vperm.xlu0 %7079, %v7236_v15  }
 0x78b   : > { %5111 = vperm.xlu1 %7080, %v7238_v12  }
 0x78c   : > { %5106 = vperm.xlu0 %7079, %v7240_v58  }
 0x78f   : > { %5121 = vperm.xlu1 %7080, %v7242_v10  }
 0x790   : > { %5116 = vperm.xlu0 %7079, %v7244_v46  }
 0x793   : > { %5131 = vperm.xlu1 %7080, %v7246_v44  }
 0x794   : > { %5126 = vperm.xlu0 %7079, %v7248_v37  }
 0x797   : > { %5141 = vperm.xlu1 %7080, %v7250_v30   ;;  %v4979_v30 = vld [vmem:[#allocation4 + $0x108] sm:$0xff] }
 0x798   : > { %5136 = vperm.xlu0 %7079, %v7252_v25  }
 0x79b   : > { %5151 = vperm.xlu1 %7080, %v7254_v43  }
 0x79c   : > { %5146 = vperm.xlu0 %7079, %v7256_v50   ;;  %v4981_v50 = vld [vmem:[#allocation4 + $0x118] sm:$0xff] }
 0x79f   : > { %5161 = vperm.xlu1 %7080, %v7258_v2  }
 0x7a0   : > { %5156 = vperm.xlu0 %7079, %v7260_v61  }
 0x7a3   : > { %5171 = vperm.xlu1 %7080, %v7262_v59  }
 0x7a4   : > { %5166 = vperm.xlu0 %7079, %v7264_v0   ;;  %v4982_v0 = vld [vmem:[#allocation4 + $0x120] sm:$0xff] }
 0x7a7   : > { %5181 = vperm.xlu1 %7080, %v7266_v51  }
 0x7a8   : > { %5176 = vperm.xlu0 %7079, %v7268_v26  }
 0x7ab   : > { %5191 = vperm.xlu1 %7080, %v7270_v52   ;;  %v4985_v52 = vld [vmem:[#allocation4 + $0x138] sm:$0xff] }
 0x7ac   : > { %5186 = vperm.xlu0 %7079, %v7272_v27  }
 0x7af   : > { %5201 = vperm.xlu1 %7080, %v7274_v4  }
 0x7b0   : > { %5196 = vperm.xlu0 %7079, %v7276_v5  }
 0x7b3   : > { %5211 = vperm.xlu1 %7080, %v7278_v28  }
 0x7b4   : > { %5206 = vperm.xlu0 %7079, %v7280_v57   ;;  %v4987_v57 = vld [vmem:[#allocation4 + $0x148] sm:$0xff] }
 0x7b7   : > { %5221 = vperm.xlu1 %7080, %v7282_v60   ;;  %v4986_v60 = vld [vmem:[#allocation4 + $0x140] sm:$0xff] }
 0x7b8   : > { %5216 = vperm.xlu0 %7079, %v7284_v53  }
 0x7ba   : > { %v10872_v38 = vpop.permute.xlu1 %4798 }
 0x7bb   : > { %v10874_v18 = vpop.permute.xlu0 %4788  ;;  %5231 = vperm.xlu1 %7080, %v7286_v54  }
 0x7bc   : > { %5226 = vperm.xlu0 %7079, %v7288_v49  }
 0x7be   : > { %v10876_v19 = vpop.permute.xlu1 %4803 }
 0x7bf   : > { %v10878_v9 = vpop.permute.xlu0 %4793 }
 0x7c2   : > { %v10880_v48 = vpop.permute.xlu1 %4813 }
 0x7c3   : > { %v10882_v17 = vpop.permute.xlu0 %4808 }
 0x7c6   : > { %v10884_v11 = vpop.permute.xlu1 %4823 }
 0x7c7   : > { %v10886_v47 = vpop.permute.xlu0 %4818 }
 0x7ca   : > { %v10888_v41 = vpop.permute.xlu1 %4833 }
 0x7cb   : > { %v10890_v13 = vpop.permute.xlu0 %4828 }
 0x7ce   : > { %v10892_v24 = vpop.permute.xlu1 %4843 }
 0x7cf   : > { %v10894_v8 = vpop.permute.xlu0 %4838 }
 0x7d2   : > { %v10896_v32 = vpop.permute.xlu1 %4853 }
 0x7d3   : > { %v10898_v22 = vpop.permute.xlu0 %4848 }
 0x7d6   : > { %v10900_v16 = vpop.permute.xlu1 %4863 }
 0x7d7   : > { %v10902_v55 = vpop.permute.xlu0 %4858 }
 0x7da   : > { %v10904_v34 = vpop.permute.xlu1 %4873 }
 0x7db   : > { %v10906_v56 = vpop.permute.xlu0 %4868 }
 0x7de   : > { %v10908_v15 = vpop.permute.xlu1 %4883 }
 0x7df   : > { %v10910_v20 = vpop.permute.xlu0 %4878 }
 0x7e2   : > { %v10912_v12 = vpop.permute.xlu1 %4893 }
 0x7e3   : > { %v10914_v42 = vpop.permute.xlu0 %4888 }
 0x7e6   : > { %v10916_v58 = vpop.permute.xlu1 %4903 }
 0x7e7   : > { %v10918_v3 = vpop.permute.xlu0 %4898 }
 0x7ea   : > { %v10920_v10 = vpop.permute.xlu1 %4913 }
 0x7eb   : > { %v10922_v63 = vpop.permute.xlu0 %4908 }
 0x7ee   : > { %v10924_v46 = vpop.permute.xlu1 %4923 }
 0x7ef   : > { %v10926_v39 = vpop.permute.xlu0 %4918 }
 0x7f2   : > { %v10928_v44 = vpop.permute.xlu1 %4933 }
 0x7f3   : > { %v10930_v6 = vpop.permute.xlu0 %4928 }
 0x7f6   : > { %v10932_v37 = vpop.permute.xlu1 %4943 }
 0x7f7   : > { %v10934_v36 = vpop.permute.xlu0 %4938 }
 0x7fa   : > { %v5082_v25 = vpop.permute.xlu1 %5081 }
 0x7fb   : > { %v5235_v33 = vmul.f32 %v5082_v25, %v4979_v30  ;;  %v5077_v43 = vpop.permute.xlu0 %5076  ;;  %v4989_v25 = vld [vmem:[#allocation4 + $0x158] sm:$0xff] }
 0x7fc   : > { %v5234_v14 = vmul.f32 %v5077_v43, %v4978_v29 }
 0x7fe   : > { %v7081_v2 = vpack.i.bf16 %v5235_v33, %v5234_v14  ;;  %v5092_v1 = vpop.permute.xlu1 %5091  ;;  %v4988_v33 = vld [vmem:[#allocation4 + $0x150] sm:$0xff] }
 0x7ff   : > { %v5237_v61 = vmul.f32 %v5092_v1, %v4981_v50  ;;  %v5087_v62 = vpop.permute.xlu0 %5086  ;;  %v4991_v1 = vld [vmem:[#allocation4 + $0x168] sm:$0xff] }
 0x800   : > { %v5236_v59 = vmul.f32 %v5087_v62, %v4980_v40  ;;  %7082 = vrot.lane.b32.xlu0 %v7081_v2, %s7561_s9 }
 0x802   : > { %v7086_v7 = vpack.i.bf16 %v5237_v61, %v5236_v59  ;;  %v5102_v51 = vpop.permute.xlu1 %5101  ;;  %v4990_v61 = vld [vmem:[#allocation4 + $0x160] sm:$0xff] }
 0x803   : > { %v5239_v45 = vmul.f32 %v5102_v51, %v4983_v23  ;;  %v5097_v26 = vpop.permute.xlu0 %5096  ;;  %v4993_v51 = vld [vmem:[#allocation4 + $0x178] sm:$0xff] }
 0x804   : > { %v5238_v21 = vmul.f32 %v5097_v26, %v4982_v0  ;;  %7087 = vrot.lane.b32.xlu1 %v7086_v7, %s7561_s9 }
 0x806   : > { %v7091_v27 = vpack.i.bf16 %v5239_v45, %v5238_v21  ;;  %v5112_v35 = vpop.permute.xlu1 %5111  ;;  %v4992_v45 = vld [vmem:[#allocation4 + $0x170] sm:$0xff] }
 0x807   : > { %v5241_v4 = vmul.f32 %v5112_v35, %v4985_v52  ;;  %v5107_v5 = vpop.permute.xlu0 %5106  ;;  %v4995_v35 = vld [vmem:[#allocation4 + $0x188] sm:$0xff] }
 0x808   : > { %v5240_v28 = vmul.f32 %v5107_v5, %v4984_v31  ;;  %7092 = vrot.lane.b32.xlu0 %v7091_v27, %s7561_s9 }
 0x80a   : > { %v7096_v53 = vpack.i.bf16 %v5241_v4, %v5240_v28  ;;  %v5122_v54 = vpop.permute.xlu1 %5121  ;;  %v4994_v4 = vld [vmem:[#allocation4 + $0x180] sm:$0xff] }
 0x80b   : > { %v5243_v49 = vmul.f32 %v5122_v54, %v4987_v57  ;;  %v5117_v30 = vpop.permute.xlu0 %5116  ;;  %v4997_v54 = vld [vmem:[#allocation4 + $0x198] sm:$0xff] }
 0x80c   : > { %v5242_v29 = vmul.f32 %v5117_v30, %v4986_v60  ;;  %7097 = vrot.lane.b32.xlu1 %v7096_v53, %s7561_s9 }
 0x80e   : > { %v7101_v43 = vpack.i.bf16 %v5243_v49, %v5242_v29  ;;  %v5132_v14 = vpop.permute.xlu1 %5131  ;;  %v4996_v49 = vld [vmem:[#allocation4 + $0x190] sm:$0xff] }
 0x80f   : > { %v5245_v50 = vmul.f32 %v5132_v14, %v4989_v25  ;;  %v5127_v40 = vpop.permute.xlu0 %5126  ;;  %v4999_v14 = vld [vmem:[#allocation4 + $0x1a8] sm:$0xff] }
 0x810   : > { %v5244_v2 = vmul.f32 %v5127_v40, %v4988_v33  ;;  %7102 = vrot.lane.b32.xlu0 %v7101_v43, %s7561_s9 }
 0x812   : > { %v7106_v62 = vpack.i.bf16 %v5245_v50, %v5244_v2  ;;  %v5142_v59 = vpop.permute.xlu1 %5141  ;;  %v4998_v50 = vld [vmem:[#allocation4 + $0x1a0] sm:$0xff] }
 0x813   : > { %v5247_v23 = vmul.f32 %v5142_v59, %v4991_v1  ;;  %v5137_v0 = vpop.permute.xlu0 %5136  ;;  %v5001_v59 = vld [vmem:[#allocation4 + $0x1b8] sm:$0xff] }
 0x814   : > { %v5246_v7 = vmul.f32 %v5137_v0, %v4990_v61  ;;  %7107 = vrot.lane.b32.xlu1 %v7106_v62, %s7561_s9 }
 0x816   : > { %v7111_v26 = vpack.i.bf16 %v5247_v23, %v5246_v7  ;;  %v5152_v21 = vpop.permute.xlu1 %5151  ;;  %v5000_v23 = vld [vmem:[#allocation4 + $0x1b0] sm:$0xff] }
 0x817   : > { %v5249_v52 = vmul.f32 %v5152_v21, %v4993_v51  ;;  %v5147_v31 = vpop.permute.xlu0 %5146  ;;  %v5003_v21 = vld [vmem:[#allocation4 + $0x1c8] sm:$0xff] }
 0x818   : > { %v5248_v27 = vmul.f32 %v5147_v31, %v4992_v45  ;;  %7112 = vrot.lane.b32.xlu0 %v7111_v26, %s7561_s9 }
 0x81a   : > { %v7116_v5 = vpack.i.bf16 %v5249_v52, %v5248_v27  ;;  %v5162_v28 = vpop.permute.xlu1 %5161  ;;  %v5002_v52 = vld [vmem:[#allocation4 + $0x1c0] sm:$0xff] }
 0x81b   : > { %v5251_v57 = vmul.f32 %v5162_v28, %v4995_v35  ;;  %v5157_v60 = vpop.permute.xlu0 %5156  ;;  %v5005_v28 = vld [vmem:[#allocation4 + $0x1d8] sm:$0xff] }
 0x81c   : > { %v5250_v53 = vmul.f32 %v5157_v60, %v4994_v4  ;;  %7117 = vrot.lane.b32.xlu1 %v7116_v5, %s7561_s9 }
 0x81e   : > { %v7121_v30 = vpack.i.bf16 %v5251_v57, %v5250_v53  ;;  %v5172_v29 = vpop.permute.xlu1 %5171  ;;  %v5004_v57 = vld [vmem:[#allocation4 + $0x1d0] sm:$0xff] }
 0x81f   : > { %v5253_v25 = vmul.f32 %v5172_v29, %v4997_v54  ;;  %v5167_v33 = vpop.permute.xlu0 %5166  ;;  %v5007_v29 = vld [vmem:[#allocation4 + $0x1e8] sm:$0xff] }
 0x820   : > { %v5252_v43 = vmul.f32 %v5167_v33, %v4996_v49  ;;  %7122 = vrot.lane.b32.xlu0 %v7121_v30, %s7561_s9 }
 0x822   : > { %v7126_v40 = vpack.i.bf16 %v5253_v25, %v5252_v43  ;;  %v5182_v2 = vpop.permute.xlu1 %5181  ;;  %v5006_v25 = vld [vmem:[#allocation4 + $0x1e0] sm:$0xff] }
 0x823   : > { %v5255_v1 = vmul.f32 %v5182_v2, %v4999_v14  ;;  %v5177_v61 = vpop.permute.xlu0 %5176  ;;  %v5009_v2 = vld [vmem:[#allocation4 + $0x1f8] sm:$0xff] }
 0x824   : > { %v5254_v62 = vmul.f32 %v5177_v61, %v4998_v50  ;;  %7127 = vrot.lane.b32.xlu1 %v7126_v40, %s7561_s9 }
 0x826   : > { %v7131_v0 = vpack.i.bf16 %v5255_v1, %v5254_v62  ;;  %v5192_v7 = vpop.permute.xlu1 %5191  ;;  %v5008_v1 = vld [vmem:[#allocation4 + $0x1f0] sm:$0xff] }
 0x827   : > { %v5257_v51 = vmul.f32 %v5192_v7, %v5001_v59  ;;  %v5187_v45 = vpop.permute.xlu0 %5186 }
 0x828   : > { %v5256_v26 = vmul.f32 %v5187_v45, %v5000_v23  ;;  %7132 = vrot.lane.b32.xlu0 %v7131_v0, %s7561_s9  ;;  %v4691_v45 = vld [vmem:[#allocation4 + $0x8] sm:$0xff] }
 0x82a   : > { %v7136_v31 = vpack.i.bf16 %v5257_v51, %v5256_v26  ;;  %v5202_v27 = vpop.permute.xlu1 %5201  ;;  %v4690_v51 = vld [vmem:[#allocation4] sm:$0xff] }
 0x82b   : > { %v5259_v35 = vmul.f32 %v5202_v27, %v5003_v21  ;;  %v5197_v4 = vpop.permute.xlu0 %5196  ;;  %v4946_v21 = vmul.f32 %v10874_v18, %v4690_v51  ;;  %v4698_v51 = vld [vmem:[#allocation4 + $0x40] sm:$0xff] }
 0x82c   : > { %v5258_v5 = vmul.f32 %v5197_v4, %v5002_v52  ;;  %7137 = vrot.lane.b32.xlu1 %v7136_v31, %s7561_s9  ;;  %v4947_v52 = vmul.f32 %v10878_v9, %v4691_v45  ;;  %v4693_v4 = vld [vmem:[#allocation4 + $0x18] sm:$0xff] }
 0x82e   : > { %v7141_v60 = vpack.i.bf16 %v5259_v35, %v5258_v5  ;;  %v5212_v53 = vpop.permute.xlu1 %5211  ;;  %v4692_v35 = vld [vmem:[#allocation4 + $0x10] sm:$0xff] }
 0x82f   : > { %v5261_v54 = vmul.f32 %v5212_v53, %v5005_v28  ;;  %v5207_v49 = vpop.permute.xlu0 %5206  ;;  %v4948_v53 = vmul.f32 %v10872_v38, %v4692_v35 }
 0x830   : > { %v5260_v30 = vmul.f32 %v5207_v49, %v5004_v57  ;;  %7142 = vrot.lane.b32.xlu0 %v7141_v60, %s7561_s9 }
 0x832   : > { %v7146_v33 = vpack.i.bf16 %v5261_v54, %v5260_v30  ;;  %v5222_v43 = vpop.permute.xlu1 %5221  ;;  %v4949_v54 = vmul.f32 %v10876_v19, %v4693_v4  ;;  %v4695_v30 = vld [vmem:[#allocation4 + $0x28] sm:$0xff]  ;;  %v4697_v19 = vld [vmem:[#allocation4 + $0x38] sm:$0xff]  ;;  %v4700_v4 = vld [vmem:[#allocation4 + $0x50] sm:$0xff] }
 0x833   : > { %v5263_v14 = vmul.f32 %v5222_v43, %v5007_v29  ;;  %v5217_v50 = vpop.permute.xlu0 %5216  ;;  %v4694_v29 = vld [vmem:[#allocation4 + $0x20] sm:$0xff] }
 0x834   : > { %v5262_v40 = vmul.f32 %v5217_v50, %v5006_v25  ;;  %7147 = vrot.lane.b32.xlu1 %v7146_v33, %s7561_s9  ;;  %v4950_v50 = vmul.f32 %v10882_v17, %v4694_v29  ;;  %v4699_v17 = vld [vmem:[#allocation4 + $0x48] sm:$0xff] }
 0x836   : > { %v7151_v61 = vpack.i.bf16 %v5263_v14, %v5262_v40  ;;  %v5232_v62 = vpop.permute.xlu1 %5231  ;;  %v4951_v14 = vmul.f32 %v10880_v48, %v4695_v30 }
 0x837   : > { %v5265_v59 = vmul.f32 %v5232_v62, %v5009_v2  ;;  %v5227_v23 = vpop.permute.xlu0 %5226  ;;  %v4696_v2 = vld [vmem:[#allocation4 + $0x30] sm:$0xff] }
 0x838   : > { %v5264_v0 = vmul.f32 %v5227_v23, %v5008_v1  ;;  %7152 = vrot.lane.b32.xlu0 %v7151_v61, %s7561_s9  ;;  %v4953_v23 = vmul.f32 %v10884_v11, %v4697_v19 }
 0x83a   : > { %v7156_v7 = vpack.i.bf16 %v5265_v59, %v5264_v0  ;;  %v4952_v0 = vmul.f32 %v10886_v47, %v4696_v2  ;;  %v4701_v47 = vld [vmem:[#allocation4 + $0x58] sm:$0xff] }
 0x83c   : > { %7157 = vrot.lane.b32.xlu1 %v7156_v7, %s7561_s9 }
 0x872   : > { %v7083_v26 = vpop.permute.xlu0 %7082 }
 0x873   : > { %v7085_v31 = vunpack.i.h.bf16 %v7083_v26  ;;  %v7084_v27 = vunpack.i.l.bf16 %v7083_v26 }
 0x875   : > { %v5394_v5 = vsel %vm869_vm2, %v4946_v21, %v7084_v27  ;;  %v5395_v28 = vsel %vm869_vm2, %v4947_v52, %v7085_v31  ;;  %v4955_v31 = vmul.f32 %v10888_v41, %v4699_v17  ;;  %v4954_v27 = vmul.f32 %v10890_v13, %v4698_v51  ;;  %v4703_v13 = vld [vmem:[#allocation4 + $0x68] sm:$0xff] }
 0x876   : > { %v6008_v57 = vpack.c.bf16 %v5395_v28, %v5394_v5  ;;  %v7088_v60 = vpop.permute.xlu1 %7087 }
 0x877   : > { %v7090_v49 = vunpack.i.h.bf16 %v7088_v60  ;;  %v7089_v18 = vunpack.i.l.bf16 %v7088_v60 }
 0x878   : > { %6009 = vst [vmem:[%s7879_s21] sm:$0xff] %v6008_v57  }
 0x879   : > { %v5396_v9 = vsel %vm869_vm2, %v4948_v53, %v7089_v18  ;;  %v5397_v25 = vsel %vm869_vm2, %v4949_v54, %v7090_v49  ;;  %v4957_v53 = vmul.f32 %v10892_v24, %v4701_v47  ;;  %v4956_v54 = vmul.f32 %v10894_v8, %v4700_v4  ;;  %v4702_v18 = vld [vmem:[#allocation4 + $0x60] sm:$0xff]  ;;  %v4705_v8 = vld [vmem:[#allocation4 + $0x78] sm:$0xff] }
 0x87a   : > { %v6013_v33 = vpack.c.bf16 %v5397_v25, %v5396_v9  ;;  %v7093_v43 = vpop.permute.xlu0 %7092  ;;  %v4710_v4 = vld [vmem:[#allocation4 + $0xa0] sm:$0xff] }
 0x87b   : > { %v7095_v38 = vunpack.i.h.bf16 %v7093_v43  ;;  %v7094_v40 = vunpack.i.l.bf16 %v7093_v43  ;;  %v4958_v43 = vmul.f32 %v10898_v22, %v4702_v18  ;;  %v4707_v22 = vld [vmem:[#allocation4 + $0x88] sm:$0xff] }
 0x87c   : > { %6085 = vst [vmem:[%s7879_s21 + $0x8] sm:$0xff] %v6013_v33   ;;  %v4959_v33 = vmul.f32 %v10896_v32, %v4703_v13  ;;  %v4963_v17 = vmul.f32 %v10904_v34, %v4707_v22 }
 0x87d   : > { %v5398_v1 = vsel %vm869_vm2, %v4950_v50, %v7094_v40  ;;  %v5399_v61 = vsel %vm869_vm2, %v4951_v14, %v7095_v38  ;;  %v4704_v50 = vld [vmem:[#allocation4 + $0x70] sm:$0xff] }
 0x87e   : > { %v6018_v62 = vpack.c.bf16 %v5399_v61, %v5398_v1  ;;  %v7098_v59 = vpop.permute.xlu1 %7097  ;;  %v4961_v1 = vmul.f32 %v10900_v16, %v4705_v8  ;;  %v4960_v61 = vmul.f32 %v10902_v55, %v4704_v50  ;;  %v4709_v55 = vld [vmem:[#allocation4 + $0x98] sm:$0xff] }
 0x87f   : > { %v7100_v48 = vunpack.i.h.bf16 %v7098_v59  ;;  %v7099_v7 = vunpack.i.l.bf16 %v7098_v59  ;;  %v4706_v59 = vld [vmem:[#allocation4 + $0x80] sm:$0xff] }
 0x880   : > { %6086 = vst [vmem:[%s7879_s21 + $0x10] sm:$0xff] %v6018_v62   ;;  %v4962_v51 = vmul.f32 %v10906_v56, %v4706_v59  ;;  %v4711_v56 = vld [vmem:[#allocation4 + $0xa8] sm:$0xff] }
 0x881   : > { %v5400_v45 = vsel %vm869_vm2, %v4952_v0, %v7099_v7  ;;  %v5401_v26 = vsel %vm869_vm2, %v4953_v23, %v7100_v48 }
 0x882   : > { %v6023_v21 = vpack.c.bf16 %v5401_v26, %v5400_v45  ;;  %v7103_v52 = vpop.permute.xlu0 %7102  ;;  %v4708_v26 = vld [vmem:[#allocation4 + $0x90] sm:$0xff] }
 0x883   : > { %v7105_v11 = vunpack.i.h.bf16 %v7103_v52  ;;  %v7104_v35 = vunpack.i.l.bf16 %v7103_v52 }
 0x884   : > { %6087 = vst [vmem:[%s7879_s21 + $0x18] sm:$0xff] %v6023_v21  }
 0x885   : > { %v5402_v5 = vsel %vm869_vm2, %v4954_v27, %v7104_v35  ;;  %v5403_v28 = vsel %vm869_vm2, %v4955_v31, %v7105_v11  ;;  %v4965_v11 = vmul.f32 %v10908_v15, %v4709_v55  ;;  %v4964_v35 = vmul.f32 %v10910_v20, %v4708_v26  ;;  %v4713_v20 = vld [vmem:[#allocation4 + $0xb8] sm:$0xff]  ;;  %v4720_v26 = vld [vmem:[#allocation4 + $0xf0] sm:$0xff] }
 0x886   : > { %v6028_v57 = vpack.c.bf16 %v5403_v28, %v5402_v5  ;;  %v7108_v60 = vpop.permute.xlu1 %7107 }
 0x887   : > { %v7110_v41 = vunpack.i.h.bf16 %v7108_v60  ;;  %v7109_v49 = vunpack.i.l.bf16 %v7108_v60 }
 0x888   : > { %6088 = vst [vmem:[%s7879_s21 + $0x20] sm:$0xff] %v6028_v57  }
 0x889   : > { %v5404_v30 = vsel %vm869_vm2, %v4956_v54, %v7109_v49  ;;  %v5405_v29 = vsel %vm869_vm2, %v4957_v53, %v7110_v41  ;;  %v4967_v53 = vmul.f32 %v10912_v12, %v4711_v56  ;;  %v4966_v54 = vmul.f32 %v10914_v42, %v4710_v4  ;;  %v4712_v49 = vld [vmem:[#allocation4 + $0xb0] sm:$0xff]  ;;  %v4715_v42 = vld [vmem:[#allocation4 + $0xc8] sm:$0xff] }
 0x88a   : > { %v6033_v9 = vpack.c.bf16 %v5405_v29, %v5404_v30  ;;  %v7113_v25 = vpop.permute.xlu0 %7112 }
 0x88b   : > { %v7115_v24 = vunpack.i.h.bf16 %v7113_v25  ;;  %v7114_v14 = vunpack.i.l.bf16 %v7113_v25  ;;  %v4968_v25 = vmul.f32 %v10918_v3, %v4712_v49  ;;  %v4717_v3 = vld [vmem:[#allocation4 + $0xd8] sm:$0xff] }
 0x88c   : > { %6089 = vst [vmem:[%s7879_s21 + $0x28] sm:$0xff] %v6033_v9   ;;  %v4969_v9 = vmul.f32 %v10916_v58, %v4713_v20  ;;  %v4973_v22 = vmul.f32 %v10924_v46, %v4717_v3 }
 0x88d   : > { %v5406_v38 = vsel %vm869_vm2, %v4958_v43, %v7114_v14  ;;  %v5407_v40 = vsel %vm869_vm2, %v4959_v33, %v7115_v24  ;;  %v4714_v43 = vld [vmem:[#allocation4 + $0xc0] sm:$0xff] }
 0x88e   : > { %v6038_v19 = vpack.c.bf16 %v5407_v40, %v5406_v38  ;;  %v7118_v2 = vpop.permute.xlu1 %7117  ;;  %v4971_v38 = vmul.f32 %v10920_v10, %v4715_v42  ;;  %v4970_v40 = vmul.f32 %v10922_v63, %v4714_v43  ;;  %v4719_v63 = vld [vmem:[#allocation4 + $0xe8] sm:$0xff] }
 0x88f   : > { %v7120_v32 = vunpack.i.h.bf16 %v7118_v2  ;;  %v7119_v62 = vunpack.i.l.bf16 %v7118_v2  ;;  %v4716_v2 = vld [vmem:[#allocation4 + $0xd0] sm:$0xff] }
 0x890   : > { %6090 = vst [vmem:[%s7879_s21 + $0x30] sm:$0xff] %v6038_v19   ;;  %v4972_v59 = vmul.f32 %v10926_v39, %v4716_v2  ;;  %v4721_v39 = vld [vmem:[#allocation4 + $0xf8] sm:$0xff] }
 0x891   : > { %v5408_v23 = vsel %vm869_vm2, %v4960_v61, %v7119_v62  ;;  %v5409_v0 = vsel %vm869_vm2, %v4961_v1, %v7120_v32 }
 0x892   : > { %v6043_v48 = vpack.c.bf16 %v5409_v0, %v5408_v23  ;;  %v7123_v7 = vpop.permute.xlu0 %7122  ;;  %v4718_v0 = vld [vmem:[#allocation4 + $0xe0] sm:$0xff] }
 0x893   : > { %v7125_v16 = vunpack.i.h.bf16 %v7123_v7  ;;  %v7124_v45 = vunpack.i.l.bf16 %v7123_v7 }
 0x894   : > { %6091 = vst [vmem:[%s7879_s21 + $0x38] sm:$0xff] %v6043_v48  }
 0x895   : > { %v5410_v21 = vsel %vm869_vm2, %v4962_v51, %v7124_v45  ;;  %v5411_v52 = vsel %vm869_vm2, %v4963_v17, %v7125_v16  ;;  %v4975_v16 = vmul.f32 %v10928_v44, %v4719_v63  ;;  %v4974_v45 = vmul.f32 %v10930_v6, %v4718_v0 }
 0x896   : > { %v6048_v31 = vpack.c.bf16 %v5411_v52, %v5410_v21  ;;  %v7128_v27 = vpop.permute.xlu1 %7127 }
 0x897   : > { %v7130_v34 = vunpack.i.h.bf16 %v7128_v27  ;;  %v7129_v47 = vunpack.i.l.bf16 %v7128_v27 }
 0x898   : > { %6092 = vst [vmem:[%s7879_s21 + $0x40] sm:$0xff] %v6048_v31  }
 0x899   : > { %v5412_v5 = vsel %vm869_vm2, %v4964_v35, %v7129_v47  ;;  %v5413_v28 = vsel %vm869_vm2, %v4965_v11, %v7130_v34  ;;  %v4977_v11 = vmul.f32 %v10932_v37, %v4721_v39  ;;  %v4976_v35 = vmul.f32 %v10934_v36, %v4720_v26 }
 0x89a   : > { %v6053_v57 = vpack.c.bf16 %v5413_v28, %v5412_v5  ;;  %v7133_v60 = vpop.permute.xlu0 %7132 }
 0x89b   : > { %v7135_v15 = vunpack.i.h.bf16 %v7133_v60  ;;  %v7134_v41 = vunpack.i.l.bf16 %v7133_v60 }
 0x89c   : > { %6093 = vst [vmem:[%s7879_s21 + $0x48] sm:$0xff] %v6053_v57  }
 0x89d   : > { %v5414_v13 = vsel %vm869_vm2, %v4966_v54, %v7134_v41  ;;  %v5415_v18 = vsel %vm869_vm2, %v4967_v53, %v7135_v15 }
 0x89e   : > { %v6058_v30 = vpack.c.bf16 %v5415_v18, %v5414_v13  ;;  %v7138_v29 = vpop.permute.xlu1 %7137 }
 0x89f   : > { %v7140_v12 = vunpack.i.h.bf16 %v7138_v29  ;;  %v7139_v33 = vunpack.i.l.bf16 %v7138_v29 }
 0x8a0   : > { %6094 = vst [vmem:[%s7879_s21 + $0x50] sm:$0xff] %v6058_v30  }
 0x8a1   : > { %v5416_v24 = vsel %vm869_vm2, %v4968_v25, %v7139_v33  ;;  %v5417_v14 = vsel %vm869_vm2, %v4969_v9, %v7140_v12 }
 0x8a2   : > { %v6063_v8 = vpack.c.bf16 %v5417_v14, %v5416_v24  ;;  %v7143_v50 = vpop.permute.xlu0 %7142 }
 0x8a3   : > { %v7145_v58 = vunpack.i.h.bf16 %v7143_v50  ;;  %v7144_v19 = vunpack.i.l.bf16 %v7143_v50 }
 0x8a4   : > { %6095 = vst [vmem:[%s7879_s21 + $0x58] sm:$0xff] %v6063_v8  }
 0x8a5   : > { %v5418_v1 = vsel %vm869_vm2, %v4970_v40, %v7144_v19  ;;  %v5419_v61 = vsel %vm869_vm2, %v4971_v38, %v7145_v58 }
 0x8a6   : > { %v6068_v32 = vpack.c.bf16 %v5419_v61, %v5418_v1  ;;  %v7148_v62 = vpop.permute.xlu1 %7147 }
 0x8a7   : > { %v7150_v10 = vunpack.i.h.bf16 %v7148_v62  ;;  %v7149_v23 = vunpack.i.l.bf16 %v7148_v62 }
 0x8a8   : > { %6096 = vst [vmem:[%s7879_s21 + $0x60] sm:$0xff] %v6068_v32  }
 0x8a9   : > { %v5420_v48 = vsel %vm869_vm2, %v4972_v59, %v7149_v23  ;;  %v5421_v7 = vsel %vm869_vm2, %v4973_v22, %v7150_v10 }
 0x8aa   : > { %v6073_v17 = vpack.c.bf16 %v5421_v7, %v5420_v48  ;;  %v7153_v51 = vpop.permute.xlu0 %7152 }
 0x8ab   : > { %v7155_v46 = vunpack.i.h.bf16 %v7153_v51  ;;  %v7154_v55 = vunpack.i.l.bf16 %v7153_v51 }
 0x8ac   : > { %6097 = vst [vmem:[%s7879_s21 + $0x68] sm:$0xff] %v6073_v17  }
 0x8ad   : > { %v5422_v21 = vsel %vm869_vm2, %v4974_v45, %v7154_v55  ;;  %v5423_v52 = vsel %vm869_vm2, %v4975_v16, %v7155_v46 }
 0x8ae   : > { %v6078_v31 = vpack.c.bf16 %v5423_v52, %v5422_v21  ;;  %v7158_v27 = vpop.permute.xlu1 %7157 }
 0x8af   : > { %v7160_v34 = vunpack.i.h.bf16 %v7158_v27  ;;  %v7159_v44 = vunpack.i.l.bf16 %v7158_v27 }
 0x8b0   : > { %6098 = vst [vmem:[%s7879_s21 + $0x70] sm:$0xff] %v6078_v31  }
 0x8b1   : > { %v5424_v6 = vsel %vm869_vm2, %v4976_v35, %v7159_v44  ;;  %v5425_v47 = vsel %vm869_vm2, %v4977_v11, %v7160_v34 }
 0x8b2   : > { %v6083_v56 = vpack.c.bf16 %v5425_v47, %v5424_v6 }
 0x8b4   : > { %6099 = vst [vmem:[%s7879_s21 + $0x78] sm:$0xff] %v6083_v56  }
 0x8b5 PF: > { %s11858_s18 = sld [smem:[#allocation21_spill]]  ;;  %s5603_s6 = sshll.u32 %s7879_s21, 4  ;;  %s11035_s6 = int_to_ptr.vmem [resolvable:$true] %s5603_s6 }
 0x8b6   : > { %s11859_s15 = sld [smem:[#allocation22_spill]]  ;;  %s5587_s2 = scalar_lea.sflag [#allocation7], %s7853_s1 }
 0x8b7   : > { %s11860_s3 = sld [smem:[#allocation29_spill]]  ;;  %s7403_s10 = scalar_lea.vmem %s11035_s6, 2048 }
 0x8b8   : > { %s11861_s29 = sld [smem:[#allocation146_spill]]  ;;  %p7404_p0 = scmp.ne.s32.totalorder %s11035_s6, %s7403_s10 }
 0x8b9   : > { %s7562_s8 = smov [#allocation13]  }
 0x8ba   : > { %s7407_s21 = sshll.u32 %s7562_s8, 4  ;;  %s7408_s21 = int_to_ptr.vmem [resolvable:$false] %s7407_s21 }
 0x8bb   : > { %s5968_s12 = sshll.u32 %s11858_s18, 5  ;;  %s7409_s11 = scalar_lea.vmem %s7408_s21, 4096 }
 0x8bc   : > { %s5969_s0 = sshll.u32 %s11859_s15, 6  ;;  %p7410_p11 = scmp.lt.s32.totalorder %s11035_s6, %s7408_s21 }
 0x8bd   : > { %s5600_s5 = sadd.s32 %s5969_s0, %s5968_s12  ;;  %p11862_p3 = scmp.ne.s32.totalorder %s11860_s3, 0 }
 0x8be   : > { %s5970_s4 = sshll.u32 %s5600_s5, 6  ;;  %p7411_p10 = scmp.lt.s32.totalorder %s7409_s11, %s7403_s10 }
 0x8bf   : > { %s11040_s30 = scalar_lea.hbm %s11861_s29, %s5970_s4  ;;  %p7405_p13 = pnand %p7404_p0, %p11862_p3 }
 0x8c0   : > { %p7412_p7 = por %p7411_p10, %p7410_p11 }
 0x8c1   : > { %p7406_p2 = pneg %p7405_p13 }
 0x8c3   : > { %p7413_p12 = pnand %p7412_p7, %p7406_p2 }
 0x8c5   : > { %7416 = shalt.err (!%p7413_p12)
}
 0x8c6   : > { %s7417_s14 = scalar_lea.hbm %s11040_s30, 2048  ;;  %s7421_s15 = scalar_lea.hbm %s11861_s29, 8192 }
 0x8c7   : > { %p7418_p1 = scmp.ne.s32.totalorder %s11040_s30, %s7417_s14  ;;  %p7422_p4 = scmp.lt.s32.totalorder %s11040_s30, %s11861_s29 }
 0x8c8   : > { %p7423_p6 = scmp.lt.s32.totalorder %s7421_s15, %s7417_s14 }
 0x8c9   : > { %p7419_p8 = pnand %p7418_p1, %p11862_p3 }
 0x8ca   : > { %p7424_p9 = por %p7423_p6, %p7422_p4 }
 0x8cb   : > { %p7420_p5 = pneg %p7419_p8 }
 0x8cd   : > { %p7425_p0 = pnand %p7424_p9, %p7420_p5 }
 0x8cf   : > { %7428 = shalt.err (!%p7425_p0)
}
 0x8d0   : > { %s7563_s5 = smov 4  }
 0x8d1   : > { %6462 = dma.vmem_to_hbm [thread:$0]  (%p11862_p3), %s11035_s6, 2048, %s11040_s30, %s5587_s2, %s7559_s22, %s7559_s22, %s7563_s5  }
 0x8d2 PF: > { %s11863_s4 = sld [smem:[#allocation19_spill]]  ;;  %p6482_p13 = scmp.ge.s32.totalorder %s7547_s27, 2 }
 0x8d3   : > { %s11864_s23 = sld [smem:[#allocation30_spill]] }
 0x8d8   : > { %s5618_s7 = sand.u32 1, %s11863_s4  }
 0x8d9   : > { %p11865_p2 = scmp.ne.s32.totalorder %s11864_s23, 0  ;;  %s5619_s10 = scalar_lea.sflag [#allocation7], %s5618_s7 }
 0x8db   : > { %p6478_p11 = pnand %p6482_p13, %p11865_p2 }
 0x8dd   : > { %p6479_p10 = pneg %p6478_p11 }
 0x8df   : > { %7494 = dma.done.wait (%p6479_p10), %s5619_s10, 2048  }
 0x8e0   : > { %7496 = vsyncadd (%p6479_p10), %s5619_s10, 4294965248  ;;  %s26_s27 = sadd.s32 1, %s7547_s27   ;;  %s11867_s15 = sld [smem:[#allocation18_spill]] }
 0x8e1   : > { %p11072_p7 = scmp.ge.s32.totalorder %s26_s27, 10   ;;  %s11868_s1 = smov %s7795_s16 }
 0x8e2   : > { %s11869_s6 = sld [smem:[#allocation25_spill]]  ;;  %s11871_s16 = smov %s7507_s17 }
 0x8e3   : > { %s11870_s30 = sld [smem:[#allocation28_spill]]  ;;  %s11872_s17 = smov %s7800_s13 }
 0x8e4   : > { %s11873_s18 = smov %s7515_s19  ;;  %s11874_s19 = smov %s7519_s20 }
 0x8e5   : > { %s11875_s20 = smov %s11868_s1  ;;  %s11876_s21 = smov %s7535_s24 }
 0x8e6   : > { %s11877_s22 = smov %s7539_s25  ;;  %s11878_s23 = smov %s7543_s26 }
 0x8e7   : > { %s11879_s24 = smov %s11883_s28  ;;  %25 = sbr.rel (!%p11072_p7) target bundleno = 20 (0x14), region = 129 }
 0x8e8   : > { %s11880_s25 = smov %s11869_s6 }
 0x8e9   : > { %s11881_s26 = smov %s11870_s30 }
 0x8ec   :  { %5624 = vsyncpa [#allocation6], 1 }
 0x8ed   :  { %5626 = vsyncpa [#allocation6 + $0x1], 1 }
 0x8ee   :  { %5627 = vsyncpa [#allocation9], 1 }
 0x8ef   :  { %5629 = vsyncpa [#allocation9 + $0x1], 1 }
 0x8f0   :  { %5630 = vsyncpa [#allocation12], 1 }
 0x8f1   :  { %5632 = vsyncpa [#allocation12 + $0x1], 1 }
 0x8f2   :  { %5633 = vsyncpa [#allocation7], 1 }
 0x8f3   :  { %5635 = vsyncpa [#allocation7 + $0x1], 1 }

</bundles_post_ra>
